<compile_context>
chip_gen: v7x
topology: tpu7x:2x2x1
jax: 0.10.0
libtpu: 0.0.40
codegen_flags: <defaults>
</compile_context>

<pallas_src>
import functools
import math

import jax
import jax.numpy as jnp
from jax.experimental import pallas as pl
from jax.experimental.pallas import tpu as pltpu


# --------------------------------------------------------------------------- kernel
def _residual_block_kernel(xp_ref, w1_ref, w2_ref, o_ref, hp_ref, *, H, W, Wp):
    """Fully fused ResidualBlock forward for one image.

    xp_ref : (Hp*Wp + 2, C)  bf16  reflect-padded input, row-major flat (+2 tail rows)
    w1_ref : (3, 3*C, C)     bf16  conv1 weights, layout [dy][dx*C + ci][co]
    w2_ref : (3, 3*C, C)     bf16  conv2 weights, same layout
    o_ref  : (H*W, C)        f32   compact output (row-major over the H*W pixels)
    hp_ref : (Hp*Wp + 2, C)  bf16  scratch: reflect-padded intermediate activation
    """
    Hp = H + 2
    HWp = H * Wp
    C = o_ref.shape[-1]

    def conv3x3(src_ref, w_ref):
        # 3 MXU matmuls with K = 3*C: concatenate the dx = 0,1,2 shifted slices of
        # one kernel row along channels, contract against that row's stacked weights.
        acc = jnp.zeros((HWp, C), jnp.float32)
        for dy in range(3):
            off = dy * Wp
            a = jnp.concatenate(
                [src_ref[off + dx:off + dx + HWp, :] for dx in range(3)], axis=-1)
            acc += jnp.dot(a, w_ref[dy], preferred_element_type=jnp.float32)
        return acc

    # Valid-position mask of the flat Wp-stride layout (last 2 columns of every row
    # are junk), generated in-kernel -- no mask input, no mask DMA.
    col = jax.lax.broadcasted_iota(jnp.int32, (HWp, 1), 0) % Wp
    valid = col < W
    inv_n = 1.0 / (H * W)

    def instance_norm(acc):
        # InstanceNorm2d (biased variance, eps=1e-5) over valid positions only.
        am = jnp.where(valid, acc, 0.0)
        mean = jnp.sum(am, axis=0, keepdims=True) * inv_n
        ex2 = jnp.sum(jnp.where(valid, acc * acc, 0.0), axis=0, keepdims=True) * inv_n
        var = jnp.maximum(ex2 - mean * mean, 0.0)          # clamp f32 cancellation
        return (acc - mean) * jax.lax.rsqrt(var + 1e-5)

    # ---- conv1 -> InstanceNorm -> ReLU (f32), kept resident in VMEM ----
    y1 = jnp.maximum(instance_norm(conv3x3(xp_ref, w1_ref)), 0.0)

    # ---- in-kernel ReflectionPad2d(1) of y1 into the bf16 scratch ----
    # Interior: output position r*Wp + c maps to padded position (r+1)*Wp + (c+1),
    # a constant shift of Wp+1 for the whole flat array, so it is ONE contiguous
    # copy (the junk columns land on halo positions that are overwritten below).
    hp_ref[Wp + 1:Wp + 1 + HWp, :] = y1.astype(jnp.bfloat16)
    # Left/right halo columns of the H interior rows (reflect col 1 / col W-2).
    # TODO(synk): vectorize this halo fill with XLU rolls if ld/st becomes binding.
    for r in range(H):
        base = (r + 1) * Wp
        hp_ref[base:base + 1, :] = hp_ref[base + 2:base + 3, :]
        hp_ref[base + Wp - 1:base + Wp, :] = hp_ref[base + Wp - 3:base + Wp - 2, :]
    # Top/bottom halo rows (reflect padded rows 2 / Hp-3; halo columns included,
    # which gives the correct 2-D reflection corners).
    hp_ref[0:Wp, :] = hp_ref[2 * Wp:3 * Wp, :]
    hp_ref[(Hp - 1) * Wp:Hp * Wp, :] = hp_ref[(Hp - 3) * Wp:(Hp - 2) * Wp, :]
    # Zero the 2 tail rows so the dy=2 tap slices read finite values.
    hp_ref[Hp * Wp:Hp * Wp + 2, :] = jnp.zeros((2, C), jnp.bfloat16)

    # ---- conv2 -> InstanceNorm -> + shortcut -> ReLU -> compact store ----
    y2 = instance_norm(conv3x3(hp_ref, w2_ref))
    # Shortcut = interior of the padded input; in the flat layout that is the same
    # constant-shift slice (no separate shortcut input, no padded f32 copy).
    shortcut = xp_ref[Wp + 1:Wp + 1 + HWp, :].astype(jnp.float32)
    out_full = jnp.maximum(y2 + shortcut, 0.0)
    # Drop the 2 junk columns per row: H small stores into the compact output.
    for r in range(H):
        o_ref[r * W:(r + 1) * W, :] = out_full[r * Wp:r * Wp + W, :]


# --------------------------------------------------------------------------- wrapper
def residual_block_forward(params, x_nchw):
    """relu( IN(conv3x3(relu(IN(conv3x3(x))))) + x ), reflection padding; NCHW in/out."""
    x = jnp.transpose(x_nchw.astype(jnp.float32), (0, 2, 3, 1))   # NCHW -> NHWC
    N, H, W, C = x.shape
    Hp, Wp = H + 2, W + 2
    Lp = Hp * Wp + 2                                              # +2 tail rows

    # Reflect-pad the (bf16) input once on the host and flatten row-major so every
    # conv tap inside the kernel is a contiguous sublane slice.
    xp = jnp.pad(x.astype(jnp.bfloat16), ((0, 0), (1, 1), (1, 1), (0, 0)),
                 mode='reflect')
    xp_flat = jnp.pad(xp.reshape(N, Hp * Wp, C), ((0, 0), (0, 2), (0, 0)))

    out = pl.pallas_call(
        functools.partial(_residual_block_kernel, H=H, W=W, Wp=Wp),
        out_shape=jax.ShapeDtypeStruct((N, H * W, C), jnp.float32),
        grid_spec=pltpu.PrefetchScalarGridSpec(
            num_scalar_prefetch=0,
            grid=(N,),
            in_specs=[
                pl.BlockSpec((None, Lp, C), lambda n: (n, 0, 0)),      # padded input
                pl.BlockSpec((3, 3 * C, C), lambda n: (0, 0, 0)),      # conv1 weights
                pl.BlockSpec((3, 3 * C, C), lambda n: (0, 0, 0)),      # conv2 weights
            ],
            out_specs=pl.BlockSpec((None, H * W, C), lambda n: (n, 0, 0)),
            scratch_shapes=[pltpu.VMEM((Lp, C), jnp.bfloat16)],        # padded h
        ),
        compiler_params=pltpu.CompilerParams(
            dimension_semantics=("parallel",)),   # images across TensorCores
    )(xp_flat, params['w1'], params['w2'])

    out = out.reshape(N, H, W, C)
    return jnp.transpose(out, (0, 3, 1, 2))                           # NHWC -> NCHW


# --------------------------------------------------------------------------- params
def init_residual_block_params(key, c):
    # Weights stored tap-row-major (3, 3*C, C) = [dy][dx*C + ci][co], pre-cast to
    # bf16 at init.  Conv biases are omitted: they cancel exactly in the following
    # InstanceNorm (affine=False), so the output is identical to the PyTorch module.
    k1, k2 = jax.random.split(key)

    def conv_init(k):
        w = jax.random.normal(k, (3, 3 * c, c), jnp.float32) / math.sqrt(9 * c)
        return w.astype(jnp.bfloat16)

    return dict(w1=conv_init(k1), w2=conv_init(k2))


# --------------------------------------------------------------------------- reference
def reference_forward(params, x_nchw):
    """Pure-JAX f32 reference (uses the same bf16-rounded weight values)."""
    x = jnp.transpose(x_nchw.astype(jnp.float32), (0, 2, 3, 1))

    def conv(h, w9):
        c = h.shape[-1]
        w = w9.astype(jnp.float32).reshape(3, 3, c, c)               # HWIO
        hp = jnp.pad(h, ((0, 0), (1, 1), (1, 1), (0, 0)), mode='reflect')
        return jax.lax.conv_general_dilated(
            hp, w, window_strides=(1, 1), padding='VALID',
            dimension_numbers=('NHWC', 'HWIO', 'NHWC'))

    def inorm(h):
        m = jnp.mean(h, axis=(1, 2), keepdims=True)
        v = jnp.mean(jnp.square(h - m), axis=(1, 2), keepdims=True)
        return (h - m) * jax.lax.rsqrt(v + 1e-5)

    h = jax.nn.relu(inorm(conv(x, params['w1'])))
    h = inorm(conv(h, params['w2']))
    return jnp.transpose(jax.nn.relu(h + x), (0, 3, 1, 2))


# --------------------------------------------------------------------------- main
if __name__ == "__main__":
    key = jax.random.PRNGKey(0)
    kx, kp = jax.random.split(key)

    N, C, H, W = 2, 128, 16, 16          # small, but lane/MXU-friendly channel count
    x = jax.random.normal(kx, (N, C, H, W), jnp.float32)
    params = init_residual_block_params(kp, C)

    fwd = jax.jit(residual_block_forward)
    out = jax.block_until_ready(fwd(params, x))

    assert out.shape == (N, C, H, W), out.shape
    assert bool(jnp.all(jnp.isfinite(out)))
    assert bool(jnp.all(out >= 0.0))      # output of a ReLU

    ref = reference_forward(params, x)
    max_err = float(jnp.max(jnp.abs(out - ref)))
    assert max_err < 1e-1, f"max abs err vs f32 reference: {max_err}"

    print("KERNEL_OK")
</pallas_src>

<mosaic_0001>
module attributes {stable_mosaic.version = 11 : i64} {
  func.func @_residual_block_kernel(%arg0: i32, %arg1: memref<1x326x128xbf16, #tpu.memory_space<vmem>>, %arg2: memref<3x384x128xbf16, #tpu.memory_space<vmem>>, %arg3: memref<3x384x128xbf16, #tpu.memory_space<vmem>>, %arg4: memref<1x256x128xf32, #tpu.memory_space<vmem>>, %arg5: memref<326x128xbf16, #tpu.memory_space<vmem>>) attributes {dimension_semantics = [#tpu.dimension_semantics<parallel>], iteration_bounds = array<i64: 2>, scalar_prefetch = 0 : i64, scratch_operands = 1 : i64, tpu.core_type = #tpu.core_type<tc>, window_params = [{transform_indices = @transform_0, window_bounds = array<i64: 1, 326, 128>}, {pipeline_mode = #tpu.pipeline_mode<synchronous>, transform_indices = @transform_1, window_bounds = array<i64: 3, 384, 128>}, {pipeline_mode = #tpu.pipeline_mode<synchronous>, transform_indices = @transform_2, window_bounds = array<i64: 3, 384, 128>}, {transform_indices = @transform_3, window_bounds = array<i64: 1, 256, 128>}]} {
    %0 = tpu.iota {dimensions = array<i32: 0>} : vector<288x1xi32>
    %c18_i32 = arith.constant 18 : i32
    %c0_i32 = arith.constant 0 : i32
    %1 = arith.cmpi eq, %c18_i32, %c0_i32 : i32
    %c1_i32 = arith.constant 1 : i32
    %2 = arith.select %1, %c1_i32, %c18_i32 : i32
    %3 = vector.broadcast %2 : i32 to vector<288x1xi32>
    %4 = arith.remsi %0, %3 : vector<288x1xi32>
    %c0_i32_0 = arith.constant 0 : i32
    %5 = vector.broadcast %c0_i32_0 : i32 to vector<288x1xi32>
    %6 = arith.cmpi ne, %4, %5 : vector<288x1xi32>
    %c0_i32_1 = arith.constant 0 : i32
    %7 = vector.broadcast %c0_i32_1 : i32 to vector<288x1xi32>
    %8 = arith.cmpi slt, %4, %7 : vector<288x1xi32>
    %c0_i32_2 = arith.constant 0 : i32
    %9 = arith.cmpi slt, %2, %c0_i32_2 : i32
    %10 = vector.broadcast %9 : i1 to vector<288x1xi1>
    %11 = vector.broadcast %10 : vector<288x1xi1> to vector<288x1xi1>
    %12 = arith.xori %8, %11 : vector<288x1xi1>
    %13 = arith.andi %12, %6 : vector<288x1xi1>
    %14 = vector.broadcast %2 : i32 to vector<288x1xi32>
    %15 = arith.addi %4, %14 : vector<288x1xi32>
    %16 = arith.select %13, %15, %4 : vector<288x1xi1>, vector<288x1xi32>
    %c16_i32 = arith.constant 16 : i32
    %17 = vector.broadcast %c16_i32 : i32 to vector<288x1xi32>
    %18 = arith.cmpi slt, %16, %17 : vector<288x1xi32>
    %cst = arith.constant 0.000000e+00 : f32
    %19 = vector.broadcast %cst : f32 to vector<288x128xf32>
    %c0 = arith.constant 0 : index
    %c0_3 = arith.constant 0 : index
    %c0_4 = arith.constant 0 : index
    %20 = vector.load %arg1[%c0, %c0_3, %c0_4] : memref<1x326x128xbf16, #tpu.memory_space<vmem>>, vector<1x288x128xbf16>
    %21 = vector.shape_cast %20 : vector<1x288x128xbf16> to vector<288x128xbf16>
    %c0_5 = arith.constant 0 : index
    %c1 = arith.constant 1 : index
    %c0_6 = arith.constant 0 : index
    %22 = vector.load %arg1[%c0_5, %c1, %c0_6] : memref<1x326x128xbf16, #tpu.memory_space<vmem>>, vector<1x288x128xbf16>
    %23 = vector.shape_cast %22 : vector<1x288x128xbf16> to vector<288x128xbf16>
    %c0_7 = arith.constant 0 : index
    %c2 = arith.constant 2 : index
    %c0_8 = arith.constant 0 : index
    %24 = vector.load %arg1[%c0_7, %c2, %c0_8] : memref<1x326x128xbf16, #tpu.memory_space<vmem>>, vector<1x288x128xbf16>
    %25 = vector.shape_cast %24 : vector<1x288x128xbf16> to vector<288x128xbf16>
    %26 = tpu.concatenate %21, %23, %25 in 1 : vector<288x128xbf16>, vector<288x128xbf16>, vector<288x128xbf16> -> vector<288x384xbf16>
    %c0_9 = arith.constant 0 : index
    %c0_10 = arith.constant 0 : index
    %c0_11 = arith.constant 0 : index
    %27 = vector.load %arg2[%c0_9, %c0_10, %c0_11] : memref<3x384x128xbf16, #tpu.memory_space<vmem>>, vector<1x384x128xbf16>
    %28 = vector.shape_cast %27 : vector<1x384x128xbf16> to vector<384x128xbf16>
    %cst_12 = arith.constant dense<0.000000e+00> : vector<288x128xf32>
    %29 = tpu.matmul %26, %28, %cst_12 {dimension_numbers = #tpu.dot_dimension_numbers<[1], [0], [0], [1], [0, 0, 1, 1], [], []>} : vector<288x384xbf16>, vector<384x128xbf16>, vector<288x128xf32> -> vector<288x128xf32>
    %30 = arith.addf %19, %29 : vector<288x128xf32>
    %c0_13 = arith.constant 0 : index
    %c18 = arith.constant 18 : index
    %c0_14 = arith.constant 0 : index
    %31 = vector.load %arg1[%c0_13, %c18, %c0_14] : memref<1x326x128xbf16, #tpu.memory_space<vmem>>, vector<1x288x128xbf16>
    %32 = vector.shape_cast %31 : vector<1x288x128xbf16> to vector<288x128xbf16>
    %c0_15 = arith.constant 0 : index
    %c19 = arith.constant 19 : index
    %c0_16 = arith.constant 0 : index
    %33 = vector.load %arg1[%c0_15, %c19, %c0_16] : memref<1x326x128xbf16, #tpu.memory_space<vmem>>, vector<1x288x128xbf16>
    %34 = vector.shape_cast %33 : vector<1x288x128xbf16> to vector<288x128xbf16>
    %c0_17 = arith.constant 0 : index
    %c20 = arith.constant 20 : index
    %c0_18 = arith.constant 0 : index
    %35 = vector.load %arg1[%c0_17, %c20, %c0_18] : memref<1x326x128xbf16, #tpu.memory_space<vmem>>, vector<1x288x128xbf16>
    %36 = vector.shape_cast %35 : vector<1x288x128xbf16> to vector<288x128xbf16>
    %37 = tpu.concatenate %32, %34, %36 in 1 : vector<288x128xbf16>, vector<288x128xbf16>, vector<288x128xbf16> -> vector<288x384xbf16>
    %c1_19 = arith.constant 1 : index
    %c0_20 = arith.constant 0 : index
    %c0_21 = arith.constant 0 : index
    %38 = vector.load %arg2[%c1_19, %c0_20, %c0_21] : memref<3x384x128xbf16, #tpu.memory_space<vmem>>, vector<1x384x128xbf16>
    %39 = vector.shape_cast %38 : vector<1x384x128xbf16> to vector<384x128xbf16>
    %cst_22 = arith.constant dense<0.000000e+00> : vector<288x128xf32>
    %40 = tpu.matmul %37, %39, %cst_22 {dimension_numbers = #tpu.dot_dimension_numbers<[1], [0], [0], [1], [0, 0, 1, 1], [], []>} : vector<288x384xbf16>, vector<384x128xbf16>, vector<288x128xf32> -> vector<288x128xf32>
    %41 = arith.addf %30, %40 : vector<288x128xf32>
    %c0_23 = arith.constant 0 : index
    %c36 = arith.constant 36 : index
    %c0_24 = arith.constant 0 : index
    %42 = vector.load %arg1[%c0_23, %c36, %c0_24] : memref<1x326x128xbf16, #tpu.memory_space<vmem>>, vector<1x288x128xbf16>
    %43 = vector.shape_cast %42 : vector<1x288x128xbf16> to vector<288x128xbf16>
    %c0_25 = arith.constant 0 : index
    %c37 = arith.constant 37 : index
    %c0_26 = arith.constant 0 : index
    %44 = vector.load %arg1[%c0_25, %c37, %c0_26] : memref<1x326x128xbf16, #tpu.memory_space<vmem>>, vector<1x288x128xbf16>
    %45 = vector.shape_cast %44 : vector<1x288x128xbf16> to vector<288x128xbf16>
    %c0_27 = arith.constant 0 : index
    %c38 = arith.constant 38 : index
    %c0_28 = arith.constant 0 : index
    %46 = vector.load %arg1[%c0_27, %c38, %c0_28] : memref<1x326x128xbf16, #tpu.memory_space<vmem>>, vector<1x288x128xbf16>
    %47 = vector.shape_cast %46 : vector<1x288x128xbf16> to vector<288x128xbf16>
    %48 = tpu.concatenate %43, %45, %47 in 1 : vector<288x128xbf16>, vector<288x128xbf16>, vector<288x128xbf16> -> vector<288x384xbf16>
    %c2_29 = arith.constant 2 : index
    %c0_30 = arith.constant 0 : index
    %c0_31 = arith.constant 0 : index
    %49 = vector.load %arg2[%c2_29, %c0_30, %c0_31] : memref<3x384x128xbf16, #tpu.memory_space<vmem>>, vector<1x384x128xbf16>
    %50 = vector.shape_cast %49 : vector<1x384x128xbf16> to vector<384x128xbf16>
    %cst_32 = arith.constant dense<0.000000e+00> : vector<288x128xf32>
    %51 = tpu.matmul %48, %50, %cst_32 {dimension_numbers = #tpu.dot_dimension_numbers<[1], [0], [0], [1], [0, 0, 1, 1], [], []>} : vector<288x384xbf16>, vector<384x128xbf16>, vector<288x128xf32> -> vector<288x128xf32>
    %52 = arith.addf %41, %51 : vector<288x128xf32>
    %cst_33 = arith.constant 0.000000e+00 : f32
    %53 = vector.shape_cast %18 : vector<288x1xi1> to vector<288x1xi1>
    %54 = vector.broadcast %53 : vector<288x1xi1> to vector<288x128xi1>
    %55 = vector.broadcast %cst_33 : f32 to vector<288x128xf32>
    %56 = arith.select %54, %52, %55 : vector<288x128xi1>, vector<288x128xf32>
    %cst_34 = arith.constant dense<0.000000e+00> : vector<128xf32>
    %57 = vector.multi_reduction <add>, %56, %cst_34 [0] : vector<288x128xf32> to vector<128xf32>
    %58 = vector.shape_cast %57 : vector<128xf32> to vector<1x128xf32>
    %cst_35 = arith.constant 3.906250e-03 : f32
    %59 = vector.broadcast %cst_35 : f32 to vector<1x128xf32>
    %60 = arith.mulf %58, %59 : vector<1x128xf32>
    %61 = arith.mulf %52, %52 : vector<288x128xf32>
    %cst_36 = arith.constant 0.000000e+00 : f32
    %62 = vector.shape_cast %18 : vector<288x1xi1> to vector<288x1xi1>
    %63 = vector.broadcast %62 : vector<288x1xi1> to vector<288x128xi1>
    %64 = vector.broadcast %cst_36 : f32 to vector<288x128xf32>
    %65 = arith.select %63, %61, %64 : vector<288x128xi1>, vector<288x128xf32>
    %cst_37 = arith.constant dense<0.000000e+00> : vector<128xf32>
    %66 = vector.multi_reduction <add>, %65, %cst_37 [0] : vector<288x128xf32> to vector<128xf32>
    %67 = vector.shape_cast %66 : vector<128xf32> to vector<1x128xf32>
    %cst_38 = arith.constant 3.906250e-03 : f32
    %68 = vector.broadcast %cst_38 : f32 to vector<1x128xf32>
    %69 = arith.mulf %67, %68 : vector<1x128xf32>
    %70 = arith.mulf %60, %60 : vector<1x128xf32>
    %71 = arith.subf %69, %70 : vector<1x128xf32>
    %cst_39 = arith.constant 0.000000e+00 : f32
    %72 = vector.broadcast %cst_39 : f32 to vector<1x128xf32>
    %73 = arith.maximumf %71, %72 : vector<1x128xf32>
    %74 = vector.broadcast %60 : vector<1x128xf32> to vector<288x128xf32>
    %75 = arith.subf %52, %74 : vector<288x128xf32>
    %cst_40 = arith.constant 9.99999974E-6 : f32
    %76 = vector.broadcast %cst_40 : f32 to vector<1x128xf32>
    %77 = arith.addf %73, %76 : vector<1x128xf32>
    %78 = math.rsqrt %77 : vector<1x128xf32>
    %79 = vector.broadcast %78 : vector<1x128xf32> to vector<288x128xf32>
    %80 = arith.mulf %75, %79 : vector<288x128xf32>
    %cst_41 = arith.constant 0.000000e+00 : f32
    %81 = vector.broadcast %cst_41 : f32 to vector<288x128xf32>
    %82 = arith.maximumf %80, %81 : vector<288x128xf32>
    %83 = arith.truncf %82 : vector<288x128xf32> to vector<288x128xbf16>
    %c19_42 = arith.constant 19 : index
    %c0_43 = arith.constant 0 : index
    %84 = vector.load %arg5[%c19_42, %c0_43] : memref<326x128xbf16, #tpu.memory_space<vmem>>, vector<288x128xbf16>
    tpu.vector_store %arg5[%c19_42, %c0_43], %83 {strides = array<i32>} : memref<326x128xbf16, #tpu.memory_space<vmem>>, vector<288x128xbf16>,
    %c20_44 = arith.constant 20 : index
    %c0_45 = arith.constant 0 : index
    %85 = vector.load %arg5[%c20_44, %c0_45] : memref<326x128xbf16, #tpu.memory_space<vmem>>, vector<1x128xbf16>
    %c18_46 = arith.constant 18 : index
    %c0_47 = arith.constant 0 : index
    %86 = vector.load %arg5[%c18_46, %c0_47] : memref<326x128xbf16, #tpu.memory_space<vmem>>, vector<1x128xbf16>
    tpu.vector_store %arg5[%c18_46, %c0_47], %85 {strides = array<i32>} : memref<326x128xbf16, #tpu.memory_space<vmem>>, vector<1x128xbf16>,
    %c33 = arith.constant 33 : index
    %c0_48 = arith.constant 0 : index
    %87 = vector.load %arg5[%c33, %c0_48] : memref<326x128xbf16, #tpu.memory_space<vmem>>, vector<1x128xbf16>
    %c35 = arith.constant 35 : index
    %c0_49 = arith.constant 0 : index
    %88 = vector.load %arg5[%c35, %c0_49] : memref<326x128xbf16, #tpu.memory_space<vmem>>, vector<1x128xbf16>
    tpu.vector_store %arg5[%c35, %c0_49], %87 {strides = array<i32>} : memref<326x128xbf16, #tpu.memory_space<vmem>>, vector<1x128xbf16>,
    %c38_50 = arith.constant 38 : index
    %c0_51 = arith.constant 0 : index
    %89 = vector.load %arg5[%c38_50, %c0_51] : memref<326x128xbf16, #tpu.memory_space<vmem>>, vector<1x128xbf16>
    %c36_52 = arith.constant 36 : index
    %c0_53 = arith.constant 0 : index
    %90 = vector.load %arg5[%c36_52, %c0_53] : memref<326x128xbf16, #tpu.memory_space<vmem>>, vector<1x128xbf16>
    tpu.vector_store %arg5[%c36_52, %c0_53], %89 {strides = array<i32>} : memref<326x128xbf16, #tpu.memory_space<vmem>>, vector<1x128xbf16>,
    %c51 = arith.constant 51 : index
    %c0_54 = arith.constant 0 : index
    %91 = vector.load %arg5[%c51, %c0_54] : memref<326x128xbf16, #tpu.memory_space<vmem>>, vector<1x128xbf16>
    %c53 = arith.constant 53 : index
    %c0_55 = arith.constant 0 : index
    %92 = vector.load %arg5[%c53, %c0_55] : memref<326x128xbf16, #tpu.memory_space<vmem>>, vector<1x128xbf16>
    tpu.vector_store %arg5[%c53, %c0_55], %91 {strides = array<i32>} : memref<326x128xbf16, #tpu.memory_space<vmem>>, vector<1x128xbf16>,
    %c56 = arith.constant 56 : index
    %c0_56 = arith.constant 0 : index
    %93 = vector.load %arg5[%c56, %c0_56] : memref<326x128xbf16, #tpu.memory_space<vmem>>, vector<1x128xbf16>
    %c54 = arith.constant 54 : index
    %c0_57 = arith.constant 0 : index
    %94 = vector.load %arg5[%c54, %c0_57] : memref<326x128xbf16, #tpu.memory_space<vmem>>, vector<1x128xbf16>
    tpu.vector_store %arg5[%c54, %c0_57], %93 {strides = array<i32>} : memref<326x128xbf16, #tpu.memory_space<vmem>>, vector<1x128xbf16>,
    %c69 = arith.constant 69 : index
    %c0_58 = arith.constant 0 : index
    %95 = vector.load %arg5[%c69, %c0_58] : memref<326x128xbf16, #tpu.memory_space<vmem>>, vector<1x128xbf16>
    %c71 = arith.constant 71 : index
    %c0_59 = arith.constant 0 : index
    %96 = vector.load %arg5[%c71, %c0_59] : memref<326x128xbf16, #tpu.memory_space<vmem>>, vector<1x128xbf16>
    tpu.vector_store %arg5[%c71, %c0_59], %95 {strides = array<i32>} : memref<326x128xbf16, #tpu.memory_space<vmem>>, vector<1x128xbf16>,
    %c74 = arith.constant 74 : index
    %c0_60 = arith.constant 0 : index
    %97 = vector.load %arg5[%c74, %c0_60] : memref<326x128xbf16, #tpu.memory_space<vmem>>, vector<1x128xbf16>
    %c72 = arith.constant 72 : index
    %c0_61 = arith.constant 0 : index
    %98 = vector.load %arg5[%c72, %c0_61] : memref<326x128xbf16, #tpu.memory_space<vmem>>, vector<1x128xbf16>
    tpu.vector_store %arg5[%c72, %c0_61], %97 {strides = array<i32>} : memref<326x128xbf16, #tpu.memory_space<vmem>>, vector<1x128xbf16>,
    %c87 = arith.constant 87 : index
    %c0_62 = arith.constant 0 : index
    %99 = vector.load %arg5[%c87, %c0_62] : memref<326x128xbf16, #tpu.memory_space<vmem>>, vector<1x128xbf16>
    %c89 = arith.constant 89 : index
    %c0_63 = arith.constant 0 : index
    %100 = vector.load %arg5[%c89, %c0_63] : memref<326x128xbf16, #tpu.memory_space<vmem>>, vector<1x128xbf16>
    tpu.vector_store %arg5[%c89, %c0_63], %99 {strides = array<i32>} : memref<326x128xbf16, #tpu.memory_space<vmem>>, vector<1x128xbf16>,
    %c92 = arith.constant 92 : index
    %c0_64 = arith.constant 0 : index
    %101 = vector.load %arg5[%c92, %c0_64] : memref<326x128xbf16, #tpu.memory_space<vmem>>, vector<1x128xbf16>
    %c90 = arith.constant 90 : index
    %c0_65 = arith.constant 0 : index
    %102 = vector.load %arg5[%c90, %c0_65] : memref<326x128xbf16, #tpu.memory_space<vmem>>, vector<1x128xbf16>
    tpu.vector_store %arg5[%c90, %c0_65], %101 {strides = array<i32>} : memref<326x128xbf16, #tpu.memory_space<vmem>>, vector<1x128xbf16>,
    %c105 = arith.constant 105 : index
    %c0_66 = arith.constant 0 : index
    %103 = vector.load %arg5[%c105, %c0_66] : memref<326x128xbf16, #tpu.memory_space<vmem>>, vector<1x128xbf16>
    %c107 = arith.constant 107 : index
    %c0_67 = arith.constant 0 : index
    %104 = vector.load %arg5[%c107, %c0_67] : memref<326x128xbf16, #tpu.memory_space<vmem>>, vector<1x128xbf16>
    tpu.vector_store %arg5[%c107, %c0_67], %103 {strides = array<i32>} : memref<326x128xbf16, #tpu.memory_space<vmem>>, vector<1x128xbf16>,
    %c110 = arith.constant 110 : index
    %c0_68 = arith.constant 0 : index
    %105 = vector.load %arg5[%c110, %c0_68] : memref<326x128xbf16, #tpu.memory_space<vmem>>, vector<1x128xbf16>
    %c108 = arith.constant 108 : index
    %c0_69 = arith.constant 0 : index
    %106 = vector.load %arg5[%c108, %c0_69] : memref<326x128xbf16, #tpu.memory_space<vmem>>, vector<1x128xbf16>
    tpu.vector_store %arg5[%c108, %c0_69], %105 {strides = array<i32>} : memref<326x128xbf16, #tpu.memory_space<vmem>>, vector<1x128xbf16>,
    %c123 = arith.constant 123 : index
    %c0_70 = arith.constant 0 : index
    %107 = vector.load %arg5[%c123, %c0_70] : memref<326x128xbf16, #tpu.memory_space<vmem>>, vector<1x128xbf16>
    %c125 = arith.constant 125 : index
    %c0_71 = arith.constant 0 : index
    %108 = vector.load %arg5[%c125, %c0_71] : memref<326x128xbf16, #tpu.memory_space<vmem>>, vector<1x128xbf16>
    tpu.vector_store %arg5[%c125, %c0_71], %107 {strides = array<i32>} : memref<326x128xbf16, #tpu.memory_space<vmem>>, vector<1x128xbf16>,
    %c128 = arith.constant 128 : index
    %c0_72 = arith.constant 0 : index
    %109 = vector.load %arg5[%c128, %c0_72] : memref<326x128xbf16, #tpu.memory_space<vmem>>, vector<1x128xbf16>
    %c126 = arith.constant 126 : index
    %c0_73 = arith.constant 0 : index
    %110 = vector.load %arg5[%c126, %c0_73] : memref<326x128xbf16, #tpu.memory_space<vmem>>, vector<1x128xbf16>
    tpu.vector_store %arg5[%c126, %c0_73], %109 {strides = array<i32>} : memref<326x128xbf16, #tpu.memory_space<vmem>>, vector<1x128xbf16>,
    %c141 = arith.constant 141 : index
    %c0_74 = arith.constant 0 : index
    %111 = vector.load %arg5[%c141, %c0_74] : memref<326x128xbf16, #tpu.memory_space<vmem>>, vector<1x128xbf16>
    %c143 = arith.constant 143 : index
    %c0_75 = arith.constant 0 : index
    %112 = vector.load %arg5[%c143, %c0_75] : memref<326x128xbf16, #tpu.memory_space<vmem>>, vector<1x128xbf16>
    tpu.vector_store %arg5[%c143, %c0_75], %111 {strides = array<i32>} : memref<326x128xbf16, #tpu.memory_space<vmem>>, vector<1x128xbf16>,
    %c146 = arith.constant 146 : index
    %c0_76 = arith.constant 0 : index
    %113 = vector.load %arg5[%c146, %c0_76] : memref<326x128xbf16, #tpu.memory_space<vmem>>, vector<1x128xbf16>
    %c144 = arith.constant 144 : index
    %c0_77 = arith.constant 0 : index
    %114 = vector.load %arg5[%c144, %c0_77] : memref<326x128xbf16, #tpu.memory_space<vmem>>, vector<1x128xbf16>
    tpu.vector_store %arg5[%c144, %c0_77], %113 {strides = array<i32>} : memref<326x128xbf16, #tpu.memory_space<vmem>>, vector<1x128xbf16>,
    %c159 = arith.constant 159 : index
    %c0_78 = arith.constant 0 : index
    %115 = vector.load %arg5[%c159, %c0_78] : memref<326x128xbf16, #tpu.memory_space<vmem>>, vector<1x128xbf16>
    %c161 = arith.constant 161 : index
    %c0_79 = arith.constant 0 : index
    %116 = vector.load %arg5[%c161, %c0_79] : memref<326x128xbf16, #tpu.memory_space<vmem>>, vector<1x128xbf16>
    tpu.vector_store %arg5[%c161, %c0_79], %115 {strides = array<i32>} : memref<326x128xbf16, #tpu.memory_space<vmem>>, vector<1x128xbf16>,
    %c164 = arith.constant 164 : index
    %c0_80 = arith.constant 0 : index
    %117 = vector.load %arg5[%c164, %c0_80] : memref<326x128xbf16, #tpu.memory_space<vmem>>, vector<1x128xbf16>
    %c162 = arith.constant 162 : index
    %c0_81 = arith.constant 0 : index
    %118 = vector.load %arg5[%c162, %c0_81] : memref<326x128xbf16, #tpu.memory_space<vmem>>, vector<1x128xbf16>
    tpu.vector_store %arg5[%c162, %c0_81], %117 {strides = array<i32>} : memref<326x128xbf16, #tpu.memory_space<vmem>>, vector<1x128xbf16>,
    %c177 = arith.constant 177 : index
    %c0_82 = arith.constant 0 : index
    %119 = vector.load %arg5[%c177, %c0_82] : memref<326x128xbf16, #tpu.memory_space<vmem>>, vector<1x128xbf16>
    %c179 = arith.constant 179 : index
    %c0_83 = arith.constant 0 : index
    %120 = vector.load %arg5[%c179, %c0_83] : memref<326x128xbf16, #tpu.memory_space<vmem>>, vector<1x128xbf16>
    tpu.vector_store %arg5[%c179, %c0_83], %119 {strides = array<i32>} : memref<326x128xbf16, #tpu.memory_space<vmem>>, vector<1x128xbf16>,
    %c182 = arith.constant 182 : index
    %c0_84 = arith.constant 0 : index
    %121 = vector.load %arg5[%c182, %c0_84] : memref<326x128xbf16, #tpu.memory_space<vmem>>, vector<1x128xbf16>
    %c180 = arith.constant 180 : index
    %c0_85 = arith.constant 0 : index
    %122 = vector.load %arg5[%c180, %c0_85] : memref<326x128xbf16, #tpu.memory_space<vmem>>, vector<1x128xbf16>
    tpu.vector_store %arg5[%c180, %c0_85], %121 {strides = array<i32>} : memref<326x128xbf16, #tpu.memory_space<vmem>>, vector<1x128xbf16>,
    %c195 = arith.constant 195 : index
    %c0_86 = arith.constant 0 : index
    %123 = vector.load %arg5[%c195, %c0_86] : memref<326x128xbf16, #tpu.memory_space<vmem>>, vector<1x128xbf16>
    %c197 = arith.constant 197 : index
    %c0_87 = arith.constant 0 : index
    %124 = vector.load %arg5[%c197, %c0_87] : memref<326x128xbf16, #tpu.memory_space<vmem>>, vector<1x128xbf16>
    tpu.vector_store %arg5[%c197, %c0_87], %123 {strides = array<i32>} : memref<326x128xbf16, #tpu.memory_space<vmem>>, vector<1x128xbf16>,
    %c200 = arith.constant 200 : index
    %c0_88 = arith.constant 0 : index
    %125 = vector.load %arg5[%c200, %c0_88] : memref<326x128xbf16, #tpu.memory_space<vmem>>, vector<1x128xbf16>
    %c198 = arith.constant 198 : index
    %c0_89 = arith.constant 0 : index
    %126 = vector.load %arg5[%c198, %c0_89] : memref<326x128xbf16, #tpu.memory_space<vmem>>, vector<1x128xbf16>
    tpu.vector_store %arg5[%c198, %c0_89], %125 {strides = array<i32>} : memref<326x128xbf16, #tpu.memory_space<vmem>>, vector<1x128xbf16>,
    %c213 = arith.constant 213 : index
    %c0_90 = arith.constant 0 : index
    %127 = vector.load %arg5[%c213, %c0_90] : memref<326x128xbf16, #tpu.memory_space<vmem>>, vector<1x128xbf16>
    %c215 = arith.constant 215 : index
    %c0_91 = arith.constant 0 : index
    %128 = vector.load %arg5[%c215, %c0_91] : memref<326x128xbf16, #tpu.memory_space<vmem>>, vector<1x128xbf16>
    tpu.vector_store %arg5[%c215, %c0_91], %127 {strides = array<i32>} : memref<326x128xbf16, #tpu.memory_space<vmem>>, vector<1x128xbf16>,
    %c218 = arith.constant 218 : index
    %c0_92 = arith.constant 0 : index
    %129 = vector.load %arg5[%c218, %c0_92] : memref<326x128xbf16, #tpu.memory_space<vmem>>, vector<1x128xbf16>
    %c216 = arith.constant 216 : index
    %c0_93 = arith.constant 0 : index
    %130 = vector.load %arg5[%c216, %c0_93] : memref<326x128xbf16, #tpu.memory_space<vmem>>, vector<1x128xbf16>
    tpu.vector_store %arg5[%c216, %c0_93], %129 {strides = array<i32>} : memref<326x128xbf16, #tpu.memory_space<vmem>>, vector<1x128xbf16>,
    %c231 = arith.constant 231 : index
    %c0_94 = arith.constant 0 : index
    %131 = vector.load %arg5[%c231, %c0_94] : memref<326x128xbf16, #tpu.memory_space<vmem>>, vector<1x128xbf16>
    %c233 = arith.constant 233 : index
    %c0_95 = arith.constant 0 : index
    %132 = vector.load %arg5[%c233, %c0_95] : memref<326x128xbf16, #tpu.memory_space<vmem>>, vector<1x128xbf16>
    tpu.vector_store %arg5[%c233, %c0_95], %131 {strides = array<i32>} : memref<326x128xbf16, #tpu.memory_space<vmem>>, vector<1x128xbf16>,
    %c236 = arith.constant 236 : index
    %c0_96 = arith.constant 0 : index
    %133 = vector.load %arg5[%c236, %c0_96] : memref<326x128xbf16, #tpu.memory_space<vmem>>, vector<1x128xbf16>
    %c234 = arith.constant 234 : index
    %c0_97 = arith.constant 0 : index
    %134 = vector.load %arg5[%c234, %c0_97] : memref<326x128xbf16, #tpu.memory_space<vmem>>, vector<1x128xbf16>
    tpu.vector_store %arg5[%c234, %c0_97], %133 {strides = array<i32>} : memref<326x128xbf16, #tpu.memory_space<vmem>>, vector<1x128xbf16>,
    %c249 = arith.constant 249 : index
    %c0_98 = arith.constant 0 : index
    %135 = vector.load %arg5[%c249, %c0_98] : memref<326x128xbf16, #tpu.memory_space<vmem>>, vector<1x128xbf16>
    %c251 = arith.constant 251 : index
    %c0_99 = arith.constant 0 : index
    %136 = vector.load %arg5[%c251, %c0_99] : memref<326x128xbf16, #tpu.memory_space<vmem>>, vector<1x128xbf16>
    tpu.vector_store %arg5[%c251, %c0_99], %135 {strides = array<i32>} : memref<326x128xbf16, #tpu.memory_space<vmem>>, vector<1x128xbf16>,
    %c254 = arith.constant 254 : index
    %c0_100 = arith.constant 0 : index
    %137 = vector.load %arg5[%c254, %c0_100] : memref<326x128xbf16, #tpu.memory_space<vmem>>, vector<1x128xbf16>
    %c252 = arith.constant 252 : index
    %c0_101 = arith.constant 0 : index
    %138 = vector.load %arg5[%c252, %c0_101] : memref<326x128xbf16, #tpu.memory_space<vmem>>, vector<1x128xbf16>
    tpu.vector_store %arg5[%c252, %c0_101], %137 {strides = array<i32>} : memref<326x128xbf16, #tpu.memory_space<vmem>>, vector<1x128xbf16>,
    %c267 = arith.constant 267 : index
    %c0_102 = arith.constant 0 : index
    %139 = vector.load %arg5[%c267, %c0_102] : memref<326x128xbf16, #tpu.memory_space<vmem>>, vector<1x128xbf16>
    %c269 = arith.constant 269 : index
    %c0_103 = arith.constant 0 : index
    %140 = vector.load %arg5[%c269, %c0_103] : memref<326x128xbf16, #tpu.memory_space<vmem>>, vector<1x128xbf16>
    tpu.vector_store %arg5[%c269, %c0_103], %139 {strides = array<i32>} : memref<326x128xbf16, #tpu.memory_space<vmem>>, vector<1x128xbf16>,
    %c272 = arith.constant 272 : index
    %c0_104 = arith.constant 0 : index
    %141 = vector.load %arg5[%c272, %c0_104] : memref<326x128xbf16, #tpu.memory_space<vmem>>, vector<1x128xbf16>
    %c270 = arith.constant 270 : index
    %c0_105 = arith.constant 0 : index
    %142 = vector.load %arg5[%c270, %c0_105] : memref<326x128xbf16, #tpu.memory_space<vmem>>, vector<1x128xbf16>
    tpu.vector_store %arg5[%c270, %c0_105], %141 {strides = array<i32>} : memref<326x128xbf16, #tpu.memory_space<vmem>>, vector<1x128xbf16>,
    %c285 = arith.constant 285 : index
    %c0_106 = arith.constant 0 : index
    %143 = vector.load %arg5[%c285, %c0_106] : memref<326x128xbf16, #tpu.memory_space<vmem>>, vector<1x128xbf16>
    %c287 = arith.constant 287 : index
    %c0_107 = arith.constant 0 : index
    %144 = vector.load %arg5[%c287, %c0_107] : memref<326x128xbf16, #tpu.memory_space<vmem>>, vector<1x128xbf16>
    tpu.vector_store %arg5[%c287, %c0_107], %143 {strides = array<i32>} : memref<326x128xbf16, #tpu.memory_space<vmem>>, vector<1x128xbf16>,
    %c290 = arith.constant 290 : index
    %c0_108 = arith.constant 0 : index
    %145 = vector.load %arg5[%c290, %c0_108] : memref<326x128xbf16, #tpu.memory_space<vmem>>, vector<1x128xbf16>
    %c288 = arith.constant 288 : index
    %c0_109 = arith.constant 0 : index
    %146 = vector.load %arg5[%c288, %c0_109] : memref<326x128xbf16, #tpu.memory_space<vmem>>, vector<1x128xbf16>
    tpu.vector_store %arg5[%c288, %c0_109], %145 {strides = array<i32>} : memref<326x128xbf16, #tpu.memory_space<vmem>>, vector<1x128xbf16>,
    %c303 = arith.constant 303 : index
    %c0_110 = arith.constant 0 : index
    %147 = vector.load %arg5[%c303, %c0_110] : memref<326x128xbf16, #tpu.memory_space<vmem>>, vector<1x128xbf16>
    %c305 = arith.constant 305 : index
    %c0_111 = arith.constant 0 : index
    %148 = vector.load %arg5[%c305, %c0_111] : memref<326x128xbf16, #tpu.memory_space<vmem>>, vector<1x128xbf16>
    tpu.vector_store %arg5[%c305, %c0_111], %147 {strides = array<i32>} : memref<326x128xbf16, #tpu.memory_space<vmem>>, vector<1x128xbf16>,
    %c36_112 = arith.constant 36 : index
    %c0_113 = arith.constant 0 : index
    %149 = vector.load %arg5[%c36_112, %c0_113] : memref<326x128xbf16, #tpu.memory_space<vmem>>, vector<18x128xbf16>
    %c0_114 = arith.constant 0 : index
    %c0_115 = arith.constant 0 : index
    %150 = vector.load %arg5[%c0_114, %c0_115] : memref<326x128xbf16, #tpu.memory_space<vmem>>, vector<18x128xbf16>
    tpu.vector_store %arg5[%c0_114, %c0_115], %149 {strides = array<i32>} : memref<326x128xbf16, #tpu.memory_space<vmem>>, vector<18x128xbf16>,
    %c270_116 = arith.constant 270 : index
    %c0_117 = arith.constant 0 : index
    %151 = vector.load %arg5[%c270_116, %c0_117] : memref<326x128xbf16, #tpu.memory_space<vmem>>, vector<18x128xbf16>
    %c306 = arith.constant 306 : index
    %c0_118 = arith.constant 0 : index
    %152 = vector.load %arg5[%c306, %c0_118] : memref<326x128xbf16, #tpu.memory_space<vmem>>, vector<18x128xbf16>
    tpu.vector_store %arg5[%c306, %c0_118], %151 {strides = array<i32>} : memref<326x128xbf16, #tpu.memory_space<vmem>>, vector<18x128xbf16>,
    %cst_119 = arith.constant 0.000000e+00 : bf16
    %153 = vector.broadcast %cst_119 : bf16 to vector<2x128xbf16>
    %c324 = arith.constant 324 : index
    %c0_120 = arith.constant 0 : index
    %154 = vector.load %arg5[%c324, %c0_120] : memref<326x128xbf16, #tpu.memory_space<vmem>>, vector<2x128xbf16>
    tpu.vector_store %arg5[%c324, %c0_120], %153 {strides = array<i32>} : memref<326x128xbf16, #tpu.memory_space<vmem>>, vector<2x128xbf16>,
    %cst_121 = arith.constant 0.000000e+00 : f32
    %155 = vector.broadcast %cst_121 : f32 to vector<288x128xf32>
    %c0_122 = arith.constant 0 : index
    %c0_123 = arith.constant 0 : index
    %156 = vector.load %arg5[%c0_122, %c0_123] : memref<326x128xbf16, #tpu.memory_space<vmem>>, vector<288x128xbf16>
    %c1_124 = arith.constant 1 : index
    %c0_125 = arith.constant 0 : index
    %157 = vector.load %arg5[%c1_124, %c0_125] : memref<326x128xbf16, #tpu.memory_space<vmem>>, vector<288x128xbf16>
    %c2_126 = arith.constant 2 : index
    %c0_127 = arith.constant 0 : index
    %158 = vector.load %arg5[%c2_126, %c0_127] : memref<326x128xbf16, #tpu.memory_space<vmem>>, vector<288x128xbf16>
    %159 = tpu.concatenate %156, %157, %158 in 1 : vector<288x128xbf16>, vector<288x128xbf16>, vector<288x128xbf16> -> vector<288x384xbf16>
    %c0_128 = arith.constant 0 : index
    %c0_129 = arith.constant 0 : index
    %c0_130 = arith.constant 0 : index
    %160 = vector.load %arg3[%c0_128, %c0_129, %c0_130] : memref<3x384x128xbf16, #tpu.memory_space<vmem>>, vector<1x384x128xbf16>
    %161 = vector.shape_cast %160 : vector<1x384x128xbf16> to vector<384x128xbf16>
    %cst_131 = arith.constant dense<0.000000e+00> : vector<288x128xf32>
    %162 = tpu.matmul %159, %161, %cst_131 {dimension_numbers = #tpu.dot_dimension_numbers<[1], [0], [0], [1], [0, 0, 1, 1], [], []>} : vector<288x384xbf16>, vector<384x128xbf16>, vector<288x128xf32> -> vector<288x128xf32>
    %163 = arith.addf %155, %162 : vector<288x128xf32>
    %c18_132 = arith.constant 18 : index
    %c0_133 = arith.constant 0 : index
    %164 = vector.load %arg5[%c18_132, %c0_133] : memref<326x128xbf16, #tpu.memory_space<vmem>>, vector<288x128xbf16>
    %c19_134 = arith.constant 19 : index
    %c0_135 = arith.constant 0 : index
    %165 = vector.load %arg5[%c19_134, %c0_135] : memref<326x128xbf16, #tpu.memory_space<vmem>>, vector<288x128xbf16>
    %c20_136 = arith.constant 20 : index
    %c0_137 = arith.constant 0 : index
    %166 = vector.load %arg5[%c20_136, %c0_137] : memref<326x128xbf16, #tpu.memory_space<vmem>>, vector<288x128xbf16>
    %167 = tpu.concatenate %164, %165, %166 in 1 : vector<288x128xbf16>, vector<288x128xbf16>, vector<288x128xbf16> -> vector<288x384xbf16>
    %c1_138 = arith.constant 1 : index
    %c0_139 = arith.constant 0 : index
    %c0_140 = arith.constant 0 : index
    %168 = vector.load %arg3[%c1_138, %c0_139, %c0_140] : memref<3x384x128xbf16, #tpu.memory_space<vmem>>, vector<1x384x128xbf16>
    %169 = vector.shape_cast %168 : vector<1x384x128xbf16> to vector<384x128xbf16>
    %cst_141 = arith.constant dense<0.000000e+00> : vector<288x128xf32>
    %170 = tpu.matmul %167, %169, %cst_141 {dimension_numbers = #tpu.dot_dimension_numbers<[1], [0], [0], [1], [0, 0, 1, 1], [], []>} : vector<288x384xbf16>, vector<384x128xbf16>, vector<288x128xf32> -> vector<288x128xf32>
    %171 = arith.addf %163, %170 : vector<288x128xf32>
    %c36_142 = arith.constant 36 : index
    %c0_143 = arith.constant 0 : index
    %172 = vector.load %arg5[%c36_142, %c0_143] : memref<326x128xbf16, #tpu.memory_space<vmem>>, vector<288x128xbf16>
    %c37_144 = arith.constant 37 : index
    %c0_145 = arith.constant 0 : index
    %173 = vector.load %arg5[%c37_144, %c0_145] : memref<326x128xbf16, #tpu.memory_space<vmem>>, vector<288x128xbf16>
    %c38_146 = arith.constant 38 : index
    %c0_147 = arith.constant 0 : index
    %174 = vector.load %arg5[%c38_146, %c0_147] : memref<326x128xbf16, #tpu.memory_space<vmem>>, vector<288x128xbf16>
    %175 = tpu.concatenate %172, %173, %174 in 1 : vector<288x128xbf16>, vector<288x128xbf16>, vector<288x128xbf16> -> vector<288x384xbf16>
    %c2_148 = arith.constant 2 : index
    %c0_149 = arith.constant 0 : index
    %c0_150 = arith.constant 0 : index
    %176 = vector.load %arg3[%c2_148, %c0_149, %c0_150] : memref<3x384x128xbf16, #tpu.memory_space<vmem>>, vector<1x384x128xbf16>
    %177 = vector.shape_cast %176 : vector<1x384x128xbf16> to vector<384x128xbf16>
    %cst_151 = arith.constant dense<0.000000e+00> : vector<288x128xf32>
    %178 = tpu.matmul %175, %177, %cst_151 {dimension_numbers = #tpu.dot_dimension_numbers<[1], [0], [0], [1], [0, 0, 1, 1], [], []>} : vector<288x384xbf16>, vector<384x128xbf16>, vector<288x128xf32> -> vector<288x128xf32>
    %179 = arith.addf %171, %178 : vector<288x128xf32>
    %cst_152 = arith.constant 0.000000e+00 : f32
    %180 = vector.shape_cast %18 : vector<288x1xi1> to vector<288x1xi1>
    %181 = vector.broadcast %180 : vector<288x1xi1> to vector<288x128xi1>
    %182 = vector.broadcast %cst_152 : f32 to vector<288x128xf32>
    %183 = arith.select %181, %179, %182 : vector<288x128xi1>, vector<288x128xf32>
    %cst_153 = arith.constant dense<0.000000e+00> : vector<128xf32>
    %184 = vector.multi_reduction <add>, %183, %cst_153 [0] : vector<288x128xf32> to vector<128xf32>
    %185 = vector.shape_cast %184 : vector<128xf32> to vector<1x128xf32>
    %cst_154 = arith.constant 3.906250e-03 : f32
    %186 = vector.broadcast %cst_154 : f32 to vector<1x128xf32>
    %187 = arith.mulf %185, %186 : vector<1x128xf32>
    %188 = arith.mulf %179, %179 : vector<288x128xf32>
    %cst_155 = arith.constant 0.000000e+00 : f32
    %189 = vector.shape_cast %18 : vector<288x1xi1> to vector<288x1xi1>
    %190 = vector.broadcast %189 : vector<288x1xi1> to vector<288x128xi1>
    %191 = vector.broadcast %cst_155 : f32 to vector<288x128xf32>
    %192 = arith.select %190, %188, %191 : vector<288x128xi1>, vector<288x128xf32>
    %cst_156 = arith.constant dense<0.000000e+00> : vector<128xf32>
    %193 = vector.multi_reduction <add>, %192, %cst_156 [0] : vector<288x128xf32> to vector<128xf32>
    %194 = vector.shape_cast %193 : vector<128xf32> to vector<1x128xf32>
    %cst_157 = arith.constant 3.906250e-03 : f32
    %195 = vector.broadcast %cst_157 : f32 to vector<1x128xf32>
    %196 = arith.mulf %194, %195 : vector<1x128xf32>
    %197 = arith.mulf %187, %187 : vector<1x128xf32>
    %198 = arith.subf %196, %197 : vector<1x128xf32>
    %cst_158 = arith.constant 0.000000e+00 : f32
    %199 = vector.broadcast %cst_158 : f32 to vector<1x128xf32>
    %200 = arith.maximumf %198, %199 : vector<1x128xf32>
    %201 = vector.broadcast %187 : vector<1x128xf32> to vector<288x128xf32>
    %202 = arith.subf %179, %201 : vector<288x128xf32>
    %cst_159 = arith.constant 9.99999974E-6 : f32
    %203 = vector.broadcast %cst_159 : f32 to vector<1x128xf32>
    %204 = arith.addf %200, %203 : vector<1x128xf32>
    %205 = math.rsqrt %204 : vector<1x128xf32>
    %206 = vector.broadcast %205 : vector<1x128xf32> to vector<288x128xf32>
    %207 = arith.mulf %202, %206 : vector<288x128xf32>
    %c0_160 = arith.constant 0 : index
    %c19_161 = arith.constant 19 : index
    %c0_162 = arith.constant 0 : index
    %208 = vector.load %arg1[%c0_160, %c19_161, %c0_162] : memref<1x326x128xbf16, #tpu.memory_space<vmem>>, vector<1x288x128xbf16>
    %209 = vector.shape_cast %208 : vector<1x288x128xbf16> to vector<288x128xbf16>
    %210 = arith.extf %209 : vector<288x128xbf16> to vector<288x128xf32>
    %211 = arith.addf %207, %210 : vector<288x128xf32>
    %cst_163 = arith.constant 0.000000e+00 : f32
    %212 = vector.broadcast %cst_163 : f32 to vector<288x128xf32>
    %213 = arith.maximumf %211, %212 : vector<288x128xf32>
    %214 = vector.extract_strided_slice %213 {offsets = [0, 0], sizes = [16, 128], strides = [1, 1]} : vector<288x128xf32> to vector<16x128xf32>
    %c0_164 = arith.constant 0 : index
    %c0_165 = arith.constant 0 : index
    %c0_166 = arith.constant 0 : index
    %215 = vector.load %arg4[%c0_164, %c0_165, %c0_166] : memref<1x256x128xf32, #tpu.memory_space<vmem>>, vector<1x16x128xf32>
    %216 = vector.shape_cast %215 : vector<1x16x128xf32> to vector<16x128xf32>
    %217 = vector.shape_cast %214 : vector<16x128xf32> to vector<1x16x128xf32>
    tpu.vector_store %arg4[%c0_164, %c0_165, %c0_166], %217 {strides = array<i32>} : memref<1x256x128xf32, #tpu.memory_space<vmem>>, vector<1x16x128xf32>,
    %218 = vector.extract_strided_slice %213 {offsets = [18, 0], sizes = [16, 128], strides = [1, 1]} : vector<288x128xf32> to vector<16x128xf32>
    %c0_167 = arith.constant 0 : index
    %c16 = arith.constant 16 : index
    %c0_168 = arith.constant 0 : index
    %219 = vector.load %arg4[%c0_167, %c16, %c0_168] : memref<1x256x128xf32, #tpu.memory_space<vmem>>, vector<1x16x128xf32>
    %220 = vector.shape_cast %219 : vector<1x16x128xf32> to vector<16x128xf32>
    %221 = vector.shape_cast %218 : vector<16x128xf32> to vector<1x16x128xf32>
    tpu.vector_store %arg4[%c0_167, %c16, %c0_168], %221 {strides = array<i32>} : memref<1x256x128xf32, #tpu.memory_space<vmem>>, vector<1x16x128xf32>,
    %222 = vector.extract_strided_slice %213 {offsets = [36, 0], sizes = [16, 128], strides = [1, 1]} : vector<288x128xf32> to vector<16x128xf32>
    %c0_169 = arith.constant 0 : index
    %c32 = arith.constant 32 : index
    %c0_170 = arith.constant 0 : index
    %223 = vector.load %arg4[%c0_169, %c32, %c0_170] : memref<1x256x128xf32, #tpu.memory_space<vmem>>, vector<1x16x128xf32>
    %224 = vector.shape_cast %223 : vector<1x16x128xf32> to vector<16x128xf32>
    %225 = vector.shape_cast %222 : vector<16x128xf32> to vector<1x16x128xf32>
    tpu.vector_store %arg4[%c0_169, %c32, %c0_170], %225 {strides = array<i32>} : memref<1x256x128xf32, #tpu.memory_space<vmem>>, vector<1x16x128xf32>,
    %226 = vector.extract_strided_slice %213 {offsets = [54, 0], sizes = [16, 128], strides = [1, 1]} : vector<288x128xf32> to vector<16x128xf32>
    %c0_171 = arith.constant 0 : index
    %c48 = arith.constant 48 : index
    %c0_172 = arith.constant 0 : index
    %227 = vector.load %arg4[%c0_171, %c48, %c0_172] : memref<1x256x128xf32, #tpu.memory_space<vmem>>, vector<1x16x128xf32>
    %228 = vector.shape_cast %227 : vector<1x16x128xf32> to vector<16x128xf32>
    %229 = vector.shape_cast %226 : vector<16x128xf32> to vector<1x16x128xf32>
    tpu.vector_store %arg4[%c0_171, %c48, %c0_172], %229 {strides = array<i32>} : memref<1x256x128xf32, #tpu.memory_space<vmem>>, vector<1x16x128xf32>,
    %230 = vector.extract_strided_slice %213 {offsets = [72, 0], sizes = [16, 128], strides = [1, 1]} : vector<288x128xf32> to vector<16x128xf32>
    %c0_173 = arith.constant 0 : index
    %c64 = arith.constant 64 : index
    %c0_174 = arith.constant 0 : index
    %231 = vector.load %arg4[%c0_173, %c64, %c0_174] : memref<1x256x128xf32, #tpu.memory_space<vmem>>, vector<1x16x128xf32>
    %232 = vector.shape_cast %231 : vector<1x16x128xf32> to vector<16x128xf32>
    %233 = vector.shape_cast %230 : vector<16x128xf32> to vector<1x16x128xf32>
    tpu.vector_store %arg4[%c0_173, %c64, %c0_174], %233 {strides = array<i32>} : memref<1x256x128xf32, #tpu.memory_space<vmem>>, vector<1x16x128xf32>,
    %234 = vector.extract_strided_slice %213 {offsets = [90, 0], sizes = [16, 128], strides = [1, 1]} : vector<288x128xf32> to vector<16x128xf32>
    %c0_175 = arith.constant 0 : index
    %c80 = arith.constant 80 : index
    %c0_176 = arith.constant 0 : index
    %235 = vector.load %arg4[%c0_175, %c80, %c0_176] : memref<1x256x128xf32, #tpu.memory_space<vmem>>, vector<1x16x128xf32>
    %236 = vector.shape_cast %235 : vector<1x16x128xf32> to vector<16x128xf32>
    %237 = vector.shape_cast %234 : vector<16x128xf32> to vector<1x16x128xf32>
    tpu.vector_store %arg4[%c0_175, %c80, %c0_176], %237 {strides = array<i32>} : memref<1x256x128xf32, #tpu.memory_space<vmem>>, vector<1x16x128xf32>,
    %238 = vector.extract_strided_slice %213 {offsets = [108, 0], sizes = [16, 128], strides = [1, 1]} : vector<288x128xf32> to vector<16x128xf32>
    %c0_177 = arith.constant 0 : index
    %c96 = arith.constant 96 : index
    %c0_178 = arith.constant 0 : index
    %239 = vector.load %arg4[%c0_177, %c96, %c0_178] : memref<1x256x128xf32, #tpu.memory_space<vmem>>, vector<1x16x128xf32>
    %240 = vector.shape_cast %239 : vector<1x16x128xf32> to vector<16x128xf32>
    %241 = vector.shape_cast %238 : vector<16x128xf32> to vector<1x16x128xf32>
    tpu.vector_store %arg4[%c0_177, %c96, %c0_178], %241 {strides = array<i32>} : memref<1x256x128xf32, #tpu.memory_space<vmem>>, vector<1x16x128xf32>,
    %242 = vector.extract_strided_slice %213 {offsets = [126, 0], sizes = [16, 128], strides = [1, 1]} : vector<288x128xf32> to vector<16x128xf32>
    %c0_179 = arith.constant 0 : index
    %c112 = arith.constant 112 : index
    %c0_180 = arith.constant 0 : index
    %243 = vector.load %arg4[%c0_179, %c112, %c0_180] : memref<1x256x128xf32, #tpu.memory_space<vmem>>, vector<1x16x128xf32>
    %244 = vector.shape_cast %243 : vector<1x16x128xf32> to vector<16x128xf32>
    %245 = vector.shape_cast %242 : vector<16x128xf32> to vector<1x16x128xf32>
    tpu.vector_store %arg4[%c0_179, %c112, %c0_180], %245 {strides = array<i32>} : memref<1x256x128xf32, #tpu.memory_space<vmem>>, vector<1x16x128xf32>,
    %246 = vector.extract_strided_slice %213 {offsets = [144, 0], sizes = [16, 128], strides = [1, 1]} : vector<288x128xf32> to vector<16x128xf32>
    %c0_181 = arith.constant 0 : index
    %c128_182 = arith.constant 128 : index
    %c0_183 = arith.constant 0 : index
    %247 = vector.load %arg4[%c0_181, %c128_182, %c0_183] : memref<1x256x128xf32, #tpu.memory_space<vmem>>, vector<1x16x128xf32>
    %248 = vector.shape_cast %247 : vector<1x16x128xf32> to vector<16x128xf32>
    %249 = vector.shape_cast %246 : vector<16x128xf32> to vector<1x16x128xf32>
    tpu.vector_store %arg4[%c0_181, %c128_182, %c0_183], %249 {strides = array<i32>} : memref<1x256x128xf32, #tpu.memory_space<vmem>>, vector<1x16x128xf32>,
    %250 = vector.extract_strided_slice %213 {offsets = [162, 0], sizes = [16, 128], strides = [1, 1]} : vector<288x128xf32> to vector<16x128xf32>
    %c0_184 = arith.constant 0 : index
    %c144_185 = arith.constant 144 : index
    %c0_186 = arith.constant 0 : index
    %251 = vector.load %arg4[%c0_184, %c144_185, %c0_186] : memref<1x256x128xf32, #tpu.memory_space<vmem>>, vector<1x16x128xf32>
    %252 = vector.shape_cast %251 : vector<1x16x128xf32> to vector<16x128xf32>
    %253 = vector.shape_cast %250 : vector<16x128xf32> to vector<1x16x128xf32>
    tpu.vector_store %arg4[%c0_184, %c144_185, %c0_186], %253 {strides = array<i32>} : memref<1x256x128xf32, #tpu.memory_space<vmem>>, vector<1x16x128xf32>,
    %254 = vector.extract_strided_slice %213 {offsets = [180, 0], sizes = [16, 128], strides = [1, 1]} : vector<288x128xf32> to vector<16x128xf32>
    %c0_187 = arith.constant 0 : index
    %c160 = arith.constant 160 : index
    %c0_188 = arith.constant 0 : index
    %255 = vector.load %arg4[%c0_187, %c160, %c0_188] : memref<1x256x128xf32, #tpu.memory_space<vmem>>, vector<1x16x128xf32>
    %256 = vector.shape_cast %255 : vector<1x16x128xf32> to vector<16x128xf32>
    %257 = vector.shape_cast %254 : vector<16x128xf32> to vector<1x16x128xf32>
    tpu.vector_store %arg4[%c0_187, %c160, %c0_188], %257 {strides = array<i32>} : memref<1x256x128xf32, #tpu.memory_space<vmem>>, vector<1x16x128xf32>,
    %258 = vector.extract_strided_slice %213 {offsets = [198, 0], sizes = [16, 128], strides = [1, 1]} : vector<288x128xf32> to vector<16x128xf32>
    %c0_189 = arith.constant 0 : index
    %c176 = arith.constant 176 : index
    %c0_190 = arith.constant 0 : index
    %259 = vector.load %arg4[%c0_189, %c176, %c0_190] : memref<1x256x128xf32, #tpu.memory_space<vmem>>, vector<1x16x128xf32>
    %260 = vector.shape_cast %259 : vector<1x16x128xf32> to vector<16x128xf32>
    %261 = vector.shape_cast %258 : vector<16x128xf32> to vector<1x16x128xf32>
    tpu.vector_store %arg4[%c0_189, %c176, %c0_190], %261 {strides = array<i32>} : memref<1x256x128xf32, #tpu.memory_space<vmem>>, vector<1x16x128xf32>,
    %262 = vector.extract_strided_slice %213 {offsets = [216, 0], sizes = [16, 128], strides = [1, 1]} : vector<288x128xf32> to vector<16x128xf32>
    %c0_191 = arith.constant 0 : index
    %c192 = arith.constant 192 : index
    %c0_192 = arith.constant 0 : index
    %263 = vector.load %arg4[%c0_191, %c192, %c0_192] : memref<1x256x128xf32, #tpu.memory_space<vmem>>, vector<1x16x128xf32>
    %264 = vector.shape_cast %263 : vector<1x16x128xf32> to vector<16x128xf32>
    %265 = vector.shape_cast %262 : vector<16x128xf32> to vector<1x16x128xf32>
    tpu.vector_store %arg4[%c0_191, %c192, %c0_192], %265 {strides = array<i32>} : memref<1x256x128xf32, #tpu.memory_space<vmem>>, vector<1x16x128xf32>,
    %266 = vector.extract_strided_slice %213 {offsets = [234, 0], sizes = [16, 128], strides = [1, 1]} : vector<288x128xf32> to vector<16x128xf32>
    %c0_193 = arith.constant 0 : index
    %c208 = arith.constant 208 : index
    %c0_194 = arith.constant 0 : index
    %267 = vector.load %arg4[%c0_193, %c208, %c0_194] : memref<1x256x128xf32, #tpu.memory_space<vmem>>, vector<1x16x128xf32>
    %268 = vector.shape_cast %267 : vector<1x16x128xf32> to vector<16x128xf32>
    %269 = vector.shape_cast %266 : vector<16x128xf32> to vector<1x16x128xf32>
    tpu.vector_store %arg4[%c0_193, %c208, %c0_194], %269 {strides = array<i32>} : memref<1x256x128xf32, #tpu.memory_space<vmem>>, vector<1x16x128xf32>,
    %270 = vector.extract_strided_slice %213 {offsets = [252, 0], sizes = [16, 128], strides = [1, 1]} : vector<288x128xf32> to vector<16x128xf32>
    %c0_195 = arith.constant 0 : index
    %c224 = arith.constant 224 : index
    %c0_196 = arith.constant 0 : index
    %271 = vector.load %arg4[%c0_195, %c224, %c0_196] : memref<1x256x128xf32, #tpu.memory_space<vmem>>, vector<1x16x128xf32>
    %272 = vector.shape_cast %271 : vector<1x16x128xf32> to vector<16x128xf32>
    %273 = vector.shape_cast %270 : vector<16x128xf32> to vector<1x16x128xf32>
    tpu.vector_store %arg4[%c0_195, %c224, %c0_196], %273 {strides = array<i32>} : memref<1x256x128xf32, #tpu.memory_space<vmem>>, vector<1x16x128xf32>,
    %274 = vector.extract_strided_slice %213 {offsets = [270, 0], sizes = [16, 128], strides = [1, 1]} : vector<288x128xf32> to vector<16x128xf32>
    %c0_197 = arith.constant 0 : index
    %c240 = arith.constant 240 : index
    %c0_198 = arith.constant 0 : index
    %275 = vector.load %arg4[%c0_197, %c240, %c0_198] : memref<1x256x128xf32, #tpu.memory_space<vmem>>, vector<1x16x128xf32>
    %276 = vector.shape_cast %275 : vector<1x16x128xf32> to vector<16x128xf32>
    %277 = vector.shape_cast %274 : vector<16x128xf32> to vector<1x16x128xf32>
    tpu.vector_store %arg4[%c0_197, %c240, %c0_198], %277 {strides = array<i32>} : memref<1x256x128xf32, #tpu.memory_space<vmem>>, vector<1x16x128xf32>,
    return
  }
  func.func @transform_0(%arg0: i32) -> (i32, i32, i32) {
    %c0_i32 = arith.constant 0 : i32
    %c0_i32_0 = arith.constant 0 : i32
    %c0_i32_1 = arith.constant 0 : i32
    return %arg0, %c0_i32, %c0_i32_0 : i32, i32, i32
  }
  func.func @transform_1(%arg0: i32) -> (i32, i32, i32) {
    %c0_i32 = arith.constant 0 : i32
    %c0_i32_0 = arith.constant 0 : i32
    %c0_i32_1 = arith.constant 0 : i32
    %c0_i32_2 = arith.constant 0 : i32
    return %c0_i32, %c0_i32_0, %c0_i32_1 : i32, i32, i32
  }
  func.func @transform_2(%arg0: i32) -> (i32, i32, i32) {
    %c0_i32 = arith.constant 0 : i32
    %c0_i32_0 = arith.constant 0 : i32
    %c0_i32_1 = arith.constant 0 : i32
    %c0_i32_2 = arith.constant 0 : i32
    return %c0_i32, %c0_i32_0, %c0_i32_1 : i32, i32, i32
  }
  func.func @transform_3(%arg0: i32) -> (i32, i32, i32) {
    %c0_i32 = arith.constant 0 : i32
    %c0_i32_0 = arith.constant 0 : i32
    %c0_i32_1 = arith.constant 0 : i32
    return %arg0, %c0_i32, %c0_i32_0 : i32, i32, i32
  }
}

</mosaic_0001>

<bundles_post_ra>
// kernel: residual_block_forward.1
= control target key start
LH: loop header
LB: loop body
LE: loop exit
PB: predicated region body
PF: predicated region fallthrough
CT: control target
= control target key end

     0   :  { %8 = vsyncpa [#allocation4], 0  ;;  %s15554_s0 = inlined_call_operand.vmem [shape: bf16[2,326,128], index: 0, kind: input, shape index: {}]   ;;  %s15555_s1 = inlined_call_operand.vmem [shape: bf16[3,384,128], index: 1, kind: input, shape index: {}]   ;;  %s15556_s2 = inlined_call_operand.vmem [shape: bf16[3,384,128], index: 2, kind: input, shape index: {}]   ;;  %s15557_s3 = inlined_call_operand.hbm [shape: f32[2,256,128], index: 3, kind: output, shape index: {}]  }
   0x1   :  { %10 = vsyncpa [#allocation4 + $0x1], 0  ;;  %s9700_s12 = smov 0   ;;  %s9702_s13 = smov 0  }
   0x2   :  { %s9704_s14 = smov 0   ;;  %s9706_s15 = smov 0  }
   0x3 LB: > { %s9721_s16 = sadd.s32 4294967295, %s9674_s15   ;;  %s8155_s17 = sadd.s32 4294967294, %s9674_s15   ;;  %s9674_s15 = sphi %s9706_s15, %s16611_s15   ;;  %s9670_s14 = sphi %s9704_s14, %s16610_s14   ;;  %s9666_s13 = sphi %s9702_s13, %s16609_s13   ;;  %s9662_s12 = sphi %s9700_s12, %s16608_s12  }
   0x4   : > { %s9725_s18 = sadd.s32 1, %s9674_s15   ;;  %s91_s19 = sadd.s32 1, %s9670_s14 }
   0x5   : > { %s88_s20 = ssub.s32 %s9674_s15, %s9725_s18  ;;  %p101_p0 = scmp.ne.s32.totalorder %s9670_s14, %s9666_s13 }
   0x6   : > { %p89_p1 = scmp.eq.s32.totalorder %s88_s20, 0  ;;  %p102_p2 = scmp.eq.s32.totalorder %s9721_s16, 1 }
   0x7   : > { %p107_p3 = scmp.ne.s32.totalorder %s9666_s13, %s9662_s12  ;;  %p108_p4 = scmp.eq.s32.totalorder %s8155_s17, 1 }
   0x8   : > { %s9736_s21 = scalar_select %p89_p1, %s9670_s14, %s91_s19  }
   0x9   : > { %p9738_p5 = por %p102_p2, %p101_p0  ;;  %p9742_p6 = por %p108_p4, %p107_p3 }
   0xa   : > { %p8158_p7 = scmp.ge.s32.totalorder %s9674_s15, 1  ;;  %p140_p8 = scmp.lt.s32.totalorder %s9674_s15, 3 }
   0xc   : > { %p141_p9 = pnand %p8158_p7, %p140_p8 }
   0xe   : > { %144 = sbr.rel (%p141_p9) target bundleno = 1502 (0x5de), region = 32 }
  0x15   : > { %v9353_v0 = vld [vmem:[%s15555_s1 + $0xc0] sm:$0xff]   ;;  %v15558_v1 = vmov 0   ;;  %p164_p10 = scmp.lt.s32.totalorder %s9721_s16, 1  ;;  %v9355_v3 = vld [vmem:[%s15555_s1 + $0xc8] sm:$0xff]   ;;  %v9358_v5 = vld [vmem:[%s15555_s1 + $0x150] sm:$0xff]   ;;  %vm15573_vm0 = vcmask 1046528  }
  0x16   : > { %1605 = vmatprep.subr.bf16.mxu0 %v15558_v1  ;;  %v9354_v2 = vld [vmem:[%s15555_s1 + $0x140] sm:$0xff]   ;;  %v9356_v4 = vld [vmem:[%s15555_s1 + $0x148] sm:$0xff]   ;;  %v9357_v6 = vld [vmem:[%s15555_s1 + $0xd0] sm:$0xff]   ;;  %vm15572_vm1 = vsmask.f32 7424  ;;  %vm15567_vm2 = vcmask 1045504  }
  0x17   : > { %1606 = vmatpush1.bf16.msra.mxu0 %v9353_v0  ;;  %8926 = vmatprep.subr.bf16.mxu1 %v9354_v2  ;;  %s165_s7 = scalar_select %p164_p10, %s9721_s16, 1  ;;  %v9360_v7 = vld [vmem:[%s15555_s1 + $0x158] sm:$0xff]   ;;  %v9362_v9 = vld [vmem:[%s15555_s1 + $0x160] sm:$0xff]   ;;  %v9364_v11 = vld [vmem:[%s15555_s1 + $0x168] sm:$0xff]  }
  0x18   : > { %1607 = vmatprep.subr.bf16.mxu0 %v15558_v1  ;;  %8927 = vmatpush3.bf16.msra.mxu1 %v9354_v2  ;;  %v9359_v8 = vld [vmem:[%s15555_s1 + $0xd8] sm:$0xff]   ;;  %v9361_v10 = vld [vmem:[%s15555_s1 + $0xe0] sm:$0xff]   ;;  %v9363_v13 = vld [vmem:[%s15555_s1 + $0xe8] sm:$0xff]   ;;  %s8684_s4 = sshll.u32 %s9721_s16, 12  ;;  %s9677_s10 = smov [#allocation3]  }
  0x19   : > { %8928 = vmatprep.subr.bf16.mxu1 %v9356_v4  ;;  %s9238_s17 = smul.u32 164, %s165_s7  ;;  %v9366_v17 = vld [vmem:[%s15555_s1 + $0x170] sm:$0xff]   ;;  %v9367_v27 = vld [vmem:[%s15555_s1 + $0xf8] sm:$0xff]   ;;  %v9374_v36 = vld [vmem:[%s15555_s1 + $0x100] sm:$0xff]   ;;  %s15486_s8 = scalar_lea.hbm %s15557_s3, %s8684_s4 }
  0x1a   : > { %v9365_v22 = vld [vmem:[%s15555_s1 + $0xf0] sm:$0xff]   ;;  %v9368_v29 = vld [vmem:[%s15555_s1 + $0x178] sm:$0xff]   ;;  %v9376_v43 = vld [vmem:[%s15555_s1] sm:$0xff]   ;;  %s9616_s11 = sshll.u32 %s9677_s10, 4  ;;  %s9617_s11 = int_to_ptr.vmem [resolvable:$false] %s9616_s11 }
  0x1b   : > { %1608 = vmatpush1.bf16.msra.mxu0 %v9355_v3  ;;  %s9784_s28 = scalar_lea.vmem %s15554_s0, %s9238_s17  ;;  %v9377_v47 = vld [vmem:[%s15555_s1 + $0x108] sm:$0xff]   ;;  %v9380_v60 = vld [vmem:[%s15555_s1 + $0x110] sm:$0xff]   ;;  %s9618_s17 = scalar_lea.vmem %s9617_s11, 8192 }
  0x1c   : > { %1609 = vmatprep.subr.bf16.mxu0 %v15558_v1  ;;  %8929 = vmatpush3.bf16.msra.mxu1 %v9356_v4  ;;  %v9794_v12 = vld [vmem:[%s9784_s28 + $0xc] sm:$0xf]  ;;  %v9800_v14 = vld [vmem:[%s9784_s28 + $0x10] sm:$0xff]   ;;  %v9803_v15 = vld [vmem:[%s9784_s28 + $0x18] sm:$0xff]  }
  0x1d   : > { %8930 = vmatprep.subr.bf16.mxu1 %v9358_v5  ;;  %v1247_v16 = vld [vmem:[%s9784_s28 + $0x8] sm:$0xc]  ;;  %v9811_v18 = vrot.slane %v9800_v14, 1  ;;  %v1144_v19 = vrot.slane %v9803_v15, 1  ;;  %v9816_v21 = vld [vmem:[%s9784_s28 + $0x20] sm:$0xff]   ;;  %v9846_v35 = vld [vmem:[%s9784_s28 + $0x30] sm:$0xff]  }
  0x1e   : > { %v8185_v20 = vcombine.low %v1247_v16, %v9794_v12  ;;  %v1146_v25 = vrot.slane %v9816_v21, 1  ;;  %v9840_v32 = vld [vmem:[%s9784_s28 + $0x28] sm:$0xff]   ;;  %v1150_v39 = vrot.slane %v9846_v35, 1  ;;  %v985_v40 = vshll.u32 %v9800_v14, 16  ;;  %v9859_v42 = vld [vmem:[%s9784_s28 + $0x38] sm:$0xff]   ;;  %v9875_v49 = vld [vmem:[%s9784_s28 + $0x40] sm:$0xff]  }
  0x1f   : > { %1610 = vmatpush1.bf16.msra.mxu0 %v9357_v6  ;;  %v9823_v23 = vsel %vm15573_vm0, %v9811_v18, %v1144_v19  ;;  %v1148_v34 = vrot.slane %v9840_v32, 1  ;;  %v1242_v45 = vld [vmem:[%s9784_s28 + $0x8] sm:$0xe]  ;;  %v1152_v48 = vrot.slane %v9859_v42, 1  ;;  %v1154_v56 = vrot.slane %v9875_v49, 1  ;;  %v9382_v62 = vld [vmem:[%s15555_s1 + $0x10] sm:$0xff]  }
  0x20   : > { %1611 = vmatprep.subr.bf16.mxu0 %v15558_v1  ;;  %8931 = vmatpush3.bf16.msra.mxu1 %v9358_v5  ;;  %15779 = vst [vmem:[#allocation6_spill] sm:$0xff] %v9823_v23  ;;  %v1289_v24 = vrot.slane %v8185_v20, 1  ;;  %v1350_v26 = vrot.slane %v9823_v23, 1  ;;  %v9837_v31 = vsel %vm15573_vm0, %v1144_v19, %v1146_v25  ;;  %v9378_v51 = vld [vmem:[%s15555_s1 + $0x8] sm:$0xff]   ;;  %v9886_v54 = vrot.slane %v985_v40, 1  ;;  %v9915_v5 = vld [vmem:[%s9784_s28 + $0x50] sm:$0xff]  }
  0x21   : > { %8932 = vmatprep.subr.bf16.mxu1 %v9360_v7  ;;  %15780 = vst [vmem:[#allocation7_spill] sm:$0xff] %v9837_v31  ;;  %v1354_v37 = vrot.slane %v9837_v31, 1  ;;  %v9853_v38 = vsel %vm15573_vm0, %v1146_v25, %v1148_v34  ;;  %v9866_v44 = vsel %vm15573_vm0, %v1148_v34, %v1150_v39  ;;  %v9884_v53 = vsel %vm15573_vm0, %v1150_v39, %v1152_v48  ;;  %v9892_v57 = vld [vmem:[%s9784_s28 + $0x48] sm:$0xff]   ;;  %v9383_v6 = vld [vmem:[%s15555_s1 + $0x118] sm:$0xff]  }
  0x22   : > { %v1290_v28 = vsel %vm15573_vm0, %v1289_v24, %v9811_v18  ;;  %15781 = vst [vmem:[#allocation8_spill] sm:$0xff] %v9853_v38  ;;  %v1358_v41 = vrot.slane %v9853_v38, 1  ;;  %v1362_v52 = vrot.slane %v9866_v44, 1  ;;  %v1366_v55 = vrot.slane %v9884_v53, 1  ;;  %v9385_v16 = vld [vmem:[%s15555_s1 + $0x18] sm:$0xff]   ;;  %v9386_v24 = vld [vmem:[%s15555_s1 + $0x120] sm:$0xff]  }
  0x23   : > { %1612 = vmatpush1.bf16.msra.mxu0 %v9359_v8  ;;  %v1349_v30 = vrot.slane %v1290_v28, 1  ;;  %v1355_v46 = vsel %vm15573_vm0, %v1350_v26, %v1354_v37  ;;  %v989_v58 = vshrl.u32 %v9800_v14, 16  ;;  %v9896_v59 = vcombine.low %v1242_v45, %v9794_v12  ;;  %v9949_v28 = vld [vmem:[%s9784_s28 + $0x60] sm:$0xff]   ;;  %v9963_v40 = vld [vmem:[%s9784_s28 + $0x68] sm:$0xff]  }
  0x24   : > { %1613 = vmatprep.subr.bf16.mxu0 %v15558_v1  ;;  %8933 = vmatpush3.bf16.msra.mxu1 %v9360_v7  ;;  %v1359_v50 = vsel %vm15573_vm0, %v1354_v37, %v1358_v41  ;;  %v1156_v61 = vrot.slane %v9892_v57, 1  ;;  %v993_v0 = vshll.u32 %v9803_v15, 16  ;;  %v1363_v2 = vsel %vm15573_vm0, %v1358_v41, %v1362_v52  ;;  %v9389_v41 = vld [vmem:[%s15555_s1 + $0x128] sm:$0xff]  }
  0x25   : > { %8934 = vmatprep.subr.bf16.mxu1 %v9362_v9  ;;  %v1351_v33 = vsel %vm15573_vm0, %v1349_v30, %v1350_v26  ;;  %v991_v63 = vor.u32 %v989_v58, %v9886_v54  ;;  %v1367_v3 = vsel %vm15573_vm0, %v1362_v52, %v1366_v55  ;;  %v9912_v4 = vsel %vm15573_vm0, %v1152_v48, %v1154_v56 }
  0x26   : > { %8942 = vmatprep.mubr.bf16.mxu1 %v1351_v33  ;;  %v9922_v7 = vsel %vm15573_vm0, %v1154_v56, %v1156_v61  ;;  %v995_v8 = vrot.slane %v993_v0, 1  ;;  %v1158_v20 = vrot.slane %v9915_v5, 1  ;;  %v9388_v33 = vld [vmem:[%s15555_s1 + $0x20] sm:$0xff]   ;;  %v997_v37 = vshrl.u32 %v9803_v15, 16  ;;  %v9395_v56 = vld [vmem:[%s15555_s1 + $0x30] sm:$0xff]  }
  0x27   : > { %1614 = vmatpush1.bf16.msra.mxu0 %v9361_v10  ;;  %v1265_v10 = vshll.u32 %v9896_v59, 16  ;;  %v1374_v19 = vrot.slane %v9922_v7, 1  ;;  %v1164_v52 = vrot.slane %v9963_v40, 1  ;;  %v1009_v0 = vshll.u32 %v9840_v32, 16 }
  0x28   : > { %1615 = vmatprep.subr.bf16.mxu0 %v15558_v1  ;;  %8935 = vmatpush3.bf16.msra.mxu1 %v9362_v9  ;;  %v1263_v9 = vshrl.u32 %v9896_v59, 16  ;;  %v9957_v34 = vsel %vm15573_vm0, %v1156_v61, %v1158_v20 }
  0x29   : > { %8936 = vmatprep.subr.bf16.mxu1 %v9364_v11  ;;  %v1267_v14 = vrot.slane %v1265_v10, 1  ;;  %v1378_v15 = vrot.slane %v9957_v34, 1 }
  0x2b   : > { %1616 = vmatpush1.bf16.msra.mxu0 %v9363_v13  ;;  %v9931_v13 = vsel %vm15572_vm1, %v991_v63, %v995_v8  ;;  %v1379_v58 = vsel %vm15573_vm0, %v1374_v19, %v1378_v15  ;;  %v1005_v63 = vshrl.u32 %v9816_v21, 16 }
  0x2c   : > { %1617 = vmatprep.subr.bf16.mxu0 %v15558_v1  ;;  %8937 = vmatpush3.bf16.msra.mxu1 %v9364_v11  ;;  %v9927_v11 = vld [vmem:[%s9784_s28 + $0x58] sm:$0xff]   ;;  %v1347_v25 = vrot.slane %v9931_v13, 1 }
  0x2d   : > { %8938 = vmatprep.subr.bf16.mxu1 %v9366_v17  ;;  %v1160_v26 = vrot.slane %v9927_v11, 1 }
  0x2f   : > { %1618 = vmatpush1.bf16.msra.mxu0 %v9365_v22  ;;  %v1268_v22 = vor.u32 %v1267_v14, %v1263_v9  ;;  %v9972_v45 = vsel %vm15573_vm0, %v1158_v20, %v1160_v26  ;;  %v10012_v9 = vld [vmem:[%s9784_s28 + $0x78] sm:$0xff]  }
  0x30   : > { %1619 = vmatprep.subr.bf16.mxu0 %v15558_v1  ;;  %8939 = vmatpush3.bf16.msra.mxu1 %v9366_v17  ;;  %v1370_v17 = vrot.slane %v9912_v4, 1  ;;  %v9398_v14 = vld [vmem:[%s15555_s1 + $0x38] sm:$0xff]  }
  0x31   : > { %8940 = vmatprep.subr.bf16.mxu1 %v9368_v29 }
  0x32   : > { %v1371_v30 = vsel %vm15573_vm0, %v1366_v55, %v1370_v17  ;;  %v1375_v39 = vsel %vm15573_vm0, %v1370_v17, %v1374_v19  ;;  %v9391_v55 = vld [vmem:[%s15555_s1 + $0x130] sm:$0xff]   ;;  %v1011_v19 = vrot.slane %v1009_v0, 1  ;;  %v1025_v0 = vshll.u32 %v9859_v42, 16 }
  0x33   : > { %1620 = vmatpush1.bf16.msra.mxu0 %v9367_v27  ;;  %v1269_v27 = vsel %vm15572_vm1, %v1268_v22, %v9886_v54  ;;  %v1168_v22 = vrot.slane %v10012_v9, 1 }
  0x34   : > { %1621 = vmatprep.subr.bf16.mxu0 %v15558_v1  ;;  %8941 = vmatpush3.bf16.msra.mxu1 %v9368_v29  ;;  %v1001_v29 = vshll.u32 %v9816_v21, 16 }
  0x35   : > { %2103 = vmatprep.subr.bf16.mxu1 %v15558_v1 }
  0x36   : > { %v1003_v48 = vrot.slane %v1001_v29, 1 }
  0x37   : > { %1622 = vmatpush1.bf16.msra.mxu0 %v9374_v36  ;;  %8943 = vmatmul.mubr.bf16.vlgmr.msra.gmra.mrb[0].mxu1 %v1355_v46  ;;  %v1346_v36 = vrot.slane %v1269_v27, 1  ;;  %v9393_v46 = vld [vmem:[%s15555_s1 + $0x28] sm:$0xff]   ;;  %v9413_v27 = vld [vmem:[%s15555_s1 + $0x80] sm:$0xff]  }
  0x38   : > { %1623 = vmatprep.subr.bf16.mxu0 %v15558_v1  ;;  %2104 = vmatpush1.bf16.msra.mxu1 %v9376_v43  ;;  %v1007_v17 = vor.u32 %v1005_v63, %v1003_v48 }
  0x39   : > { %8946 = vmatprep.mubr.bf16.mxu1 %v1359_v50  ;;  %2105 = vmatprep.subr.bf16.mxu1 %v15558_v1  ;;  %v1348_v43 = vsel %vm15573_vm0, %v1346_v36, %v1347_v25  ;;  %v999_v50 = vor.u32 %v997_v37, %v995_v8  ;;  %v1344_v8 = vrot.slane %v9896_v59, 1  ;;  %v10042_v36 = vld [vmem:[%s9784_s28 + $0x80] sm:$0xff]  }
  0x3a   : > { %1637 = vmatprep.mubr.bf16.mxu0 %v1348_v43 }
  0x3b   : > { %1624 = vmatpush1.bf16.msra.mxu0 %v9377_v47  ;;  %v1162_v47 = vrot.slane %v9949_v28, 1  ;;  %v1345_v20 = vsel %vm15573_vm0, %v1344_v8, %v9811_v18 }
  0x3c   : > { %1625 = vmatprep.subr.bf16.mxu0 %v15558_v1  ;;  %2106 = vmatpush1.bf16.msra.mxu1 %v9378_v51  ;;  %v1382_v51 = vrot.slane %v9972_v45, 1 }
  0x3d   : > { %2107 = vmatprep.subr.bf16.mxu1 %v15558_v1  ;;  %v9995_v61 = vsel %vm15573_vm0, %v1160_v26, %v1162_v47  ;;  %v1017_v26 = vshll.u32 %v9846_v35, 16 }
  0x3e   : > { %v1386_v21 = vrot.slane %v9995_v61, 1 }
  0x3f   : > { %1626 = vmatpush1.bf16.msra.mxu0 %v9380_v60  ;;  %8947 = vmatmul.mubr.bf16.gmra.mrb[4].mxu1 %v1363_v2  ;;  %v9992_v60 = vld [vmem:[%s9784_s28 + $0x70] sm:$0xff]   ;;  %v9394_v2 = vld [vmem:[%s15555_s1 + $0x138] sm:$0xff]  }
  0x40   : > { %1627 = vmatprep.subr.bf16.mxu0 %v15558_v1  ;;  %2108 = vmatpush1.bf16.msra.mxu1 %v9382_v62  ;;  %v9998_v62 = vsel %vm15572_vm1, %v999_v50, %v1003_v48  ;;  %v1166_v59 = vrot.slane %v9992_v60, 1  ;;  %v9402_v50 = vld [vmem:[%s15555_s1 + $0x48] sm:$0xff]  }
  0x41   : > { %8950 = vmatprep.mubr.bf16.mxu1 %v1367_v3  ;;  %2109 = vmatprep.subr.bf16.mxu1 %v15558_v1  ;;  %v1383_v3 = vsel %vm15573_vm0, %v1378_v15, %v1382_v51  ;;  %v1352_v10 = vrot.slane %v9998_v62, 1  ;;  %v1019_v15 = vrot.slane %v1017_v26, 1 }
  0x43   : > { %1628 = vmatpush1.bf16.msra.mxu0 %v9383_v6  ;;  %v10008_v6 = vsel %vm15573_vm0, %v1162_v47, %v1164_v52  ;;  %v1353_v29 = vsel %vm15573_vm0, %v1347_v25, %v1352_v10  ;;  %v10047_v25 = vsel %vm15573_vm0, %v1164_v52, %v1166_v59  ;;  %v10057_v47 = vld [vmem:[%s9784_s28 + $0x90] sm:$0xff]   ;;  %v9418_v52 = vld [vmem:[%s15555_s1 + $0x88] sm:$0xff]  }
  0x44   : > { %1629 = vmatprep.subr.bf16.mxu0 %v15558_v1  ;;  %2110 = vmatpush1.bf16.msra.mxu1 %v9385_v16  ;;  %v1390_v16 = vrot.slane %v10008_v6, 1  ;;  %v1394_v48 = vrot.slane %v10047_v25, 1  ;;  %v10082_v8 = vrot.slane %v10057_v47, 1 }
  0x45   : > { %2111 = vmatprep.subr.bf16.mxu1 %v15558_v1 }
  0x46   : > { %v1391_v37 = vsel %vm15573_vm0, %v1386_v21, %v1390_v16 }
  0x47   : > { %1630 = vmatpush1.bf16.msra.mxu0 %v9386_v24  ;;  %8951 = vmatmul.mubr.bf16.gmra.mrb[8].mxu1 %v1371_v30  ;;  %v1013_v24 = vshrl.u32 %v9840_v32, 16  ;;  %v1387_v30 = vsel %vm15573_vm0, %v1382_v51, %v1386_v21  ;;  %v10039_v32 = vsel %vm15572_vm1, %v1007_v17, %v1011_v19  ;;  %v1170_v51 = vrot.slane %v10042_v36, 1 }
  0x48   : > { %1631 = vmatprep.subr.bf16.mxu0 %v15558_v1  ;;  %2112 = vmatpush1.bf16.msra.mxu1 %v9388_v33  ;;  %v9399_v33 = vld [vmem:[%s15555_s1 + $0x40] sm:$0xff]   ;;  %v1395_v21 = vsel %vm15573_vm0, %v1390_v16, %v1394_v48 }
  0x49   : > { %8954 = vmatprep.mubr.bf16.mxu1 %v1375_v39  ;;  %2113 = vmatprep.subr.bf16.mxu1 %v15558_v1  ;;  %v10050_v39 = vld [vmem:[%s9784_s28 + $0x88] sm:$0xff]   ;;  %v1015_v43 = vor.u32 %v1013_v24, %v1011_v19  ;;  %v9421_v19 = vld [vmem:[%s15555_s1 + $0x90] sm:$0xff]  }
  0x4b   : > { %1632 = vmatpush1.bf16.msra.mxu0 %v9389_v41  ;;  %v10053_v41 = vsel %vm15573_vm0, %v1166_v59, %v1168_v22  ;;  %v10074_v63 = vsel %vm15572_vm1, %v1015_v43, %v1019_v15  ;;  %v821_v59 = vld [vmem:[%s9784_s28 + $0x8] sm:$0xf]  ;;  %v9424_v43 = vld [vmem:[%s15555_s1 + $0x98] sm:$0xff]  }
  0x4c   : > { %1633 = vmatprep.subr.bf16.mxu0 %v15558_v1  ;;  %2114 = vmatpush1.bf16.msra.mxu1 %v9393_v46  ;;  %v1356_v46 = vrot.slane %v10039_v32, 1  ;;  %v1360_v17 = vrot.slane %v10074_v63, 1 }
  0x4d   : > { %2115 = vmatprep.subr.bf16.mxu1 %v15558_v1 }
  0x4f   : > { %1634 = vmatpush1.bf16.msra.mxu0 %v9391_v55  ;;  %8955 = vmatmul.mubr.bf16.gmra.mrb[12].mxu1 %v1379_v58  ;;  %v1398_v55 = vrot.slane %v10053_v41, 1  ;;  %v1021_v58 = vshrl.u32 %v9846_v35, 16  ;;  %v9403_v35 = vld [vmem:[%s15555_s1 + $0x50] sm:$0xff]  }
  0x50   : > { %1635 = vmatprep.subr.bf16.mxu0 %v15558_v1  ;;  %2116 = vmatpush1.bf16.msra.mxu1 %v9395_v56  ;;  %v10070_v56 = vrot.slane %v10050_v39, 1 }
  0x51   : > { %8958 = vmatprep.mubr.bf16.mxu1 %v1383_v3  ;;  %2117 = vmatprep.subr.bf16.mxu1 %v15558_v1  ;;  %v1357_v3 = vsel %vm15573_vm0, %v1352_v10, %v1356_v46  ;;  %v1399_v10 = vsel %vm15573_vm0, %v1394_v48, %v1398_v55  ;;  %v1029_v48 = vshrl.u32 %v9859_v42, 16  ;;  %v9408_v42 = vld [vmem:[%s15555_s1 + $0x60] sm:$0xff]  }
  0x52   : > { %15782 = vst [vmem:[#allocation9_spill] sm:$0xff] %v10070_v56  ;;  %v10098_v16 = vsel %vm15573_vm0, %v1170_v51, %v10070_v56 }
  0x53   : > { %1636 = vmatpush1.bf16.msra.mxu0 %v9394_v2  ;;  %v10078_v2 = vld [vmem:[%s9784_s28 + $0x98] ss:$0 sps:$4 sm:$0x33]  }
  0x54   : > { %2118 = vmatpush1.bf16.msra.mxu1 %v9398_v14  ;;  %8978 = vmatprep.subr.bf16.mxu0 %v9413_v27  ;;  %v10089_v14 = vsel %vm15573_vm0, %v1168_v22, %v1170_v51  ;;  %v1027_v22 = vrot.slane %v1025_v0, 1  ;;  %v1293_v24 = vrot.slane %v10078_v2, 1  ;;  %v1361_v51 = vsel %vm15573_vm0, %v1356_v46, %v1360_v17 }
  0x55   : > { %2119 = vmatprep.subr.bf16.mxu1 %v15558_v1  ;;  %v1402_v26 = vrot.slane %v10089_v14, 1  ;;  %v1037_v46 = vshrl.u32 %v9875_v49, 16 }
  0x56   : > { %1638 = vmatmul.mubr.bf16.vlgmr.msra.gmra.mrb[0].mxu0 %v1345_v20  ;;  %v1023_v20 = vor.u32 %v1021_v58, %v1019_v15  ;;  %v10122_v15 = vcombine.low %v821_v59, %v9794_v12  ;;  %v10136_v12 = vsel %vm15573_vm0, %v10082_v8, %v1293_v24  ;;  %v10141_v0 = vrot.slane %v1293_v24, 1 }
  0x57   : > { %1645 = vmatprep.mubr.bf16.mxu0 %v1353_v29  ;;  %8979 = vmatpush3.bf16.msra.mxu0 %v9413_v27  ;;  %v9406_v27 = vld [vmem:[%s15555_s1 + $0x58] sm:$0xff]   ;;  %v10111_v29 = vsel %vm15573_vm0, %v10070_v56, %v10082_v8 }
  0x58   : > { %8959 = vmatmul.mubr.bf16.gmra.mrb[16].mxu1 %v1387_v30  ;;  %8980 = vmatprep.subr.bf16.mxu0 %v9418_v52  ;;  %v819_v30 = vld [vmem:[%s9784_s28] sm:$0xf]  ;;  %v10132_v58 = vsel %vm15572_vm1, %v1023_v20, %v1027_v22  ;;  %v1031_v20 = vor.u32 %v1029_v48, %v1027_v22  ;;  %v977_v22 = vshll.u32 %v10122_v15, 16 }
  0x59   : > { %2120 = vmatpush1.bf16.msra.mxu1 %v9399_v33  ;;  %8962 = vmatprep.mubr.bf16.mxu1 %v1391_v37  ;;  %v1406_v33 = vrot.slane %v10098_v16, 1  ;;  %v10116_v37 = vld [vmem:[%s9784_s28 + $0x4] sm:$0xf] }
  0x5a   : > { %2121 = vmatprep.subr.bf16.mxu1 %v15558_v1 }
  0x5b   : > { %8981 = vmatpush3.bf16.msra.mxu0 %v9418_v52  ;;  %v1410_v52 = vrot.slane %v10111_v29, 1  ;;  %v1407_v59 = vsel %vm15573_vm0, %v1402_v26, %v1406_v33 }
  0x5c   : > { %8982 = vmatprep.subr.bf16.mxu0 %v9421_v19 }
  0x5d   : > { %2122 = vmatpush1.bf16.msra.mxu1 %v9402_v50  ;;  %v1033_v50 = vshll.u32 %v9875_v49, 16  ;;  %v9427_v49 = vld [vmem:[%s15555_s1 + $0xa0] sm:$0xff]  }
  0x5e   : > { %1646 = vmatmul.mubr.bf16.gmra.mrb[4].mxu0 %v9823_v23  ;;  %2123 = vmatprep.subr.bf16.mxu1 %v15558_v1 }
  0x5f   : > { %1653 = vmatprep.mubr.bf16.mxu0 %v1357_v3  ;;  %8983 = vmatpush3.bf16.msra.mxu0 %v9421_v19  ;;  %v10144_v3 = vcombine.low %v819_v30, %v10116_v37  ;;  %v1035_v24 = vrot.slane %v1033_v50, 1  ;;  %v1271_v19 = vshll.u32 %v10057_v47, 16 }
  0x60   : > { %8963 = vmatmul.mubr.bf16.gmra.mrb[20].mxu1 %v1395_v21  ;;  %8984 = vmatprep.subr.bf16.mxu0 %v9424_v43  ;;  %v1041_v21 = vshll.u32 %v9892_v57, 16 }
  0x61   : > { %2124 = vmatpush1.bf16.msra.mxu1 %v9403_v35  ;;  %8966 = vmatprep.mubr.bf16.mxu1 %v1399_v10  ;;  %v1403_v35 = vsel %vm15573_vm0, %v1398_v55, %v1402_v26  ;;  %v15561_v10 = vrot.slane %v10132_v58, 1  ;;  %v9410_v55 = vld [vmem:[%s15555_s1 + $0x68] sm:$0xff]   ;;  %v1105_v26 = vshll.u32 %v10050_v39, 16  ;;  %v972_v30 = vshll.u32 %v10144_v3, 16 }
  0x62   : > { %2125 = vmatprep.subr.bf16.mxu1 %v15558_v1  ;;  %v1039_v48 = vor.u32 %v1037_v46, %v1035_v24  ;;  %v10164_v50 = vrot.slane %v1041_v21, 1  ;;  %v1279_v46 = vshll.u32 %v10078_v2, 16 }
  0x63   : > { %8985 = vmatpush3.bf16.msra.mxu0 %v9424_v43  ;;  %v9430_v43 = vld [vmem:[%s15555_s1 + $0xa8] sm:$0xff]   ;;  %v1365_v21 = vsel %vm15573_vm0, %v1360_v17, %v15561_v10  ;;  %v1283_v17 = vshrl.u32 %v10078_v2, 16  ;;  %v1045_v2 = vshrl.u32 %v9892_v57, 16 }
  0x64   : > { %8986 = vmatprep.subr.bf16.mxu0 %v9427_v49  ;;  %v1281_v56 = vrot.slane %v1279_v46, 1  ;;  %v1057_v46 = vshll.u32 %v9927_v11, 16 }
  0x65   : > { %2126 = vmatpush1.bf16.msra.mxu1 %v9406_v27  ;;  %v1109_v27 = vshrl.u32 %v10050_v39, 16  ;;  %v1411_v39 = vsel %vm15573_vm0, %v1406_v33, %v1410_v52  ;;  %v9412_v33 = vld [vmem:[%s15555_s1 + $0x70] sm:$0xff]  }
  0x66   : > { %1654 = vmatmul.mubr.bf16.gmra.mrb[8].mxu0 %v9837_v31  ;;  %2127 = vmatprep.subr.bf16.mxu1 %v15558_v1  ;;  %v981_v31 = vshrl.u32 %v10122_v15, 16 }
  0x67   : > { %1661 = vmatprep.mubr.bf16.mxu0 %v1361_v51  ;;  %v10166_v51 = vrot.slane %v1105_v26, 1  ;;  %8987 = vmatpush3.bf16.msra.mxu0 %v9427_v49  ;;  %v9433_v49 = vld [vmem:[%s15555_s1 + $0xb0] sm:$0xff]  }
  0x68   : > { %8967 = vmatmul.mubr.bf16.gmra.mrb[24].mxu1 %v1403_v35  ;;  %v10175_v35 = vsel %vm15572_vm1, %v1031_v20, %v1035_v24  ;;  %v970_v20 = vshrl.u32 %v10144_v3, 16  ;;  %v979_v24 = vrot.slane %v977_v22, 1  ;;  %8988 = vmatprep.subr.bf16.mxu0 %v9430_v43  ;;  %v9414_v22 = vld [vmem:[%s15555_s1 + $0x78] sm:$0xff]  }
  0x69   : > { %8970 = vmatprep.mubr.bf16.mxu1 %v1407_v59  ;;  %2128 = vmatpush1.bf16.msra.mxu1 %v9408_v42  ;;  %v1275_v42 = vshrl.u32 %v10057_v47, 16  ;;  %v15783_v59 = vrot.slane %v10136_v12, 1  ;;  %v10192_v47 = vor.u32 %v1109_v27, %v10166_v51  ;;  %v1368_v10 = vrot.slane %v10175_v35, 1 }
  0x6a   : > { %2129 = vmatprep.subr.bf16.mxu1 %v15558_v1  ;;  %v1273_v1 = vrot.slane %v1271_v19, 1  ;;  %v15785_v19 = vmov 0  }
  0x6b   : > { %v1415_v26 = vsel %vm15573_vm0, %v1410_v52, %v15783_v59  ;;  %15784 = vst [vmem:[#allocation10_spill] sm:$0xff] %v10192_v47  ;;  %v974_v52 = vrot.slane %v972_v30, 1  ;;  %v10198_v59 = vsel %vm15572_vm1, %v1039_v48, %v10164_v50  ;;  %v1053_v48 = vshrl.u32 %v9915_v5, 16  ;;  %8989 = vmatpush3.bf16.msra.mxu0 %v9430_v43 }
  0x6c   : > { %v10210_v27 = vsel %vm15572_vm1, %v10192_v47, %v1273_v1  ;;  %v1277_v30 = vor.u32 %v1275_v42, %v1273_v1  ;;  %v1372_v57 = vrot.slane %v10198_v59, 1  ;;  %8990 = vmatprep.subr.bf16.mxu0 %v9433_v49  ;;  %v9434_v1 = vld [vmem:[%s15555_s1 + $0xb8] sm:$0xff]   ;;  %v856_v42 = vld [vmem:[%s9784_s28] sm:$0xe]  ;;  %v1140_v43 = vrot.slane %v10122_v15, 1 }
  0x6d   : > { %2130 = vmatpush1.bf16.msra.mxu1 %v9410_v55  ;;  %v1049_v55 = vshll.u32 %v9915_v5, 16 }
  0x6e   : > { %1662 = vmatmul.mubr.bf16.gmra.mrb[12].mxu0 %v9853_v38  ;;  %2131 = vmatprep.subr.bf16.mxu1 %v15785_v19  ;;  %v1285_v38 = vor.u32 %v1283_v17, %v1281_v56  ;;  %v1282_v23 = vsel %vm15572_vm1, %v1277_v30, %v1281_v56  ;;  %v8180_v17 = vcombine.low %v856_v42, %v10116_v37 }
  0x6f   : > { %1669 = vmatprep.mubr.bf16.mxu0 %v1365_v21  ;;  %v1408_v21 = vrot.slane %v10210_v27, 1  ;;  %v1412_v5 = vrot.slane %v1282_v23, 1  ;;  %8991 = vmatpush3.bf16.msra.mxu0 %v9433_v49  ;;  %v983_v49 = vor.u32 %v981_v31, %v979_v24  ;;  %v9417_v31 = vld [vmem:[%s15555_s1 + $0x188] sm:$0xff]   ;;  %v9432_v27 = vld [vmem:[%s9784_s28 + $0x98] ss:$0 sps:$4 sm:$0x11]  }
  0x70   : > { %8971 = vmatmul.mubr.bf16.gmra.mrb[28].mxu1 %v1411_v39  ;;  %v1418_v47 = vrot.slane %v1285_v38, 1  ;;  %v975_v39 = vor.u32 %v974_v52, %v970_v20  ;;  %v1051_v38 = vrot.slane %v1049_v55, 1  ;;  %8992 = vmatprep.subr.bf16.mxu0 %v9434_v1  ;;  %v15787_v20 = vrot.slane %v10136_v12, 1 }
  0x71   : > { %8974 = vmatprep.mubr.bf16.mxu1 %v1415_v26  ;;  %2132 = vmatpush1.bf16.msra.mxu1 %v9412_v33  ;;  %v10230_v56 = vsel %vm15573_vm0, %v1408_v21, %v1412_v5  ;;  %v15786_v26 = vrot.slane %v10132_v58, 1  ;;  %v1139_v33 = vrot.slane %v8180_v17, 1  ;;  %v1047_v12 = vor.u32 %v1045_v2, %v10164_v50  ;;  %v10289_v17 = vld [vmem:[%s15555_s1 + $0x200] sm:$0xff]  }
  0x72   : > { %2133 = vmatprep.subr.bf16.mxu1 %v15785_v19  ;;  %v10233_v30 = vsel %vm15573_vm0, %v1412_v5, %v1418_v47  ;;  %v1421_v37 = vsel %vm15573_vm0, %v15787_v20, %v10141_v0  ;;  %v980_v52 = vsel %vm15572_vm1, %v975_v39, %v979_v24  ;;  %v9416_v0 = vld [vmem:[%s15555_s1 + $0x180] sm:$0xff]   ;;  %v1373_v55 = vsel %vm15573_vm0, %v1368_v10, %v1372_v57 }
  0x73   : > { %v1369_v23 = vsel %vm15573_vm0, %v15786_v26, %v1368_v10  ;;  %v10248_v47 = vsel %vm15573_vm0, %v1139_v33, %v1140_v43  ;;  %8993 = vmatpush3.bf16.msra.mxu0 %v9434_v1  ;;  %v988_v42 = vsel %vm15572_vm1, %v983_v49, %v9886_v54  ;;  %v1059_v24 = vrot.slane %v1057_v46, 1 }
  0x74   : > { %v1055_v10 = vor.u32 %v1053_v48, %v1051_v38  ;;  %v1061_v1 = vshrl.u32 %v9927_v11, 16  ;;  %v1065_v54 = vshll.u32 %v9949_v28, 16  ;;  %v9420_v48 = vld [vmem:[%s15555_s1 + $0x198] sm:$0xff]   ;;  %v1073_v39 = vshll.u32 %v9963_v40, 16  ;;  %9030 = vmatprep.subr.bf16.mxu0 %v10289_v17 }
  0x75   : > { %2134 = vmatpush1.bf16.msra.mxu1 %v9414_v22  ;;  %v10256_v22 = vsel %vm15572_vm1, %v1047_v12, %v1051_v38  ;;  %v1069_v38 = vshrl.u32 %v9949_v28, 16  ;;  %v1081_v28 = vshll.u32 %v9992_v60, 16  ;;  %v9423_v12 = vld [vmem:[%s15555_s1 + $0x1a8] sm:$0xff]  }
  0x76   : > { %1670 = vmatmul.mubr.bf16.gmra.mrb[16].mxu0 %v9866_v44  ;;  %3142 = vmatprep.subr.bf16.mxu1 %v15785_v19  ;;  %v1376_v50 = vrot.slane %v10256_v22, 1  ;;  %v10274_v5 = vsel %vm15572_vm1, %v1055_v10, %v1059_v24  ;;  %v1063_v46 = vor.u32 %v1061_v1, %v1059_v24  ;;  %v1075_v20 = vrot.slane %v1073_v39, 1 }
  0x77   : > { %1677 = vmatprep.mubr.bf16.mxu0 %v1369_v23  ;;  %v1380_v11 = vrot.slane %v10274_v5, 1  ;;  %v1085_v1 = vshrl.u32 %v9992_v60, 16 }
  0x78   : > { %8975 = vmatmul.mubr.bf16.gmra.mrb[32].mxu1 %v1421_v37  ;;  %v1377_v2 = vsel %vm15573_vm0, %v1372_v57, %v1376_v50  ;;  %v1067_v57 = vrot.slane %v1065_v54, 1  ;;  %v9593_v37 = vld [vmem:[%s9784_s28 + $0x10] sm:$0xff]   ;;  %v1089_v54 = vshll.u32 %v10012_v9, 16 }
  0x79   : > { %2135 = vmatprep.mubr.bf16.mxu1 %v980_v52  ;;  %v1381_v26 = vsel %vm15573_vm0, %v1376_v50, %v1380_v11  ;;  %v9594_v50 = vld [vmem:[%s9784_s28 + $0x18] sm:$0xff]  }
  0x7a   : > { %v10293_v23 = vsel %vm15572_vm1, %v1063_v46, %v1067_v57  ;;  %v1071_v52 = vor.u32 %v1069_v38, %v1067_v57  ;;  %v9429_v46 = vld [vmem:[%s15555_s1 + $0x1c8] sm:$0xff]   ;;  %v1097_v38 = vshll.u32 %v10042_v36, 16 }
  0x7b   : > { %v1384_v33 = vrot.slane %v10293_v23, 1 }
  0x7d   : > { %v1385_v49 = vsel %vm15573_vm0, %v1380_v11, %v1384_v33  ;;  %v1091_v11 = vrot.slane %v1089_v54, 1  ;;  %v9601_v54 = vld [vmem:[%s9784_s28 + $0x50] sm:$0xff]  }
  0x7e   : > { %1678 = vmatmul.mubr.bf16.gmra.mrb[20].mxu0 %v9884_v53 }
  0x7f   : > { %1685 = vmatprep.mubr.bf16.mxu0 %v1373_v55  ;;  %v1077_v55 = vshrl.u32 %v9963_v40, 16  ;;  %v9426_v40 = vld [vmem:[%s15555_s1 + $0x1b8] sm:$0xff]  }
  0x80   : > { %2136 = vmatmul.mubr.bf16.vlgmr.msra.gmra.mrb[36].mxu1 %v10144_v3  ;;  %v9419_v3 = vld [vmem:[%s15555_s1 + $0x190] sm:$0xff]  }
  0x81   : > { %3143 = vmatpush1.bf16.msra.mxu1 %v9416_v0  ;;  %2143 = vmatprep.mubr.bf16.mxu1 %v988_v42  ;;  %v10312_v0 = vsel %vm15572_vm1, %v1071_v52, %v1075_v20  ;;  %v1079_v24 = vor.u32 %v1077_v55, %v1075_v20  ;;  %v1099_v20 = vrot.slane %v1097_v38, 1 }
  0x82   : > { %3144 = vmatprep.subr.bf16.mxu1 %v15785_v19  ;;  %v1388_v42 = vrot.slane %v10312_v0, 1 }
  0x84   : > { %v1389_v10 = vsel %vm15573_vm0, %v1384_v33, %v1388_v42 }
  0x85   : > { %3145 = vmatpush1.bf16.msra.mxu1 %v9417_v31  ;;  %v1083_v31 = vrot.slane %v1081_v28, 1 }
  0x86   : > { %1686 = vmatmul.mubr.bf16.gmra.mrb[24].mxu0 %v9912_v4  ;;  %3146 = vmatprep.subr.bf16.mxu1 %v15785_v19 }
  0x87   : > { %1693 = vmatprep.mubr.bf16.mxu0 %v1377_v2  ;;  %v10329_v2 = vsel %vm15572_vm1, %v1079_v24, %v1083_v31  ;;  %v1087_v60 = vor.u32 %v1085_v1, %v1083_v31  ;;  %v9600_v1 = vld [vmem:[%s9784_s28 + $0x48] sm:$0xff]  }
  0x88   : > { %2144 = vmatmul.mubr.bf16.gmra.mrb[40].mxu1 %v10122_v15  ;;  %v9448_v15 = vld [vmem:[%s15555_s1 + $0x210] sm:$0xff]  }
  0x89   : > { %2151 = vmatprep.mubr.bf16.mxu1 %v9931_v13  ;;  %3147 = vmatpush1.bf16.msra.mxu1 %v9419_v3  ;;  %v9422_v13 = vld [vmem:[%s15555_s1 + $0x1a0] sm:$0xff]   ;;  %v1392_v3 = vrot.slane %v10329_v2, 1  ;;  %v10347_v39 = vsel %vm15572_vm1, %v1087_v60, %v1091_v11  ;;  %v10456_v60 = vld [vmem:[%s9784_s28 + $0x90] ss:$0 sps:$4 sm:$0x11]  }
  0x8a   : > { %3148 = vmatprep.subr.bf16.mxu1 %v15785_v19  ;;  %v1396_v33 = vrot.slane %v10347_v39, 1 }
  0x8b   : > { %v1393_v57 = vsel %vm15573_vm0, %v1388_v42, %v1392_v3 }
  0x8c   : > { %v1397_v52 = vsel %vm15573_vm0, %v1392_v3, %v1396_v33  ;;  %v9605_v3 = vld [vmem:[%s9784_s28 + $0x70] sm:$0xff]  }
  0x8d   : > { %3149 = vmatpush1.bf16.msra.mxu1 %v9420_v48  ;;  %v9595_v48 = vld [vmem:[%s9784_s28 + $0x20] sm:$0xff]  }
  0x8e   : > { %1694 = vmatmul.mubr.bf16.gmra.mrb[28].mxu0 %v9922_v7  ;;  %3150 = vmatprep.subr.bf16.mxu1 %v15785_v19 }
  0x8f   : > { %1701 = vmatprep.mubr.bf16.mxu0 %v1381_v26  ;;  %v1093_v26 = vshrl.u32 %v10012_v9, 16 }
  0x90   : > { %2152 = vmatmul.mubr.bf16.gmra.mrb[44].mxu1 %v9593_v37  ;;  %v9435_v37 = vld [vmem:[%s15555_s1 + $0x1d8] sm:$0xff]  }
  0x91   : > { %2159 = vmatprep.mubr.bf16.mxu1 %v9998_v62  ;;  %3151 = vmatpush1.bf16.msra.mxu1 %v9422_v13  ;;  %v9425_v62 = vld [vmem:[%s15555_s1 + $0x1b0] sm:$0xff]   ;;  %v9596_v13 = vld [vmem:[%s9784_s28 + $0x28] sm:$0xff]   ;;  %v1095_v9 = vor.u32 %v1093_v26, %v1091_v11  ;;  %v10459_v11 = vld [vmem:[%s9784_s28 + $0x20] sm:$0xff]   ;;  %v1113_v26 = vshll.u32 %v10456_v60, 16 }
  0x92   : > { %3152 = vmatprep.subr.bf16.mxu1 %v15785_v19 }
  0x93   : > { %v10365_v28 = vsel %vm15572_vm1, %v1095_v9, %v1099_v20  ;;  %v2608_v9 = vshll.u32 %v10459_v11, 16 }
  0x94   : > { %v1400_v55 = vrot.slane %v10365_v28, 1 }
  0x95   : > { %3153 = vmatpush1.bf16.msra.mxu1 %v9423_v12  ;;  %v1101_v12 = vshrl.u32 %v10042_v36, 16  ;;  %v9438_v36 = vld [vmem:[%s15555_s1 + $0x1e8] sm:$0xff]  }
  0x96   : > { %1702 = vmatmul.mubr.bf16.gmra.mrb[32].mxu0 %v9957_v34  ;;  %3154 = vmatprep.subr.bf16.mxu1 %v15785_v19  ;;  %v1401_v42 = vsel %vm15573_vm0, %v1396_v33, %v1400_v55 }
  0x97   : > { %1709 = vmatprep.mubr.bf16.mxu0 %v1385_v49  ;;  %v9597_v49 = vld [vmem:[%s9784_s28 + $0x30] sm:$0xff]  }
  0x98   : > { %2160 = vmatmul.mubr.bf16.gmra.mrb[48].mxu1 %v9594_v50  ;;  %v9598_v50 = vld [vmem:[%s9784_s28 + $0x38] sm:$0xff]  }
  0x99   : > { %2167 = vmatprep.mubr.bf16.mxu1 %v10039_v32  ;;  %3155 = vmatpush1.bf16.msra.mxu1 %v9425_v62  ;;  %v9428_v32 = vld [vmem:[%s15555_s1 + $0x1c0] sm:$0xff]   ;;  %v1103_v62 = vor.u32 %v1101_v12, %v1099_v20  ;;  %v9606_v20 = vld [vmem:[%s9784_s28 + $0x78] sm:$0xff]   ;;  %v10478_v12 = vld [vmem:[%s9784_s28 + $0x28] sm:$0xff]  }
  0x9a   : > { %3156 = vmatprep.subr.bf16.mxu1 %v15785_v19 }
  0x9b   : > { %v10383_v31 = vsel %vm15572_vm1, %v1103_v62, %v10166_v51  ;;  %v9441_v51 = vld [vmem:[%s15555_s1 + $0x1f8] sm:$0xff]  }
  0x9c   : > { %v1404_v24 = vrot.slane %v10383_v31, 1 }
  0x9d   : > { %3157 = vmatpush1.bf16.msra.mxu1 %v9426_v40 }
  0x9e   : > { %1710 = vmatmul.mubr.bf16.gmra.mrb[36].mxu0 %v9972_v45  ;;  %3158 = vmatprep.subr.bf16.mxu1 %v15785_v19  ;;  %v1405_v40 = vsel %vm15573_vm0, %v1400_v55, %v1404_v24 }
  0x9f   : > { %1717 = vmatprep.mubr.bf16.mxu0 %v1389_v10  ;;  %v9599_v10 = vld [vmem:[%s9784_s28 + $0x40] sm:$0xff]  }
  0xa0   : > { %2168 = vmatmul.mubr.bf16.gmra.mrb[52].mxu1 %v9595_v48  ;;  %v9451_v48 = vld [vmem:[%s15555_s1 + $0x220] sm:$0xff]  }
  0xa1   : > { %2175 = vmatprep.mubr.bf16.mxu1 %v10074_v63  ;;  %3159 = vmatpush1.bf16.msra.mxu1 %v9428_v32  ;;  %v9431_v63 = vld [vmem:[%s15555_s1 + $0x1d0] sm:$0xff]   ;;  %v10448_v32 = vld [vmem:[%s9784_s28 + $0x18] sm:$0xff]  }
  0xa2   : > { %3160 = vmatprep.subr.bf16.mxu1 %v15785_v19  ;;  %v2604_v33 = vshrl.u32 %v10448_v32, 16 }
  0xa5   : > { %3161 = vmatpush1.bf16.msra.mxu1 %v9429_v46 }
  0xa6   : > { %1718 = vmatmul.mubr.bf16.gmra.mrb[40].mxu0 %v9995_v61  ;;  %3162 = vmatprep.subr.bf16.mxu1 %v15785_v19 }
  0xa7   : > { %1725 = vmatprep.mubr.bf16.mxu0 %v1393_v57  ;;  %v2600_v57 = vshll.u32 %v10448_v32, 16 }
  0xa8   : > { %2176 = vmatmul.mubr.bf16.gmra.mrb[56].mxu1 %v9596_v13 }
  0xa9   : > { %2183 = vmatprep.mubr.bf16.mxu1 %v10132_v58  ;;  %3163 = vmatpush1.bf16.msra.mxu1 %v9431_v63  ;;  %v9437_v58 = vld [vmem:[%s15555_s1 + $0x1e0] sm:$0xff]   ;;  %v2602_v13 = vrot.slane %v2600_v57, 1 }
  0xaa   : > { %3164 = vmatprep.subr.bf16.mxu1 %v15785_v19  ;;  %v10528_v57 = vld [vmem:[%s9784_s28 + $0x40] sm:$0xff]  }
  0xad   : > { %3165 = vmatpush1.bf16.msra.mxu1 %v9435_v37  ;;  %v1115_v37 = vrot.slane %v1113_v26, 1 }
  0xae   : > { %1726 = vmatmul.mubr.bf16.gmra.mrb[44].mxu0 %v10008_v6  ;;  %3166 = vmatprep.subr.bf16.mxu1 %v15785_v19 }
  0xaf   : > { %1733 = vmatprep.mubr.bf16.mxu0 %v1397_v52 }
  0xb0   : > { %2184 = vmatmul.mubr.bf16.gmra.mrb[60].mxu1 %v9597_v49  ;;  %v15791_v49 = vld [vmem:[#allocation10_spill] sm:$0xff] }
  0xb1   : > { %2191 = vmatprep.mubr.bf16.mxu1 %v10175_v35  ;;  %3167 = vmatpush1.bf16.msra.mxu1 %v9437_v58  ;;  %v9439_v35 = vld [vmem:[%s15555_s1 + $0x1f0] sm:$0xff]   ;;  %v9455_v58 = vld [vmem:[%s15555_s1 + $0x238] sm:$0xff]   ;;  %v1116_v55 = vsel %vm15572_vm1, %v15791_v49, %v1115_v37  ;;  %v2747_v37 = vrot.slane %v10448_v32, 1 }
  0xb2   : > { %3168 = vmatprep.subr.bf16.mxu1 %v15785_v19 }
  0xb5   : > { %3169 = vmatpush1.bf16.msra.mxu1 %v9438_v36 }
  0xb6   : > { %1734 = vmatmul.mubr.bf16.gmra.mrb[48].mxu0 %v10047_v25  ;;  %3170 = vmatprep.subr.bf16.mxu1 %v15785_v19 }
  0xb7   : > { %1741 = vmatprep.mubr.bf16.mxu0 %v1401_v42  ;;  %v2612_v42 = vshrl.u32 %v10459_v11, 16 }
  0xb8   : > { %2192 = vmatmul.mubr.bf16.gmra.mrb[64].mxu1 %v9598_v50 }
  0xb9   : > { %2199 = vmatprep.mubr.bf16.mxu1 %v10198_v59  ;;  %3171 = vmatpush1.bf16.msra.mxu1 %v9439_v35  ;;  %v1409_v59 = vsel %vm15573_vm0, %v1404_v24, %v1408_v21  ;;  %v1416_v21 = vrot.slane %v9432_v27, 1  ;;  %v9607_v35 = vld [vmem:[%s9784_s28 + $0x80] sm:$0xff]  }
  0xba   : > { %3172 = vmatprep.subr.bf16.mxu1 %v15785_v19 }
  0xbd   : > { %3173 = vmatpush1.bf16.msra.mxu1 %v9441_v51 }
  0xbe   : > { %1742 = vmatmul.mubr.bf16.gmra.mrb[52].mxu0 %v10053_v41 }
  0xbf   : > { %1749 = vmatprep.mubr.bf16.mxu0 %v1405_v40 }
  0xc0   : > { %2200 = vmatmul.mubr.bf16.gmra.mrb[68].mxu1 %v9599_v10 }
  0xc1   : > { %2207 = vmatprep.mubr.bf16.mxu1 %v10256_v22  ;;  %v9602_v22 = vld [vmem:[%s9784_s28 + $0x58] sm:$0xff]  }
  0xc6   : > { %1750 = vmatmul.mubr.bf16.gmra.mrb[56].mxu0 %v10089_v14 }
  0xc7   : > { %1757 = vmatprep.mubr.bf16.mxu0 %v1409_v59  ;;  %v2620_v59 = vshrl.u32 %v10478_v12, 16 }
  0xc8   : > { %2208 = vmatmul.mubr.bf16.gmra.mrb[72].mxu1 %v9600_v1 }
  0xc9   : > { %2215 = vmatprep.mubr.bf16.mxu1 %v10274_v5  ;;  %v1417_v5 = vsel %vm15573_vm0, %v10082_v8, %v1416_v21  ;;  %v15788_v8 = vld [vmem:[#allocation6_spill] sm:$0xff]  ;;  %v2834_v21 = vrot.slane %v10448_v32, 2 }
  0xce   : > { %1758 = vmatmul.mubr.bf16.gmra.mrb[60].mxu0 %v10098_v16 }
  0xcf   : > { %1765 = vmatprep.mubr.bf16.mxu0 %v10230_v56  ;;  %v9603_v56 = vld [vmem:[%s9784_s28 + $0x60] sm:$0xff]  }
  0xd0   : > { %2216 = vmatmul.mubr.bf16.gmra.mrb[76].mxu1 %v9601_v54  ;;  %v9608_v54 = vld [vmem:[%s9784_s28 + $0x88] sm:$0xff]  }
  0xd1   : > { %2223 = vmatprep.mubr.bf16.mxu1 %v10293_v23  ;;  %v15789_v23 = vld [vmem:[#allocation7_spill] sm:$0xff] }
  0xd6   : > { %1766 = vmatmul.mubr.bf16.gmra.mrb[64].mxu0 %v10111_v29  ;;  %v1143_v29 = vsel %vm15573_vm0, %v1140_v43, %v9811_v18  ;;  %v2457_v18 = vld [vmem:[%s9784_s28 + $0x10] sm:$0xc]  ;;  %v10437_v43 = vld [vmem:[%s9784_s28 + $0x14] sm:$0xf] }
  0xd7   : > { %1773 = vmatprep.mubr.bf16.mxu0 %v10233_v30  ;;  %v9446_v30 = vld [vmem:[%s15555_s1 + $0x208] sm:$0xff]  }
  0xd8   : > { %2224 = vmatmul.mubr.bf16.gmra.mrb[80].mxu1 %v9602_v22 }
  0xd9   : > { %2231 = vmatprep.mubr.bf16.mxu1 %v10312_v0  ;;  %v15790_v0 = vld [vmem:[#allocation8_spill] sm:$0xff] }
  0xde   : > { %1774 = vmatmul.mubr.bf16.gmra.mrb[68].mxu0 %v1417_v5 }
  0xdf   : > { %8994 = vmatprep.mubr.bf16.mxu0 %v10248_v47  ;;  %v9604_v47 = vld [vmem:[%s9784_s28 + $0x68] sm:$0xff]  }
  0xe0   : > { %2232 = vmatmul.mubr.bf16.gmra.mrb[84].mxu1 %v9603_v56 }
  0xe1   : > { %2239 = vmatprep.mubr.bf16.mxu1 %v10329_v2  ;;  %v10445_v2 = vcombine.low %v2457_v18, %v10437_v43 }
  0xe3   : > { %v2595_v46 = vshll.u32 %v10445_v2, 16  ;;  %v2593_v38 = vshrl.u32 %v10445_v2, 16  ;;  %v2833_v27 = vrot.slane %v10445_v2, 2 }
  0xe5   : > { %v2597_v63 = vrot.slane %v2595_v46, 1 }
  0xe6   : > { %8995 = vmatmul.mubr.bf16.vlgmr.msra.gmra.mrb[72].mxu0 %v1143_v29 }
  0xe7   : > { %8998 = vmatprep.mubr.bf16.mxu0 %v15788_v8  ;;  %9031 = vmatpush3.bf16.msra.mxu0 %v10289_v17  ;;  %v9449_v17 = vld [vmem:[%s15555_s1 + $0x218] sm:$0xff]   ;;  %v2598_v52 = vor.u32 %v2597_v63, %v2593_v38  ;;  %v2835_v8 = vsel %vm15567_vm2, %v2833_v27, %v2834_v21 }
  0xe8   : > { %2240 = vmatmul.mubr.bf16.gmra.mrb[88].mxu1 %v9604_v47  ;;  %9032 = vmatprep.subr.bf16.mxu0 %v9446_v30 }
  0xe9   : > { %2247 = vmatprep.mubr.bf16.mxu1 %v10347_v39  ;;  %v9452_v39 = vld [vmem:[%s15555_s1 + $0x228] sm:$0xff]   ;;  %v2603_v62 = vsel %vm15572_vm1, %v2598_v52, %v2602_v13 }
  0xeb   : > { %9033 = vmatpush3.bf16.msra.mxu0 %v9446_v30 }
  0xec   : > { %9034 = vmatprep.subr.bf16.mxu0 %v9448_v15 }
  0xee   : > { %8999 = vmatmul.mubr.bf16.gmra.mrb[76].mxu0 %v15789_v23 }
  0xef   : > { %9002 = vmatprep.mubr.bf16.mxu0 %v15790_v0  ;;  %9035 = vmatpush3.bf16.msra.mxu0 %v9448_v15  ;;  %v2842_v0 = vrot.slane %v10459_v11, 2 }
  0xf0   : > { %2248 = vmatmul.mubr.bf16.gmra.mrb[92].mxu1 %v9605_v3  ;;  %9036 = vmatprep.subr.bf16.mxu0 %v9449_v17  ;;  %v2495_v3 = vld [vmem:[%s9784_s28 + $0x10] sm:$0x8] }
  0xf1   : > { %2255 = vmatprep.mubr.bf16.mxu1 %v10365_v28  ;;  %v2610_v28 = vrot.slane %v2608_v9, 1  ;;  %v2843_v26 = vsel %vm15567_vm2, %v2834_v21, %v2842_v0  ;;  %v8302_v38 = vcombine.low %v2495_v3, %v10437_v43  ;;  %v10576_v21 = vld [vmem:[%s9784_s28 + $0x50] sm:$0xff]  }
  0xf3   : > { %9037 = vmatpush3.bf16.msra.mxu0 %v9449_v17  ;;  %v2614_v24 = vor.u32 %v2612_v42, %v2610_v28  ;;  %v2746_v43 = vrot.slane %v8302_v38, 1  ;;  %v2757_v38 = vrot.slane %v10528_v57, 1 }
  0xf4   : > { %9038 = vmatprep.subr.bf16.mxu0 %v9451_v48 }
  0xf6   : > { %9003 = vmatmul.mubr.bf16.gmra.mrb[80].mxu0 %v9866_v44  ;;  %v9454_v44 = vld [vmem:[%s15555_s1 + $0x230] sm:$0xff]  }
  0xf7   : > { %9006 = vmatprep.mubr.bf16.mxu0 %v9884_v53  ;;  %9039 = vmatpush3.bf16.msra.mxu0 %v9451_v48  ;;  %v2606_v53 = vor.u32 %v2604_v33, %v2602_v13 }
  0xf8   : > { %2256 = vmatmul.mubr.bf16.gmra.mrb[96].mxu1 %v9606_v20  ;;  %9040 = vmatprep.subr.bf16.mxu0 %v9452_v39  ;;  %v2640_v20 = vshll.u32 %v10528_v57, 16 }
  0xf9   : > { %2263 = vmatprep.mubr.bf16.mxu1 %v10383_v31  ;;  %v2611_v36 = vsel %vm15572_vm1, %v2606_v53, %v2610_v28  ;;  %v2616_v31 = vshll.u32 %v10478_v12, 16 }
  0xfa   : > { %v2837_v50 = vrot.slane %v2611_v36, 2  ;;  %v2748_v36 = vsel %vm15573_vm0, %v2746_v43, %v2747_v37 }
  0xfb   : > { %9041 = vmatpush3.bf16.msra.mxu0 %v9452_v39  ;;  %v2618_v51 = vrot.slane %v2616_v31, 1  ;;  %v1174_v31 = vrot.slane %v10456_v60, 1  ;;  %v15792_v60 = vld [vmem:[#allocation9_spill] sm:$0xff] }
  0xfc   : > { %9042 = vmatprep.subr.bf16.mxu0 %v9454_v44 }
  0xfd   : > { %v2619_v10 = vsel %vm15572_vm1, %v2614_v24, %v2618_v51  ;;  %v2839_v24 = vrot.slane %v2748_v36, 2 }
  0xfe   : > { %9007 = vmatmul.mubr.bf16.gmra.mrb[84].mxu0 %v9912_v4  ;;  %v2836_v4 = vrot.slane %v2603_v62, 2  ;;  %v2844_v22 = vrot.slane %v2619_v10, 2 }
  0xff   : > { %9010 = vmatprep.mubr.bf16.mxu0 %v9922_v7  ;;  %9043 = vmatpush3.bf16.msra.mxu0 %v9454_v44  ;;  %v10493_v7 = vld [vmem:[%s9784_s28 + $0x30] sm:$0xff]   ;;  %v2848_v44 = vrot.slane %v10478_v12, 2 }
 0x100   : > { %2264 = vmatmul.mubr.bf16.gmra.mrb[100].mxu1 %v9607_v35  ;;  %9044 = vmatprep.subr.bf16.mxu0 %v9455_v58  ;;  %v2838_v40 = vsel %vm15567_vm2, %v2836_v4, %v2837_v50  ;;  %v2624_v1 = vshll.u32 %v10493_v7, 16  ;;  %v2845_v15 = vsel %vm15567_vm2, %v2837_v50, %v2844_v22  ;;  %v2628_v17 = vshrl.u32 %v10493_v7, 16 }
 0x101   : > { %2271 = vmatprep.mubr.bf16.mxu1 %v1116_v55  ;;  %v2849_v62 = vsel %vm15567_vm2, %v2842_v0, %v2848_v44  ;;  %v2644_v4 = vshrl.u32 %v10528_v57, 16  ;;  %v2753_v10 = vrot.slane %v10493_v7, 1 }
 0x102   : > { %v2626_v56 = vrot.slane %v2624_v1, 1  ;;  %v1175_v1 = vsel %vm15573_vm0, %v15792_v60, %v1174_v31 }
 0x103   : > { %9045 = vmatpush3.bf16.msra.mxu0 %v9455_v58  ;;  %v10550_v58 = vld [vmem:[%s9784_s28 + $0x48] sm:$0xff]  }
 0x104   : > { %5547 = vmatprep.subr.bf16.mxu0 %v15785_v19  ;;  %v2630_v46 = vor.u32 %v2628_v17, %v2626_v56  ;;  %v2648_v50 = vshll.u32 %v10550_v58, 16  ;;  %v2652_v0 = vshrl.u32 %v10550_v58, 16 }
 0x106   : > { %9011 = vmatmul.mubr.bf16.gmra.mrb[88].mxu0 %v9957_v34  ;;  %v2622_v34 = vor.u32 %v2620_v59, %v2618_v51  ;;  %v2650_v27 = vrot.slane %v2648_v50, 1  ;;  %v2660_v50 = vshrl.u32 %v10576_v21, 16 }
 0x107   : > { %9014 = vmatprep.mubr.bf16.mxu0 %v9972_v45  ;;  %v10508_v45 = vld [vmem:[%s9784_s28 + $0x38] sm:$0xff]  }
 0x108   : > { %2272 = vmatmul.mubr.bf16.gmra.mrb[104].mxu1 %v9608_v54  ;;  %v2627_v18 = vsel %vm15572_vm1, %v2622_v34, %v2626_v56  ;;  %v2632_v23 = vshll.u32 %v10508_v45, 16  ;;  %v2636_v9 = vshrl.u32 %v10508_v45, 16 }
 0x109   : > { %3174 = vmatprep.mubr.bf16.mxu1 %v2838_v40  ;;  %v2850_v2 = vrot.slane %v2627_v18, 2  ;;  %v2751_v40 = vrot.slane %v10478_v12, 1 }
 0x10a   : > { %v10505_v5 = vpop.f32.mrb[0].mxu1 }
 0x10b   : > { %v10510_v29 = vpop.f32.mrb[1].mxu1  ;;  %v2851_v13 = vsel %vm15567_vm2, %v2844_v22, %v2850_v2 }
 0x10c   : > { %v10512_v30 = vpop.f32.mrb[2].mxu1 }
 0x10d   : > { %v10515_v47 = vpop.f32.mrb[3].mxu1 }
 0x10e   : > { %9015 = vmatmul.mubr.bf16.gmra.mrb[92].mxu0 %v9995_v61  ;;  %v2634_v61 = vrot.slane %v2632_v23, 1 }
 0x10f   : > { %9018 = vmatprep.mubr.bf16.mxu0 %v10008_v6 }
 0x110   : > { %3175 = vmatmul.mubr.bf16.vlgmr.msra.gmra.mrb[108].mxu1 %v2835_v8  ;;  %v2635_v33 = vsel %vm15572_vm1, %v2630_v46, %v2634_v61  ;;  %v2638_v28 = vor.u32 %v2636_v9, %v2634_v61  ;;  %v2754_v8 = vsel %vm15573_vm0, %v2751_v40, %v2753_v10  ;;  %v2755_v46 = vrot.slane %v10508_v45, 1 }
 0x111   : > { %3182 = vmatprep.mubr.bf16.mxu1 %v2845_v15  ;;  %v2856_v52 = vrot.slane %v2635_v33, 2  ;;  %v2852_v3 = vrot.slane %v2754_v8, 2 }
 0x112   : > { %v10525_v48 = vpop.f32.mrb[4].mxu1 }
 0x113   : > { %v10530_v39 = vpop.f32.mrb[5].mxu1 }
 0x114   : > { %v10532_v6 = vpop.f32.mrb[6].mxu1 }
 0x115   : > { %v10536_v63 = vpop.f32.mrb[7].mxu1 }
 0x116   : > { %9019 = vmatmul.mubr.bf16.gmra.mrb[96].mxu0 %v10047_v25  ;;  %v2749_v25 = vrot.slane %v10459_v11, 1  ;;  %v2857_v11 = vsel %vm15567_vm2, %v2850_v2, %v2856_v52  ;;  %v2656_v2 = vshll.u32 %v10576_v21, 16 }
 0x117   : > { %9022 = vmatprep.mubr.bf16.mxu0 %v10053_v41  ;;  %v2642_v41 = vrot.slane %v2640_v20, 1 }
 0x118   : > { %3183 = vmatmul.mubr.bf16.gmra.mrb[112].mxu1 %v2843_v26  ;;  %v2750_v42 = vsel %vm15573_vm0, %v2747_v37, %v2749_v25  ;;  %v2752_v12 = vsel %vm15573_vm0, %v2749_v25, %v2751_v40  ;;  %v2860_v26 = vrot.slane %v10508_v45, 2  ;;  %v2654_v37 = vor.u32 %v2652_v0, %v2650_v27 }
 0x119   : > { %3190 = vmatprep.mubr.bf16.mxu1 %v2851_v13  ;;  %v2643_v35 = vsel %vm15572_vm1, %v2638_v28, %v2642_v41  ;;  %v2840_v51 = vrot.slane %v2750_v42, 2  ;;  %v2646_v54 = vor.u32 %v2644_v4, %v2642_v41  ;;  %v2846_v17 = vrot.slane %v2752_v12, 2 }
 0x11a   : > { %v10547_v53 = vpop.f32.mrb[8].mxu1  ;;  %v2658_v25 = vrot.slane %v2656_v2, 1  ;;  %v2759_v40 = vrot.slane %v10550_v58, 1 }
 0x11b   : > { %v10552_v49 = vpop.f32.mrb[9].mxu1  ;;  %v2841_v34 = vsel %vm15567_vm2, %v2839_v24, %v2840_v51  ;;  %v10590_v23 = vsel %vm15572_vm1, %v2646_v54, %v2650_v27  ;;  %v2847_v43 = vsel %vm15567_vm2, %v2840_v51, %v2846_v17 }
 0x11c   : > { %v10554_v55 = vpop.f32.mrb[10].mxu1  ;;  %v2868_v9 = vrot.slane %v10590_v23, 2  ;;  %v10622_v4 = vsel %vm15572_vm1, %v2654_v37, %v2658_v25  ;;  %v2760_v0 = vsel %vm15573_vm0, %v2757_v38, %v2759_v40 }
 0x11d   : > { %v10559_v32 = vpop.f32.mrb[11].mxu1  ;;  %v2874_v54 = vrot.slane %v10622_v4, 2 }
 0x11e   : > { %9023 = vmatmul.mubr.bf16.gmra.mrb[100].mxu0 %v10089_v14  ;;  %v2854_v14 = vrot.slane %v10493_v7, 2 }
 0x11f   : > { %9026 = vmatprep.mubr.bf16.mxu0 %v10098_v16  ;;  %v2862_v16 = vrot.slane %v2643_v35, 2 }
 0x120   : > { %3191 = vmatmul.mubr.bf16.gmra.mrb[116].mxu1 %v2849_v62  ;;  %v2855_v7 = vsel %vm15567_vm2, %v2848_v44, %v2854_v14  ;;  %v2756_v62 = vsel %vm15573_vm0, %v2753_v10, %v2755_v46  ;;  %v2861_v42 = vsel %vm15567_vm2, %v2854_v14, %v2860_v26  ;;  %v2866_v10 = vrot.slane %v10528_v57, 2 }
 0x121   : > { %3198 = vmatprep.mubr.bf16.mxu1 %v2857_v11  ;;  %v2863_v18 = vsel %vm15567_vm2, %v2856_v52, %v2862_v16  ;;  %v10605_v52 = vld [vmem:[%s9784_s28 + $0x58] sm:$0xff]   ;;  %v2758_v11 = vsel %vm15573_vm0, %v2755_v46, %v2757_v38  ;;  %v2869_v35 = vsel %vm15567_vm2, %v2862_v16, %v2868_v9  ;;  %v2761_v16 = vrot.slane %v10576_v21, 1 }
 0x122   : > { %v10571_v59 = vpop.f32.mrb[12].mxu1  ;;  %v2664_v24 = vshll.u32 %v10605_v52, 16  ;;  %v2864_v51 = vrot.slane %v2758_v11, 2  ;;  %v2867_v46 = vsel %vm15567_vm2, %v2860_v26, %v2866_v10  ;;  %v2763_v26 = vrot.slane %v10605_v52, 1 }
 0x123   : > { %v10578_v22 = vpop.f32.mrb[13].mxu1 }
 0x124   : > { %v10582_v56 = vpop.f32.mrb[14].mxu1  ;;  %v2666_v8 = vrot.slane %v2664_v24, 1 }
 0x125   : > { %v10586_v15 = vpop.f32.mrb[15].mxu1 }
 0x126   : > { %9027 = vmatmul.mubr.bf16.gmra.mrb[104].mxu0 %v1175_v1 }
 0x127   : > { %9046 = vmatprep.mubr.bf16.mxu0 %v2841_v34 }
 0x128   : > { %3199 = vmatmul.mubr.bf16.gmra.mrb[120].mxu1 %v2855_v7  ;;  %v2662_v7 = vor.u32 %v2660_v50, %v2658_v25 }
 0x129   : > { %v1639_v61 = vpop.f32.mrb[0].mxu0  ;;  %3206 = vmatprep.mubr.bf16.mxu1 %v2863_v18  ;;  %v10637_v18 = vld [vmem:[%s9784_s28 + $0x60] sm:$0xff]  }
 0x12a   : > { %v10598_v13 = vadd.f32 %v10510_v29, %v1639_v61  ;;  %v1641_v33 = vpop.f32.mrb[1].mxu0  ;;  %v2853_v29 = vsel %vm15567_vm2, %v2846_v17, %v2852_v3  ;;  %v2672_v38 = vshll.u32 %v10637_v18, 16 }
 0x12b   : > { %v10601_v20 = vpop.f32.mrb[16].mxu1  ;;  %v1642_v44 = vpop.f32.mrb[2].mxu0  ;;  %v2875_v33 = vsel %vm15567_vm2, %v2868_v9, %v2874_v54  ;;  %v2765_v9 = vrot.slane %v10637_v18, 1 }
 0x12c   : > { %v10608_v28 = vadd.f32 %v10515_v47, %v1642_v44  ;;  %v10610_v45 = vpop.f32.mrb[17].mxu1  ;;  %v1644_v41 = vpop.f32.mrb[3].mxu0  ;;  %v2858_v47 = vrot.slane %v2756_v62, 2  ;;  %v10654_v44 = vsel %vm15572_vm1, %v2662_v7, %v2666_v8  ;;  %v2674_v50 = vrot.slane %v2672_v38, 1  ;;  %v10683_v7 = vld [vmem:[%s9784_s28 + $0x70] sm:$0xff]  }
 0x12d   : > { %v10614_v36 = vpop.f32.mrb[18].mxu1  ;;  %v2872_v41 = vrot.slane %v10550_v58, 2 }
 0x12e   : > { %v10618_v31 = vpop.f32.mrb[19].mxu1  ;;  %9047 = vmatmul.mubr.bf16.vlgmr.msra.gmra.mrb[108].mxu0 %v2847_v43  ;;  %v2859_v12 = vsel %vm15567_vm2, %v2852_v3, %v2858_v47  ;;  %v2762_v3 = vsel %vm15573_vm0, %v2759_v40, %v2761_v16  ;;  %v2668_v43 = vshrl.u32 %v10605_v52, 16 }
 0x12f   : > { %9050 = vmatprep.mubr.bf16.mxu0 %v2853_v29  ;;  %v2876_v37 = vrot.slane %v2762_v3, 2 }
 0x130   : > { %3207 = vmatmul.mubr.bf16.gmra.mrb[124].mxu1 %v2861_v42  ;;  %v2880_v42 = vrot.slane %v10654_v44, 2  ;;  %v2670_v4 = vor.u32 %v2668_v43, %v2666_v8 }
 0x131   : > { %v1647_v14 = vpop.f32.mrb[4].mxu0  ;;  %3214 = vmatprep.mubr.bf16.mxu1 %v2869_v35 }
 0x132   : > { %v10630_v60 = vadd.f32 %v10505_v5, %v1647_v14  ;;  %v1649_v1 = vpop.f32.mrb[5].mxu0  ;;  %v2865_v5 = vsel %vm15567_vm2, %v2858_v47, %v2864_v51  ;;  %v2764_v14 = vsel %vm15573_vm0, %v2761_v16, %v2763_v26  ;;  %v2676_v16 = vshrl.u32 %v10637_v18, 16 }
 0x133   : > { %v10633_v27 = vpop.f32.mrb[20].mxu1  ;;  %v1650_v34 = vpop.f32.mrb[6].mxu0  ;;  %v10676_v1 = vld [vmem:[%s9784_s28 + $0x68] sm:$0xff]  }
 0x134   : > { %v10640_v17 = vadd.f32 %v10512_v30, %v1650_v34  ;;  %v10642_v57 = vpop.f32.mrb[21].mxu1  ;;  %v1652_v23 = vpop.f32.mrb[7].mxu0  ;;  %v2870_v30 = vrot.slane %v2760_v0, 2  ;;  %v2680_v0 = vshll.u32 %v10676_v1, 16 }
 0x135   : > { %v10646_v2 = vpop.f32.mrb[22].mxu1  ;;  %v2882_v23 = vrot.slane %v2764_v14, 2 }
 0x136   : > { %v10650_v61 = vpop.f32.mrb[23].mxu1  ;;  %9051 = vmatmul.mubr.bf16.gmra.mrb[112].mxu0 %v2859_v12  ;;  %v2871_v47 = vsel %vm15567_vm2, %v2864_v51, %v2870_v30  ;;  %v2873_v12 = vsel %vm15567_vm2, %v2866_v10, %v2872_v41  ;;  %v2766_v51 = vsel %vm15573_vm0, %v2763_v26, %v2765_v9 }
 0x137   : > { %9054 = vmatprep.mubr.bf16.mxu0 %v2865_v5  ;;  %v10689_v5 = vsel %vm15572_vm1, %v2670_v4, %v2674_v50  ;;  %v2888_v10 = vrot.slane %v2766_v51, 2 }
 0x138   : > { %3215 = vmatmul.mubr.bf16.gmra.mrb[128].mxu1 %v2867_v46  ;;  %v2767_v46 = vrot.slane %v10676_v1, 1  ;;  %v2886_v43 = vrot.slane %v10689_v5, 2  ;;  %v2688_v5 = vshll.u32 %v10683_v7, 16 }
 0x139   : > { %v1655_v25 = vpop.f32.mrb[8].mxu0  ;;  %3222 = vmatprep.mubr.bf16.mxu1 %v2875_v33  ;;  %v2878_v33 = vrot.slane %v10576_v21, 2 }
 0x13a   : > { %v10662_v29 = vadd.f32 %v10530_v39, %v1655_v25  ;;  %v1657_v62 = vpop.f32.mrb[9].mxu0  ;;  %v2877_v39 = vsel %vm15567_vm2, %v2870_v30, %v2876_v37  ;;  %v2883_v25 = vsel %vm15567_vm2, %v2876_v37, %v2882_v23 }
 0x13b   : > { %v10665_v11 = vpop.f32.mrb[24].mxu1  ;;  %v1658_v35 = vpop.f32.mrb[10].mxu0  ;;  %v2678_v62 = vor.u32 %v2676_v16, %v2674_v50  ;;  %v10718_v50 = vld [vmem:[%s9784_s28 + $0x80] sm:$0xff]  }
 0x13c   : > { %v10669_v24 = vadd.f32 %v10536_v63, %v1658_v35  ;;  %v10671_v58 = vpop.f32.mrb[25].mxu1  ;;  %v1660_v40 = vpop.f32.mrb[11].mxu0  ;;  %v2881_v63 = vsel %vm15567_vm2, %v2874_v54, %v2880_v42  ;;  %v2769_v54 = vrot.slane %v10683_v7, 1  ;;  %v2682_v35 = vrot.slane %v2680_v0, 1 }
 0x13d   : > { %v10678_v34 = vpop.f32.mrb[26].mxu1  ;;  %v2768_v40 = vsel %vm15573_vm0, %v2765_v9, %v2767_v46  ;;  %v2684_v9 = vshrl.u32 %v10676_v1, 16 }
 0x13e   : > { %v10685_v8 = vpop.f32.mrb[27].mxu1  ;;  %9055 = vmatmul.mubr.bf16.gmra.mrb[116].mxu0 %v2871_v47  ;;  %v2770_v37 = vsel %vm15573_vm0, %v2767_v46, %v2769_v54  ;;  %v2884_v46 = vrot.slane %v10605_v52, 2 }
 0x13f   : > { %9058 = vmatprep.mubr.bf16.mxu0 %v2877_v39  ;;  %v10711_v39 = vld [vmem:[%s9784_s28 + $0x78] sm:$0xff]  }
 0x140   : > { %3223 = vmatmul.mubr.bf16.gmra.mrb[132].mxu1 %v2873_v12  ;;  %v2879_v12 = vsel %vm15567_vm2, %v2872_v41, %v2878_v33  ;;  %v2900_v41 = vrot.slane %v2770_v37, 2  ;;  %v2771_v16 = vrot.slane %v10711_v39, 1 }
 0x141   : > { %v1663_v3 = vpop.f32.mrb[12].mxu0  ;;  %3230 = vmatprep.mubr.bf16.mxu1 %v2881_v63  ;;  %v2894_v63 = vrot.slane %v2768_v40, 2  ;;  %v2690_v40 = vrot.slane %v2688_v5, 1  ;;  %v2692_v5 = vshrl.u32 %v10683_v7, 16 }
 0x142   : > { %v10697_v30 = vadd.f32 %v10525_v48, %v1663_v3  ;;  %v1665_v44 = vpop.f32.mrb[13].mxu0  ;;  %v2889_v48 = vsel %vm15567_vm2, %v2882_v23, %v2888_v10  ;;  %v10724_v23 = vsel %vm15572_vm1, %v2678_v62, %v2682_v35 }
 0x143   : > { %v10700_v38 = vpop.f32.mrb[28].mxu1  ;;  %v1666_v26 = vpop.f32.mrb[14].mxu0 }
 0x144   : > { %v10704_v47 = vadd.f32 %v10532_v6, %v1666_v26  ;;  %v10706_v21 = vpop.f32.mrb[29].mxu1  ;;  %v1668_v4 = vpop.f32.mrb[15].mxu0  ;;  %v2887_v6 = vsel %vm15567_vm2, %v2880_v42, %v2886_v43  ;;  %v2773_v42 = vrot.slane %v10718_v50, 1  ;;  %v2892_v26 = vrot.slane %v10724_v23, 2 }
 0x145   : > { %v10713_v14 = vpop.f32.mrb[30].mxu1  ;;  %v2895_v4 = vsel %vm15567_vm2, %v2888_v10, %v2894_v63 }
 0x146   : > { %15793 = vst [vmem:[#allocation6_spill] sm:$0xff] %v10713_v14  ;;  %v10720_v51 = vpop.f32.mrb[31].mxu1  ;;  %9059 = vmatmul.mubr.bf16.gmra.mrb[120].mxu0 %v2883_v25  ;;  %v2774_v10 = vsel %vm15573_vm0, %v2771_v16, %v2773_v42 }
 0x147   : > { %9062 = vmatprep.mubr.bf16.mxu0 %v2889_v48  ;;  %v2686_v48 = vor.u32 %v2684_v9, %v2682_v35  ;;  %v10753_v35 = vld [vmem:[%s9784_s28 + $0x90] sm:$0xff]  }
 0x148   : > { %3231 = vmatmul.mubr.bf16.gmra.mrb[136].mxu1 %v2879_v12 }
 0x149   : > { %v1671_v0 = vpop.f32.mrb[16].mxu0  ;;  %3238 = vmatprep.mubr.bf16.mxu1 %v2887_v6  ;;  %v2772_v6 = vsel %vm15573_vm0, %v2769_v54, %v2771_v16 }
 0x14a   : > { %v10732_v3 = vadd.f32 %v10552_v49, %v1671_v0  ;;  %v1673_v44 = vpop.f32.mrb[17].mxu0  ;;  %v2901_v49 = vsel %vm15567_vm2, %v2894_v63, %v2900_v41  ;;  %v10746_v0 = vld [vmem:[%s9784_s28 + $0x88] sm:$0xff]   ;;  %v10759_v63 = vsel %vm15572_vm1, %v2686_v48, %v2690_v40  ;;  %v2906_v54 = vrot.slane %v2772_v6, 2 }
 0x14b   : > { %v10735_v25 = vpop.f32.mrb[32].mxu1  ;;  %v1674_v62 = vpop.f32.mrb[18].mxu0  ;;  %v2885_v44 = vsel %vm15567_vm2, %v2878_v33, %v2884_v46  ;;  %v2912_v33 = vrot.slane %v2774_v10, 2  ;;  %v2775_v16 = vrot.slane %v10746_v0, 1  ;;  %v2898_v6 = vrot.slane %v10759_v63, 2 }
 0x14c   : > { %15794 = vst [vmem:[#allocation7_spill] sm:$0xff] %v10735_v25  ;;  %v10739_v12 = vadd.f32 %v10559_v32, %v1674_v62  ;;  %v10741_v52 = vpop.f32.mrb[33].mxu1  ;;  %v1676_v37 = vpop.f32.mrb[19].mxu0  ;;  %v2893_v32 = vsel %vm15567_vm2, %v2886_v43, %v2892_v26  ;;  %v2696_v62 = vshll.u32 %v10711_v39, 16  ;;  %v2777_v43 = vrot.slane %v10753_v35, 1 }
 0x14d   : > { %15795 = vst [vmem:[#allocation8_spill] sm:$0xff] %v10741_v52  ;;  %v10748_v23 = vpop.f32.mrb[34].mxu1  ;;  %v2694_v10 = vor.u32 %v2692_v5, %v2690_v40  ;;  %v2913_v52 = vsel %vm15567_vm2, %v2906_v54, %v2912_v33  ;;  %v10785_v40 = vld [vmem:[%s9784_s28 + $0xa0] ss:$0 sps:$4 sm:$0x77]  }
 0x14e   : > { %15796 = vst [vmem:[#allocation10_spill] sm:$0xff] %v10748_v23  ;;  %v10755_v9 = vpop.f32.mrb[35].mxu1  ;;  %9063 = vmatmul.mubr.bf16.gmra.mrb[124].mxu0 %v2895_v4  ;;  %v2890_v4 = vrot.slane %v10637_v18, 2  ;;  %v2698_v25 = vrot.slane %v2696_v62, 1 }
 0x14f   : > { %15797 = vst [vmem:[#allocation9_spill] sm:$0xff] %v10755_v9  ;;  %9066 = vmatprep.mubr.bf16.mxu0 %v2901_v49 }
 0x150   : > { %3239 = vmatmul.mubr.bf16.gmra.mrb[140].mxu1 %v2885_v44  ;;  %v2907_v44 = vsel %vm15567_vm2, %v2900_v41, %v2906_v54  ;;  %v2891_v14 = vsel %vm15567_vm2, %v2884_v46, %v2890_v4  ;;  %v2778_v41 = vsel %vm15573_vm0, %v2775_v16, %v2777_v43 }
 0x151   : > { %v1679_v37 = vpop.f32.mrb[20].mxu0  ;;  %3246 = vmatprep.mubr.bf16.mxu1 %v2893_v32  ;;  %v2924_v46 = vrot.slane %v2778_v41, 2 }
 0x152   : > { %v10767_v49 = vadd.f32 %v10547_v53, %v1679_v37  ;;  %v1681_v48 = vpop.f32.mrb[21].mxu0  ;;  %v2776_v53 = vsel %vm15573_vm0, %v2773_v42, %v2775_v16  ;;  %v10777_v37 = vld [vmem:[%s9784_s28 + $0x98] sm:$0xff]   ;;  %v2699_v42 = vsel %vm15572_vm1, %v2694_v10, %v2698_v25  ;;  %v2781_v16 = vrot.slane %v10785_v40, 1 }
 0x153   : > { %v2137_v19 = vpop.f32.mrb[36].mxu1  ;;  %v1682_v23 = vpop.f32.mrb[22].mxu0  ;;  %v2918_v54 = vrot.slane %v2776_v53, 2  ;;  %v2779_v5 = vrot.slane %v10777_v37, 1 }
 0x154   : > { %v10772_v32 = vadd.f32 %v10554_v55, %v1682_v23  ;;  %v2139_v9 = vpop.f32.mrb[37].mxu1  ;;  %v1684_v18 = vpop.f32.mrb[23].mxu0  ;;  %v10780_v63 = vadd.f32 %v2137_v19, %v10598_v13  ;;  %v2899_v23 = vsel %vm15567_vm2, %v2892_v26, %v2898_v6  ;;  %v2700_v19 = vshrl.u32 %v10711_v39, 16 }
 0x155   : > { %v2140_v48 = vpop.f32.mrb[38].mxu1  ;;  %v2704_v13 = vshll.u32 %v10718_v50, 16  ;;  %v2896_v26 = vrot.slane %v10676_v1, 2  ;;  %v2925_v1 = vsel %vm15567_vm2, %v2918_v54, %v2924_v46 }
 0x156   : > { %v2142_v55 = vpop.f32.mrb[39].mxu1  ;;  %9067 = vmatmul.mubr.bf16.gmra.mrb[128].mxu0 %v2907_v44  ;;  %v10789_v9 = vadd.f32 %v2140_v48, %v10608_v28  ;;  %v2702_v48 = vor.u32 %v2700_v19, %v2698_v25  ;;  %v2782_v25 = vsel %vm15573_vm0, %v2779_v5, %v2781_v16 }
 0x157   : > { %9070 = vmatprep.mubr.bf16.mxu0 %v2913_v52  ;;  %v2904_v52 = vrot.slane %v2699_v42, 2  ;;  %v2706_v55 = vrot.slane %v2704_v13, 1  ;;  %v2897_v42 = vsel %vm15567_vm2, %v2890_v4, %v2896_v26 }
 0x158   : > { %15798 = vst [vmem:[#allocation11_spill] sm:$0xff] %v10789_v9  ;;  %3247 = vmatmul.mubr.bf16.gmra.mrb[144].mxu1 %v2891_v14  ;;  %v2919_v14 = vsel %vm15567_vm2, %v2912_v33, %v2918_v54  ;;  %v2780_v9 = vsel %vm15573_vm0, %v2777_v43, %v2779_v5  ;;  %v2708_v54 = vshrl.u32 %v10718_v50, 16  ;;  %v2712_v43 = vshll.u32 %v10746_v0, 16 }
 0x159   : > { %v1687_v62 = vpop.f32.mrb[24].mxu0  ;;  %3254 = vmatprep.mubr.bf16.mxu1 %v2899_v23  ;;  %v2905_v33 = vsel %vm15567_vm2, %v2898_v6, %v2904_v52  ;;  %v2707_v13 = vsel %vm15572_vm1, %v2702_v48, %v2706_v55  ;;  %v2902_v5 = vrot.slane %v10683_v7, 2 }
 0x15a   : > { %v10798_v28 = vadd.f32 %v10578_v22, %v1687_v62  ;;  %v1689_v44 = vpop.f32.mrb[25].mxu0  ;;  %v2710_v48 = vor.u32 %v2708_v54, %v2706_v55  ;;  %v2942_v54 = vrot.slane %v2781_v16, 2 }
 0x15b   : > { %v2145_v10 = vpop.f32.mrb[40].mxu1  ;;  %v1690_v18 = vpop.f32.mrb[26].mxu0  ;;  %v2936_v44 = vrot.slane %v2782_v25, 2  ;;  %v2903_v25 = vsel %vm15567_vm2, %v2896_v26, %v2902_v5  ;;  %v2908_v26 = vrot.slane %v10711_v39, 2 }
 0x15c   : > { %v10802_v53 = vadd.f32 %v10586_v15, %v1690_v18  ;;  %v2147_v41 = vpop.f32.mrb[41].mxu1  ;;  %v1692_v23 = vpop.f32.mrb[27].mxu0  ;;  %v10807_v22 = vadd.f32 %v2145_v10, %v10630_v60  ;;  %v2930_v60 = vrot.slane %v2780_v9, 2 }
 0x15d   : > { %v2148_v62 = vpop.f32.mrb[42].mxu1  ;;  %v2714_v41 = vrot.slane %v2712_v43, 1 }
 0x15e   : > { %v2150_v19 = vpop.f32.mrb[43].mxu1  ;;  %9071 = vmatmul.mubr.bf16.gmra.mrb[132].mxu0 %v2919_v14  ;;  %v10813_v15 = vadd.f32 %v2148_v62, %v10640_v17  ;;  %v2910_v17 = vrot.slane %v2707_v13, 2  ;;  %v2931_v23 = vsel %vm15567_vm2, %v2924_v46, %v2930_v60  ;;  %v2716_v46 = vshrl.u32 %v10746_v0, 16 }
 0x15f   : > { %9074 = vmatprep.mubr.bf16.mxu0 %v2925_v1  ;;  %v2720_v13 = vshll.u32 %v10753_v35, 16 }
 0x160   : > { %3255 = vmatmul.mubr.bf16.gmra.mrb[148].mxu1 %v2897_v42  ;;  %v2937_v42 = vsel %vm15567_vm2, %v2930_v60, %v2936_v44 }
 0x161   : > { %v1695_v4 = vpop.f32.mrb[28].mxu0  ;;  %3262 = vmatprep.mubr.bf16.mxu1 %v2905_v33  ;;  %v2911_v33 = vsel %vm15567_vm2, %v2904_v52, %v2910_v17 }
 0x162   : > { %v10820_v6 = vadd.f32 %v10571_v59, %v1695_v4  ;;  %v1697_v10 = vpop.f32.mrb[29].mxu0 }
 0x163   : > { %v2153_v18 = vpop.f32.mrb[44].mxu1  ;;  %v1698_v14 = vpop.f32.mrb[30].mxu0  ;;  %v2718_v10 = vor.u32 %v2716_v46, %v2714_v41 }
 0x164   : > { %v10824_v1 = vadd.f32 %v10582_v56, %v1698_v14  ;;  %v2155_v9 = vpop.f32.mrb[45].mxu1  ;;  %v1700_v62 = vpop.f32.mrb[31].mxu0  ;;  %v10828_v7 = vadd.f32 %v2153_v18, %v10662_v29  ;;  %v2715_v56 = vsel %vm15572_vm1, %v2710_v48, %v2714_v41  ;;  %v2722_v18 = vrot.slane %v2720_v13, 1 }
 0x165   : > { %v2156_v59 = vpop.f32.mrb[46].mxu1  ;;  %v2916_v60 = vrot.slane %v2715_v56, 2  ;;  %v2943_v14 = vsel %vm15567_vm2, %v2936_v44, %v2942_v54  ;;  %v2909_v62 = vsel %vm15567_vm2, %v2902_v5, %v2908_v26 }
 0x166   : > { %v2158_v19 = vpop.f32.mrb[47].mxu1  ;;  %9075 = vmatmul.mubr.bf16.gmra.mrb[136].mxu0 %v2931_v23  ;;  %v10833_v55 = vadd.f32 %v2156_v59, %v10669_v24  ;;  %v2723_v44 = vsel %vm15572_vm1, %v2718_v10, %v2722_v18  ;;  %v2724_v59 = vshrl.u32 %v10753_v35, 16 }
 0x167   : > { %9078 = vmatprep.mubr.bf16.mxu0 %v2937_v42  ;;  %v2922_v5 = vrot.slane %v2723_v44, 2 }
 0x168   : > { %3263 = vmatmul.mubr.bf16.gmra.mrb[152].mxu1 %v2903_v25 }
 0x169   : > { %v1703_v29 = vpop.f32.mrb[32].mxu0  ;;  %3270 = vmatprep.mubr.bf16.mxu1 %v2911_v33  ;;  %v2923_v10 = vsel %vm15567_vm2, %v2916_v60, %v2922_v5 }
 0x16a   : > { %v1705_v43 = vpop.f32.mrb[33].mxu0  ;;  %v10840_v52 = vadd.f32 %v10610_v45, %v1703_v29  ;;  %v2917_v45 = vsel %vm15567_vm2, %v2910_v17, %v2916_v60 }
 0x16b   : > { %v2161_v24 = vpop.f32.mrb[48].mxu1  ;;  %v1706_v4 = vpop.f32.mrb[34].mxu0 }
 0x16c   : > { %v2163_v48 = vpop.f32.mrb[49].mxu1  ;;  %v1708_v23 = vpop.f32.mrb[35].mxu0  ;;  %v10844_v16 = vadd.f32 %v10618_v31, %v1706_v4  ;;  %v10847_v9 = vadd.f32 %v2161_v24, %v10697_v30  ;;  %v2728_v31 = vshll.u32 %v10777_v37, 16  ;;  %v2914_v30 = vrot.slane %v10718_v50, 2 }
 0x16d   : > { %v2164_v39 = vpop.f32.mrb[50].mxu1  ;;  %v2736_v48 = vshll.u32 %v10785_v40, 16 }
 0x16e   : > { %v2166_v42 = vpop.f32.mrb[51].mxu1  ;;  %9079 = vmatmul.mubr.bf16.gmra.mrb[140].mxu0 %v2943_v14  ;;  %v10852_v41 = vadd.f32 %v2164_v39, %v10704_v47  ;;  %v2726_v47 = vor.u32 %v2724_v59, %v2722_v18  ;;  %v2730_v46 = vrot.slane %v2728_v31, 1  ;;  %v2915_v50 = vsel %vm15567_vm2, %v2908_v26, %v2914_v30 }
 0x16f   : > { %v2732_v14 = vshrl.u32 %v10777_v37, 16  ;;  %v2738_v42 = vrot.slane %v2736_v48, 1 }
 0x170   : > { %3271 = vmatmul.mubr.bf16.gmra.mrb[156].mxu1 %v2909_v62  ;;  %v2731_v18 = vsel %vm15572_vm1, %v2726_v47, %v2730_v46 }
 0x171   : > { %v1711_v25 = vpop.f32.mrb[36].mxu0  ;;  %3278 = vmatprep.mubr.bf16.mxu1 %v2917_v45  ;;  %v2928_v39 = vrot.slane %v2731_v18, 2 }
 0x172   : > { %v1713_v19 = vpop.f32.mrb[37].mxu0  ;;  %v10859_v33 = vadd.f32 %v10601_v20, %v1711_v25 }
 0x173   : > { %v2169_v17 = vpop.f32.mrb[52].mxu1  ;;  %v1714_v56 = vpop.f32.mrb[38].mxu0 }
 0x174   : > { %v2171_v13 = vpop.f32.mrb[53].mxu1  ;;  %v1716_v54 = vpop.f32.mrb[39].mxu0  ;;  %v10862_v29 = vadd.f32 %v10614_v36, %v1714_v56  ;;  %v10865_v43 = vadd.f32 %v2169_v17, %v10732_v3  ;;  %v2920_v3 = vrot.slane %v10746_v0, 2  ;;  %v2929_v17 = vsel %vm15567_vm2, %v2922_v5, %v2928_v39 }
 0x175   : > { %v2172_v24 = vpop.f32.mrb[54].mxu1 }
 0x176   : > { %v2174_v4 = vpop.f32.mrb[55].mxu1  ;;  %v10870_v20 = vadd.f32 %v2172_v24, %v10739_v12  ;;  %v2734_v12 = vor.u32 %v2732_v14, %v2730_v46  ;;  %v2921_v0 = vsel %vm15567_vm2, %v2914_v30, %v2920_v3 }
 0x178   : > { %3279 = vmatmul.mubr.bf16.gmra.mrb[160].mxu1 %v2915_v50  ;;  %v2739_v56 = vsel %vm15572_vm1, %v2734_v12, %v2738_v42 }
 0x179   : > { %v1719_v36 = vpop.f32.mrb[40].mxu0  ;;  %3286 = vmatprep.mubr.bf16.mxu1 %v2923_v10  ;;  %v2934_v13 = vrot.slane %v2739_v56, 2 }
 0x17a   : > { %v1721_v23 = vpop.f32.mrb[41].mxu0  ;;  %v10877_v26 = vadd.f32 %v10642_v57, %v1719_v36 }
 0x17b   : > { %v2177_v60 = vpop.f32.mrb[56].mxu1  ;;  %v1722_v62 = vpop.f32.mrb[42].mxu0  ;;  %v2935_v14 = vsel %vm15567_vm2, %v2928_v39, %v2934_v13 }
 0x17c   : > { %v2179_v45 = vpop.f32.mrb[57].mxu1  ;;  %v1724_v44 = vpop.f32.mrb[43].mxu0  ;;  %v10880_v59 = vadd.f32 %v10650_v61, %v1722_v62  ;;  %v10883_v31 = vadd.f32 %v2177_v60, %v10767_v49  ;;  %v2926_v61 = vrot.slane %v10753_v35, 2  ;;  %v2740_v49 = vshrl.u32 %v10785_v40, 16 }
 0x17d   : > { %v2180_v25 = vpop.f32.mrb[58].mxu1  ;;  %v9470_v44 = vld [vmem:[%s9784_s28 + $0xa0] ss:$0 sps:$4 sm:$0x33]  }
 0x17e   : > { %v2182_v19 = vpop.f32.mrb[59].mxu1  ;;  %v10888_v57 = vadd.f32 %v2180_v25, %v10772_v32  ;;  %v2927_v35 = vsel %vm15567_vm2, %v2920_v3, %v2926_v61  ;;  %v2742_v40 = vor.u32 %v2740_v49, %v2738_v42 }
 0x17f   : > { %v2938_v19 = vrot.slane %v9470_v44, 2 }
 0x180   : > { %3287 = vmatmul.mubr.bf16.gmra.mrb[164].mxu1 %v2921_v0  ;;  %v2940_v23 = vrot.slane %v2742_v40, 2 }
 0x181   : > { %v1727_v47 = vpop.f32.mrb[44].mxu0  ;;  %3294 = vmatprep.mubr.bf16.mxu1 %v2929_v17 }
 0x182   : > { %v1729_v46 = vpop.f32.mrb[45].mxu0  ;;  %v10894_v54 = vadd.f32 %v10633_v27, %v1727_v47  ;;  %v2941_v25 = vsel %vm15567_vm2, %v2934_v13, %v2940_v23 }
 0x183   : > { %v2185_v30 = vpop.f32.mrb[60].mxu1  ;;  %v1730_v24 = vpop.f32.mrb[46].mxu0 }
 0x184   : > { %v2187_v5 = vpop.f32.mrb[61].mxu1  ;;  %v1732_v50 = vpop.f32.mrb[47].mxu0  ;;  %v10897_v32 = vadd.f32 %v10646_v2, %v1730_v24  ;;  %v10900_v4 = vadd.f32 %v2185_v30, %v10798_v28  ;;  %v2932_v2 = vrot.slane %v10777_v37, 2 }
 0x185   : > { %v2188_v10 = vpop.f32.mrb[62].mxu1 }
 0x186   : > { %v2190_v18 = vpop.f32.mrb[63].mxu1  ;;  %v10905_v27 = vadd.f32 %v2188_v10, %v10802_v53  ;;  %v2933_v45 = vsel %vm15567_vm2, %v2926_v61, %v2932_v2  ;;  %v2939_v49 = vsel %vm15567_vm2, %v2932_v2, %v2938_v19 }
 0x188   : > { %3295 = vmatmul.mubr.bf16.gmra.mrb[168].mxu1 %v2927_v35 }
 0x189   : > { %v1735_v48 = vpop.f32.mrb[48].mxu0  ;;  %3302 = vmatprep.mubr.bf16.mxu1 %v2935_v14 }
 0x18a   : > { %v1737_v36 = vpop.f32.mrb[49].mxu0  ;;  %v10909_v28 = vadd.f32 %v10671_v58, %v1735_v48 }
 0x18b   : > { %v2193_v60 = vpop.f32.mrb[64].mxu1  ;;  %v1738_v3 = vpop.f32.mrb[50].mxu0 }
 0x18c   : > { %v2195_v62 = vpop.f32.mrb[65].mxu1  ;;  %v1740_v12 = vpop.f32.mrb[51].mxu0  ;;  %v10912_v39 = vadd.f32 %v10685_v8, %v1738_v3  ;;  %v10915_v53 = vadd.f32 %v2193_v60, %v10820_v6 }
 0x18d   : > { %v2196_v42 = vpop.f32.mrb[66].mxu1  ;;  %v15799_v12 = vld [vmem:[#allocation6_spill] sm:$0xff] }
 0x18e   : > { %v2198_v37 = vpop.f32.mrb[67].mxu1  ;;  %v10921_v58 = vadd.f32 %v2196_v42, %v10824_v1 }
 0x190   : > { %3303 = vmatmul.mubr.bf16.gmra.mrb[172].mxu1 %v2933_v45 }
 0x191   : > { %v1743_v0 = vpop.f32.mrb[52].mxu0  ;;  %3310 = vmatprep.mubr.bf16.mxu1 %v2941_v25  ;;  %v15800_v25 = vld [vmem:[#allocation8_spill] sm:$0xff] }
 0x192   : > { %v1745_v17 = vpop.f32.mrb[53].mxu0  ;;  %v10924_v8 = vadd.f32 %v10665_v11, %v1743_v0 }
 0x193   : > { %v2201_v6 = vpop.f32.mrb[68].mxu1  ;;  %v1746_v56 = vpop.f32.mrb[54].mxu0 }
 0x194   : > { %v10927_v47 = vadd.f32 %v2201_v6, %v10840_v52  ;;  %v2203_v61 = vpop.f32.mrb[69].mxu1  ;;  %v1748_v46 = vpop.f32.mrb[55].mxu0  ;;  %v10930_v13 = vadd.f32 %v10678_v34, %v1746_v56  ;;  %v15801_v56 = vld [vmem:[#allocation9_spill] sm:$0xff] }
 0x195   : > { %v2204_v1 = vpop.f32.mrb[70].mxu1 }
 0x196   : > { %v10934_v30 = vadd.f32 %v2204_v1, %v10844_v16  ;;  %v2206_v24 = vpop.f32.mrb[71].mxu1 }
 0x197   : > { %v15802_v24 = vld [vmem:[#allocation7_spill] sm:$0xff] }
 0x198   : > { %3311 = vmatmul.mubr.bf16.gmra.mrb[176].mxu1 %v2939_v49 }
 0x199   : > { %v1751_v11 = vpop.f32.mrb[56].mxu0 }
 0x19a   : > { %v1753_v5 = vpop.f32.mrb[57].mxu0  ;;  %v10937_v50 = vadd.f32 %v10706_v21, %v1751_v11 }
 0x19b   : > { %v2209_v52 = vpop.f32.mrb[72].mxu1  ;;  %v1754_v10 = vpop.f32.mrb[58].mxu0 }
 0x19c   : > { %v10940_v35 = vadd.f32 %v2209_v52, %v10859_v33  ;;  %v2211_v34 = vpop.f32.mrb[73].mxu1  ;;  %v1756_v18 = vpop.f32.mrb[59].mxu0  ;;  %v10943_v14 = vadd.f32 %v10720_v51, %v1754_v10 }
 0x19d   : > { %v2212_v40 = vpop.f32.mrb[74].mxu1  ;;  %v15803_v34 = vld [vmem:[#allocation10_spill] sm:$0xff] }
 0x19e   : > { %v10946_v16 = vadd.f32 %v2212_v40, %v10862_v29  ;;  %v2214_v48 = vpop.f32.mrb[75].mxu1 }
 0x1a1   : > { %v1759_v2 = vpop.f32.mrb[60].mxu0 }
 0x1a2   : > { %v1761_v36 = vpop.f32.mrb[61].mxu0  ;;  %v10949_v21 = vadd.f32 %v10700_v38, %v1759_v2 }
 0x1a3   : > { %v2217_v23 = vpop.f32.mrb[76].mxu1  ;;  %v1762_v60 = vpop.f32.mrb[62].mxu0 }
 0x1a4   : > { %v10952_v33 = vadd.f32 %v2217_v23, %v10877_v26  ;;  %v2219_v3 = vpop.f32.mrb[77].mxu1  ;;  %v1764_v62 = vpop.f32.mrb[63].mxu0  ;;  %v10955_v51 = vadd.f32 %v15799_v12, %v1762_v60  ;;  %v170_v23 = vlaneseq }
 0x1a5   : > { %v2220_v42 = vpop.f32.mrb[78].mxu1 }
 0x1a6   : > { %v10958_v29 = vadd.f32 %v2220_v42, %v10880_v59  ;;  %v2222_v45 = vpop.f32.mrb[79].mxu1  ;;  %v10987_v12 = vshrl.u32 %v170_v23, 7 }
 0x1a9   : > { %v1767_v44 = vpop.f32.mrb[64].mxu0 }
 0x1aa   : > { %v1769_v37 = vpop.f32.mrb[65].mxu0  ;;  %v10961_v38 = vadd.f32 %v15800_v25, %v1767_v44 }
 0x1ab   : > { %v2225_v0 = vpop.f32.mrb[80].mxu1  ;;  %v1770_v19 = vpop.f32.mrb[66].mxu0 }
 0x1ac   : > { %v10964_v26 = vadd.f32 %v2225_v0, %v10894_v54  ;;  %v2227_v17 = vpop.f32.mrb[81].mxu1  ;;  %v1772_v6 = vpop.f32.mrb[67].mxu0  ;;  %v10967_v61 = vadd.f32 %v15801_v56, %v1770_v19  ;;  %v15806_v19 = vld [vmem:[#allocation11_spill] sm:$0xff]  ;;  %v11006_v56 = vadd.s32 24, %v10987_v12 }
 0x1ad   : > { %v2228_v46 = vpop.f32.mrb[82].mxu1 }
 0x1ae   : > { %v10970_v59 = vadd.f32 %v2228_v46, %v10897_v32  ;;  %v2230_v1 = vpop.f32.mrb[83].mxu1  ;;  %v11009_v46 = vadd.s32 8, %v10987_v12 }
 0x1b1   : > { %v1775_v49 = vpop.f32.mrb[68].mxu0 }
 0x1b2   : > { %v10973_v11 = vadd.f32 %v15802_v24, %v1775_v49  ;;  %v1777_v5 = vpop.f32.mrb[69].mxu0 }
 0x1b3   : > { %v2233_v52 = vpop.f32.mrb[84].mxu1  ;;  %v1778_v10 = vpop.f32.mrb[70].mxu0 }
 0x1b4   : > { %v10976_v54 = vadd.f32 %v2233_v52, %v10909_v28  ;;  %v10979_v18 = vadd.f32 %v15803_v34, %v1778_v10  ;;  %v2235_v40 = vpop.f32.mrb[85].mxu1  ;;  %v1780_v48 = vpop.f32.mrb[71].mxu0  ;;  %v11021_v10 = vmul.u32.u64.low 3817748708, %v10987_v12  ;;  %v11022_v34 = vmul.u32.u64.high 3817748708, %v10987_v12, %v11021_v10 }
 0x1b5   : > { %v2236_v2 = vpop.f32.mrb[86].mxu1 }
 0x1b6   : > { %v10982_v32 = vadd.f32 %v2236_v2, %v10912_v39  ;;  %v2238_v36 = vpop.f32.mrb[87].mxu1 }
 0x1b7   : > { %v11031_v36 = vmul.u32.u64.low 3817748708, %v11006_v56  ;;  %v11032_v23 = vmul.u32.u64.high 3817748708, %v11006_v56, %v11031_v36 }
 0x1b9   : > { %v8996_v60 = vpop.f32.mrb[72].mxu0 }
 0x1ba   : > { %v10985_v3 = vadd.f32 %v8996_v60, %v10807_v22  ;;  %v2314_v62 = vpop.f32.mrb[73].mxu0 }
 0x1bb   : > { %v2241_v28 = vpop.f32.mrb[88].mxu1  ;;  %v10990_v42 = vadd.f32 %v2314_v62, %v10780_v63  ;;  %v8997_v45 = vpop.f32.mrb[74].mxu0  ;;  %v173_v63 = vadd.s32 16, %v10987_v12 }
 0x1bc   : > { %v10993_v44 = vadd.f32 %v2241_v28, %v10924_v8  ;;  %v2243_v37 = vpop.f32.mrb[89].mxu1  ;;  %v10996_v39 = vadd.f32 %v8997_v45, %v10813_v15  ;;  %v2317_v25 = vpop.f32.mrb[75].mxu0  ;;  %v11038_v62 = vmul.u32.u64.low 3817748708, %v11009_v46  ;;  %v11039_v28 = vmul.u32.u64.high 3817748708, %v11009_v46, %v11038_v62 }
 0x1bd   : > { %15804 = vst [vmem:[#allocation6_spill] sm:$0xff] %v10990_v42  ;;  %v2244_v0 = vpop.f32.mrb[90].mxu1  ;;  %v10999_v22 = vadd.f32 %v2317_v25, %v15806_v19  ;;  %v11014_v49 = vmul.u32.u64.low 3817748708, %v173_v63  ;;  %v11015_v24 = vmul.u32.u64.high 3817748708, %v173_v63, %v11014_v49  ;;  %v11048_v37 = vadd.s32 32, %v10987_v12 }
 0x1be   : > { %15805 = vst [vmem:[#allocation8_spill] sm:$0xff] %v10996_v39  ;;  %v11002_v17 = vadd.f32 %v2244_v0, %v10930_v13  ;;  %v2246_v6 = vpop.f32.mrb[91].mxu1  ;;  %v11051_v25 = vadd.s32 56, %v10987_v12 }
 0x1bf   : > { %15807 = vst [vmem:[#allocation9_spill] sm:$0xff] %v10999_v22  ;;  %v11330_v22 = vadd.s32 136, %v10987_v12 }
 0x1c1   : > { %v9000_v8 = vpop.f32.mrb[76].mxu0 }
 0x1c2   : > { %v11012_v15 = vadd.f32 %v9000_v8, %v10847_v9  ;;  %v2330_v1 = vpop.f32.mrb[77].mxu0 }
 0x1c3   : > { %v2249_v5 = vpop.f32.mrb[92].mxu1  ;;  %v11018_v13 = vadd.f32 %v2330_v1, %v10828_v7  ;;  %v9001_v52 = vpop.f32.mrb[78].mxu0  ;;  %v235_v1 = vshrl.u32 %v11015_v24, 4 }
 0x1c4   : > { %15808 = vst [vmem:[#allocation7_spill] sm:$0xff] %v11012_v15  ;;  %v11025_v40 = vadd.f32 %v2249_v5, %v10937_v50  ;;  %v2251_v48 = vpop.f32.mrb[93].mxu1  ;;  %v11028_v9 = vadd.f32 %v9001_v52, %v10852_v41  ;;  %v2333_v2 = vpop.f32.mrb[79].mxu0  ;;  %v11042_v50 = vadd.s32 48, %v10987_v12 }
 0x1c5   : > { %15809 = vst [vmem:[#allocation10_spill] sm:$0xff] %v11018_v13  ;;  %v2252_v60 = vpop.f32.mrb[94].mxu1  ;;  %v11035_v7 = vadd.f32 %v2333_v2, %v10833_v55  ;;  %v213_v48 = vshrl.u32 %v11022_v34, 4  ;;  %v11070_v2 = vmul.u32.u64.low 3817748708, %v11051_v25  ;;  %v11071_v36 = vmul.u32.u64.high 3817748708, %v11051_v25, %v11070_v2 }
 0x1c6   : > { %15810 = vst [vmem:[#allocation11_spill] sm:$0xff] %v11028_v9  ;;  %v11045_v45 = vadd.f32 %v2252_v60, %v10943_v14  ;;  %v2254_v41 = vpop.f32.mrb[95].mxu1  ;;  %v11054_v55 = vmul.u32.u64.low 3817748708, %v11042_v50  ;;  %v11055_v19 = vmul.u32.u64.high 3817748708, %v11042_v50, %v11054_v55  ;;  %v224_v34 = vshrl.u32 %v11039_v28, 4 }
 0x1c7   : > { %15811 = vst [vmem:[#allocation12_spill] sm:$0xff] %v11035_v7  ;;  %v11062_v14 = vmul.u32.u64.low 3817748708, %v11048_v37  ;;  %v11063_v49 = vmul.u32.u64.high 3817748708, %v11048_v37, %v11062_v14  ;;  %v246_v41 = vshrl.u32 %v11032_v23, 4 }
 0x1c8   : > { %v236_v14 = vmul.u32 18, %v235_v1 }
 0x1c9   : > { %v9004_v0 = vpop.f32.mrb[80].mxu0 }
 0x1ca   : > { %v11058_v6 = vadd.f32 %v9004_v0, %v10883_v31  ;;  %v2346_v8 = vpop.f32.mrb[81].mxu0 }
 0x1cb   : > { %v2257_v5 = vpop.f32.mrb[96].mxu1  ;;  %v11066_v52 = vadd.f32 %v2346_v8, %v10865_v43  ;;  %v9005_v10 = vpop.f32.mrb[82].mxu0 }
 0x1cc   : > { %15812 = vst [vmem:[#allocation13_spill] sm:$0xff] %v11058_v6  ;;  %v11074_v31 = vadd.f32 %v2257_v5, %v10949_v21  ;;  %v2259_v60 = vpop.f32.mrb[97].mxu1  ;;  %v11077_v24 = vadd.f32 %v9005_v10, %v10888_v57  ;;  %v2349_v62 = vpop.f32.mrb[83].mxu0  ;;  %v214_v21 = vmul.u32 18, %v213_v48  ;;  %v247_v5 = vmul.u32 18, %v246_v41 }
 0x1cd   : > { %15813 = vst [vmem:[#allocation14_spill] sm:$0xff] %v11066_v52  ;;  %v2260_v0 = vpop.f32.mrb[98].mxu1  ;;  %v11081_v43 = vadd.f32 %v2349_v62, %v10870_v20  ;;  %v225_v60 = vmul.u32 18, %v224_v34  ;;  %v279_v57 = vshrl.u32 %v11055_v19, 4  ;;  %v257_v20 = vshrl.u32 %v11063_v49, 4 }
 0x1ce   : > { %15814 = vst [vmem:[#allocation15_spill] sm:$0xff] %v11077_v24  ;;  %v11085_v55 = vadd.f32 %v2260_v0, %v10955_v51  ;;  %v2262_v8 = vpop.f32.mrb[99].mxu1  ;;  %v11091_v24 = vsub.s32 %v173_v63, %v236_v14  ;;  %v11098_v1 = vsub.s32 %v10987_v12, %v214_v21  ;;  %v290_v48 = vshrl.u32 %v11071_v36, 4 }
 0x1cf   : > { %15815 = vst [vmem:[#allocation16_spill] sm:$0xff] %v11081_v43  ;;  %v11102_v19 = vadd.s32 40, %v10987_v12  ;;  %v11117_v36 = vsub.s32 %v11009_v46, %v225_v60  ;;  %v280_v8 = vmul.u32 18, %v279_v57 }
 0x1d0   : > { %vm605_vm3 = vcmp.ne.s32.totalorder %v11091_v24, 0  ;;  %vm641_vm4 = vcmp.lt.s32.totalorder %v11091_v24, 0  ;;  %vm603_vm5 = vcmp.ne.s32.totalorder %v11098_v1, 0  ;;  %vm639_vm6 = vcmp.lt.s32.totalorder %v11098_v1, 0 }
 0x1d1   : > { %v9008_v2 = vpop.f32.mrb[84].mxu0  ;;  %v11129_v21 = vmul.u32.u64.low 3817748708, %v11102_v19  ;;  %v11130_v46 = vmul.u32.u64.high 3817748708, %v11102_v19, %v11129_v21  ;;  %vm604_vm9 = vcmp.ne.s32.totalorder %v11117_v36, 0  ;;  %vm640_vm10 = vcmp.lt.s32.totalorder %v11117_v36, 0  ;;  %vm11219_vm2 = vmand %vm641_vm4, %vm605_vm3 }
 0x1d2   : > { %v11089_v10 = vadd.f32 %v9008_v2, %v10915_v53  ;;  %v2362_v23 = vpop.f32.mrb[85].mxu0  ;;  %v11141_v2 = vadd.s32 64, %v10987_v12  ;;  %vm11240_vm3 = vmand %vm639_vm6, %vm603_vm5 }
 0x1d3   : > { %v2265_v28 = vpop.f32.mrb[100].mxu1  ;;  %v11095_v51 = vadd.f32 %v2362_v23, %v10900_v4  ;;  %v9009_v62 = vpop.f32.mrb[86].mxu0  ;;  %v11111_v4 = vsub.s32 %v11006_v56, %v247_v5  ;;  %v258_v56 = vmul.u32 18, %v257_v20  ;;  %v11133_v5 = vadd.s32 80, %v10987_v12  ;;  %vm11273_vm6 = vmand %vm640_vm10, %vm604_vm9 }
 0x1d4   : > { %15816 = vst [vmem:[#allocation17_spill] sm:$0xff] %v11089_v10  ;;  %v11105_v53 = vadd.f32 %v2265_v28, %v10961_v38  ;;  %v2267_v63 = vpop.f32.mrb[101].mxu1  ;;  %v11108_v41 = vadd.f32 %v9009_v62, %v10921_v58  ;;  %v2365_v49 = vpop.f32.mrb[87].mxu0  ;;  %v11125_v58 = vadd.s32 18, %v11091_v24  ;;  %v11149_v23 = vsub.s32 %v11042_v50, %v280_v8 }
 0x1d5   : > { %15817 = vst [vmem:[#allocation18_spill] sm:$0xff] %v11095_v51  ;;  %v2268_v0 = vpop.f32.mrb[102].mxu1  ;;  %v11114_v34 = vadd.f32 %v2365_v49, %v10905_v27  ;;  %v291_v27 = vmul.u32 18, %v290_v48  ;;  %vm606_vm7 = vcmp.ne.s32.totalorder %v11111_v4, 0  ;;  %vm642_vm8 = vcmp.lt.s32.totalorder %v11111_v4, 0 }
 0x1d6   : > { %15818 = vst [vmem:[#allocation19_spill] sm:$0xff] %v11108_v41  ;;  %v11120_v14 = vadd.f32 %v2268_v0, %v10967_v61  ;;  %v2270_v38 = vpop.f32.mrb[103].mxu1  ;;  %v11137_v61 = vadd.s32 18, %v11098_v1  ;;  %v11145_v57 = vadd.s32 18, %v11111_v4  ;;  %15820 = vst [vmem:[#allocation21_spill] sm:$0xff] %v11149_v23  ;;  %v11156_v62 = vsub.s32 %v11048_v37, %v258_v56 }
 0x1d7   : > { %15819 = vst [vmem:[#allocation20_spill] sm:$0xff] %v11114_v34  ;;  %v11159_v48 = vadd.s32 88, %v10987_v12  ;;  %v11165_v50 = vsub.s32 %v11051_v25, %v291_v27  ;;  %v11185_v27 = vadd.s32 18, %v11117_v36  ;;  %vm609_vm11 = vcmp.ne.s32.totalorder %v11149_v23, 0  ;;  %vm11260_vm4 = vmand %vm642_vm8, %vm606_vm7 }
 0x1d8   : > { %vm645_vm12 = vcmp.lt.s32.totalorder %v11149_v23, 0  ;;  %vm607_vm13 = vcmp.ne.s32.totalorder %v11156_v62, 0  ;;  %vm643_vm14 = vcmp.lt.s32.totalorder %v11156_v62, 0  ;;  %v11249_v10 = vadd.s32 128, %v10987_v12 }
 0x1d9   : > { %v9012_v60 = vpop.f32.mrb[88].mxu0  ;;  %15823 = vst [vmem:[#allocation24_spill] sm:$0xff] %v11165_v50  ;;  %vm610_vm15 = vcmp.ne.s32.totalorder %v11165_v50, 0  ;;  %vm646_vm5 = vcmp.lt.s32.totalorder %v11165_v50, 0  ;;  %vm11291_vm7 = vmand %vm645_vm12, %vm609_vm11 }
 0x1da   : > { %v11152_v20 = vadd.f32 %v9012_v60, %v10940_v35  ;;  %v2378_v28 = vpop.f32.mrb[89].mxu0  ;;  %v11168_v35 = vmul.u32.u64.low 3817748708, %v11133_v5  ;;  %v11169_v8 = vmul.u32.u64.high 3817748708, %v11133_v5, %v11168_v35  ;;  %vm11306_vm8 = vmand %vm643_vm14, %vm607_vm13 }
 0x1db   : > { %v2273_v63 = vpop.f32.mrb[104].mxu1  ;;  %v11162_v49 = vadd.f32 %v2378_v28, %v10927_v47  ;;  %v9013_v0 = vpop.f32.mrb[90].mxu0  ;;  %v11178_v60 = vmul.u32.u64.low 3817748708, %v11141_v2  ;;  %v11179_v47 = vmul.u32.u64.high 3817748708, %v11141_v2, %v11178_v60  ;;  %v11204_v35 = vadd.s32 18, %v11156_v62  ;;  %vm11322_vm9 = vmand %vm646_vm5, %vm610_vm15 }
 0x1dc   : > { %15821 = vst [vmem:[#allocation22_spill] sm:$0xff] %v11152_v20  ;;  %v11172_v38 = vadd.f32 %v2273_v63, %v10973_v11  ;;  %v2275_v37 = vpop.f32.mrb[105].mxu1  ;;  %v11175_v56 = vadd.f32 %v9013_v0, %v10946_v16  ;;  %v2381_v21 = vpop.f32.mrb[91].mxu0  ;;  %v11189_v11 = vadd.s32 72, %v10987_v12  ;;  %v11196_v0 = vadd.s32 18, %v11149_v23 }
 0x1dd   : > { %15822 = vst [vmem:[#allocation23_spill] sm:$0xff] %v11162_v49  ;;  %v2276_v28 = vpop.f32.mrb[106].mxu1  ;;  %v11182_v25 = vadd.f32 %v2381_v21, %v10934_v30  ;;  %v11199_v30 = vadd.s32 112, %v10987_v12  ;;  %v268_v37 = vshrl.u32 %v11130_v46, 4  ;;  %v11213_v60 = vadd.s32 96, %v10987_v12 }
 0x1de   : > { %15824 = vst [vmem:[#allocation25_spill] sm:$0xff] %v11175_v56  ;;  %v11192_v16 = vadd.f32 %v2276_v28, %v10979_v18  ;;  %v2278_v63 = vpop.f32.mrb[107].mxu1  ;;  %v11209_v18 = vmul.u32.u64.low 3817748708, %v11159_v48  ;;  %v11210_v21 = vmul.u32.u64.high 3817748708, %v11159_v48, %v11209_v18  ;;  %v11228_v20 = vadd.s32 120, %v10987_v12 }
 0x1df   : > { %15825 = vst [vmem:[#allocation26_spill] sm:$0xff] %v11182_v25  ;;  %v11224_v46 = vmul.u32.u64.low 3817748708, %v11189_v11  ;;  %v11225_v56 = vmul.u32.u64.high 3817748708, %v11189_v11, %v11224_v46  ;;  %v11231_v18 = vadd.s32 104, %v10987_v12  ;;  %v323_v43 = vshrl.u32 %v11169_v8, 4 }
 0x1e0   : > { %v11245_v46 = vmul.u32.u64.low 3817748708, %v11199_v30  ;;  %v11246_v34 = vmul.u32.u64.high 3817748708, %v11199_v30, %v11245_v46  ;;  %v301_v6 = vshrl.u32 %v11179_v47, 4 }
 0x1e1   : > { %v9016_v28 = vpop.f32.mrb[92].mxu0  ;;  %v269_v46 = vmul.u32 18, %v268_v37  ;;  %v11279_v7 = vmul.u32.u64.low 3817748708, %v11213_v60  ;;  %v11280_v37 = vmul.u32.u64.high 3817748708, %v11213_v60, %v11279_v7 }
 0x1e2   : > { %v11234_v25 = vadd.f32 %v9016_v28, %v10964_v26  ;;  %v2394_v49 = vpop.f32.mrb[93].mxu0  ;;  %v11315_v9 = vmul.u32.u64.low 3817748708, %v11249_v10  ;;  %v11316_v13 = vmul.u32.u64.high 3817748708, %v11249_v10, %v11315_v9  ;;  %v324_v15 = vmul.u32 18, %v323_v43 }
 0x1e3   : > { %v11252_v51 = vadd.f32 %v2394_v49, %v10952_v33  ;;  %v11254_v26 = vpop.f32.mrb[108].mxu1  ;;  %v9017_v28 = vpop.f32.mrb[94].mxu0  ;;  %v302_v39 = vmul.u32 18, %v301_v6  ;;  %v312_v6 = vshrl.u32 %v11225_v56, 4 }
 0x1e4   : > { %15828 = vst [vmem:[#allocation27_spill] sm:$0xff] %v11234_v25  ;;  %v15832_v25 = vmov 0  ;;  %v11267_v52 = vadd.f32 %v9017_v28, %v10970_v59  ;;  %v3178_v33 = vpop.f32.mrb[109].mxu1  ;;  %v2397_v49 = vpop.f32.mrb[95].mxu0  ;;  %v15839_v28 = vmov 0 }
 0x1e5   : > { %15831 = vst [vmem:[#allocation28_spill] sm:$0xff] %v11252_v51  ;;  %v15833_v25 = vsel %vm11260_vm4, 4294967295, %v15832_v25  ;;  %v11283_v8 = vadd.f32 %v2397_v49, %v10958_v29  ;;  %v11285_v59 = vpop.f32.mrb[110].mxu1  ;;  %v15840_v28 = vsel %vm11291_vm7, 4294967295, %v15839_v28  ;;  %v11296_v33 = vadd.s32 18, %v11165_v50 }
 0x1e6   : > { %15834 = vst [vmem:[#allocation29_spill] sm:$0xff] %v11267_v52  ;;  %15838 = vst [vmem:[#allocation31_spill] sm:$0xff] %v11285_v59  ;;  %v11299_v47 = vmul.u32.u64.low 3817748708, %v11228_v20  ;;  %v11300_v52 = vmul.u32.u64.high 3817748708, %v11228_v20, %v11299_v47  ;;  %v3181_v7 = vpop.f32.mrb[111].mxu1  ;;  %v15842_v29 = vmov 0 }
 0x1e7   : > { %15837 = vst [vmem:[#allocation30_spill] sm:$0xff] %v11283_v8  ;;  %15841 = vst [vmem:[#allocation32_spill] sm:$0xff] %v11296_v33  ;;  %v15843_v29 = vsel %vm11306_vm8, 4294967295, %v15842_v29  ;;  %v11311_v49 = vmul.u32.u64.low 3817748708, %v11231_v18  ;;  %v11312_v8 = vmul.u32.u64.high 3817748708, %v11231_v18, %v11311_v49  ;;  %v15844_v47 = vmov 0 }
 0x1e8   : > { %v15845_v47 = vsel %vm11322_vm9, 4294967295, %v15844_v47  ;;  %v11327_v7 = vsub.s32 %v11102_v19, %v269_v46  ;;  %v334_v59 = vshrl.u32 %v11210_v21, 4  ;;  %v367_v49 = vshrl.u32 %v11246_v34, 4 }
 0x1e9   : > { %15846 = vst [vmem:[#allocation33_spill] sm:$0xff] %v15845_v47  ;;  %v9020_v42 = vpop.f32.mrb[96].mxu0 }
 0x1ea   : > { %v11355_v21 = vadd.f32 %v9020_v42, %v10993_v44  ;;  %v2410_v9 = vpop.f32.mrb[97].mxu0  ;;  %vm608_vm10 = vcmp.ne.s32.totalorder %v11327_v7, 0  ;;  %v11373_v44 = vsub.s32 %v11133_v5, %v324_v15  ;;  %vm644_vm11 = vcmp.lt.s32.totalorder %v11327_v7, 0 }
 0x1eb   : > { %v11367_v46 = vadd.f32 %v2410_v9, %v10976_v54  ;;  %v11369_v56 = vpop.f32.mrb[112].mxu1  ;;  %v9021_v42 = vpop.f32.mrb[98].mxu0  ;;  %v11383_v54 = vsub.s32 %v11141_v2, %v302_v39  ;;  %v335_v9 = vmul.u32 18, %v334_v59  ;;  %v313_v5 = vmul.u32 18, %v312_v6  ;;  %vm11462_vm0 = vmand %vm644_vm11, %vm608_vm10 }
 0x1ec   : > { %15847 = vst [vmem:[#allocation34_spill] sm:$0xff] %v11355_v21  ;;  %v11376_v43 = vmul.u32.u64.low 3817748708, %v11330_v22  ;;  %v11377_v21 = vmul.u32.u64.high 3817748708, %v11330_v22, %v11376_v43  ;;  %v11380_v47 = vadd.f32 %v9021_v42, %v11002_v17  ;;  %v3186_v19 = vpop.f32.mrb[113].mxu1  ;;  %v2413_v34 = vpop.f32.mrb[99].mxu0  ;;  %v368_v42 = vmul.u32 18, %v367_v49 }
 0x1ed   : > { %15848 = vst [vmem:[#allocation35_spill] sm:$0xff] %v11367_v46  ;;  %v345_v46 = vshrl.u32 %v11280_v37, 4  ;;  %v11387_v50 = vadd.f32 %v2413_v34, %v10982_v32  ;;  %v11389_v15 = vpop.f32.mrb[114].mxu1  ;;  %v378_v43 = vshrl.u32 %v11300_v52, 4  ;;  %v11394_v19 = vadd.s32 18, %v11327_v7 }
 0x1ee   : > { %15849 = vst [vmem:[#allocation36_spill] sm:$0xff] %v11380_v47  ;;  %v3189_v17 = vpop.f32.mrb[115].mxu1  ;;  %v356_v39 = vshrl.u32 %v11312_v8, 4  ;;  %v389_v2 = vshrl.u32 %v11316_v13, 4  ;;  %vm613_vm12 = vcmp.ne.s32.totalorder %v11373_v44, 0  ;;  %vm649_vm13 = vcmp.lt.s32.totalorder %v11373_v44, 0 }
 0x1ef   : > { %15850 = vst [vmem:[#allocation37_spill] sm:$0xff] %v11387_v50  ;;  %v11401_v32 = vadd.s32 18, %v11373_v44  ;;  %v11404_v37 = vadd.s32 144, %v10987_v12  ;;  %vm611_vm14 = vcmp.ne.s32.totalorder %v11383_v54, 0  ;;  %v11409_v52 = vsub.s32 %v11159_v48, %v335_v9  ;;  %vm11478_vm15 = vmand %vm649_vm13, %vm613_vm12 }
 0x1f0   : > { %v346_v8 = vmul.u32 18, %v345_v46  ;;  %v11412_v13 = vadd.s32 18, %v11383_v54  ;;  %v11415_v49 = vsub.s32 %v11189_v11, %v313_v5  ;;  %v379_v6 = vmul.u32 18, %v378_v43 }
 0x1f1   : > { %v9024_v59 = vpop.f32.mrb[100].mxu0  ;;  %v11418_v34 = vadd.s32 152, %v10987_v12  ;;  %v11424_v50 = vsub.s32 %v11199_v30, %v368_v42  ;;  %v357_v48 = vmul.u32 18, %v356_v39  ;;  %v390_v46 = vmul.u32 18, %v389_v2 }
 0x1f2   : > { %v11421_v17 = vadd.f32 %v9024_v59, %v11074_v31  ;;  %v2426_v47 = vpop.f32.mrb[101].mxu0  ;;  %v400_v5 = vshrl.u32 %v11377_v21, 4  ;;  %v11433_v43 = vmul.u32.u64.low 3817748708, %v11404_v37  ;;  %v11434_v23 = vmul.u32.u64.high 3817748708, %v11404_v37, %v11433_v43 }
 0x1f3   : > { %15851 = vst [vmem:[#allocation38_spill] sm:$0xff] %v11418_v34  ;;  %15853 = vst [vmem:[#allocation40_spill] sm:$0xff] %v11424_v50  ;;  %v11427_v9 = vadd.f32 %v2426_v47, %v11025_v40  ;;  %v11429_v33 = vpop.f32.mrb[116].mxu1  ;;  %v9025_v11 = vpop.f32.mrb[102].mxu0  ;;  %v11442_v40 = vsub.s32 %v11213_v60, %v346_v8  ;;  %v11450_v42 = vadd.s32 18, %v11409_v52  ;;  %v11456_v39 = vadd.s32 160, %v10987_v12 }
 0x1f4   : > { %15852 = vst [vmem:[#allocation39_spill] sm:$0xff] %v11421_v17  ;;  %v11437_v31 = vadd.f32 %v9025_v11, %v11085_v55  ;;  %v3194_v59 = vpop.f32.mrb[117].mxu1  ;;  %v2429_v30 = vpop.f32.mrb[103].mxu0  ;;  %v11453_v55 = vsub.s32 %v11228_v20, %v379_v6  ;;  %v11472_v20 = vsub.s32 %v11231_v18, %v357_v48  ;;  %v15862_v8 = vmov 0 }
 0x1f5   : > { %15854 = vst [vmem:[#allocation41_spill] sm:$0xff] %v11427_v9  ;;  %v11445_v47 = vadd.f32 %v2429_v30, %v11045_v45  ;;  %v11447_v21 = vpop.f32.mrb[118].mxu1  ;;  %15859 = vst [vmem:[#allocation46_spill] sm:$0xff] %v11456_v39  ;;  %v11469_v45 = vadd.s32 18, %v11415_v49  ;;  %v15863_v8 = vsel %vm11478_vm15, 4294967295, %v15862_v8  ;;  %v11485_v6 = vsub.s32 %v11249_v10, %v390_v46 }
 0x1f6   : > { %15855 = vst [vmem:[#allocation42_spill] sm:$0xff] %v11437_v31  ;;  %15857 = vst [vmem:[#allocation44_spill] sm:$0xff] %v11447_v21  ;;  %v3197_v2 = vpop.f32.mrb[119].mxu1  ;;  %v401_v11 = vmul.u32 18, %v400_v5  ;;  %vm15865_vm5 = vcmp.lt.s32.totalorder %v11383_v54, 0  ;;  %v11496_v48 = vadd.s32 18, %v11424_v50  ;;  %v752_v41 = vsel %vm11462_vm0, %v11394_v19, %v11327_v7 }
 0x1f7   : > { %15856 = vst [vmem:[#allocation43_spill] sm:$0xff] %v11445_v47  ;;  %15858 = vst [vmem:[#allocation45_spill] sm:$0xff] %v11453_v55  ;;  %v11500_v43 = vmul.u32.u64.low 3817748708, %v11418_v34  ;;  %v11501_v59 = vmul.u32.u64.high 3817748708, %v11418_v34, %v11500_v43  ;;  %vm15869_vm13 = vcmp.ne.s32.totalorder %v11409_v52, 0  ;;  %vm15870_vm11 = vcmp.lt.s32.totalorder %v11409_v52, 0 }
 0x1f8   : > { %15864 = vst [vmem:[#allocation47_spill] sm:$0xff] %v11485_v6  ;;  %vm11491_vm1 = vmand %vm15865_vm5, %vm611_vm14  ;;  %v11513_v5 = vadd.s32 18, %v11442_v40  ;;  %v11517_v30 = vadd.s32 168, %v10987_v12  ;;  %vm15874_vm12 = vcmp.ne.s32.totalorder %v11415_v49, 0  ;;  %vm654_vm14 = vcmp.lt.s32.totalorder %v11453_v55, 0  ;;  %v15972_v31 = vld [vmem:[#allocation12_spill] sm:$0xff] }
 0x1f9   : > { %15868 = vst [vmem:[#allocation48_spill] sm:$0xff] %v11496_v48  ;;  %v9028_v10 = vpop.f32.mrb[104].mxu0  ;;  %vm11507_vm10 = vmand %vm15870_vm11, %vm15869_vm13  ;;  %vm15875_vm11 = vcmp.lt.s32.totalorder %v11415_v49, 0  ;;  %vm15879_vm7 = vcmp.ne.s32.totalorder %v11424_v50, 0  ;;  %vm15880_vm8 = vcmp.lt.s32.totalorder %v11424_v50, 0  ;;  %v11548_v47 = vsub.s32 %v11330_v22, %v401_v11 }
 0x1fa   : > { %v11520_v2 = vadd.f32 %v9028_v10, %v11172_v38  ;;  %v2442_v43 = vpop.f32.mrb[105].mxu0  ;;  %vm11526_vm13 = vmand %vm15875_vm11, %vm15874_vm12  ;;  %v411_v9 = vshrl.u32 %v11434_v23, 4  ;;  %vm15885_vm5 = vcmp.ne.s32.totalorder %v11442_v40, 0  ;;  %vm15886_vm9 = vcmp.lt.s32.totalorder %v11442_v40, 0 }
 0x1fb   : > { %v11534_v17 = vadd.f32 %v2442_v43, %v11105_v53  ;;  %v11536_v38 = vpop.f32.mrb[120].mxu1  ;;  %v9029_v10 = vpop.f32.mrb[106].mxu0  ;;  %vm11542_vm12 = vmand %vm15880_vm8, %vm15879_vm7  ;;  %15883 = vst [vmem:[#allocation51_spill] sm:$0xff] %v11548_v47  ;;  %vm655_vm8 = vcmp.lt.s32.totalorder %v11485_v6, 0  ;;  %v11564_v22 = vmul.u32.u64.low 3817748708, %v11456_v39  ;;  %v11565_v11 = vmul.u32.u64.high 3817748708, %v11456_v39, %v11564_v22 }
 0x1fc   : > { %15873 = vst [vmem:[#allocation49_spill] sm:$0xff] %v11520_v2  ;;  %v11552_v53 = vadd.f32 %v9029_v10, %v11192_v16  ;;  %v3202_v43 = vpop.f32.mrb[121].mxu1  ;;  %vm11558_vm7 = vmand %vm15886_vm9, %vm15885_vm5  ;;  %vm15890_vm11 = vcmp.ne.s32.totalorder %v11453_v55, 0  ;;  %v15891_v10 = vmov 0  ;;  %v15900_v21 = vmov 0 }
 0x1fd   : > { %15878 = vst [vmem:[#allocation50_spill] sm:$0xff] %v11534_v17  ;;  %v2445_v17 = vpop.f32.mrb[107].mxu0  ;;  %v11570_v16 = vpop.f32.mrb[122].mxu1  ;;  %vm11576_vm4 = vmand %vm654_vm14, %vm15890_vm11  ;;  %v11581_v43 = vadd.s32 18, %v11453_v55  ;;  %vm15904_vm5 = vcmp.lt.s32.totalorder %v11472_v20, 0  ;;  %vm15908_vm0 = vcmp.ne.s32.totalorder %v11485_v6, 0  ;;  %v15912_v60 = vsel %vm11219_vm2, %v11125_v58, %v11091_v24 }
 0x1fe   : > { %15884 = vst [vmem:[#allocation52_spill] sm:$0xff] %v11552_v53  ;;  %v11568_v23 = vadd.f32 %v2445_v17, %v11120_v14  ;;  %v15892_v10 = vsel %vm11576_vm4, 4294967295, %v15891_v10  ;;  %v11584_v53 = vmul.u32.u64.low 3817748708, %v11517_v30  ;;  %v11585_v39 = vmul.u32.u64.high 3817748708, %v11517_v30, %v11584_v53  ;;  %v3205_v22 = vpop.f32.mrb[123].mxu1  ;;  %v15932_v55 = vld [vmem:[#allocation6_spill] sm:$0xff] }
 0x1ff   : > { %15893 = vst [vmem:[#allocation54_spill] sm:$0xff] %v15892_v10  ;;  %15894 = vst [vmem:[#allocation55_spill] sm:$0xff] %v11581_v43  ;;  %v15895_v14 = vsel %vm11240_vm3, %v11137_v61, %v11098_v1  ;;  %v15896_v17 = vmov 0  ;;  %vm15903_vm3 = vcmp.ne.s32.totalorder %v11472_v20, 0  ;;  %v11625_v61 = vadd.s32 18, %v11485_v6 }
 0x200   : > { %15889 = vst [vmem:[#allocation53_spill] sm:$0xff] %v11568_v23  ;;  %vm11592_vm9 = vcmp.lt.s32.totalorder %v15895_v14, 16  ;;  %v15899_v23 = vsel %vm11273_vm6, %v11185_v27, %v11117_v36  ;;  %vm11617_vm11 = vmand %vm15904_vm5, %vm15903_vm3  ;;  %v11622_v36 = vadd.s32 18, %v11472_v20  ;;  %v15909_v7 = vmov 0 }
 0x201   : > { %v15897_v17 = vsel %vm11592_vm9, 4294967295, %v15896_v17  ;;  %vm11601_vm14 = vcmp.lt.s32.totalorder %v15899_v23, 16  ;;  %15907 = vst [vmem:[#allocation58_spill] sm:$0xff] %v11625_v61  ;;  %vm11635_vm6 = vmand %vm655_vm8, %vm15908_vm0  ;;  %vm620_vm3 = vcmp.ne.s32.totalorder %v11548_v47, 0  ;;  %vm656_vm5 = vcmp.lt.s32.totalorder %v11548_v47, 0  ;;  %v9048_v58 = vpop.f32.mrb[108].mxu0 }
 0x202   : > { %15898 = vst [vmem:[#allocation56_spill] sm:$0xff] %v15897_v17  ;;  %v15901_v21 = vsel %vm11601_vm14, 4294967295, %v15900_v21  ;;  %v15910_v7 = vsel %vm11635_vm6, 4294967295, %v15909_v7  ;;  %v412_v19 = vmul.u32 18, %v411_v9  ;;  %vm11646_vm15 = vcmp.lt.s32.totalorder %v15912_v60, 16  ;;  %vm11699_vm0 = vmand %vm656_vm5, %vm620_vm3 }
 0x203   : > { %15902 = vst [vmem:[#allocation57_spill] sm:$0xff] %v15901_v21  ;;  %15911 = vst [vmem:[#allocation59_spill] sm:$0xff] %v15910_v7  ;;  %v15913_v53 = vmov 0  ;;  %v422_v24 = vshrl.u32 %v11501_v59, 4  ;;  %v11672_v60 = vadd.s32 18, %v11548_v47  ;;  %v11675_v23 = vadd.s32 176, %v10987_v12 }
 0x204   : > { %v15914_v53 = vsel %vm11646_vm15, 4294967295, %v15913_v53  ;;  %v3362_v63 = vadd.f32 %v9048_v58, %v11369_v56  ;;  %v3353_v59 = vpop.f32.mrb[109].mxu0  ;;  %vm15918_vm2 = vnez %v15833_v25  ;;  %v15920_v9 = vmov 0  ;;  %v11706_v25 = vpop.f32.mrb[124].mxu1 }
 0x205   : > { %15915 = vst [vmem:[#allocation60_spill] sm:$0xff] %v15914_v53  ;;  %15916 = vst [vmem:[#allocation61_spill] sm:$0xff] %v11672_v60  ;;  %v15919_v1 = vsel %vm15918_vm2, %v11145_v57, %v11111_v4  ;;  %v15923_v4 = vmov 0  ;;  %v11704_v57 = vadd.s32 184, %v10987_v12  ;;  %v9049_v58 = vpop.f32.mrb[110].mxu0  ;;  %v11710_v14 = vsub.s32 %v11404_v37, %v412_v19  ;;  %v3210_v6 = vpop.f32.mrb[125].mxu1 }
 0x206   : > { %15917 = vst [vmem:[#allocation62_spill] sm:$0xff] %v11675_v23  ;;  %vm11683_vm8 = vcmp.lt.s32.totalorder %v15919_v1, 16  ;;  %v15924_v4 = vsel %vm11699_vm0, 4294967295, %v15923_v4  ;;  %v3354_v1 = vadd.f32 %v3353_v59, %v11254_v26  ;;  %v11713_v56 = vadd.s32 192, %v10987_v12  ;;  %v3356_v7 = vpop.f32.mrb[111].mxu0  ;;  %v15934_v6 = vld [vmem:[#allocation31_spill] sm:$0xff] }
 0x207   : > { %v15921_v9 = vsel %vm11683_vm8, 4294967295, %v15920_v9  ;;  %15925 = vst [vmem:[#allocation64_spill] sm:$0xff] %v15924_v4  ;;  %15926 = vst [vmem:[#allocation65_spill] sm:$0xff] %v11704_v57  ;;  %v11716_v22 = vadd.s32 200, %v10987_v12  ;;  %v11719_v27 = vadd.f32 %v3362_v63, %v10985_v3  ;;  %v3365_v61 = vadd.f32 %v9049_v58, %v11389_v15  ;;  %v11735_v3 = vpop.f32.mrb[126].mxu1  ;;  %v15948_v60 = vld [vmem:[#allocation33_spill] sm:$0xff] }
 0x208   : > { %15922 = vst [vmem:[#allocation63_spill] sm:$0xff] %v15921_v9  ;;  %vm15927_vm3 = vnez %v15843_v29  ;;  %v15929_v37 = vmov 0  ;;  %v423_v19 = vmul.u32 18, %v422_v24  ;;  %v433_v59 = vshrl.u32 %v11565_v11, 4  ;;  %v3213_v24 = vpop.f32.mrb[127].mxu1  ;;  %v15950_v4 = vld [vmem:[#allocation32_spill] sm:$0xff] }
 0x209   : > { %v15928_v26 = vsel %vm15927_vm3, %v11204_v35, %v11156_v62  ;;  %v11733_v43 = vadd.f32 %v3354_v1, %v15932_v55  ;;  %v3357_v15 = vadd.f32 %v3356_v7, %v15934_v6  ;;  %v444_v62 = vshrl.u32 %v11585_v39, 4  ;;  %v15935_v35 = vld [vmem:[#allocation8_spill] sm:$0xff] }
 0x20a   : > { %vm11727_vm5 = vcmp.lt.s32.totalorder %v15928_v26, 16  ;;  %v11744_v63 = vadd.f32 %v3365_v61, %v15935_v35  ;;  %vm11746_vm2 = vcmp.lt.s32.totalorder %v752_v41, 16  ;;  %v15936_v11 = vmov 0  ;;  %v15940_v26 = vld [vmem:[#allocation9_spill] sm:$0xff] }
 0x20b   : > { %v15930_v37 = vsel %vm11727_vm5, 4294967295, %v15929_v37  ;;  %15933 = vst [vmem:[#allocation6_spill] sm:$0xff] %v11733_v43  ;;  %v15937_v11 = vsel %vm11746_vm2, 4294967295, %v15936_v11  ;;  %v11751_v55 = vmul.u32.u64.low 3817748708, %v11675_v23  ;;  %v11752_v1 = vmul.u32.u64.high 3817748708, %v11675_v23, %v11751_v55  ;;  %v15943_v41 = vld [vmem:[#allocation21_spill] sm:$0xff] }
 0x20c   : > { %15931 = vst [vmem:[#allocation66_spill] sm:$0xff] %v15930_v37  ;;  %15938 = vst [vmem:[#allocation31_spill] sm:$0xff] %v15937_v11  ;;  %v11755_v7 = vadd.s32 208, %v10987_v12  ;;  %v3682_v58 = vmul.f32 %v11733_v43, %v11733_v43  ;;  %v11760_v39 = vadd.f32 %v3357_v15, %v15940_v26  ;;  %vm621_vm3 = vcmp.ne.s32.totalorder %v11710_v14, 0 }
 0x20d   : > { %vm15942_vm6 = vnez %v15840_v28  ;;  %v15945_v6 = vmov 0  ;;  %v11774_v35 = vadd.s32 18, %v11710_v14  ;;  %v434_v24 = vmul.u32 18, %v433_v59  ;;  %v9052_v59 = vpop.f32.mrb[112].mxu0 }
 0x20e   : > { %15939 = vst [vmem:[#allocation8_spill] sm:$0xff] %v11755_v7  ;;  %15941 = vst [vmem:[#allocation9_spill] sm:$0xff] %v11760_v39  ;;  %v15944_v61 = vsel %vm15942_vm6, %v11196_v0, %v15943_v41  ;;  %v11777_v15 = vmul.u32.u64.low 3817748708, %v11704_v57  ;;  %v11778_v55 = vmul.u32.u64.high 3817748708, %v11704_v57, %v11777_v15  ;;  %v3684_v26 = vmul.f32 %v11719_v27, %v11719_v27  ;;  %v3369_v47 = vpop.f32.mrb[113].mxu0  ;;  %v15951_v57 = vld [vmem:[#allocation24_spill] sm:$0xff] }
 0x20f   : > { %vm11769_vm4 = vcmp.lt.s32.totalorder %v15944_v61, 16  ;;  %v3604_v0 = vsel %vm11592_vm9, %v11733_v43, 0.0  ;;  %v3605_v28 = vsel %vm11601_vm14, %v11760_v39, 0.0  ;;  %v3683_v41 = vmul.f32 %v11760_v39, %v11760_v39 }
 0x210   : > { %v15946_v6 = vsel %vm11769_vm4, 4294967295, %v15945_v6  ;;  %v3685_v61 = vmul.f32 %v11744_v63, %v11744_v63  ;;  %v3640_v29 = vadd.f32 %v3605_v28, %v3604_v0  ;;  %v3378_v15 = vadd.f32 %v9052_v59, %v11536_v38  ;;  %v3216_v28 = vpop.f32.mrb[128].mxu1  ;;  %v9053_v59 = vpop.f32.mrb[114].mxu0 }
 0x211   : > { %15947 = vst [vmem:[#allocation21_spill] sm:$0xff] %v15946_v6  ;;  %vm15949_vm6 = vnez %v15948_v60  ;;  %v15953_v23 = vmov 0  ;;  %v445_v10 = vmul.u32 18, %v444_v62  ;;  %v3606_v39 = vsel %vm11646_vm15, %v11719_v27, 0.0  ;;  %v3218_v62 = vpop.f32.mrb[129].mxu1  ;;  %v3372_v48 = vpop.f32.mrb[115].mxu0 }
 0x212   : > { %v15952_v43 = vsel %vm15949_vm6, %v15950_v4, %v15951_v57  ;;  %v3718_v0 = vsel %vm11592_vm9, %v3682_v58, 0.0  ;;  %v3719_v38 = vsel %vm11601_vm14, %v3683_v41, 0.0  ;;  %v3370_v60 = vadd.f32 %v3369_v47, %v11429_v33  ;;  %v15956_v57 = vld [vmem:[#allocation7_spill] sm:$0xff] }
 0x213   : > { %vm11799_vm0 = vcmp.lt.s32.totalorder %v15952_v43, 16  ;;  %v3641_v4 = vadd.f32 %v3640_v29, %v3606_v39  ;;  %v3754_v43 = vadd.f32 %v3719_v38, %v3718_v0  ;;  %v11812_v7 = vadd.f32 %v3378_v15, %v15956_v57  ;;  %v15961_v29 = vld [vmem:[#allocation10_spill] sm:$0xff]  ;;  %v15962_v15 = vld [vmem:[#allocation44_spill] sm:$0xff] }
 0x214   : > { %v15954_v23 = vsel %vm11799_vm0, 4294967295, %v15953_v23  ;;  %v3381_v50 = vadd.f32 %v9053_v59, %v11570_v16  ;;  %v15957_v58 = vsel %vm11491_vm1, %v11412_v13, %v11383_v54  ;;  %v15958_v41 = vmov 0  ;;  %v3219_v16 = vpop.f32.mrb[130].mxu1  ;;  %v15970_v59 = vld [vmem:[#allocation38_spill] sm:$0xff] }
 0x215   : > { %15955 = vst [vmem:[#allocation33_spill] sm:$0xff] %v15954_v23  ;;  %vm11820_vm6 = vcmp.lt.s32.totalorder %v15957_v58, 16  ;;  %v3720_v33 = vsel %vm11646_vm15, %v3684_v26, 0.0  ;;  %v3607_v47 = vsel %vm11683_vm8, %v11744_v63, 0.0  ;;  %v11830_v39 = vadd.f32 %v3370_v60, %v15961_v29  ;;  %v3221_v38 = vpop.f32.mrb[131].mxu1 }
 0x216   : > { %v15959_v41 = vsel %vm11820_vm6, 4294967295, %v15958_v41  ;;  %v3373_v18 = vadd.f32 %v3372_v48, %v15962_v15  ;;  %vm15963_vm1 = vcmp.lt.s32.totalorder %v11710_v14, 0  ;;  %v3721_v13 = vsel %vm11683_vm8, %v3685_v61, 0.0 }
 0x217   : > { %15960 = vst [vmem:[#allocation32_spill] sm:$0xff] %v15959_v41  ;;  %vm11837_vm9 = vmand %vm15963_vm1, %vm621_vm3  ;;  %v3755_v26 = vadd.f32 %v3754_v43, %v3720_v33  ;;  %v3642_v0 = vadd.f32 %v3641_v4, %v3607_v47  ;;  %v15966_v60 = vsel %vm11526_vm13, %v11469_v45, %v11415_v49  ;;  %v15967_v48 = vmov 0  ;;  %v15971_v4 = vld [vmem:[#allocation11_spill] sm:$0xff]  ;;  %v15978_v47 = vld [vmem:[#allocation46_spill] sm:$0xff] }
 0x218   : > { %vm11848_vm15 = vcmp.lt.s32.totalorder %v15966_v60, 16  ;;  %v11853_v57 = vsub.s32 %v15970_v59, %v423_v19  ;;  %v3608_v62 = vsel %vm11727_vm5, %v11830_v39, 0.0  ;;  %v3686_v61 = vmul.f32 %v11830_v39, %v11830_v39 }
 0x219   : > { %v15968_v48 = vsel %vm11848_vm15, 4294967295, %v15967_v48  ;;  %v11861_v43 = vadd.f32 %v3381_v50, %v15971_v4  ;;  %v11864_v58 = vadd.f32 %v3373_v18, %v15972_v31  ;;  %v3643_v49 = vadd.f32 %v3642_v0, %v3608_v62  ;;  %v3224_v62 = vpop.f32.mrb[132].mxu1 }
 0x21a   : > { %15969 = vst [vmem:[#allocation24_spill] sm:$0xff] %v15968_v48  ;;  %v3756_v45 = vadd.f32 %v3755_v26, %v3721_v13  ;;  %vm15973_vm13 = vnez %v15863_v8  ;;  %v15975_v33 = vmov 0  ;;  %v11880_v29 = vsub.s32 %v15978_v47, %v434_v24 }
 0x21b   : > { %v15974_v19 = vsel %vm15973_vm13, %v11401_v32, %v11373_v44  ;;  %v3688_v15 = vmul.f32 %v11812_v7, %v11812_v7  ;;  %v3722_v8 = vsel %vm11727_vm5, %v3686_v61, 0.0  ;;  %v3609_v44 = vsel %vm11746_vm2, %v11864_v58, 0.0  ;;  %v9056_v32 = vpop.f32.mrb[116].mxu0 }
 0x21c   : > { %vm11871_vm3 = vcmp.lt.s32.totalorder %v15974_v19, 16  ;;  %v11890_v18 = vsub.s32 %v11517_v30, %v445_v10  ;;  %v3757_v13 = vadd.f32 %v3756_v45, %v3722_v8  ;;  %v3644_v26 = vadd.f32 %v3643_v49, %v3609_v44  ;;  %v3385_v38 = vpop.f32.mrb[117].mxu0  ;;  %v15983_v45 = vld [vmem:[#allocation13_spill] sm:$0xff]  ;;  %v15984_v8 = vld [vmem:[#allocation14_spill] sm:$0xff] }
 0x21d   : > { %v15976_v33 = vsel %vm11871_vm3, 4294967295, %v15975_v33  ;;  %v3687_v24 = vmul.f32 %v11864_v58, %v11864_v58  ;;  %v3394_v0 = vadd.f32 %v9056_v32, %v3216_v28  ;;  %v3610_v60 = vsel %vm11769_vm4, %v11812_v7, 0.0  ;;  %v9057_v28 = vpop.f32.mrb[118].mxu0 }
 0x21e   : > { %15977 = vst [vmem:[#allocation7_spill] sm:$0xff] %v15976_v33  ;;  %v3689_v59 = vmul.f32 %v11861_v43, %v11861_v43  ;;  %v3386_v61 = vadd.f32 %v3385_v38, %v11706_v25  ;;  %v15979_v30 = vsel %vm11507_vm10, %v11450_v42, %v11409_v52  ;;  %v15980_v10 = vmov 0  ;;  %v3226_v25 = vpop.f32.mrb[133].mxu1  ;;  %v3388_v46 = vpop.f32.mrb[119].mxu0  ;;  %v16023_v33 = vld [vmem:[#allocation59_spill] sm:$0xff] }
 0x21f   : > { %vm11905_vm1 = vcmp.lt.s32.totalorder %v15979_v30, 16  ;;  %v455_v4 = vshrl.u32 %v11752_v1, 4  ;;  %v3645_v31 = vadd.f32 %v3644_v26, %v3610_v60  ;;  %v3723_v49 = vsel %vm11746_vm2, %v3687_v24, 0.0  ;;  %v3227_v32 = vpop.f32.mrb[134].mxu1 }
 0x220   : > { %v15981_v10 = vsel %vm11905_vm1, 4294967295, %v15980_v10  ;;  %v11913_v19 = vadd.f32 %v3394_v0, %v15983_v45  ;;  %v3397_v47 = vadd.f32 %v9057_v28, %v3219_v16  ;;  %v3611_v52 = vsel %vm11799_vm0, %v11861_v43, 0.0 }
 0x221   : > { %15982 = vst [vmem:[#allocation10_spill] sm:$0xff] %v15981_v10  ;;  %v3758_v42 = vadd.f32 %v3757_v13, %v3723_v49  ;;  %v11919_v44 = vadd.f32 %v3386_v61, %v15984_v8  ;;  %v3389_v26 = vadd.f32 %v3388_v46, %v11735_v3  ;;  %v15985_v24 = vsel %vm11558_vm7, %v11513_v5, %v11442_v40  ;;  %v15989_v13 = vld [vmem:[#allocation15_spill] sm:$0xff]  ;;  %v3229_v61 = vpop.f32.mrb[135].mxu1  ;;  %v15990_v5 = vld [vmem:[#allocation16_spill] sm:$0xff] }
 0x222   : > { %vm11927_vm10 = vcmp.lt.s32.totalorder %v15985_v24, 16  ;;  %v15986_v0 = vmov 0  ;;  %v3724_v16 = vsel %vm11769_vm4, %v3688_v15, 0.0  ;;  %v3646_v38 = vadd.f32 %v3645_v31, %v3611_v52  ;;  %v9060_v52 = vpop.f32.mrb[120].mxu0  ;;  %v3232_v61 = vpop.f32.mrb[136].mxu1 }
 0x223   : > { %v15987_v0 = vsel %vm11927_vm10, 4294967295, %v15986_v0  ;;  %v11934_v60 = vadd.f32 %v3397_v47, %v15989_v13  ;;  %v11937_v30 = vadd.s32 216, %v10987_v12  ;;  %v3759_v3 = vadd.f32 %v3758_v42, %v3724_v16  ;;  %v3401_v16 = vpop.f32.mrb[121].mxu0 }
 0x224   : > { %15988 = vst [vmem:[#allocation44_spill] sm:$0xff] %v15987_v0  ;;  %v3612_v34 = vsel %vm11820_vm6, %v11919_v44, 0.0  ;;  %v3690_v40 = vmul.f32 %v11919_v44, %v11919_v44  ;;  %v11945_v28 = vadd.f32 %v3389_v26, %v15990_v5  ;;  %v3725_v15 = vsel %vm11799_vm0, %v3689_v59, 0.0  ;;  %v16022_v0 = vld [vmem:[#allocation62_spill] sm:$0xff] }
 0x225   : > { %v3647_v31 = vadd.f32 %v3646_v38, %v3612_v34  ;;  %v11952_v49 = vmul.u32.u64.low 3817748708, %v11713_v56  ;;  %v11953_v45 = vmul.u32.u64.high 3817748708, %v11713_v56, %v11952_v49  ;;  %v3760_v47 = vadd.f32 %v3759_v3, %v3725_v15  ;;  %v9061_v34 = vpop.f32.mrb[122].mxu0 }
 0x226   : > { %v3726_v25 = vsel %vm11820_vm6, %v3690_v40, 0.0  ;;  %v3613_v46 = vsel %vm11848_vm15, %v11945_v28, 0.0  ;;  %v3691_v59 = vmul.f32 %v11945_v28, %v11945_v28  ;;  %v15991_v42 = vsel %vm11617_vm11, %v11622_v36, %v11472_v20  ;;  %v3404_v49 = vpop.f32.mrb[123].mxu0 }
 0x227   : > { %vm11967_vm13 = vcmp.lt.s32.totalorder %v15991_v42, 16  ;;  %v15992_v8 = vmov 0  ;;  %v3692_v26 = vmul.f32 %v11913_v19, %v11913_v19  ;;  %v3648_v24 = vadd.f32 %v3647_v31, %v3613_v46  ;;  %v3234_v31 = vpop.f32.mrb[137].mxu1  ;;  %v15995_v42 = vld [vmem:[#allocation18_spill] sm:$0xff] }
 0x228   : > { %v15993_v8 = vsel %vm11967_vm13, 4294967295, %v15992_v8  ;;  %v11975_v38 = vmul.u32.u64.low 3817748708, %v11716_v22  ;;  %v11976_v13 = vmul.u32.u64.high 3817748708, %v11716_v22, %v11975_v38  ;;  %v3614_v51 = vsel %vm11871_vm3, %v11913_v19, 0.0 }
 0x229   : > { %15994 = vst [vmem:[#allocation38_spill] sm:$0xff] %v15993_v8  ;;  %v3761_v20 = vadd.f32 %v3760_v47, %v3726_v25  ;;  %v3727_v36 = vsel %vm11848_vm15, %v3691_v59, 0.0  ;;  %v3402_v3 = vadd.f32 %v3401_v16, %v3224_v62  ;;  %v3693_v40 = vmul.f32 %v11934_v60, %v11934_v60  ;;  %v3235_v25 = vpop.f32.mrb[138].mxu1 }
 0x22a   : > { %v3649_v5 = vadd.f32 %v3648_v24, %v3614_v51  ;;  %v3410_v15 = vadd.f32 %v9060_v52, %v3232_v61  ;;  %v3405_v47 = vadd.f32 %v3404_v49, %v3227_v32  ;;  %v466_v59 = vshrl.u32 %v11778_v55, 4  ;;  %v15996_v52 = vld [vmem:[#allocation17_spill] sm:$0xff]  ;;  %v3237_v61 = vpop.f32.mrb[139].mxu1  ;;  %v16003_v49 = vld [vmem:[#allocation20_spill] sm:$0xff] }
 0x22b   : > { %v3762_v46 = vadd.f32 %v3761_v20, %v3727_v36  ;;  %v11987_v38 = vadd.f32 %v3402_v3, %v15995_v42  ;;  %v3728_v62 = vsel %vm11871_vm3, %v3692_v26, 0.0  ;;  %v3615_v24 = vsel %vm11905_vm1, %v11934_v60, 0.0  ;;  %v15997_v36 = vld [vmem:[#allocation48_spill] sm:$0xff] }
 0x22c   : > { %v11996_v16 = vadd.f32 %v3410_v15, %v15996_v52  ;;  %v3413_v51 = vadd.f32 %v9061_v34, %v3235_v25  ;;  %v15998_v3 = vld [vmem:[#allocation40_spill] sm:$0xff]  ;;  %v16000_v55 = vmov 0  ;;  %v3650_v26 = vadd.f32 %v3649_v5, %v3615_v24  ;;  %v16004_v15 = vld [vmem:[#allocation19_spill] sm:$0xff] }
 0x22d   : > { %v3763_v20 = vadd.f32 %v3762_v46, %v3728_v62  ;;  %v15999_v32 = vsel %vm11542_vm12, %v15997_v36, %v15998_v3  ;;  %v3694_v31 = vmul.f32 %v11987_v38, %v11987_v38  ;;  %v12010_v42 = vadd.f32 %v3405_v47, %v16003_v49  ;;  %v12022_v62 = vpop.f32.mrb[124].mxu0  ;;  %v16005_v52 = vld [vmem:[#allocation8_spill] sm:$0xff]  ;;  %v3240_v49 = vpop.f32.mrb[140].mxu1 }
 0x22e   : > { %vm12003_vm11 = vcmp.lt.s32.totalorder %v15999_v32, 16  ;;  %v3729_v34 = vsel %vm11905_vm1, %v3693_v40, 0.0  ;;  %v3616_v2 = vsel %vm11927_vm10, %v11987_v38, 0.0  ;;  %v12018_v46 = vadd.f32 %v3413_v51, %v16004_v15  ;;  %v3417_v3 = vpop.f32.mrb[125].mxu0  ;;  %v16008_v51 = vld [vmem:[#allocation55_spill] sm:$0xff] }
 0x22f   : > { %v16001_v55 = vsel %vm12003_vm11, 4294967295, %v16000_v55  ;;  %v456_v25 = vmul.u32 18, %v455_v4  ;;  %v3764_v5 = vadd.f32 %v3763_v20, %v3729_v34  ;;  %v467_v24 = vmul.u32 18, %v466_v59  ;;  %v16006_v4 = vld [vmem:[#allocation54_spill] sm:$0xff]  ;;  %v16009_v59 = vld [vmem:[#allocation45_spill] sm:$0xff]  ;;  %v16041_v34 = vld [vmem:[#allocation51_spill] sm:$0xff] }
 0x230   : > { %16002 = vst [vmem:[#allocation11_spill] sm:$0xff] %v16001_v55  ;;  %v12025_v47 = vmul.u32.u64.low 3817748708, %v16005_v52  ;;  %v12026_v61 = vmul.u32.u64.high 3817748708, %v16005_v52, %v12025_v47  ;;  %v3730_v40 = vsel %vm11927_vm10, %v3694_v31, 0.0  ;;  %v3695_v36 = vmul.f32 %v12010_v42, %v12010_v42  ;;  %v12043_v31 = vpop.f32.mrb[126].mxu0 }
 0x231   : > { %v3651_v1 = vadd.f32 %v3650_v26, %v3616_v2  ;;  %vm16007_vm1 = vnez %v16006_v4  ;;  %v16011_v32 = vmov 0  ;;  %vm16014_vm10 = vcmp.ne.s32.totalorder %v11853_v57, 0 }
 0x232   : > { %v16010_v20 = vsel %vm16007_vm1, %v16008_v51, %v16009_v59  ;;  %vm16015_vm15 = vcmp.lt.s32.totalorder %v11853_v57, 0  ;;  %v12054_v26 = vadd.s32 18, %v11853_v57  ;;  %v12057_v2 = vadd.s32 18, %v11880_v29  ;;  %v3242_v51 = vpop.f32.mrb[141].mxu1  ;;  %v3420_v59 = vpop.f32.mrb[127].mxu0 }
 0x233   : > { %vm12039_vm3 = vcmp.lt.s32.totalorder %v16010_v20, 16  ;;  %vm12049_vm12 = vmand %vm16015_vm15, %vm16014_vm10  ;;  %v477_v15 = vshrl.u32 %v11953_v45, 4  ;;  %v3617_v47 = vsel %vm11967_vm13, %v12010_v42, 0.0  ;;  %v3418_v4 = vadd.f32 %v3417_v3, %v3240_v49  ;;  %v16025_v3 = vld [vmem:[#allocation58_spill] sm:$0xff]  ;;  %v16026_v49 = vld [vmem:[#allocation47_spill] sm:$0xff]  ;;  %v3243_v41 = vpop.f32.mrb[142].mxu1 }
 0x234   : > { %v16012_v32 = vsel %vm12039_vm3, 4294967295, %v16011_v32  ;;  %vm16018_vm15 = vcmp.ne.s32.totalorder %v11880_v29, 0  ;;  %vm16019_vm1 = vcmp.lt.s32.totalorder %v11880_v29, 0  ;;  %v12072_v50 = vadd.s32 18, %v11890_v18  ;;  %v3245_v6 = vpop.f32.mrb[143].mxu1 }
 0x235   : > { %16013 = vst [vmem:[#allocation12_spill] sm:$0xff] %v16012_v32  ;;  %vm12067_vm10 = vmand %vm16019_vm1, %vm16018_vm15  ;;  %v12075_v45 = vsub.s32 %v16022_v0, %v456_v25  ;;  %v3765_v10 = vadd.f32 %v3764_v5, %v3730_v40  ;;  %vm16024_vm7 = vnez %v16023_v33  ;;  %v16028_v48 = vmov 0  ;;  %v16035_v0 = vld [vmem:[#allocation65_spill] sm:$0xff] }
 0x236   : > { %v16027_v51 = vsel %vm16024_vm7, %v16025_v3, %v16026_v49  ;;  %vm16031_vm15 = vcmp.ne.s32.totalorder %v11890_v18, 0  ;;  %vm16032_vm1 = vcmp.lt.s32.totalorder %v11890_v18, 0  ;;  %v12095_v25 = vsub.s32 %v16035_v0, %v467_v24  ;;  %v16036_v3 = vld [vmem:[#allocation23_spill] sm:$0xff] }
 0x237   : > { %vm12082_vm6 = vcmp.lt.s32.totalorder %v16027_v51, 16  ;;  %vm12090_vm0 = vmand %vm16032_vm1, %vm16031_vm15  ;;  %v12098_v33 = vmul.u32.u64.low 3817748708, %v11937_v30  ;;  %v12099_v5 = vmul.u32.u64.high 3817748708, %v11937_v30, %v12098_v33  ;;  %v3731_v40 = vsel %vm11967_vm13, %v3695_v36, 0.0 }
 0x238   : > { %v16029_v48 = vsel %vm12082_vm6, 4294967295, %v16028_v48  ;;  %v12104_v49 = vadd.f32 %v3418_v4, %v16036_v3  ;;  %v3421_v51 = vadd.f32 %v3420_v59, %v3243_v41  ;;  %v488_v11 = vshrl.u32 %v11976_v13, 4  ;;  %v16037_v33 = vld [vmem:[#allocation26_spill] sm:$0xff]  ;;  %v16038_v13 = vld [vmem:[#allocation64_spill] sm:$0xff] }
 0x239   : > { %16030 = vst [vmem:[#allocation46_spill] sm:$0xff] %v16029_v48  ;;  %v3652_v37 = vadd.f32 %v3651_v1, %v3617_v47  ;;  %v766_v24 = vsel %vm12049_vm12, %v12054_v26, %v11853_v57  ;;  %v478_v0 = vmul.u32 18, %v477_v15  ;;  %v12112_v9 = vadd.s32 224, %v10987_v12  ;;  %v16040_v1 = vld [vmem:[#allocation61_spill] sm:$0xff]  ;;  %v12136_v47 = vpop.f32.mrb[128].mxu0 }
 0x23a   : > { %v3696_v36 = vmul.f32 %v11996_v16, %v11996_v16  ;;  %v12117_v4 = vadd.f32 %v3421_v51, %v16037_v33  ;;  %v767_v6 = vsel %vm12067_vm10, %v12057_v2, %v11880_v29  ;;  %v3766_v57 = vadd.f32 %v3765_v10, %v3731_v40  ;;  %v3433_v2 = vpop.f32.mrb[129].mxu0 }
 0x23b   : > { %vm16039_vm7 = vnez %v16038_v13  ;;  %v16043_v15 = vmov 0  ;;  %vm625_vm15 = vcmp.ne.s32.totalorder %v12075_v45, 0  ;;  %vm661_vm10 = vcmp.lt.s32.totalorder %v12075_v45, 0  ;;  %v12157_v33 = vpop.f32.mrb[130].mxu0 }
 0x23c   : > { %v16042_v26 = vsel %vm16039_vm7, %v16040_v1, %v16041_v34  ;;  %v499_v29 = vshrl.u32 %v12026_v61, 4  ;;  %v3618_v10 = vsel %vm12003_vm11, %v11996_v16, 0.0  ;;  %v12145_v59 = vadd.s32 18, %v12075_v45  ;;  %v3248_v61 = vpop.f32.mrb[144].mxu1  ;;  %v3436_v54 = vpop.f32.mrb[131].mxu0  ;;  %vm12189_vm1 = vmand %vm661_vm10, %vm625_vm15 }
 0x23d   : > { %vm12132_vm12 = vcmp.lt.s32.totalorder %v16042_v26, 16  ;;  %v489_v20 = vmul.u32 18, %v488_v11  ;;  %v3653_v40 = vadd.f32 %v3652_v37, %v3618_v10  ;;  %v16046_v3 = vsel %vm11837_vm9, %v11774_v35, %v11710_v14  ;;  %v3250_v35 = vpop.f32.mrb[145].mxu1 }
 0x23e   : > { %v16044_v15 = vsel %vm12132_vm12, 4294967295, %v16043_v15  ;;  %vm12153_vm7 = vcmp.lt.s32.totalorder %v16046_v3, 16  ;;  %v16047_v51 = vmov 0  ;;  %v12160_v13 = vsub.s32 %v11713_v56, %v478_v0  ;;  %v3251_v10 = vpop.f32.mrb[146].mxu1 }
 0x23f   : > { %16045 = vst [vmem:[#allocation13_spill] sm:$0xff] %v16044_v15  ;;  %v16048_v51 = vsel %vm12153_vm7, 4294967295, %v16047_v51  ;;  %v12163_v1 = vmul.u32.u64.low 3817748708, %v12112_v9  ;;  %v12164_v34 = vmul.u32.u64.high 3817748708, %v12112_v9, %v12163_v1  ;;  %v3732_v37 = vsel %vm12003_vm11, %v3696_v36, 0.0 }
 0x240   : > { %16049 = vst [vmem:[#allocation14_spill] sm:$0xff] %v16048_v51  ;;  %v3697_v14 = vmul.f32 %v12018_v46, %v12018_v46  ;;  %v3426_v11 = vadd.f32 %v12022_v62, %v3248_v61  ;;  %vm662_vm9 = vcmp.lt.s32.totalorder %v12095_v25, 0  ;;  %v3767_v26 = vadd.f32 %v3766_v57, %v3732_v37  ;;  %v16050_v62 = vld [vmem:[#allocation22_spill] sm:$0xff]  ;;  %v3253_v57 = vpop.f32.mrb[147].mxu1 }
 0x241   : > { %v12173_v56 = vadd.s32 18, %v12095_v25  ;;  %v500_v0 = vmul.u32 18, %v499_v29  ;;  %v510_v3 = vshrl.u32 %v12099_v5, 4  ;;  %v3619_v36 = vsel %vm12039_vm3, %v12018_v46, 0.0 }
 0x242   : > { %v3698_v1 = vmul.f32 %v12104_v49, %v12104_v49  ;;  %v12182_v61 = vadd.f32 %v3426_v11, %v16050_v62  ;;  %v3429_v35 = vadd.f32 %v12043_v31, %v3251_v10  ;;  %v3654_v5 = vadd.f32 %v3653_v40, %v3619_v36  ;;  %v16059_v10 = vld [vmem:[#allocation25_spill] sm:$0xff] }
 0x243   : > { %vm12193_vm11 = vcmp.lt.s32.totalorder %v766_v24, 16  ;;  %v16053_v37 = vmov 0  ;;  %vm16056_vm13 = vcmp.ne.s32.totalorder %v12095_v25, 0  ;;  %vm627_vm2 = vcmp.ne.s32.totalorder %v12160_v13, 0 }
 0x244   : > { %v16054_v37 = vsel %vm12193_vm11, 4294967295, %v16053_v37  ;;  %vm12199_vm4 = vmand %vm662_vm9, %vm16056_vm13  ;;  %vm663_vm5 = vcmp.lt.s32.totalorder %v12160_v13, 0  ;;  %v12206_v31 = vsub.s32 %v11716_v22, %v489_v20  ;;  %v3733_v40 = vsel %vm12039_vm3, %v3697_v14, 0.0  ;;  %v12227_v20 = vpop.f32.mrb[132].mxu0 }
 0x245   : > { %16055 = vst [vmem:[#allocation15_spill] sm:$0xff] %v16054_v37  ;;  %v3620_v24 = vsel %vm12082_vm6, %v12104_v49, 0.0  ;;  %v12214_v36 = vadd.f32 %v3429_v35, %v16059_v10  ;;  %v12217_v62 = vadd.s32 232, %v10987_v12  ;;  %v3768_v57 = vadd.f32 %v3767_v26, %v3733_v40  ;;  %vm12247_vm15 = vmand %vm663_vm5, %vm627_vm2  ;;  %v3256_v10 = vpop.f32.mrb[148].mxu1 }
 0x246   : > { %vm12219_vm13 = vcmp.lt.s32.totalorder %v767_v6, 16  ;;  %v16061_v41 = vmov 0  ;;  %v769_v22 = vsel %vm12189_vm1, %v12145_v59, %v12075_v45  ;;  %v12230_v14 = vadd.s32 18, %v12160_v13  ;;  %v12251_v59 = vpop.f32.mrb[133].mxu0  ;;  %v3258_v55 = vpop.f32.mrb[149].mxu1 }
 0x247   : > { %16060 = vst [vmem:[#allocation16_spill] sm:$0xff] %v12214_v36  ;;  %v16062_v41 = vsel %vm12219_vm13, 4294967295, %v16061_v41  ;;  %v12233_v35 = vadd.s32 240, %v10987_v12  ;;  %v3734_v26 = vsel %vm12082_vm6, %v3698_v1, 0.0  ;;  %v3699_v6 = vmul.f32 %v12117_v4, %v12117_v4  ;;  %v12256_v48 = vpop.f32.mrb[134].mxu0 }
 0x248   : > { %16063 = vst [vmem:[#allocation18_spill] sm:$0xff] %v16062_v41  ;;  %v770_v29 = vsel %vm12199_vm4, %v12173_v56, %v12095_v25  ;;  %v12254_v1 = vsub.s32 %v16005_v52, %v500_v0  ;;  %v3655_v40 = vadd.f32 %v3654_v5, %v3620_v24  ;;  %vm628_vm10 = vcmp.ne.s32.totalorder %v12206_v31, 0  ;;  %v12265_v52 = vpop.f32.mrb[135].mxu0  ;;  %v3259_v24 = vpop.f32.mrb[150].mxu1 }
 0x249   : > { %vm664_vm4 = vcmp.lt.s32.totalorder %v12206_v31, 0  ;;  %v511_v25 = vmul.u32 18, %v510_v3  ;;  %v3621_v56 = vsel %vm12132_vm12, %v12117_v4, 0.0  ;;  %v3700_v11 = vmul.f32 %v12182_v61, %v12182_v61 }
 0x24a   : > { %v3434_v32 = vadd.f32 %v3433_v2, %v3256_v10  ;;  %v521_v0 = vshrl.u32 %v12164_v34, 4  ;;  %v3769_v5 = vadd.f32 %v3768_v57, %v3734_v26  ;;  %v16066_v3 = vsel %vm12090_vm0, %v12072_v50, %v11890_v18  ;;  %v16070_v18 = vld [vmem:[#allocation28_spill] sm:$0xff]  ;;  %v3261_v10 = vpop.f32.mrb[151].mxu1  ;;  %vm12301_vm2 = vmand %vm664_vm4, %vm628_vm10 }
 0x24b   : > { %vm12273_vm5 = vcmp.lt.s32.totalorder %v16066_v3, 16  ;;  %v16067_v8 = vmov 0  ;;  %v771_v55 = vsel %vm12247_vm15, %v12230_v14, %v12160_v13  ;;  %v736_v2 = vadd.s32 18, %v12206_v31 }
 0x24c   : > { %v16068_v8 = vsel %vm12273_vm5, 4294967295, %v16067_v8  ;;  %v12283_v34 = vadd.s32 248, %v10987_v12  ;;  %v3735_v23 = vsel %vm12132_vm12, %v3699_v6, 0.0  ;;  %v3622_v50 = vsel %vm12153_vm7, %v12182_v61, 0.0  ;;  %v16077_v6 = vld [vmem:[#allocation30_spill] sm:$0xff] }
 0x24d   : > { %16069 = vst [vmem:[#allocation17_spill] sm:$0xff] %v16068_v8  ;;  %v12291_v57 = vadd.f32 %v3434_v32, %v16070_v18  ;;  %v3437_v26 = vadd.f32 %v3436_v54, %v3259_v24  ;;  %v3656_v3 = vadd.f32 %v3655_v40, %v3621_v56  ;;  %vm12293_vm0 = vcmp.lt.s32.totalorder %v769_v22, 16  ;;  %v12317_v18 = vpop.f32.mrb[136].mxu0 }
 0x24e   : > { %v16072_v13 = vmov 0  ;;  %vm629_vm1 = vcmp.ne.s32.totalorder %v12254_v1, 0  ;;  %vm665_vm9 = vcmp.lt.s32.totalorder %v12254_v1, 0  ;;  %v12308_v32 = vsub.s32 %v11937_v30, %v511_v25 }
 0x24f   : > { %16071 = vst [vmem:[#allocation48_spill] sm:$0xff] %v12291_v57  ;;  %v16073_v13 = vsel %vm12293_vm0, 4294967295, %v16072_v13  ;;  %v3736_v54 = vsel %vm12153_vm7, %v3700_v11, 0.0  ;;  %v3701_v22 = vmul.f32 %v12214_v36, %v12214_v36  ;;  %v12315_v45 = vadd.f32 %v3437_v26, %v16077_v6 }
 0x250   : > { %16074 = vst [vmem:[#allocation40_spill] sm:$0xff] %v16073_v13  ;;  %v522_v40 = vmul.u32 18, %v521_v0  ;;  %v3770_v56 = vadd.f32 %v3769_v5, %v3735_v23  ;;  %v3657_v24 = vadd.f32 %v3656_v3, %v3622_v50  ;;  %v3623_v30 = vsel %vm12193_vm11, %v12214_v36, 0.0  ;;  %v12334_v5 = vpop.f32.mrb[137].mxu0  ;;  %v3264_v50 = vpop.f32.mrb[152].mxu1  ;;  %v16095_v13 = vld [vmem:[#allocation35_spill] sm:$0xff] }
 0x251   : > { %16078 = vst [vmem:[#allocation20_spill] sm:$0xff] %v12315_v45  ;;  %v12320_v10 = vmul.u32.u64.low 3817748708, %v12217_v62  ;;  %v12321_v15 = vmul.u32.u64.high 3817748708, %v12217_v62, %v12320_v10  ;;  %v3702_v25 = vmul.f32 %v12291_v57, %v12291_v57  ;;  %v772_v11 = vsel %vm12301_vm2, %v736_v2, %v12206_v31  ;;  %v12345_v14 = vpop.f32.mrb[138].mxu0  ;;  %vm12377_vm2 = vmand %vm665_vm9, %vm629_vm1 }
 0x252   : > { %v12332_v0 = vadd.s32 18, %v12254_v1  ;;  %v3771_v23 = vadd.f32 %v3770_v56, %v3736_v54  ;;  %vm12336_vm15 = vcmp.lt.s32.totalorder %v770_v29, 16  ;;  %v16079_v26 = vmov 0  ;;  %v3266_v54 = vpop.f32.mrb[153].mxu1  ;;  %v12353_v6 = vpop.f32.mrb[139].mxu0 }
 0x253   : > { %v16080_v26 = vsel %vm12336_vm15, 4294967295, %v16079_v26  ;;  %vm630_vm10 = vcmp.ne.s32.totalorder %v12308_v32, 0  ;;  %vm666_vm4 = vcmp.lt.s32.totalorder %v12308_v32, 0  ;;  %v12343_v3 = vadd.s32 18, %v12308_v32  ;;  %v3267_v51 = vpop.f32.mrb[154].mxu1 }
 0x254   : > { %16081 = vst [vmem:[#allocation19_spill] sm:$0xff] %v16080_v26  ;;  %v3737_v31 = vsel %vm12193_vm11, %v3701_v22, 0.0  ;;  %v3624_v2 = vsel %vm12219_vm13, %v12291_v57, 0.0  ;;  %v3442_v29 = vadd.f32 %v12136_v47, %v3264_v50  ;;  %v12356_v56 = vadd.s32 256, %v10987_v12  ;;  %v16082_v50 = vld [vmem:[#allocation27_spill] sm:$0xff] }
 0x255   : > { %v3658_v10 = vadd.f32 %v3657_v24, %v3623_v30  ;;  %v12359_v53 = vsub.s32 %v12112_v9, %v522_v40  ;;  %v12362_v37 = vmul.u32.u64.low 3817748708, %v12233_v35  ;;  %v12363_v22 = vmul.u32.u64.high 3817748708, %v12233_v35, %v12362_v37  ;;  %v3269_v24 = vpop.f32.mrb[155].mxu1 }
 0x256   : > { %v3738_v17 = vsel %vm12219_vm13, %v3702_v25, 0.0  ;;  %v3703_v47 = vmul.f32 %v12315_v45, %v12315_v45  ;;  %v12370_v54 = vadd.f32 %v3442_v29, %v16082_v50  ;;  %v3445_v21 = vadd.f32 %v12157_v33, %v3267_v51  ;;  %vm12385_vm13 = vmand %vm666_vm4, %vm630_vm10  ;;  %v9471_v25 = vld [vmem:[%s15556_s2 + $0x140] sm:$0xff]  }
 0x257   : > { %v3772_v37 = vadd.f32 %v3771_v23, %v3737_v31  ;;  %v3659_v40 = vadd.f32 %v3658_v10, %v3624_v2  ;;  %v12390_v51 = vmul.u32.u64.low 3817748708, %v12283_v34  ;;  %v12391_v33 = vmul.u32.u64.high 3817748708, %v12283_v34, %v12390_v51  ;;  %v16088_v2 = vld [vmem:[#allocation29_spill] sm:$0xff]  ;;  %9082 = vmatprep.subr.bf16.mxu1 %v9471_v25 }
 0x258   : > { %16083 = vst [vmem:[#allocation8_spill] sm:$0xff] %v12370_v54  ;;  %v3625_v23 = vsel %vm12273_vm5, %v12315_v45, 0.0  ;;  %v3704_v31 = vmul.f32 %v12370_v54, %v12370_v54  ;;  %v12402_v29 = vadd.f32 %v3445_v21, %v16088_v2  ;;  %vm12404_vm1 = vcmp.lt.s32.totalorder %v771_v55, 16  ;;  %v12417_v45 = vpop.f32.mrb[140].mxu0  ;;  %9083 = vmatpush3.bf16.msra.mxu1 %v9471_v25 }
 0x259   : > { %v16089_v10 = vmov 0  ;;  %v3773_v50 = vadd.f32 %v3772_v37, %v3738_v17  ;;  %vm12408_vm9 = vcmp.lt.s32.totalorder %v772_v11, 16  ;;  %v16092_v24 = vmov 0  ;;  %v12428_v11 = vpop.f32.mrb[141].mxu0 }
 0x25a   : > { %v16090_v10 = vsel %vm12404_vm1, 4294967295, %v16089_v10  ;;  %v16093_v24 = vsel %vm12408_vm9, 4294967295, %v16092_v24  ;;  %v773_v51 = vsel %vm12377_vm2, %v12332_v0, %v12254_v1  ;;  %v532_v41 = vshrl.u32 %v12321_v15, 4  ;;  %v3272_v0 = vpop.f32.mrb[156].mxu1  ;;  %v12438_v37 = vpop.f32.mrb[142].mxu0 }
 0x25b   : > { %16091 = vst [vmem:[#allocation54_spill] sm:$0xff] %v16090_v10  ;;  %16094 = vst [vmem:[#allocation55_spill] sm:$0xff] %v16093_v24  ;;  %v3739_v21 = vsel %vm12273_vm5, %v3703_v47, 0.0  ;;  %v3626_v17 = vsel %vm12293_vm0, %v12370_v54, 0.0  ;;  %v774_v55 = vsel %vm12385_vm13, %v12343_v3, %v12308_v32  ;;  %v12431_v1 = vadd.s32 264, %v10987_v12  ;;  %v3274_v2 = vpop.f32.mrb[157].mxu1 }
 0x25c   : > { %v3660_v15 = vadd.f32 %v3659_v40, %v3625_v23  ;;  %vm631_vm10 = vcmp.ne.s32.totalorder %v12359_v53, 0  ;;  %v12435_v47 = vmul.u32.u64.low 3817748708, %v12356_v56  ;;  %v12436_v9 = vmul.u32.u64.high 3817748708, %v12356_v56, %v12435_v47  ;;  %v12446_v40 = vpop.f32.mrb[143].mxu0  ;;  %v3275_v8 = vpop.f32.mrb[158].mxu1 }
 0x25d   : > { %v3740_v30 = vsel %vm12293_vm0, %v3704_v31, 0.0  ;;  %v3705_v32 = vmul.f32 %v12402_v29, %v12402_v29  ;;  %v3450_v3 = vadd.f32 %v12251_v59, %v3272_v0  ;;  %vm667_vm13 = vcmp.lt.s32.totalorder %v12359_v53, 0  ;;  %v3277_v0 = vpop.f32.mrb[159].mxu1 }
 0x25e   : > { %v3774_v25 = vadd.f32 %v3773_v50, %v3739_v21  ;;  %v3661_v23 = vadd.f32 %v3660_v15, %v3626_v17  ;;  %v12449_v47 = vadd.s32 18, %v12359_v53  ;;  %v533_v54 = vmul.u32 18, %v532_v41  ;;  %vm12461_vm4 = vmand %vm667_vm13, %vm631_vm10 }
 0x25f   : > { %v3627_v31 = vsel %vm12336_vm15, %v12402_v29, 0.0  ;;  %v12455_v57 = vadd.f32 %v3450_v3, %v16095_v13  ;;  %v3453_v59 = vadd.f32 %v12265_v52, %v3275_v8  ;;  %v543_v2 = vshrl.u32 %v12363_v22, 4  ;;  %v16099_v22 = vld [vmem:[#allocation37_spill] sm:$0xff] }
 0x260   : > { %v3775_v36 = vadd.f32 %v3774_v25, %v3740_v30  ;;  %v554_v41 = vshrl.u32 %v12391_v33, 4  ;;  %v12467_v21 = vmul.u32.u64.low 3817748708, %v12431_v1  ;;  %v12468_v17 = vmul.u32.u64.high 3817748708, %v12431_v1, %v12467_v21 }
 0x261   : > { %16096 = vst [vmem:[#allocation45_spill] sm:$0xff] %v12455_v57  ;;  %v3741_v13 = vsel %vm12336_vm15, %v3705_v32, 0.0  ;;  %v3628_v8 = vsel %vm12404_vm1, %v12455_v57, 0.0  ;;  %v3706_v52 = vmul.f32 %v12455_v57, %v12455_v57  ;;  %v12478_v15 = vadd.f32 %v3453_v59, %v16099_v22 }
 0x262   : > { %v3662_v30 = vadd.f32 %v3661_v23, %v3627_v31  ;;  %vm12480_vm2 = vcmp.lt.s32.totalorder %v773_v51, 16  ;;  %v16100_v33 = vmov 0  ;;  %v12485_v3 = vsub.s32 %v12217_v62, %v533_v54  ;;  %v3280_v23 = vpop.f32.mrb[160].mxu1 }
 0x263   : > { %v16101_v33 = vsel %vm12480_vm2, 4294967295, %v16100_v33  ;;  %v12488_v32 = vadd.s32 272, %v10987_v12  ;;  %v3742_v25 = vsel %vm12404_vm1, %v3706_v52, 0.0  ;;  %v3707_v0 = vmul.f32 %v12478_v15, %v12478_v15  ;;  %v3282_v22 = vpop.f32.mrb[161].mxu1 }
 0x264   : > { %16102 = vst [vmem:[#allocation62_spill] sm:$0xff] %v16101_v33  ;;  %vm12494_vm10 = vcmp.lt.s32.totalorder %v774_v55, 16  ;;  %v16103_v59 = vmov 0  ;;  %v775_v51 = vsel %vm12461_vm4, %v12449_v47, %v12359_v53  ;;  %v3776_v62 = vadd.f32 %v3775_v36, %v3741_v13  ;;  %v3283_v50 = vpop.f32.mrb[162].mxu1  ;;  %v16106_v47 = vld [vmem:[#allocation34_spill] sm:$0xff] }
 0x265   : > { %v16104_v59 = vsel %vm12494_vm10, 4294967295, %v16103_v59  ;;  %v3663_v54 = vadd.f32 %v3662_v30, %v3628_v8  ;;  %v544_v31 = vmul.u32 18, %v543_v2  ;;  %v565_v21 = vshrl.u32 %v12436_v9, 4 }
 0x266   : > { %16105 = vst [vmem:[#allocation59_spill] sm:$0xff] %v16104_v59  ;;  %v3629_v52 = vsel %vm12408_vm9, %v12478_v15, 0.0  ;;  %v3458_v55 = vadd.f32 %v12227_v20, %v3280_v23  ;;  %v555_v10 = vmul.u32 18, %v554_v41  ;;  %v12508_v26 = vadd.s32 280, %v10987_v12  ;;  %v3285_v41 = vpop.f32.mrb[163].mxu1 }
 0x267   : > { %v3777_v57 = vadd.f32 %v3776_v62, %v3742_v25  ;;  %vm632_vm13 = vcmp.ne.s32.totalorder %v12485_v3, 0  ;;  %v12512_v53 = vmul.u32.u64.low 3817748708, %v12488_v32  ;;  %v12513_v36 = vmul.u32.u64.high 3817748708, %v12488_v32, %v12512_v53  ;;  %v16107_v62 = vld [vmem:[#allocation36_spill] sm:$0xff] }
 0x268   : > { %v3743_v9 = vsel %vm12408_vm9, %v3707_v0, 0.0  ;;  %v12518_v2 = vadd.f32 %v3458_v55, %v16106_v47  ;;  %v3461_v20 = vadd.f32 %v12256_v48, %v3283_v50  ;;  %vm668_vm4 = vcmp.lt.s32.totalorder %v12485_v3, 0 }
 0x269   : > { %v3664_v12 = vadd.f32 %v3663_v54, %v3629_v52  ;;  %v740_v13 = vadd.s32 18, %v12485_v3  ;;  %v12524_v8 = vsub.s32 %v12233_v35, %v544_v31  ;;  %v566_v30 = vmul.u32 18, %v565_v21  ;;  %vm12537_vm9 = vmand %vm668_vm4, %vm632_vm13 }
 0x26a   : > { %v3630_v25 = vsel %vm12480_vm2, %v12518_v2, 0.0  ;;  %v3708_v0 = vmul.f32 %v12518_v2, %v12518_v2  ;;  %v12532_v23 = vadd.f32 %v3461_v20, %v16107_v62  ;;  %v576_v48 = vshrl.u32 %v12468_v17, 4 }
 0x26b   : > { %v3778_v55 = vadd.f32 %v3777_v57, %v3743_v9  ;;  %v3665_v54 = vadd.f32 %v3664_v12, %v3630_v25  ;;  %v12542_v31 = vmul.u32.u64.low 3817748708, %v12508_v26  ;;  %v12543_v21 = vmul.u32.u64.high 3817748708, %v12508_v26, %v12542_v31  ;;  %v3288_v9 = vpop.f32.mrb[164].mxu1 }
 0x26c   : > { %v3744_v52 = vsel %vm12480_vm2, %v3708_v0, 0.0  ;;  %v3631_v22 = vsel %vm12494_vm10, %v12532_v23, 0.0  ;;  %v3709_v57 = vmul.f32 %v12532_v23, %v12532_v23  ;;  %v12553_v17 = vsub.s32 %v12283_v34, %v555_v10  ;;  %v3290_v12 = vpop.f32.mrb[165].mxu1 }
 0x26d   : > { %v3779_v50 = vadd.f32 %v3778_v55, %v3744_v52  ;;  %v3666_v53 = vadd.f32 %v3665_v54, %v3631_v22  ;;  %vm633_vm13 = vcmp.ne.s32.totalorder %v12524_v8, 0  ;;  %vm669_vm4 = vcmp.lt.s32.totalorder %v12524_v8, 0  ;;  %v3291_v25 = vpop.f32.mrb[166].mxu1  ;;  %v16113_v54 = vld [vmem:[#allocation41_spill] sm:$0xff] }
 0x26e   : > { %v3745_v47 = vsel %vm12494_vm10, %v3709_v57, 0.0  ;;  %vm12559_vm2 = vcmp.lt.s32.totalorder %v775_v51, 16  ;;  %v16110_v20 = vmov 0  ;;  %v3466_v41 = vadd.f32 %v12334_v5, %v3288_v9  ;;  %v3293_v52 = vpop.f32.mrb[167].mxu1  ;;  %vm12579_vm10 = vmand %vm669_vm4, %vm633_vm13 }
 0x26f   : > { %v16111_v20 = vsel %vm12559_vm2, 4294967295, %v16110_v20  ;;  %v776_v34 = vsel %vm12537_vm9, %v740_v13, %v12485_v3  ;;  %v3780_v10 = vadd.f32 %v3779_v50, %v3745_v47  ;;  %v741_v0 = vadd.s32 18, %v12524_v8 }
 0x270   : > { %16112 = vst [vmem:[#allocation58_spill] sm:$0xff] %v16111_v20  ;;  %v12569_v62 = vsub.s32 %v12356_v56, %v566_v30  ;;  %v577_v55 = vmul.u32 18, %v576_v48  ;;  %v12572_v51 = vadd.f32 %v3466_v41, %v16113_v54  ;;  %v3469_v31 = vadd.f32 %v12353_v6, %v3291_v25  ;;  %v16119_v30 = vld [vmem:[#allocation43_spill] sm:$0xff]  ;;  %v9472_v41 = vld [vmem:[%s15556_s2 + $0xc0] sm:$0xff]  }
 0x271   : > { %vm634_vm9 = vcmp.ne.s32.totalorder %v12553_v17, 0  ;;  %vm670_vm1 = vcmp.lt.s32.totalorder %v12553_v17, 0  ;;  %vm12585_vm15 = vcmp.lt.s32.totalorder %v776_v34, 16  ;;  %v16116_v56 = vmov 0  ;;  %5548 = vmatpush1.bf16.msra.mxu0 %v9472_v41 }
 0x272   : > { %v16117_v56 = vsel %vm12585_vm15, 4294967295, %v16116_v56  ;;  %v587_v3 = vshrl.u32 %v12513_v36, 4  ;;  %v3632_v6 = vsel %vm12559_vm2, %v12572_v51, 0.0  ;;  %v3710_v13 = vmul.f32 %v12572_v51, %v12572_v51  ;;  %vm12602_vm13 = vmand %vm670_vm1, %vm634_vm9 }
 0x273   : > { %16118 = vst [vmem:[#allocation47_spill] sm:$0xff] %v16117_v56  ;;  %v12596_v48 = vadd.f32 %v3469_v31, %v16119_v30  ;;  %v742_v35 = vadd.s32 18, %v12553_v17  ;;  %v3667_v22 = vadd.f32 %v3666_v53, %v3632_v6  ;;  %v777_v57 = vsel %vm12579_vm10, %v741_v0, %v12524_v8  ;;  %v16126_v6 = vld [vmem:[#allocation39_spill] sm:$0xff] }
 0x274   : > { %vm635_vm4 = vcmp.ne.s32.totalorder %v12569_v62, 0  ;;  %v12608_v36 = vsub.s32 %v12431_v1, %v577_v55  ;;  %v3746_v9 = vsel %vm12559_vm2, %v3710_v13, 0.0  ;;  %v598_v8 = vshrl.u32 %v12543_v21, 4  ;;  %v3296_v1 = vpop.f32.mrb[168].mxu1  ;;  %v9526_v56 = vld [vmem:[%s15556_s2 + $0x50] sm:$0xff]  }
 0x275   : > { %v3633_v53 = vsel %vm12585_vm15, %v12596_v48, 0.0  ;;  %v3711_v47 = vmul.f32 %v12596_v48, %v12596_v48  ;;  %v3781_v12 = vadd.f32 %v3780_v10, %v3746_v9  ;;  %vm671_vm1 = vcmp.lt.s32.totalorder %v12569_v62, 0  ;;  %v3298_v54 = vpop.f32.mrb[169].mxu1 }
 0x276   : > { %v3668_v34 = vadd.f32 %v3667_v22, %v3633_v53  ;;  %v588_v25 = vmul.u32 18, %v587_v3  ;;  %v3474_v55 = vadd.f32 %v12317_v18, %v3296_v1  ;;  %v778_v21 = vsel %vm12602_vm13, %v742_v35, %v12553_v17  ;;  %v3299_v10 = vpop.f32.mrb[170].mxu1  ;;  %vm12643_vm13 = vmand %vm671_vm1, %vm635_vm4  ;;  %v9473_v22 = vld [vmem:[%s15556_s2 + $0xc8] sm:$0xff]  }
 0x277   : > { %v3747_v0 = vsel %vm12585_vm15, %v3711_v47, 0.0  ;;  %vm12628_vm10 = vcmp.lt.s32.totalorder %v777_v57, 16  ;;  %v16122_v52 = vmov 0  ;;  %v743_v5 = vadd.s32 18, %v12569_v62  ;;  %v3301_v30 = vpop.f32.mrb[171].mxu1  ;;  %v16132_v53 = vld [vmem:[#allocation42_spill] sm:$0xff] }
 0x278   : > { %v3782_v31 = vadd.f32 %v3781_v12, %v3747_v0  ;;  %v16123_v52 = vsel %vm12628_vm10, 4294967295, %v16122_v52  ;;  %v16125_v3 = vmov 0   ;;  %v12636_v18 = vadd.f32 %v3474_v55, %v16126_v6  ;;  %v9474_v0 = vld [vmem:[%s15556_s2 + $0xd0] sm:$0xff]  }
 0x279   : > { %16124 = vst [vmem:[#allocation65_spill] sm:$0xff] %v16123_v52  ;;  %5549 = vmatprep.subr.bf16.mxu0 %v16125_v3  ;;  %v3477_v13 = vadd.f32 %v12345_v14, %v3299_v10  ;;  %vm672_vm15 = vcmp.lt.s32.totalorder %v12608_v36, 0  ;;  %v599_v35 = vmul.u32 18, %v598_v8  ;;  %vm12651_vm9 = vcmp.lt.s32.totalorder %v778_v21, 16  ;;  %v3304_v21 = vpop.f32.mrb[172].mxu1 }
 0x27a   : > { %v16129_v57 = vmov 0  ;;  %v589_v14 = vsub.s32 %v12488_v32, %v588_v25  ;;  %v3634_v50 = vsel %vm12628_vm10, %v12636_v18, 0.0  ;;  %v3712_v9 = vmul.f32 %v12636_v18, %v12636_v18  ;;  %5550 = vmatpush1.bf16.msra.mxu0 %v9473_v22  ;;  %v3306_v6 = vpop.f32.mrb[173].mxu1 }
 0x27b   : > { %v16130_v57 = vsel %vm12651_vm9, 4294967295, %v16129_v57  ;;  %v12662_v47 = vadd.f32 %v3477_v13, %v16132_v53  ;;  %v744_v8 = vadd.s32 18, %v12608_v36  ;;  %v3669_v41 = vadd.f32 %v3668_v34, %v3634_v50  ;;  %5551 = vmatprep.subr.bf16.mxu0 %v16125_v3 }
 0x27c   : > { %16131 = vst [vmem:[#allocation23_spill] sm:$0xff] %v16130_v57  ;;  %v779_v12 = vsel %vm12643_vm13, %v743_v5, %v12569_v62  ;;  %vm16133_vm4 = vcmp.ne.s32.totalorder %v12608_v36, 0  ;;  %v3748_v1 = vsel %vm12628_vm10, %v3712_v9, 0.0  ;;  %v600_v62 = vsub.s32 %v12508_v26, %v599_v35  ;;  %v16139_v35 = vld [vmem:[#allocation50_spill] sm:$0xff] }
 0x27d   : > { %vm12670_vm1 = vmand %vm672_vm15, %vm16133_vm4  ;;  %v3635_v25 = vsel %vm12651_vm9, %v12662_v47, 0.0  ;;  %v3713_v34 = vmul.f32 %v12662_v47, %v12662_v47  ;;  %v3783_v55 = vadd.f32 %v3782_v31, %v3748_v1  ;;  %v3482_v5 = vadd.f32 %v12428_v11, %v3304_v21  ;;  %v3307_v31 = vpop.f32.mrb[174].mxu1 }
 0x27e   : > { %v3670_v54 = vadd.f32 %v3669_v41, %v3635_v25  ;;  %v780_v13 = vsel %vm12670_vm1, %v744_v8, %v12608_v36  ;;  %vm673_vm13 = vcmp.lt.s32.totalorder %v589_v14, 0  ;;  %5552 = vmatpush1.bf16.msra.mxu0 %v9474_v0  ;;  %vm12692_vm4 = vcmp.lt.s32.totalorder %v779_v12, 16  ;;  %v3309_v50 = vpop.f32.mrb[175].mxu1  ;;  %v9476_v36 = vld [vmem:[%s15556_s2 + $0xd8] sm:$0xff]  }
 0x27f   : > { %v3749_v10 = vsel %vm12651_vm9, %v3713_v34, 0.0  ;;  %v16136_v30 = vmov 0  ;;  %v745_v17 = vadd.s32 18, %v589_v14  ;;  %5553 = vmatprep.subr.bf16.mxu0 %v16125_v3  ;;  %v12698_v22 = vadd.f32 %v3482_v5, %v16139_v35  ;;  %v16146_v41 = vld [vmem:[#allocation53_spill] sm:$0xff]  ;;  %v3312_v6 = vpop.f32.mrb[176].mxu1 }
 0x280   : > { %v3784_v26 = vadd.f32 %v3783_v55, %v3749_v10  ;;  %v16137_v30 = vsel %vm12692_vm4, 4294967295, %v16136_v30  ;;  %v3485_v11 = vadd.f32 %v12446_v40, %v3307_v31  ;;  %vm638_vm15 = vcmp.ne.s32.totalorder %v600_v62, 0  ;;  %v3314_v35 = vpop.f32.mrb[177].mxu1 }
 0x281   : > { %16138 = vst [vmem:[#allocation26_spill] sm:$0xff] %v16137_v30  ;;  %vm674_vm9 = vcmp.lt.s32.totalorder %v600_v62, 0  ;;  %vm12704_vm1 = vcmp.lt.s32.totalorder %v780_v13, 16  ;;  %v16140_v9 = vmov 0  ;;  %vm16143_vm10 = vcmp.ne.s32.totalorder %v589_v14, 0 }
 0x282   : > { %v16141_v9 = vsel %vm12704_vm1, 4294967295, %v16140_v9  ;;  %vm12709_vm2 = vmand %vm673_vm13, %vm16143_vm10  ;;  %v3636_v40 = vsel %vm12692_vm4, %v12698_v22, 0.0  ;;  %v3714_v8 = vmul.f32 %v12698_v22, %v12698_v22  ;;  %v12719_v12 = vadd.f32 %v3485_v11, %v16146_v41  ;;  %5554 = vmatpush1.bf16.msra.mxu0 %v9476_v36 }
 0x283   : > { %16142 = vst [vmem:[#allocation64_spill] sm:$0xff] %v16141_v9  ;;  %v746_v32 = vadd.s32 18, %v600_v62  ;;  %v3671_v1 = vadd.f32 %v3670_v54, %v3636_v40  ;;  %vm12721_vm0 = vmand %vm674_vm9, %vm638_vm15  ;;  %5555 = vmatprep.subr.bf16.mxu0 %v16125_v3  ;;  %v781_v21 = vsel %vm12709_vm2, %v745_v17, %v589_v14  ;;  %v9477_v54 = vld [vmem:[%s15556_s2 + $0xe0] sm:$0xff]   ;;  %v3490_v31 = vadd.f32 %v12417_v45, %v3312_v6  ;;  %v3315_v17 = vpop.f32.mrb[178].mxu1  ;;  %v9478_v45 = vld [vmem:[%s15556_s2 + $0xe8] sm:$0xff]  }
 0x284   : > { %v3750_v34 = vsel %vm12692_vm4, %v3714_v8, 0.0  ;;  %v3637_v0 = vsel %vm12704_vm1, %v12719_v12, 0.0  ;;  %v3715_v55 = vmul.f32 %v12719_v12, %v12719_v12  ;;  %vm12743_vm10 = vcmp.lt.s32.totalorder %v781_v21, 16  ;;  %v3317_v40 = vpop.f32.mrb[179].mxu1 }
 0x285   : > { %v3785_v10 = vadd.f32 %v3784_v26, %v3750_v34  ;;  %v3672_v5 = vadd.f32 %v3671_v1, %v3637_v0  ;;  %v782_v11 = vsel %vm12721_vm0, %v746_v32, %v600_v62  ;;  %v16149_v14 = vmov 0  ;;  %v16152_v26 = vld [vmem:[#allocation49_spill] sm:$0xff]  ;;  %v16156_v32 = vld [vmem:[#allocation52_spill] sm:$0xff] }
 0x286   : > { %v3751_v13 = vsel %vm12704_vm1, %v3715_v55, 0.0  ;;  %5556 = vmatpush1.bf16.msra.mxu0 %v9477_v54  ;;  %v16150_v14 = vsel %vm12743_vm10, 4294967295, %v16149_v14  ;;  %v12749_v36 = vadd.f32 %v3490_v31, %v16152_v26  ;;  %v3493_v53 = vadd.f32 %v12438_v37, %v3315_v17  ;;  %v9479_v55 = vld [vmem:[%s15556_s2 + $0xf0] sm:$0xff]   ;;  %v9482_v26 = vld [vmem:[%s15556_s2 + $0x100] sm:$0xff]  }
 0x287   : > { %v3786_v50 = vadd.f32 %v3785_v10, %v3751_v13  ;;  %16151 = vst [vmem:[#allocation61_spill] sm:$0xff] %v16150_v14  ;;  %5557 = vmatprep.subr.bf16.mxu0 %v16125_v3  ;;  %vm12755_vm0 = vcmp.lt.s32.totalorder %v782_v11, 16  ;;  %v16153_v62 = vmov 0  ;;  %v9481_v13 = vld [vmem:[%s15556_s2 + $0xf8] sm:$0xff]   ;;  %vm15725_vm2 = vsmask.f32 1280 }
 0x288   : > { %v16154_v62 = vsel %vm12755_vm0, 4294967295, %v16153_v62  ;;  %v3638_v8 = vsel %vm12743_vm10, %v12749_v36, 0.0  ;;  %v3716_v41 = vmul.f32 %v12749_v36, %v12749_v36  ;;  %v12765_v1 = vadd.f32 %v3493_v53, %v16156_v32  ;;  %v9483_v32 = vld [vmem:[%s15556_s2 + $0x108] sm:$0xff]  }
 0x289   : > { %16155 = vst [vmem:[#allocation51_spill] sm:$0xff] %v16154_v62  ;;  %v3673_v37 = vadd.f32 %v3672_v5, %v3638_v8  ;;  %vm4018_vm9 = vsmask.f32 5392  ;;  %vm4485_vm13 = vcmask 1042434   ;;  %vm16177_vm1 = vcmask 1041408  }
 0x28a   : > { %5558 = vmatpush1.bf16.msra.mxu0 %v9478_v45  ;;  %v3752_v25 = vsel %vm12743_vm10, %v3716_v41, 0.0  ;;  %v3639_v34 = vsel %vm12755_vm0, %v12765_v1, 0.0  ;;  %v3717_v0 = vmul.f32 %v12765_v1, %v12765_v1  ;;  %v9480_v41 = vld [vmem:[%s15556_s2 + $0x150] sm:$0xff]   ;;  %vm12955_vm15 = vmor %vm15725_vm2, %vm4018_vm9  ;;  %vm16176_vm9 = vsmask.f32 1280 }
 0x28b   : > { %5559 = vmatprep.subr.bf16.mxu0 %v16125_v3  ;;  %v3787_v21 = vadd.f32 %v3786_v50, %v3752_v25  ;;  %v3674_v54 = vadd.f32 %v3673_v37, %v3639_v34  ;;  %v9475_v50 = vld [vmem:[%s15556_s2 + $0x148] sm:$0xff]   ;;  %vm13028_vm4 = vmand %vm16177_vm1, %vm16176_vm9  ;;  %vm16186_vm1 = vsmask.f32 3328  ;;  %vm16208_vm5 = vcmask 1040384  }
 0x28c   : > { %v3753_v10 = vsel %vm12755_vm0, %v3717_v0, 0.0  ;;  %9084 = vmatprep.subr.bf16.mxu1 %v9475_v50  ;;  %vm4486_vm0 = vsmask.f32 2304 }
 0x28d   : > { %v3675_v5 = vrot.slane %v3674_v54, 4  ;;  %v3788_v6 = vadd.f32 %v3787_v21, %v3753_v10  ;;  %9085 = vmatpush3.bf16.msra.mxu1 %v9475_v50  ;;  %v9484_v21 = vld [vmem:[%s15556_s2 + $0x110] sm:$0xff]   ;;  %vm12993_vm10 = vmand %vm4485_vm13, %vm4486_vm0  ;;  %vm16172_vm0 = vsmask.f32 7946 }
 0x28e   : > { %5560 = vmatpush1.bf16.msra.mxu0 %v9479_v55  ;;  %9086 = vmatprep.subr.bf16.mxu1 %v9480_v41  ;;  %v9485_v55 = vld [vmem:[%s15556_s2 + $0x158] sm:$0xff]   ;;  %vm13015_vm2 = vmand %vm4485_vm13, %vm16172_vm0  ;;  %vm16187_vm13 = vcmask 1043459  }
 0x28f   : > { %5561 = vmatprep.subr.bf16.mxu0 %v16125_v3  ;;  %v3676_v31 = vadd.f32 %v3675_v5, %v3674_v54  ;;  %v3789_v35 = vrot.slane %v3788_v6, 4  ;;  %vm13079_vm9 = vmand %vm16187_vm13, %vm16186_vm1 }
 0x290   : > { %vm16197_vm0 = vmmov %vm16187_vm13  ;;  %vm4417_vm13 = vsmask.f32 7942 }
 0x291   : > { %v3677_v11 = vrot.slane %v3676_v31, 2  ;;  %v3790_v17 = vadd.f32 %v3789_v35, %v3788_v6  ;;  %9087 = vmatpush3.bf16.msra.mxu1 %v9480_v41  ;;  %v9491_v41 = vld [vmem:[%s15556_s2 + $0x170] sm:$0xff]  }
 0x292   : > { %5562 = vmatpush1.bf16.msra.mxu0 %v9481_v13  ;;  %9088 = vmatprep.subr.bf16.mxu1 %v9485_v55 }
 0x293   : > { %5563 = vmatprep.subr.bf16.mxu0 %v16125_v3  ;;  %v3678_v53 = vadd.f32 %v3677_v11, %v3676_v31  ;;  %v3791_v40 = vrot.slane %v3790_v17, 2 }
 0x295   : > { %v3679_v45 = vrot.slane %v3678_v53, 1  ;;  %v3792_v8 = vadd.f32 %v3791_v40, %v3790_v17  ;;  %9089 = vmatpush3.bf16.msra.mxu1 %v9485_v55  ;;  %v9487_v17 = vld [vmem:[%s15556_s2 + $0x160] sm:$0xff]   ;;  %v9499_v55 = vld [vmem:[%s15556_s2 + $0x138] sm:$0xff]  }
 0x296   : > { %5564 = vmatpush1.bf16.msra.mxu0 %v9482_v26  ;;  %v9486_v26 = vld [vmem:[%s15556_s2 + $0x118] sm:$0xff]   ;;  %9090 = vmatprep.subr.bf16.mxu1 %v9487_v17 }
 0x297   : > { %5565 = vmatprep.subr.bf16.mxu0 %v16125_v3  ;;  %v3680_v37 = vadd.f32 %v3679_v45, %v3678_v53  ;;  %v3793_v25 = vrot.slane %v3792_v8, 1  ;;  %v9489_v53 = vld [vmem:[%s15556_s2 + $0x168] sm:$0xff]   ;;  %v9488_v45 = vld [vmem:[%s15556_s2 + $0x120] sm:$0xff]  }
 0x299   : > { %v12798_v34 = vmul.f32 0.00390625, %v3680_v37  ;;  %v3794_v0 = vadd.f32 %v3793_v25, %v3792_v8  ;;  %9091 = vmatpush3.bf16.msra.mxu1 %v9487_v17  ;;  %v9490_v25 = vld [vmem:[%s15556_s2 + $0x128] sm:$0xff]   ;;  %v16160_v37 = vld [vmem:[#allocation48_spill] sm:$0xff] }
 0x29a   : > { %5566 = vmatpush1.bf16.msra.mxu0 %v9483_v32  ;;  %9092 = vmatprep.subr.bf16.mxu1 %v9489_v53  ;;  %v16161_v32 = vld [vmem:[#allocation20_spill] sm:$0xff] }
 0x29b   : > { %5567 = vmatprep.subr.bf16.mxu0 %v16125_v3  ;;  %v3795_v54 = vmul.f32 0.00390625, %v3794_v0  ;;  %v3796_v10 = vmul.f32 %v12798_v34, %v12798_v34  ;;  %v3829_v5 = vsub.f32 %v12636_v18, %v12798_v34  ;;  %v3830_v6 = vsub.f32 %v12662_v47, %v12798_v34 }
 0x29c   : > { %v3831_v31 = vsub.f32 %v12698_v22, %v12798_v34  ;;  %v3832_v35 = vsub.f32 %v12719_v12, %v12798_v34  ;;  %v3833_v11 = vsub.f32 %v12749_v36, %v12798_v34  ;;  %v3802_v17 = vsub.f32 %v11744_v63, %v12798_v34  ;;  %v16163_v63 = vld [vmem:[#allocation45_spill] sm:$0xff] }
 0x29d   : > { %v3797_v13 = vsub.f32 %v3795_v54, %v3796_v10  ;;  %9093 = vmatpush3.bf16.msra.mxu1 %v9489_v53  ;;  %v16157_v54 = vld [vmem:[#allocation9_spill] sm:$0xff]  ;;  %v16158_v53 = vld [vmem:[#allocation6_spill] sm:$0xff]  ;;  %v16164_v47 = vsub.f32 %v12765_v1, %v12798_v34 }
 0x29e   : > { %5568 = vmatpush1.bf16.msra.mxu0 %v9484_v21  ;;  %9094 = vmatprep.subr.bf16.mxu1 %v9491_v41  ;;  %v9493_v21 = vld [vmem:[%s15556_s2 + $0x178] sm:$0xff]   ;;  %v3800_v10 = vsub.f32 %v16157_v54, %v12798_v34 }
 0x29f   : > { %5569 = vmatprep.subr.bf16.mxu0 %v16125_v3  ;;  %v3798_v40 = vmax.f32 %v3797_v13, 0.0  ;;  %v3801_v13 = vsub.f32 %v11719_v27, %v12798_v34  ;;  %v9492_v27 = vld [vmem:[%s15556_s2 + $0x130] sm:$0xff]  }
 0x2a1   : > { %v3835_v8 = vadd.f32 1e-05, %v3798_v40  ;;  %9095 = vmatpush3.bf16.msra.mxu1 %v9491_v41 }
 0x2a2   : > { %5570 = vmatpush1.bf16.msra.mxu0 %v9486_v26  ;;  %v3803_v26 = vsub.f32 %v11830_v39, %v12798_v34  ;;  %9096 = vmatprep.subr.bf16.mxu1 %v9493_v21  ;;  %v16162_v39 = vld [vmem:[#allocation8_spill] sm:$0xff] }
 0x2a3   : > { %5571 = vmatprep.subr.bf16.mxu0 %v16125_v3  ;;  %9589 = vrsqrt.f32 %v3835_v8 }
 0x2a5   : > { %9097 = vmatpush3.bf16.msra.mxu1 %v9493_v21 }
 0x2a6   : > { %5572 = vmatpush1.bf16.msra.mxu0 %v9488_v45  ;;  %6045 = vmatprep.subr.bf16.mxu1 %v16125_v3 }
 0x2a7   : > { %5573 = vmatprep.subr.bf16.mxu0 %v16125_v3 }
 0x2aa   : > { %5574 = vmatpush1.bf16.msra.mxu0 %v9490_v25  ;;  %v16159_v25 = vld [vmem:[#allocation16_spill] sm:$0xff] }
 0x2ab   : > { %5575 = vmatprep.subr.bf16.mxu0 %v16125_v3 }
 0x2ad   : > { %v12906_v41 = vpop.eup %9589 }
 0x2ae   : > { %5576 = vmatpush1.bf16.msra.mxu0 %v9492_v27  ;;  %v9501_v27 = vld [vmem:[%s15556_s2 + $0x80] sm:$0xff]   ;;  %v3838_v45 = vmul.f32 %v12906_v41, %v3800_v10  ;;  %v3839_v8 = vmul.f32 %v12906_v41, %v3801_v13  ;;  %v3840_v50 = vmul.f32 %v12906_v41, %v3802_v17  ;;  %v3841_v0 = vmul.f32 %v12906_v41, %v3803_v26 }
 0x2af   : > { %5577 = vmatprep.subr.bf16.mxu0 %v16125_v3  ;;  %v3867_v21 = vmul.f32 %v12906_v41, %v3829_v5  ;;  %v3868_v10 = vmul.f32 %v12906_v41, %v3830_v6  ;;  %v3869_v13 = vmul.f32 %v12906_v41, %v3831_v31  ;;  %v3870_v17 = vmul.f32 %v12906_v41, %v3832_v35 }
 0x2b0   : > { %v3871_v18 = vmul.f32 %v12906_v41, %v3833_v11  ;;  %v3872_v5 = vmul.f32 %v12906_v41, %v16164_v47  ;;  %v3874_v6 = vmax.f32 %v3838_v45, 0.0  ;;  %v3875_v26 = vmax.f32 %v3839_v8, 0.0 }
 0x2b1   : > { %v3876_v22 = vmax.f32 %v3840_v50, 0.0  ;;  %v3877_v31 = vmax.f32 %v3841_v0, 0.0  ;;  %v3903_v54 = vmax.f32 %v3867_v21, 0.0  ;;  %v3904_v40 = vmax.f32 %v3868_v10, 0.0 }
 0x2b2   : > { %5578 = vmatpush1.bf16.msra.mxu0 %v9499_v55  ;;  %v3905_v12 = vmax.f32 %v3869_v13, 0.0  ;;  %v3906_v35 = vmax.f32 %v3870_v17, 0.0  ;;  %v3907_v62 = vmax.f32 %v3871_v18, 0.0  ;;  %v3908_v14 = vmax.f32 %v3872_v5, 0.0 }
 0x2b3   : > { %9134 = vmatprep.subr.bf16.mxu0 %v9501_v27  ;;  %v8649_v36 = vpack.c.bf16 %v3874_v6, %v3874_v6  ;;  %v8650_v9 = vpack.c.bf16 %v3875_v26, %v3875_v26  ;;  %v8651_v11 = vpack.c.bf16 %v3876_v22, %v3876_v22  ;;  %v8652_v30 = vpack.c.bf16 %v3877_v31, %v3877_v31 }
 0x2b4   : > { %v8678_v57 = vpack.c.bf16 %v3903_v54, %v3903_v54  ;;  %v8679_v1 = vpack.c.bf16 %v3904_v40, %v3904_v40  ;;  %v8680_v52 = vpack.c.bf16 %v3905_v12, %v3905_v12  ;;  %v8681_v47 = vpack.c.bf16 %v3906_v35, %v3906_v35 }
 0x2b5   : > { %v12947_v45 = vpack.c.bf16 %v3907_v62, %v3907_v62  ;;  %v12949_v55 = vpack.c.bf16 %v3908_v14, %v3908_v14  ;;  %v4030_v50 = vshrl.u32 %v8649_v36, 16  ;;  %v4033_v0 = vshll.u32 %v8649_v36, 16 }
 0x2b6   : > { %v4040_v8 = vshrl.u32 %v8650_v9, 16  ;;  %v4043_v27 = vshll.u32 %v8650_v9, 16  ;;  %v4050_v21 = vshrl.u32 %v8651_v11, 16  ;;  %v4053_v10 = vshll.u32 %v8651_v11, 16 }
 0x2b7   : > { %v4032_v13 = vrot.slane %v4030_v50, 6  ;;  %v4035_v17 = vrot.slane %v4033_v0, 7  ;;  %v4060_v18 = vshrl.u32 %v8652_v30, 16  ;;  %v4063_v5 = vshll.u32 %v8652_v30, 16 }
 0x2b8   : > { %v4042_v6 = vrot.slane %v4040_v8, 6  ;;  %v4045_v26 = vrot.slane %v4043_v27, 7  ;;  %v4052_v54 = vrot.slane %v4050_v21, 6  ;;  %v4055_v40 = vrot.slane %v4053_v10, 7 }
 0x2b9   : > { %v12951_v22 = vor.u32 %v4035_v17, %v4032_v13  ;;  %v4062_v62 = vrot.slane %v4060_v18, 6  ;;  %v4065_v31 = vrot.slane %v4063_v5, 7  ;;  %v4320_v14 = vshrl.u32 %v8678_v57, 16 }
 0x2ba   : > { %v4046_v9 = vor.u32 %v4045_v26, %v4042_v6  ;;  %v4056_v35 = vor.u32 %v4055_v40, %v4052_v54  ;;  %v4323_v30 = vshll.u32 %v8678_v57, 16  ;;  %v4330_v36 = vshrl.u32 %v8679_v1, 16 }
 0x2bb   : > { %v4038_v11 = vrot.slane %v12951_v22, 4  ;;  %v12960_v50 = vor.u32 %v4065_v31, %v4062_v62  ;;  %v4322_v0 = vrot.slane %v4320_v14, 6  ;;  %v4333_v8 = vshll.u32 %v8679_v1, 16 }
 0x2bc   : > { %v4048_v27 = vrot.slane %v4046_v9, 4  ;;  %v4058_v21 = vrot.slane %v4056_v35, 4  ;;  %v4325_v10 = vrot.slane %v4323_v30, 7  ;;  %v4332_v13 = vrot.slane %v4330_v36, 6 }
 0x2bd   : > { %v4047_v17 = vsel %vm12955_vm15, %v4038_v11, %v4046_v9  ;;  %v4335_v18 = vrot.slane %v4333_v8, 7  ;;  %v4340_v5 = vshrl.u32 %v8680_v52, 16  ;;  %v4343_v6 = vshll.u32 %v8680_v52, 16 }
 0x2be   : > { %v4057_v57 = vsel %vm12955_vm15, %v4048_v27, %v4056_v35  ;;  %v4067_v26 = vsel %vm12955_vm15, %v4058_v21, %v12960_v50  ;;  %v12969_v54 = vor.u32 %v4325_v10, %v4322_v0  ;;  %v4350_v1 = vshrl.u32 %v8681_v47, 16  ;;  %4423 = vst [vmem:[#allocation2 + $0x10] sm:$0xf] %v4047_v17 }
 0x2bf   : > { %v4336_v40 = vor.u32 %v4335_v18, %v4332_v13  ;;  %v4342_v62 = vrot.slane %v4340_v5, 6  ;;  %v4345_v31 = vrot.slane %v4343_v6, 7  ;;  %v4353_v14 = vshll.u32 %v8681_v47, 16  ;;  %4424 = vst [vmem:[#allocation2 + $0x14] sm:$0xf] %v4057_v57 }
 0x2c0   : > { %4425 = vst [vmem:[#allocation2 + $0x18] sm:$0xf] %v4067_v26  ;;  %v4328_v52 = vrot.slane %v12969_v54, 4  ;;  %v4352_v9 = vrot.slane %v4350_v1, 6  ;;  %v4360_v35 = vshrl.u32 %v12947_v45, 16  ;;  %v4363_v30 = vshll.u32 %v12947_v45, 16 }
 0x2c1   : > { %v4338_v36 = vrot.slane %v4336_v40, 4  ;;  %v4346_v11 = vor.u32 %v4345_v31, %v4342_v62  ;;  %v4355_v0 = vrot.slane %v4353_v14, 7  ;;  %v4370_v8 = vshrl.u32 %v12949_v55, 16 }
 0x2c2   : > { %v4337_v27 = vsel %vm12955_vm15, %v4328_v52, %v4336_v40  ;;  %v4362_v21 = vrot.slane %v4360_v35, 6  ;;  %v4365_v47 = vrot.slane %v4363_v30, 7  ;;  %v4373_v10 = vshll.u32 %v12949_v55, 16 }
 0x2c3   : > { %v4347_v13 = vsel %vm12955_vm15, %v4338_v36, %v4346_v11  ;;  %v4348_v17 = vrot.slane %v4346_v11, 4  ;;  %v12980_v18 = vor.u32 %v4355_v0, %v4352_v9  ;;  %v4372_v45 = vrot.slane %v4370_v8, 6  ;;  %4452 = vst [vmem:[#allocation2 + $0x84] sm:$0xf] %v4337_v27 }
 0x2c4   : > { %v12982_v5 = vor.u32 %v4365_v47, %v4362_v21  ;;  %v4375_v6 = vrot.slane %v4373_v10, 7  ;;  %4453 = vst [vmem:[#allocation2 + $0x88] sm:$0xf] %v4347_v13  ;;  %v16167_v26 = vsub.f32 %v16158_v53, %v12798_v34  ;;  %v16170_v53 = vsub.f32 %v11864_v58, %v12798_v34  ;;  %v4459_v58 = vld [vmem:[#allocation2 + $0x98] sm:$0x3] }
 0x2c5   : > { %v4357_v40 = vsel %vm12955_vm15, %v4348_v17, %v12980_v18  ;;  %v4480_v62 = vld [vmem:[#allocation2 + $0x10] sm:$0x8]  ;;  %v4358_v31 = vrot.slane %v12980_v18, 4  ;;  %v16171_v52 = vsub.f32 %v11812_v7, %v12798_v34  ;;  %v16175_v8 = vsub.f32 %v11861_v43, %v12798_v34  ;;  %v4488_v21 = vld [vmem:[#allocation2 + $0x10] sm:$0x4] }
 0x2c6   : > { %v12989_v55 = vmul.f32 %v12906_v41, %v16167_v26  ;;  %v13005_v14 = vmul.f32 %v12906_v41, %v16170_v53  ;;  %v4368_v30 = vrot.slane %v12982_v5, 4  ;;  %v4376_v36 = vor.u32 %v4375_v6, %v4372_v45  ;;  %4454 = vst [vmem:[#allocation2 + $0x8c] sm:$0xf] %v4357_v40  ;;  %v13032_v10 = vld [vmem:[#allocation2 + $0x14] sm:$0xf] }
 0x2c7   : > { %v13011_v9 = vmul.f32 %v12906_v41, %v16171_v52  ;;  %v8412_v11 = vrot.slane %v4480_v62, 9  ;;  %v4491_v0 = vld [vmem:[#allocation2 + $0x18] sm:$0x2]  ;;  %v13024_v7 = vmul.f32 %v12906_v41, %v16175_v8  ;;  %v16180_v13 = vsub.f32 %v11919_v44, %v12798_v34  ;;  %v4497_v53 = vld [vmem:[#allocation2 + $0x18] sm:$0x4] }
 0x2c8   : > { %v4493_v47 = vrot.slane %v4491_v0, 7  ;;  %v16181_v43 = vsub.f32 %v11945_v28, %v12798_v34  ;;  %v16182_v6 = vsub.f32 %v11913_v19, %v12798_v34  ;;  %v4377_v40 = vsel %vm12955_vm15, %v4368_v30, %v4376_v36 }
 0x2c9   : > { %v13038_v17 = vmul.f32 %v12906_v41, %v16180_v13  ;;  %v4378_v62 = vrot.slane %v4376_v36, 4  ;;  %v4489_v44 = vsel %vm12993_vm10, %v8412_v11, %v4488_v21  ;;  %v15735_v52 = vrot.slane %v13032_v10, 6  ;;  %4456 = vst [vmem:[#allocation2 + $0x94] sm:$0xf] %v4377_v40 }
 0x2ca   : > { %v13044_v45 = vmul.f32 %v12906_v41, %v16181_v43  ;;  %v13050_v26 = vmul.f32 %v12906_v41, %v16182_v6  ;;  %4490 = vst [vmem:[#allocation2 + $0x10] sm:$0x4] %v4489_v44  ;;  %v4498_v28 = vsel %vm13015_vm2, %v4493_v47, %v4497_v53  ;;  %v16183_v19 = vsub.f32 %v11934_v60, %v12798_v34 }
 0x2cb   : > { %v16184_v30 = vsub.f32 %v11987_v38, %v12798_v34  ;;  %v16185_v11 = vsub.f32 %v12010_v42, %v12798_v34  ;;  %v4460_v60 = vsel %vm13028_vm4, %v4378_v62, %v4459_v58  ;;  %4499 = vst [vmem:[#allocation2 + $0x18] sm:$0x4] %v4498_v28  ;;  %v4732_v38 = vrot.slane %v15735_v52, 4  ;;  %v4690_v6 = vld [vmem:[#allocation2 + $0x88] sm:$0x1] }
 0x2cc   : > { %v13063_v0 = vmul.f32 %v12906_v41, %v16183_v19  ;;  %v16190_v47 = vsub.f32 %v11996_v16, %v12798_v34  ;;  %v16191_v13 = vsub.f32 %v12018_v46, %v12798_v34  ;;  %4461 = vst [vmem:[#allocation2 + $0x98] sm:$0x3] %v4460_v60  ;;  %v13099_v27 = vld [vmem:[#allocation2 + $0x88] sm:$0xf]  ;;  %v13101_v58 = vld [vmem:[#allocation2 + $0x10] sm:$0x1]  ;;  %v16192_v40 = vsub.f32 %v12104_v49, %v12798_v34 }
 0x2cd   : > { %v13069_v36 = vmul.f32 %v12906_v41, %v16184_v30  ;;  %v13075_v8 = vmul.f32 %v12906_v41, %v16185_v11  ;;  %v16193_v62 = vsub.f32 %v12117_v4, %v12798_v34  ;;  %v16194_v44 = vsub.f32 %v12182_v61, %v12798_v34  ;;  %v4694_v30 = vld [vmem:[#allocation2 + $0x84] sm:$0x8] }
 0x2ce   : > { %v13091_v42 = vmul.f32 %v12906_v41, %v16190_v47  ;;  %v13097_v43 = vmul.f32 %v12906_v41, %v16191_v13  ;;  %v13107_v16 = vmul.f32 %v12906_v41, %v16192_v40  ;;  %v16195_v28 = vsub.f32 %v16159_v25, %v12798_v34  ;;  %v4697_v13 = vld [vmem:[#allocation2 + $0x8c] sm:$0x4]  ;;  %v13146_v40 = vld [vmem:[#allocation2 + $0x84] sm:$0x2] }
 0x2cf   : > { %v13113_v46 = vmul.f32 %v12906_v41, %v16193_v62  ;;  %v13119_v53 = vmul.f32 %v12906_v41, %v16194_v44  ;;  %vm16196_vm4 = vsmask.f32 7950  ;;  %v4692_v4 = vrot.slane %v4690_v6, 5 }
 0x2d0   : > { %v13125_v49 = vmul.f32 %v12906_v41, %v16195_v28  ;;  %vm13129_vm1 = vmand %vm16197_vm0, %vm16196_vm4  ;;  %v15734_v11 = vrot.slane %v13099_v27, 6  ;;  %v16200_v61 = vsub.f32 %v16160_v37, %v12798_v34  ;;  %v16201_v25 = vsub.f32 %v16161_v32, %v12798_v34 }
 0x2d1   : > { %v16202_v6 = vsub.f32 %v16162_v39, %v12798_v34  ;;  %v16203_v37 = vsub.f32 %v12402_v29, %v12798_v34  ;;  %v16204_v32 = vsub.f32 %v16163_v63, %v12798_v34  ;;  %v4695_v29 = vsel %vm13079_vm9, %v4692_v4, %v4694_v30 }
 0x2d2   : > { %v13138_v60 = vmul.f32 %v12906_v41, %v16200_v61  ;;  %v13144_v47 = vmul.f32 %v12906_v41, %v16201_v25  ;;  %v16205_v61 = vsub.f32 %v12478_v15, %v12798_v34  ;;  %v4699_v25 = vrot.slane %v4697_v13, 7  ;;  %4696 = vst [vmem:[#allocation2 + $0x84] sm:$0x8] %v4695_v29  ;;  %v4722_v18 = vld [vmem:[#allocation2 + $0x18] sm:$0x7] }
 0x2d3   : > { %v13152_v62 = vmul.f32 %v12906_v41, %v16202_v6  ;;  %v13158_v44 = vmul.f32 %v12906_v41, %v16203_v37  ;;  %v13164_v28 = vmul.f32 %v12906_v41, %v16204_v32  ;;  %v13176_v6 = vrot.slane %v15734_v11, 4  ;;  %v4701_v32 = vld [vmem:[#allocation2 + $0x8c] sm:$0x8] }
 0x2d4   : > { %v13170_v39 = vmul.f32 %v12906_v41, %v16205_v61  ;;  %v16206_v63 = vsub.f32 %v12518_v2, %v12798_v34  ;;  %vm16207_vm0 = vsmask.f32 7938  ;;  %v16211_v4 = vsub.f32 %v12532_v23, %v12798_v34 }
 0x2d5   : > { %vm13186_vm11 = vmand %vm16208_vm5, %vm16207_vm0  ;;  %v16212_v2 = vsub.f32 %v12572_v51, %v12798_v34  ;;  %v16213_v61 = vsub.f32 %v12596_v48, %v12798_v34  ;;  %v4367_v23 = vsel %vm12955_vm15, %v4358_v31, %v12982_v5  ;;  %v4702_v29 = vsel %vm13129_vm1, %v4699_v25, %v4701_v32  ;;  %v4720_v51 = vld [vmem:[#allocation2 + $0x10] sm:$0xc]  ;;  %v4717_v32 = vld [vmem:[#allocation2 + $0x98] sm:$0x1] }
 0x2d6   : > { %v13182_v37 = vmul.f32 %v12906_v41, %v16206_v63  ;;  %v13194_v30 = vmul.f32 %v12906_v41, %v16211_v4  ;;  %v4712_v4 = vld [vmem:[#allocation2 + $0x94] sm:$0x8]  ;;  %vm16214_vm5 = vcmask 1045508   ;;  %vm16215_vm0 = vcmask 1041408   ;;  %4455 = vst [vmem:[#allocation2 + $0x90] sm:$0xf] %v4367_v23 }
 0x2d7   : > { %v13200_v13 = vmul.f32 %v12906_v41, %v16212_v2  ;;  %v13206_v63 = vmul.f32 %v12906_v41, %v16213_v61  ;;  %vm13217_vm4 = vmor %vm16215_vm0, %vm16214_vm5  ;;  %v4474_v48 = vrot.slane %v13101_v58, 7  ;;  %v4685_v34 = vrot.slane %v13146_v40, 7  ;;  %4703 = vst [vmem:[#allocation2 + $0x8c] sm:$0x8] %v4702_v29 }
 0x2d8   : > { %v8426_v41 = vrot.slane %v4712_v4, 11  ;;  %v8427_v5 = vrot.slane %v4720_v51, 10  ;;  %v3873_v31 = vmax.f32 %v12989_v55, 0.0  ;;  %v3878_v25 = vmax.f32 %v13005_v14, 0.0 }
 0x2d9   : > { %v4733_v61 = vrot.slane %v4722_v18, 6  ;;  %v3879_v57 = vmax.f32 %v13011_v9, 0.0  ;;  %v3880_v11 = vmax.f32 %v13024_v7, 0.0  ;;  %v3881_v52 = vmax.f32 %v13038_v17, 0.0 }
 0x2da   : > { %v4718_v58 = vsel %vm13186_vm11, %v8426_v41, %v4717_v32  ;;  %v16218_v40 = vrot.slane %v13032_v10, 6  ;;  %v3882_v55 = vmax.f32 %v13044_v45, 0.0  ;;  %v3883_v14 = vmax.f32 %v13050_v26, 0.0  ;;  %v4742_v26 = vld [vmem:[#allocation2 + $0x84] sm:$0x8] }
 0x2db   : > { %4719 = vst [vmem:[#allocation2 + $0x98] sm:$0x1] %v4718_v58  ;;  %v4734_v9 = vsel %vm13217_vm4, %v4732_v38, %v4733_v61  ;;  %v4735_v29 = vrot.slane %v4733_v61, 4  ;;  %v3884_v7 = vmax.f32 %v13063_v0, 0.0  ;;  %v3885_v17 = vmax.f32 %v13069_v36, 0.0 }
 0x2dc   : > { %v4731_v23 = vsel %vm13217_vm4, %v8427_v5, %v16218_v40  ;;  %4740 = vst [vmem:[#allocation2 + $0x4] sm:$0xf] %v4734_v9  ;;  %v3886_v10 = vmax.f32 %v13075_v8, 0.0  ;;  %v3887_v4 = vmax.f32 %v13091_v42, 0.0  ;;  %v3888_v51 = vmax.f32 %v13097_v43, 0.0 }
 0x2dd   : > { %4739 = vst [vmem:[#allocation2] sm:$0xf] %v4731_v23  ;;  %v3889_v45 = vmax.f32 %v13107_v16, 0.0  ;;  %4741 = vst [vmem:[#allocation2 + $0x8] sm:$0x1] %v4735_v29  ;;  %v3890_v41 = vmax.f32 %v13113_v46, 0.0  ;;  %v8654_v9 = vpack.c.bf16 %v3879_v57, %v3879_v57  ;;  %v8655_v29 = vpack.c.bf16 %v3880_v11, %v3880_v11 }
 0x2de   : > { %v3891_v38 = vmax.f32 %v13119_v53, 0.0  ;;  %v3892_v18 = vmax.f32 %v13125_v49, 0.0  ;;  %v3893_v0 = vmax.f32 %v13138_v60, 0.0  ;;  %vm16219_vm5 = vcmask 1041409   ;;  %v4477_v42 = vld [vmem:[#allocation2 + $0x10] sm:$0x2] }
 0x2df   : > { %vm13250_vm0 = vmand %vm16219_vm5, %vm4417_vm13  ;;  %v8428_v8 = vrot.slane %v4742_v26, 10  ;;  %v3894_v43 = vmax.f32 %v13144_v47, 0.0  ;;  %v3895_v16 = vmax.f32 %v13152_v62, 0.0  ;;  %v3896_v46 = vmax.f32 %v13158_v44, 0.0  ;;  %v4744_v5 = vld [vmem:[#allocation2 + $0x8c] sm:$0xf] }
 0x2e0   : > { %v3897_v53 = vmax.f32 %v13164_v28, 0.0  ;;  %v3898_v49 = vmax.f32 %v13170_v39, 0.0  ;;  %v3899_v60 = vmax.f32 %v13182_v37, 0.0  ;;  %v3900_v32 = vmax.f32 %v13194_v30, 0.0  ;;  %v4687_v47 = vld [vmem:[#allocation2 + $0x84] sm:$0x4] }
 0x2e1   : > { %v16222_v61 = vrot.slane %v13099_v27, 6  ;;  %v4753_v40 = vrot.slane %v4744_v5, 6  ;;  %v3901_v62 = vmax.f32 %v13200_v13, 0.0  ;;  %v3902_v44 = vmax.f32 %v13206_v63, 0.0 }
 0x2e2   : > { %v4478_v28 = vsel %vm13250_vm0, %v4474_v48, %v4477_v42  ;;  %v4688_v39 = vsel %vm13015_vm2, %v4685_v34, %v4687_v47  ;;  %v8648_v37 = vpack.c.bf16 %v3873_v31, %v3873_v31  ;;  %v8653_v30 = vpack.c.bf16 %v3878_v25, %v3878_v25 }
 0x2e3   : > { %v4751_v58 = vsel %vm13217_vm4, %v8428_v8, %v16222_v61  ;;  %v4754_v27 = vsel %vm13217_vm4, %v13176_v6, %v4753_v40  ;;  %v4755_v23 = vrot.slane %v4753_v40, 4  ;;  %4479 = vst [vmem:[#allocation2 + $0x10] sm:$0x2] %v4478_v28  ;;  %4689 = vst [vmem:[#allocation2 + $0x84] sm:$0x4] %v4688_v39  ;;  %v8656_v13 = vpack.c.bf16 %v3881_v52, %v3881_v52 }
 0x2e4   : > { %4759 = vst [vmem:[#allocation2 + $0x98] sm:$0xe] %v4751_v58  ;;  %4760 = vst [vmem:[#allocation2 + $0x9c] sm:$0xf] %v4754_v27  ;;  %v8657_v63 = vpack.c.bf16 %v3882_v55, %v3882_v55  ;;  %v13274_v26 = vpack.c.bf16 %v3883_v14, %v3883_v14  ;;  %v13276_v48 = vpack.c.bf16 %v3884_v7, %v3884_v7  ;;  %v4070_v8 = vshrl.u32 %v8653_v30, 16 }
 0x2e5   : > { %4761 = vst [vmem:[#allocation2 + $0xa0] sm:$0x3] %v4755_v23  ;;  %v13278_v34 = vpack.c.bf16 %v3885_v17, %v3885_v17  ;;  %v13280_v31 = vpack.c.bf16 %v3886_v10, %v3886_v10  ;;  %v13282_v25 = vpack.c.bf16 %v3887_v4, %v3887_v4  ;;  %v13284_v6 = vpack.c.bf16 %v3888_v51, %v3888_v51 }
 0x2e6   : > { %v13286_v57 = vpack.c.bf16 %v3889_v45, %v3889_v45  ;;  %v13288_v11 = vpack.c.bf16 %v3890_v41, %v3890_v41  ;;  %v13290_v2 = vpack.c.bf16 %v3891_v38, %v3891_v38  ;;  %v13292_v52 = vpack.c.bf16 %v3892_v18, %v3892_v18 }
 0x2e7   : > { %v13294_v55 = vpack.c.bf16 %v3893_v0, %v3893_v0  ;;  %v13296_v14 = vpack.c.bf16 %v3894_v43, %v3894_v43  ;;  %v13298_v7 = vpack.c.bf16 %v3895_v16, %v3895_v16  ;;  %v13300_v17 = vpack.c.bf16 %v3896_v46, %v3896_v46 }
 0x2e8   : > { %v13302_v10 = vpack.c.bf16 %v3897_v53, %v3897_v53  ;;  %v13304_v4 = vpack.c.bf16 %v3898_v49, %v3898_v49  ;;  %v13306_v51 = vpack.c.bf16 %v3899_v60, %v3899_v60  ;;  %v13308_v45 = vpack.c.bf16 %v3900_v32, %v3900_v32 }
 0x2e9   : > { %v13310_v41 = vpack.c.bf16 %v3901_v62, %v3901_v62  ;;  %v13312_v38 = vpack.c.bf16 %v3902_v44, %v3902_v44  ;;  %v4021_v18 = vshrl.u32 %v8648_v37, 16  ;;  %v4024_v0 = vshll.u32 %v8648_v37, 16 }
 0x2ea   : > { %v4073_v42 = vshll.u32 %v8653_v30, 16  ;;  %v4080_v43 = vshrl.u32 %v8654_v9, 16  ;;  %v4083_v16 = vshll.u32 %v8654_v9, 16  ;;  %v4090_v53 = vshrl.u32 %v8655_v29, 16 }
 0x2eb   : > { %v4023_v46 = vrot.slane %v4021_v18, 6  ;;  %v4026_v5 = vrot.slane %v4024_v0, 7  ;;  %v4093_v61 = vshll.u32 %v8655_v29, 16  ;;  %v4072_v49 = vrot.slane %v4070_v8, 6 }
 0x2ec   : > { %v4075_v58 = vrot.slane %v4073_v42, 7  ;;  %v4082_v60 = vrot.slane %v4080_v43, 6  ;;  %v4085_v40 = vrot.slane %v4083_v16, 7  ;;  %v4092_v47 = vrot.slane %v4090_v53, 6 }
 0x2ed   : > { %v13314_v32 = vor.u32 %v4026_v5, %v4023_v46  ;;  %v4095_v62 = vrot.slane %v4093_v61, 7  ;;  %v4100_v44 = vshrl.u32 %v8656_v13, 16  ;;  %v4103_v37 = vshll.u32 %v8656_v13, 16 }
 0x2ee   : > { %v4076_v28 = vor.u32 %v4075_v58, %v4072_v49  ;;  %v4086_v39 = vor.u32 %v4085_v40, %v4082_v60  ;;  %v4110_v27 = vshrl.u32 %v8657_v63, 16  ;;  %v4113_v18 = vshll.u32 %v8657_v63, 16 }
 0x2ef   : > { %v4028_v30 = vrot.slane %v13314_v32, 4  ;;  %v4096_v23 = vor.u32 %v4095_v62, %v4092_v47  ;;  %v4102_v9 = vrot.slane %v4100_v44, 6  ;;  %v16223_v29 = vrot.slane %v12960_v50, 4 }
 0x2f0   : > { %v4078_v8 = vrot.slane %v4076_v28, 4  ;;  %v4088_v42 = vrot.slane %v4086_v39, 4  ;;  %v4105_v43 = vrot.slane %v4103_v37, 7  ;;  %v4112_v13 = vrot.slane %v4110_v27, 6 }
 0x2f1   : > { %v4077_v0 = vsel %vm12955_vm15, %v16223_v29, %v4076_v28  ;;  %v4037_v16 = vsel %vm12955_vm15, %v4028_v30, %v12951_v22  ;;  %v4098_v46 = vrot.slane %v4096_v23, 4  ;;  %v4115_v5 = vrot.slane %v4113_v18, 7 }
 0x2f2   : > { %4426 = vst [vmem:[#allocation2 + $0x1c] sm:$0xf] %v4077_v0  ;;  %v4087_v53 = vsel %vm12955_vm15, %v4078_v8, %v4086_v39  ;;  %v4097_v50 = vsel %vm12955_vm15, %v4088_v42, %v4096_v23  ;;  %v4106_v63 = vor.u32 %v4105_v43, %v4102_v9  ;;  %v4120_v61 = vshrl.u32 %v13274_v26, 16  ;;  %4422 = vst [vmem:[#allocation2 + $0xc] sm:$0xf] %v4037_v16 }
 0x2f3   : > { %v4116_v49 = vor.u32 %v4115_v5, %v4112_v13  ;;  %v4123_v58 = vshll.u32 %v13274_v26, 16  ;;  %v4130_v60 = vshrl.u32 %v13276_v48, 16  ;;  %v4133_v22 = vshll.u32 %v13276_v48, 16  ;;  %4427 = vst [vmem:[#allocation2 + $0x20] sm:$0xf] %v4087_v53 }
 0x2f4   : > { %4428 = vst [vmem:[#allocation2 + $0x24] sm:$0xf] %v4097_v50  ;;  %v4107_v40 = vsel %vm12955_vm15, %v4098_v46, %v4106_v63  ;;  %v4108_v47 = vrot.slane %v4106_v63, 4  ;;  %v4122_v62 = vrot.slane %v4120_v61, 6  ;;  %v4140_v44 = vshrl.u32 %v13278_v34, 16 }
 0x2f5   : > { %v4118_v28 = vrot.slane %v4116_v49, 4  ;;  %v4125_v39 = vrot.slane %v4123_v58, 7  ;;  %v4132_v37 = vrot.slane %v4130_v60, 6  ;;  %v4135_v27 = vrot.slane %v4133_v22, 7  ;;  %4429 = vst [vmem:[#allocation2 + $0x28] sm:$0xf] %v4107_v40 }
 0x2f6   : > { %v4117_v26 = vsel %vm12955_vm15, %v4108_v47, %v4116_v49  ;;  %v4142_v30 = vrot.slane %v4140_v44, 6  ;;  %v4143_v48 = vshll.u32 %v13278_v34, 16  ;;  %v4150_v23 = vshrl.u32 %v13280_v31, 16 }
 0x2f7   : > { %v4126_v9 = vor.u32 %v4125_v39, %v4122_v62  ;;  %v4136_v18 = vor.u32 %v4135_v27, %v4132_v37  ;;  %v4153_v29 = vshll.u32 %v13280_v31, 16  ;;  %v4160_v0 = vshrl.u32 %v13282_v25, 16  ;;  %4430 = vst [vmem:[#allocation2 + $0x2c] sm:$0xf] %v4117_v26 }
 0x2f8   : > { %v4145_v8 = vrot.slane %v4143_v48, 7  ;;  %v4152_v42 = vrot.slane %v4150_v23, 6  ;;  %v4163_v43 = vshll.u32 %v13282_v25, 16  ;;  %v4170_v16 = vshrl.u32 %v13284_v6, 16 }
 0x2f9   : > { %v4127_v46 = vsel %vm12955_vm15, %v4118_v28, %v4126_v9  ;;  %v4128_v13 = vrot.slane %v4126_v9, 4  ;;  %v4138_v34 = vrot.slane %v4136_v18, 4  ;;  %v4155_v5 = vrot.slane %v4153_v29, 7 }
 0x2fa   : > { %v4146_v53 = vor.u32 %v4145_v8, %v4142_v30  ;;  %v4162_v50 = vrot.slane %v4160_v0, 6  ;;  %v4165_v63 = vrot.slane %v4163_v43, 7  ;;  %v4172_v61 = vrot.slane %v4170_v16, 6  ;;  %4431 = vst [vmem:[#allocation2 + $0x30] sm:$0xf] %v4127_v46 }
 0x2fb   : > { %v4137_v31 = vsel %vm12955_vm15, %v4128_v13, %v4136_v18  ;;  %v4156_v49 = vor.u32 %v4155_v5, %v4152_v42  ;;  %v4173_v58 = vshll.u32 %v13284_v6, 16  ;;  %v4180_v25 = vshrl.u32 %v13286_v57, 16 }
 0x2fc   : > { %v4147_v60 = vsel %vm12955_vm15, %v4138_v34, %v4146_v53  ;;  %v4148_v22 = vrot.slane %v4146_v53, 4  ;;  %v4166_v40 = vor.u32 %v4165_v63, %v4162_v50  ;;  %v4183_v47 = vshll.u32 %v13286_v57, 16  ;;  %4432 = vst [vmem:[#allocation2 + $0x34] sm:$0xf] %v4137_v31 }
 0x2fd   : > { %v4158_v62 = vrot.slane %v4156_v49, 4  ;;  %v4175_v44 = vrot.slane %v4173_v58, 7  ;;  %v4182_v28 = vrot.slane %v4180_v25, 6  ;;  %v4190_v39 = vshrl.u32 %v13288_v11, 16  ;;  %4433 = vst [vmem:[#allocation2 + $0x38] sm:$0xf] %v4147_v60 }
 0x2fe   : > { %v4157_v37 = vsel %vm12955_vm15, %v4148_v22, %v4156_v49  ;;  %v4168_v6 = vrot.slane %v4166_v40, 4  ;;  %v4185_v27 = vrot.slane %v4183_v47, 7  ;;  %v4193_v26 = vshll.u32 %v13288_v11, 16 }
 0x2ff   : > { %v4167_v30 = vsel %vm12955_vm15, %v4158_v62, %v4166_v40  ;;  %v4176_v48 = vor.u32 %v4175_v44, %v4172_v61  ;;  %v4192_v23 = vrot.slane %v4190_v39, 6  ;;  %v4200_v57 = vshrl.u32 %v13290_v2, 16  ;;  %4434 = vst [vmem:[#allocation2 + $0x3c] sm:$0xf] %v4157_v37 }
 0x300   : > { %v4186_v9 = vor.u32 %v4185_v27, %v4182_v28  ;;  %v4195_v18 = vrot.slane %v4193_v26, 7  ;;  %v4203_v29 = vshll.u32 %v13290_v2, 16  ;;  %v4210_v0 = vshrl.u32 %v13292_v52, 16  ;;  %4435 = vst [vmem:[#allocation2 + $0x40] sm:$0xf] %v4167_v30 }
 0x301   : > { %v4177_v8 = vsel %vm12955_vm15, %v4168_v6, %v4176_v48  ;;  %v4178_v42 = vrot.slane %v4176_v48, 4  ;;  %v4202_v11 = vrot.slane %v4200_v57, 6  ;;  %v4213_v43 = vshll.u32 %v13292_v52, 16 }
 0x302   : > { %v4188_v16 = vrot.slane %v4186_v9, 4  ;;  %v4196_v46 = vor.u32 %v4195_v18, %v4192_v23  ;;  %v4205_v13 = vrot.slane %v4203_v29, 7  ;;  %v4212_v34 = vrot.slane %v4210_v0, 6  ;;  %4436 = vst [vmem:[#allocation2 + $0x44] sm:$0xf] %v4177_v8 }
 0x303   : > { %v4187_v5 = vsel %vm12955_vm15, %v4178_v42, %v4186_v9  ;;  %v4215_v53 = vrot.slane %v4213_v43, 7  ;;  %v4220_v2 = vshrl.u32 %v13294_v55, 16  ;;  %v4223_v50 = vshll.u32 %v13294_v55, 16 }
 0x304   : > { %v4197_v63 = vsel %vm12955_vm15, %v4188_v16, %v4196_v46  ;;  %v4198_v61 = vrot.slane %v4196_v46, 4  ;;  %v4206_v31 = vor.u32 %v4205_v13, %v4202_v11  ;;  %v4230_v52 = vshrl.u32 %v13296_v14, 16  ;;  %4437 = vst [vmem:[#allocation2 + $0x48] sm:$0xf] %v4187_v5 }
 0x305   : > { %v4216_v49 = vor.u32 %v4215_v53, %v4212_v34  ;;  %v4222_v58 = vrot.slane %v4220_v2, 6  ;;  %v4225_v25 = vrot.slane %v4223_v50, 7  ;;  %v4233_v60 = vshll.u32 %v13296_v14, 16  ;;  %4438 = vst [vmem:[#allocation2 + $0x4c] sm:$0xf] %v4197_v63 }
 0x306   : > { %vm4416_vm4 = vcmask 1043457   ;;  %v4207_v22 = vsel %vm12955_vm15, %v4198_v61, %v4206_v31  ;;  %v4208_v40 = vrot.slane %v4206_v31, 4  ;;  %v4232_v55 = vrot.slane %v4230_v52, 6  ;;  %v4419_v63 = vld [vmem:[#allocation2 + $0x8] sm:$0xe] }
 0x307   : > { %v4240_v47 = vshrl.u32 %v13298_v7, 16  ;;  %v4218_v62 = vrot.slane %v4216_v49, 4  ;;  %v4226_v44 = vor.u32 %v4225_v25, %v4222_v58  ;;  %v4235_v28 = vrot.slane %v4233_v60, 7  ;;  %4439 = vst [vmem:[#allocation2 + $0x50] sm:$0xf] %v4207_v22  ;;  %vm13400_vm5 = vmand %vm4416_vm4, %vm4417_vm13 }
 0x308   : > { %v4243_v39 = vshll.u32 %v13298_v7, 16  ;;  %v4217_v37 = vsel %vm12955_vm15, %v4208_v40, %v4216_v49  ;;  %v4250_v14 = vshrl.u32 %v13300_v17, 16  ;;  %v4253_v27 = vshll.u32 %v13300_v17, 16  ;;  %v4500_v22 = vld [vmem:[#allocation2 + $0x1c] sm:$0x1] }
 0x309   : > { %v4242_v6 = vrot.slane %v4240_v47, 6  ;;  %v4227_v26 = vsel %vm12955_vm15, %v4218_v62, %v4226_v44  ;;  %v4228_v30 = vrot.slane %v4226_v44, 4  ;;  %v4236_v48 = vor.u32 %v4235_v28, %v4232_v55  ;;  %4440 = vst [vmem:[#allocation2 + $0x54] sm:$0xf] %v4217_v37  ;;  %v4510_v62 = vld [vmem:[#allocation2 + $0x20] sm:$0x4] }
 0x30a   : > { %v4245_v23 = vrot.slane %v4243_v39, 7  ;;  %v4252_v57 = vrot.slane %v4250_v14, 6  ;;  %v4255_v9 = vrot.slane %v4253_v27, 7  ;;  %v4260_v7 = vshrl.u32 %v13302_v10, 16  ;;  %4441 = vst [vmem:[#allocation2 + $0x58] sm:$0xf] %v4227_v26 }
 0x30b   : > { %v4263_v18 = vshll.u32 %v13302_v10, 16  ;;  %v4237_v29 = vsel %vm12955_vm15, %v4228_v30, %v4236_v48  ;;  %v4238_v0 = vrot.slane %v4236_v48, 4  ;;  %v4270_v8 = vshrl.u32 %v13304_v4, 16  ;;  %v4530_v14 = vld [vmem:[#allocation2 + $0x28] sm:$0x8] }
 0x30c   : > { %v4246_v17 = vor.u32 %v4245_v23, %v4242_v6  ;;  %v4256_v42 = vor.u32 %v4255_v9, %v4252_v57  ;;  %v4262_v11 = vrot.slane %v4260_v7, 6  ;;  %v4273_v16 = vshll.u32 %v13304_v4, 16  ;;  %4442 = vst [vmem:[#allocation2 + $0x5c] sm:$0xf] %v4237_v29  ;;  %v4519_v6 = vld [vmem:[#allocation2 + $0x24] sm:$0x2] }
 0x30d   : > { %v4265_v43 = vrot.slane %v4263_v18, 7  ;;  %v4272_v34 = vrot.slane %v4270_v8, 6  ;;  %v4280_v10 = vshrl.u32 %v13306_v51, 16  ;;  %v4283_v50 = vshll.u32 %v13306_v51, 16  ;;  %v4540_v23 = vld [vmem:[#allocation2 + $0x2c] sm:$0x4] }
 0x30e   : > { %v4247_v46 = vsel %vm12955_vm15, %v4238_v0, %v4246_v17  ;;  %v4248_v13 = vrot.slane %v4246_v17, 4  ;;  %v4258_v5 = vrot.slane %v4256_v42, 4  ;;  %v4275_v2 = vrot.slane %v4273_v16, 7  ;;  %v4507_v57 = vld [vmem:[#allocation2 + $0x18] sm:$0x8] }
 0x30f   : > { %v4266_v53 = vor.u32 %v4265_v43, %v4262_v11  ;;  %4443 = vst [vmem:[#allocation2 + $0x60] sm:$0xf] %v4247_v46  ;;  %v4282_v31 = vrot.slane %v4280_v10, 6  ;;  %v4290_v4 = vshrl.u32 %v13308_v45, 16  ;;  %v4293_v52 = vshll.u32 %v13308_v45, 16 }
 0x310   : > { %v4257_v61 = vsel %vm12955_vm15, %v4248_v13, %v4256_v42  ;;  %v4276_v25 = vor.u32 %v4275_v2, %v4272_v34  ;;  %v4285_v60 = vrot.slane %v4283_v50, 7  ;;  %v4300_v47 = vshrl.u32 %v13310_v41, 16  ;;  %v4548_v29 = vld [vmem:[#allocation2 + $0x34] sm:$0x1]  ;;  %v4555_v0 = vld [vmem:[#allocation2 + $0x34] sm:$0x8] }
 0x311   : > { %v4267_v49 = vsel %vm12955_vm15, %v4258_v5, %v4266_v53  ;;  %v4268_v58 = vrot.slane %v4266_v53, 4  ;;  %4444 = vst [vmem:[#allocation2 + $0x64] sm:$0xf] %v4257_v61  ;;  %v4292_v40 = vrot.slane %v4290_v4, 6  ;;  %v4295_v55 = vrot.slane %v4293_v52, 7 }
 0x312   : > { %v4303_v45 = vshll.u32 %v13310_v41, 16  ;;  %4445 = vst [vmem:[#allocation2 + $0x68] sm:$0xf] %v4267_v49  ;;  %v4278_v28 = vrot.slane %v4276_v25, 4  ;;  %v4286_v39 = vor.u32 %v4285_v60, %v4282_v31  ;;  %v4310_v37 = vshrl.u32 %v13312_v38, 16 }
 0x313   : > { %v4277_v44 = vsel %vm12955_vm15, %v4268_v58, %v4276_v25  ;;  %v4296_v27 = vor.u32 %v4295_v55, %v4292_v40  ;;  %v4302_v26 = vrot.slane %v4300_v47, 6  ;;  %v4313_v48 = vshll.u32 %v13312_v38, 16  ;;  %v4516_v43 = vld [vmem:[#allocation2 + $0x20] sm:$0x8]  ;;  %v4527_v16 = vld [vmem:[#allocation2 + $0x24] sm:$0x1] }
 0x314   : > { %v4305_v30 = vrot.slane %v4303_v45, 7  ;;  %4446 = vst [vmem:[#allocation2 + $0x6c] sm:$0xf] %v4277_v44  ;;  %v4287_v41 = vsel %vm12955_vm15, %v4278_v28, %v4286_v39  ;;  %v4288_v9 = vrot.slane %v4286_v39, 4  ;;  %v4312_v7 = vrot.slane %v4310_v37, 6 }
 0x315   : > { %v4420_v18 = vsel %vm13400_vm5, %v13314_v32, %v4419_v63  ;;  %vm16226_vm13 = vsmask.f32 256  ;;  %vm16227_vm4 = vcmask 1040384   ;;  %v4298_v38 = vrot.slane %v4296_v27, 4  ;;  %4447 = vst [vmem:[#allocation2 + $0x70] sm:$0xf] %v4287_v41 }
 0x316   : > { %vm13417_vm7 = vmand %vm16227_vm4, %vm16226_vm13  ;;  %v4306_v8 = vor.u32 %v4305_v30, %v4302_v26  ;;  %v4315_v42 = vrot.slane %v4313_v48, 7  ;;  %4421 = vst [vmem:[#allocation2 + $0x8] sm:$0xe] %v4420_v18  ;;  %v4502_v11 = vrot.slane %v4500_v22, 5  ;;  %v4537_v46 = vld [vmem:[#allocation2 + $0x2c] sm:$0x1]  ;;  %v4297_v32 = vsel %vm12955_vm15, %v4288_v9, %v4296_v27 }
 0x317   : > { %v4563_v13 = vld [vmem:[#allocation2 + $0x3c] sm:$0x2]  ;;  %v4570_v34 = vld [vmem:[#allocation2 + $0x40] sm:$0x1]  ;;  %v4512_v10 = vrot.slane %v4510_v62, 7  ;;  %v8413_v5 = vrot.slane %v4519_v6, 9 }
 0x318   : > { %v8414_v53 = vrot.slane %v4530_v14, 11  ;;  %v4577_v2 = vld [vmem:[#allocation2 + $0x44] sm:$0x4]  ;;  %v4307_v50 = vsel %vm12955_vm15, %v4298_v38, %v4306_v8  ;;  %v4308_v63 = vrot.slane %v4306_v8, 4  ;;  %v4316_v61 = vor.u32 %v4315_v42, %v4312_v7  ;;  %4448 = vst [vmem:[#allocation2 + $0x74] sm:$0xf] %v4297_v32 }
 0x319   : > { %v4508_v31 = vsel %vm13079_vm9, %v4502_v11, %v4507_v57  ;;  %v4545_v4 = vld [vmem:[#allocation2 + $0x2c] sm:$0x2]  ;;  %v4584_v52 = vld [vmem:[#allocation2 + $0x48] sm:$0x2]  ;;  %v13427_v49 = vld [vmem:[#allocation2 + $0x4c] sm:$0x8]  ;;  %v4517_v58 = vsel %vm13129_vm1, %v4512_v10, %v4516_v43  ;;  %v4528_v25 = vsel %vm13417_vm7, %v8413_v5, %v4527_v16 }
 0x31a   : > { %4449 = vst [vmem:[#allocation2 + $0x78] sm:$0xf] %v4307_v50  ;;  %4509 = vst [vmem:[#allocation2 + $0x18] sm:$0x8] %v4508_v31  ;;  %v4538_v60 = vsel %vm13186_vm11, %v8414_v53, %v4537_v46  ;;  %v8415_v22 = vrot.slane %v4540_v23, 9  ;;  %vm16231_vm13 = vcmask 1041409   ;;  %v4317_v62 = vsel %vm12955_vm15, %v4308_v63, %v4316_v61 }
 0x31b   : > { %v4552_v51 = vld [vmem:[#allocation2 + $0x34] sm:$0x2]  ;;  %v4560_v40 = vld [vmem:[#allocation2 + $0x34] sm:$0x4]  ;;  %v13435_v55 = vld [vmem:[#allocation2 + $0x50] sm:$0x4] }
 0x31c   : > { %v13437_v47 = vld [vmem:[#allocation2 + $0x58] sm:$0x1]  ;;  %vm16230_vm5 = vsmask.f32 1280  ;;  %v4318_v44 = vrot.slane %v4316_v61, 4  ;;  %v4550_v28 = vrot.slane %v4548_v29, 7 }
 0x31d   : > { %vm13441_vm4 = vmand %vm16231_vm13, %vm16230_vm5  ;;  %4518 = vst [vmem:[#allocation2 + $0x20] sm:$0x8] %v4517_v58  ;;  %v8416_v39 = vrot.slane %v4555_v0, 9  ;;  %v4567_v37 = vld [vmem:[#allocation2 + $0x3c] sm:$0x4]  ;;  %v4565_v48 = vrot.slane %v4563_v13, 7 }
 0x31e   : > { %4529 = vst [vmem:[#allocation2 + $0x24] sm:$0x1] %v4528_v25  ;;  %4539 = vst [vmem:[#allocation2 + $0x2c] sm:$0x1] %v4538_v60  ;;  %v4574_v6 = vld [vmem:[#allocation2 + $0x3c] sm:$0x8]  ;;  %v4546_v30 = vsel %vm13441_vm4, %v8415_v22, %v4545_v4  ;;  %v4327_v7 = vsel %vm12955_vm15, %v4318_v44, %v12969_v54  ;;  %v4553_v18 = vsel %vm13250_vm0, %v4550_v28, %v4552_v51 }
 0x31f   : > { %v4581_v14 = vld [vmem:[#allocation2 + $0x44] sm:$0x8]  ;;  %v4615_v27 = vld [vmem:[#allocation2 + $0x58] sm:$0x8]  ;;  %v4623_v26 = vld [vmem:[#allocation2 + $0x60] sm:$0x2]  ;;  %v4561_v29 = vsel %vm12993_vm10, %v8416_v39, %v4560_v40  ;;  %v4568_v11 = vsel %vm13015_vm2, %v4565_v48, %v4567_v37 }
 0x320   : > { %4450 = vst [vmem:[#allocation2 + $0x7c] sm:$0xf] %v4317_v62  ;;  %v4572_v23 = vrot.slane %v4570_v34, 5  ;;  %v4579_v57 = vrot.slane %v4577_v2, 7  ;;  %v4589_v41 = vld [vmem:[#allocation2 + $0x48] sm:$0x1] }
 0x321   : > { %v4630_v9 = vld [vmem:[#allocation2 + $0x64] sm:$0x1]  ;;  %4547 = vst [vmem:[#allocation2 + $0x2c] sm:$0x2] %v4546_v30  ;;  %v8417_v0 = vrot.slane %v4584_v52, 9  ;;  %v8418_v43 = vrot.slane %v13427_v49, 11 }
 0x322   : > { %v4597_v38 = vld [vmem:[#allocation2 + $0x50] sm:$0x1]  ;;  %v4637_v8 = vld [vmem:[#allocation2 + $0x68] sm:$0x4]  ;;  %4451 = vst [vmem:[#allocation2 + $0x80] sm:$0xf] %v4327_v7  ;;  %v4575_v12 = vsel %vm13079_vm9, %v4572_v23, %v4574_v6  ;;  %v4582_v54 = vsel %vm13129_vm1, %v4579_v57, %v4581_v14 }
 0x323   : > { %v4462_v42 = vld [vmem:[#allocation2 + $0x8] sm:$0x4]  ;;  %4554 = vst [vmem:[#allocation2 + $0x34] sm:$0x2] %v4553_v18  ;;  %4562 = vst [vmem:[#allocation2 + $0x34] sm:$0x4] %v4561_v29  ;;  %v4590_v53 = vsel %vm13417_vm7, %v8417_v0, %v4589_v41  ;;  %v4598_v4 = vsel %vm13186_vm11, %v8418_v43, %v4597_v38 }
 0x324   : > { %v4605_v16 = vld [vmem:[#allocation2 + $0x50] sm:$0x2]  ;;  %v4612_v46 = vld [vmem:[#allocation2 + $0x58] sm:$0x2]  ;;  %v4644_v13 = vld [vmem:[#allocation2 + $0x6c] sm:$0x2] }
 0x325   : > { %v13463_v34 = vld [vmem:[#allocation2 + $0xc] sm:$0xf]  ;;  %v13465_v32 = vld [vmem:[#allocation2 + $0x90] sm:$0x2]  ;;  %v8411_v10 = vrot.slane %v4462_v42, 9  ;;  %v8419_v2 = vrot.slane %v13435_v55, 9 }
 0x326   : > { %v4469_v5 = vld [vmem:[#allocation2 + $0x8] sm:$0x2]  ;;  %4569 = vst [vmem:[#allocation2 + $0x3c] sm:$0x4] %v4568_v11  ;;  %4576 = vst [vmem:[#allocation2 + $0x3c] sm:$0x8] %v4575_v12 }
 0x327   : > { %4583 = vst [vmem:[#allocation2 + $0x44] sm:$0x8] %v4582_v54  ;;  %v4610_v50 = vrot.slane %v13437_v47, 7  ;;  %v4620_v63 = vld [vmem:[#allocation2 + $0x58] sm:$0x4]  ;;  %v8420_v52 = vrot.slane %v4615_v27, 9  ;;  %v4470_v51 = vsel %vm13441_vm4, %v8411_v10, %v4469_v5  ;;  %v4606_v40 = vsel %vm13441_vm4, %v8419_v2, %v4605_v16 }
 0x328   : > { %v4627_v61 = vld [vmem:[#allocation2 + $0x60] sm:$0x4]  ;;  %v4634_v31 = vld [vmem:[#allocation2 + $0x60] sm:$0x8]  ;;  %4591 = vst [vmem:[#allocation2 + $0x48] sm:$0x1] %v4590_v53 }
 0x329   : > { %v4625_v49 = vrot.slane %v4623_v26, 7  ;;  %v4632_v58 = vrot.slane %v4630_v9, 5  ;;  %v4641_v25 = vld [vmem:[#allocation2 + $0x68] sm:$0x8]  ;;  %v4652_v60 = vld [vmem:[#allocation2 + $0x70] sm:$0x8]  ;;  %v4613_v55 = vsel %vm13250_vm0, %v4610_v50, %v4612_v46  ;;  %v4621_v39 = vsel %vm12993_vm10, %v8420_v52, %v4620_v63 }
 0x32a   : > { %v13473_v22 = vld [vmem:[#allocation2 + $0x10] sm:$0xff]   ;;  %4599 = vst [vmem:[#allocation2 + $0x50] sm:$0x1] %v4598_v4  ;;  %v4639_v47 = vrot.slane %v4637_v8, 7  ;;  %v4649_v62 = vld [vmem:[#allocation2 + $0x6c] sm:$0x1] }
 0x32b   : > { %v4660_v44 = vld [vmem:[#allocation2 + $0x74] sm:$0x4]  ;;  %v13481_v28 = vld [vmem:[#allocation2 + $0x18] sm:$0xff]   ;;  %4471 = vst [vmem:[#allocation2 + $0x8] sm:$0x2] %v4470_v51  ;;  %v4628_v37 = vsel %vm13015_vm2, %v4625_v49, %v4627_v61  ;;  %v4635_v6 = vsel %vm13079_vm9, %v4632_v58, %v4634_v31  ;;  %v8421_v14 = vrot.slane %v4644_v13, 9 }
 0x32c   : > { %4607 = vst [vmem:[#allocation2 + $0x50] sm:$0x2] %v4606_v40  ;;  %4614 = vst [vmem:[#allocation2 + $0x58] sm:$0x2] %v4613_v55  ;;  %v4657_v27 = vld [vmem:[#allocation2 + $0x74] sm:$0x1]  ;;  %v4642_v57 = vsel %vm13129_vm1, %v4639_v47, %v4641_v25 }
 0x32d   : > { %v4665_v26 = vld [vmem:[#allocation2 + $0x74] sm:$0x2]  ;;  %v5189_v30 = vld [vmem:[#allocation2 + $0x8] sm:$0xc]  ;;  %v13489_v48 = vld [vmem:[#allocation2 + $0x20] sm:$0xff]   ;;  %v8422_v41 = vrot.slane %v4652_v60, 11  ;;  %v4650_v18 = vsel %vm13417_vm7, %v8421_v14, %v4649_v62 }
 0x32e   : > { %v4709_v23 = vld [vmem:[#allocation2 + $0x90] sm:$0x1]  ;;  %4622 = vst [vmem:[#allocation2 + $0x58] sm:$0x4] %v4621_v39  ;;  %4629 = vst [vmem:[#allocation2 + $0x60] sm:$0x4] %v4628_v37  ;;  %v8453_v21 = vcombine.low %v5189_v30, %v13463_v34 }
 0x32f   : > { %v8423_v9 = vrot.slane %v4660_v44, 9  ;;  %v4668_v7 = vld [vmem:[#allocation2 + $0x7c] sm:$0x1]  ;;  %v4672_v35 = vld [vmem:[#allocation2 + $0x7c] sm:$0x2]  ;;  %v8425_v8 = vrot.slane %v13465_v32, 9  ;;  %v4658_v19 = vsel %vm13186_vm11, %v8422_v41, %v4657_v27 }
 0x330   : > { %4636 = vst [vmem:[#allocation2 + $0x60] sm:$0x8] %v4635_v6  ;;  %4643 = vst [vmem:[#allocation2 + $0x68] sm:$0x8] %v4642_v57  ;;  %v4670_v29 = vrot.slane %v4668_v7, 7  ;;  %v13502_v12 = vrot.slane %v13473_v22, 1 }
 0x331   : > { %v4675_v0 = vld [vmem:[#allocation2 + $0x7c] sm:$0x8]  ;;  %v4680_v38 = vld [vmem:[#allocation2 + $0x7c] sm:$0x4]  ;;  %4651 = vst [vmem:[#allocation2 + $0x6c] sm:$0x1] %v4650_v18  ;;  %v4666_v42 = vsel %vm13441_vm4, %v8423_v9, %v4665_v26  ;;  %v4710_v43 = vsel %vm13417_vm7, %v8425_v8, %v4709_v23 }
 0x332   : > { %v8424_v11 = vrot.slane %v4675_v0, 9  ;;  %4659 = vst [vmem:[#allocation2 + $0x74] sm:$0x1] %v4658_v19  ;;  %4667 = vst [vmem:[#allocation2 + $0x74] sm:$0x2] %v4666_v42  ;;  %v4673_v54 = vsel %vm13250_vm0, %v4670_v29, %v4672_v35  ;;  %v5086_v16 = vrot.slane %v13481_v28, 1 }
 0x333   : > { %v5231_v46 = vrot.slane %v8453_v21, 1  ;;  %v13509_v15 = vld [vmem:[#allocation2 + $0x28] sm:$0xff]   ;;  %4674 = vst [vmem:[#allocation2 + $0x7c] sm:$0x2] %v4673_v54  ;;  %4711 = vst [vmem:[#allocation2 + $0x90] sm:$0x1] %v4710_v43 }
 0x334   : > { %v4681_v45 = vsel %vm12993_vm10, %v8424_v11, %v4680_v38  ;;  %v5088_v13 = vrot.slane %v13489_v48, 1  ;;  %v4928_v32 = vshll.u32 %v13473_v22, 16  ;;  %v4932_v36 = vshrl.u32 %v13473_v22, 16  ;;  %v5184_v53 = vld [vmem:[#allocation2 + $0x8] sm:$0xe]  ;;  %v9504_v31 = vld [vmem:[%s15556_s2] sm:$0xff]  }
 0x335   : > { %4682 = vst [vmem:[#allocation2 + $0x7c] sm:$0x4] %v4681_v45  ;;  %vm16234_vm11 = vcmask 1046528   ;;  %v5090_v5 = vrot.slane %v13509_v15, 1  ;;  %v4936_v1 = vshll.u32 %v13481_v28, 16  ;;  %v8449_v4 = vcombine.low %v5184_v53, %v13463_v34  ;;  %v13538_v25 = vld [vmem:[#allocation2 + $0x30] sm:$0xff]  }
 0x336   : > { %v13518_v17 = vsel %vm16234_vm11, %v13502_v12, %v5086_v16  ;;  %vm16236_vm7 = vmmov %vm16234_vm11  ;;  %v13528_v61 = vrot.slane %v4928_v32, 1  ;;  %v13540_v60 = vld [vmem:[#allocation2 + $0x38] sm:$0xff]   ;;  %v4940_v47 = vshrl.u32 %v13481_v28, 16  ;;  %v9505_v39 = vld [vmem:[%s15556_s2 + $0x8] sm:$0xff]   ;;  %vm16244_vm0 = vsmask.f32 7424 }
 0x337   : > { %16235 = vst [vmem:[#allocation22_spill] sm:$0xff] %v13518_v17  ;;  %v5232_v10 = vsel %vm16236_vm7, %v5231_v46, %v13502_v12  ;;  %v5292_v50 = vrot.slane %v13518_v17, 1  ;;  %vm16237_vm10 = vmmov %vm16236_vm7  ;;  %v4938_v58 = vrot.slane %v4936_v1, 1  ;;  %v5207_v44 = vshll.u32 %v8449_v4, 16  ;;  %v13555_v26 = vld [vmem:[#allocation2 + $0x40] sm:$0xff]   ;;  %v13558_v41 = vld [vmem:[#allocation2 + $0x48] sm:$0xff]  }
 0x338   : > { %v5291_v2 = vrot.slane %v5232_v10, 1  ;;  %v13526_v63 = vsel %vm16237_vm10, %v5086_v16, %v5088_v13  ;;  %vm16239_vm2 = vmmov %vm16236_vm7  ;;  %v4934_v55 = vor.u32 %v4932_v36, %v13528_v61  ;;  %v4944_v27 = vshll.u32 %v13489_v48, 16  ;;  %16245 = vst [vmem:[#allocation30_spill] sm:$0xff] %v13555_v26  ;;  %v9510_v53 = vld [vmem:[%s15556_s2 + $0x88] sm:$0xff]  }
 0x339   : > { %16238 = vst [vmem:[#allocation25_spill] sm:$0xff] %v13526_v63  ;;  %v5296_v52 = vrot.slane %v13526_v63, 1  ;;  %v13536_v49 = vsel %vm16239_vm2, %v5088_v13, %v5090_v5  ;;  %vm16241_vm15 = vmmov %vm16239_vm2  ;;  %v4942_v14 = vor.u32 %v4940_v47, %v4938_v58  ;;  %v5205_v30 = vshrl.u32 %v8449_v4, 16  ;;  %v9508_v13 = vld [vmem:[%s15556_s2 + $0x10] sm:$0xff]  }
 0x33a   : > { %16240 = vst [vmem:[#allocation28_spill] sm:$0xff] %v13536_v49  ;;  %v5293_v51 = vsel %vm16241_vm15, %v5291_v2, %v5292_v50  ;;  %v5300_v40 = vrot.slane %v13536_v49, 1  ;;  %vm16242_vm9 = vmmov %vm16239_vm2  ;;  %v13552_v6 = vsel %vm16244_vm0, %v4934_v55, %v4938_v58  ;;  %v5209_v23 = vrot.slane %v5207_v44, 1  ;;  %v13594_v2 = vld [vmem:[#allocation2 + $0x50] sm:$0xff]  }
 0x33b   : > { %9098 = vmatprep.mubr.bf16.mxu1 %v5293_v51  ;;  %v5297_v62 = vsel %vm16242_vm9, %v5292_v50, %v5296_v52  ;;  %vm16243_vm1 = vmmov %vm16239_vm2  ;;  %v5092_v57 = vrot.slane %v13538_v25, 1  ;;  %16246 = vst [vmem:[#allocation27_spill] sm:$0xff] %v13558_v41  ;;  %v5286_v9 = vrot.slane %v8449_v4, 1  ;;  %v4946_v7 = vrot.slane %v4944_v27, 1  ;;  %v9509_v51 = vld [vmem:[%s15556_s2 + $0x18] sm:$0xff]  }
 0x33c   : > { %9099 = vmatmul.mubr.bf16.vlgmr.msra.gmra.mrb[180].mxu1 %v5297_v62  ;;  %v5301_v37 = vsel %vm16243_vm1, %v5296_v52, %v5300_v40  ;;  %v5094_v35 = vrot.slane %v13540_v60, 1  ;;  %v5210_v21 = vor.u32 %v5209_v23, %v5205_v30  ;;  %v5289_v18 = vrot.slane %v13552_v6, 1  ;;  %vm16247_vm5 = vmmov %vm16243_vm1  ;;  %v13601_v52 = vld [vmem:[#allocation2 + $0x58] sm:$0xff]   ;;  %v9513_v23 = vld [vmem:[%s15556_s2 + $0x20] sm:$0xff]  }
 0x33d   : > { %9102 = vmatprep.mubr.bf16.mxu1 %v5301_v37  ;;  %6046 = vmatpush1.bf16.msra.mxu1 %v9504_v31  ;;  %v13564_v29 = vsel %vm16247_vm5, %v5090_v5, %v5092_v57  ;;  %v4948_v0 = vshrl.u32 %v13489_v48, 16  ;;  %vm16249_vm13 = vmmov %vm16244_vm0  ;;  %v5096_v42 = vrot.slane %v13555_v26, 1  ;;  %v4952_v43 = vshll.u32 %v13509_v15, 16 }
 0x33e   : > { %6047 = vmatprep.subr.bf16.mxu1 %v16125_v3  ;;  %16248 = vst [vmem:[#allocation29_spill] sm:$0xff] %v13564_v29  ;;  %v13568_v38 = vsel %vm16249_vm13, %v4942_v14, %v4946_v7  ;;  %v5304_v8 = vrot.slane %v13564_v29, 1  ;;  %vm16250_vm4 = vmmov %vm16243_vm1  ;;  %v5098_v16 = vrot.slane %v13558_v41, 1  ;;  %v5100_v44 = vrot.slane %v13594_v2, 1 }
 0x33f   : > { %v13572_v19 = vsel %vm16250_vm4, %v5092_v57, %v5094_v35  ;;  %vm16251_vm11 = vmmov %vm16244_vm0  ;;  %v5294_v45 = vrot.slane %v13568_v38, 1  ;;  %v4950_v36 = vor.u32 %v4948_v0, %v4946_v7  ;;  %v4954_v31 = vrot.slane %v4952_v43, 1 }
 0x340   : > { %v5211_v11 = vsel %vm16251_vm11, %v5210_v21, %v13528_v61  ;;  %v5308_v54 = vrot.slane %v13572_v19, 1  ;;  %vm16252_vm7 = vmmov %vm16243_vm1  ;;  %v13599_v4 = vsel %vm16243_vm1, %v5096_v42, %v5098_v16  ;;  %v4956_v37 = vshrl.u32 %v13509_v15, 16  ;;  %v13633_v21 = vld [vmem:[#allocation2 + $0x60] sm:$0xff]  }
 0x341   : > { %6048 = vmatpush1.bf16.msra.mxu1 %v9505_v39  ;;  %v5288_v46 = vrot.slane %v5211_v11, 1  ;;  %v5305_v32 = vsel %vm16252_vm7, %v5300_v40, %v5304_v8  ;;  %vm16253_vm10 = vmmov %vm16243_vm1  ;;  %v9609_v40 = vld [vmem:[%s15556_s2 + $0x80] sm:$0xff]   ;;  %v5316_v62 = vrot.slane %v13599_v4, 1  ;;  %v9520_v39 = vld [vmem:[%s15556_s2 + $0x90] sm:$0xff]   ;;  %v4960_v14 = vshll.u32 %v13538_v25, 16 }
 0x342   : > { %6049 = vmatprep.subr.bf16.mxu1 %v16125_v3  ;;  %vm16254_vm2 = vmmov %vm16243_vm1  ;;  %v5102_v27 = vrot.slane %v13601_v52, 1 }
 0x343   : > { %v5290_v10 = vsel %vm16253_vm10, %v5288_v46, %v5289_v18  ;;  %v5309_v5 = vsel %vm16254_vm2, %v5304_v8, %v5308_v54  ;;  %vm16255_vm15 = vmmov %vm16243_vm1  ;;  %v13638_v8 = vld [vmem:[#allocation2 + $0x68] sm:$0xff]  }
 0x344   : > { %9103 = vmatmul.mubr.bf16.gmra.mrb[184].mxu1 %v5305_v32  ;;  %v13589_v1 = vsel %vm16255_vm15, %v5094_v35, %v5096_v42  ;;  %5579 = vmatprep.mubr.bf16.mxu0 %v5290_v10  ;;  %vm16256_vm9 = vmmov %vm16243_vm1  ;;  %v9531_v42 = vld [vmem:[%s15556_s2 + $0x98] sm:$0xff]   ;;  %v4968_v32 = vshll.u32 %v13540_v60, 16  ;;  %v9537_v10 = vld [vmem:[%s15556_s2 + $0xa0] sm:$0xff]  }
 0x345   : > { %v5287_v50 = vsel %vm16256_vm9, %v5286_v9, %v13502_v12  ;;  %9106 = vmatprep.mubr.bf16.mxu1 %v5309_v5  ;;  %vm16257_vm0 = vmmov %vm16243_vm1  ;;  %6050 = vmatpush1.bf16.msra.mxu1 %v9508_v13  ;;  %v5312_v47 = vrot.slane %v13589_v1, 1  ;;  %v4958_v9 = vor.u32 %v4956_v37, %v4954_v31  ;;  %v5104_v13 = vrot.slane %v13633_v21, 1  ;;  %v13676_v37 = vld [vmem:[#allocation2 + $0x78] sm:$0xff]  }
 0x346   : > { %5580 = vmatmul.mubr.bf16.vlgmr.msra.gmra.mrb[144].mxu0 %v5287_v50  ;;  %v5295_v58 = vsel %vm16257_vm0, %v5289_v18, %v5294_v45  ;;  %vm16258_vm5 = vmmov %vm16251_vm11  ;;  %6051 = vmatprep.subr.bf16.mxu1 %v16125_v3  ;;  %v4962_v18 = vrot.slane %v4960_v14, 1 }
 0x347   : > { %5587 = vmatprep.mubr.bf16.mxu0 %v5295_v58  ;;  %9135 = vmatpush3.bf16.msra.mxu0 %v9609_v40  ;;  %v13611_v55 = vsel %vm16258_vm5, %v4950_v36, %v4954_v31  ;;  %vm16259_vm13 = vmmov %vm16257_vm0  ;;  %v5106_v36 = vrot.slane %v13638_v8, 1  ;;  %v4765_v58 = vld [vmem:[#allocation2 + $0x8] sm:$0xf] }
 0x348   : > { %9136 = vmatprep.subr.bf16.mxu0 %v9510_v53  ;;  %v5298_v30 = vrot.slane %v13611_v55, 1  ;;  %v5313_v57 = vsel %vm16259_vm13, %v5308_v54, %v5312_v47  ;;  %vm16260_vm4 = vmmov %vm16257_vm0  ;;  %v9514_v54 = vld [vmem:[%s15556_s2 + $0x28] sm:$0xff]  }
 0x349   : > { %6052 = vmatpush1.bf16.msra.mxu1 %v9509_v51  ;;  %v5317_v7 = vsel %vm16260_vm4, %v5312_v47, %v5316_v62  ;;  %vm16261_vm11 = vmmov %vm16257_vm0  ;;  %v13671_v47 = vld [vmem:[#allocation2 + $0x70] sm:$0xff]  }
 0x34a   : > { %6053 = vmatprep.subr.bf16.mxu1 %v16125_v3  ;;  %v13631_v35 = vsel %vm16261_vm11, %v5098_v16, %v5100_v44  ;;  %vm16262_vm7 = vmmov %vm16257_vm0 }
 0x34b   : > { %9137 = vmatpush3.bf16.msra.mxu0 %v9510_v53  ;;  %v13636_v0 = vsel %vm16262_vm7, %v5100_v44, %v5102_v27  ;;  %vm16263_vm10 = vmmov %vm16257_vm0  ;;  %v5320_v16 = vrot.slane %v13631_v35, 1  ;;  %v9517_v53 = vld [vmem:[%s15556_s2 + $0x30] sm:$0xff]   ;;  %v4970_v44 = vrot.slane %v4968_v32, 1 }
 0x34c   : > { %9107 = vmatmul.mubr.bf16.gmra.mrb[188].mxu1 %v5313_v57  ;;  %9138 = vmatprep.subr.bf16.mxu0 %v9520_v39  ;;  %v5299_v11 = vsel %vm16263_vm10, %v5294_v45, %v5298_v30  ;;  %vm16264_vm2 = vmmov %vm16258_vm5  ;;  %v5324_v46 = vrot.slane %v13636_v0, 1  ;;  %v4964_v45 = vshrl.u32 %v13538_v25, 16 }
 0x34d   : > { %9110 = vmatprep.mubr.bf16.mxu1 %v5317_v7  ;;  %6054 = vmatpush1.bf16.msra.mxu1 %v9513_v23  ;;  %v13649_v43 = vsel %vm16264_vm2, %v4958_v9, %v4962_v18  ;;  %vm16265_vm15 = vmmov %vm16257_vm0  ;;  %v13687_v23 = vcombine.low %v4765_v58, %v13463_v34  ;;  %v5110_v34 = vrot.slane %v13676_v37, 1 }
 0x34e   : > { %5588 = vmatmul.mubr.bf16.gmra.mrb[148].mxu0 %v13518_v17  ;;  %6055 = vmatprep.subr.bf16.mxu1 %v16125_v3  ;;  %v5302_v5 = vrot.slane %v13649_v43, 1  ;;  %v5321_v50 = vsel %vm16265_vm15, %v5316_v62, %v5320_v16  ;;  %v4966_v31 = vor.u32 %v4964_v45, %v4962_v18  ;;  %vm16266_vm9 = vmmov %vm16257_vm0  ;;  %v9538_v62 = vld [vmem:[%s15556_s2 + $0xa8] sm:$0xff]   ;;  %v4972_v18 = vshrl.u32 %v13540_v60, 16  ;;  %v13707_v45 = vld [vmem:[#allocation2 + $0x80] sm:$0xff]  }
 0x34f   : > { %5595 = vmatprep.mubr.bf16.mxu0 %v5299_v11  ;;  %9139 = vmatpush3.bf16.msra.mxu0 %v9520_v39  ;;  %v5325_v51 = vsel %vm16266_vm9, %v5320_v16, %v5324_v46  ;;  %vm16267_vm1 = vmmov %vm16257_vm0  ;;  %v13674_v39 = vsel %vm16257_vm0, %v5104_v13, %v5106_v36  ;;  %v4920_v11 = vshll.u32 %v13687_v23, 16 }
 0x350   : > { %9140 = vmatprep.subr.bf16.mxu0 %v9531_v42  ;;  %v13669_v40 = vsel %vm16267_vm1, %v5102_v27, %v5104_v13  ;;  %vm16268_vm5 = vmmov %vm16257_vm0  ;;  %v9518_v27 = vld [vmem:[%s15556_s2 + $0x38] sm:$0xff]   ;;  %v5332_v7 = vrot.slane %v13674_v39, 1  ;;  %v9522_v13 = vld [vmem:[%s15556_s2 + $0x40] sm:$0xff]  }
 0x351   : > { %6056 = vmatpush1.bf16.msra.mxu1 %v9514_v54  ;;  %v5303_v14 = vsel %vm16268_vm5, %v5298_v30, %v5302_v5  ;;  %vm16269_vm13 = vmmov %vm16264_vm2  ;;  %v5328_v9 = vrot.slane %v13669_v40, 1  ;;  %v5108_v30 = vrot.slane %v13671_v47, 1  ;;  %v9539_v54 = vld [vmem:[%s15556_s2 + $0xb0] sm:$0xff]  }
 0x352   : > { %6057 = vmatprep.subr.bf16.mxu1 %v16125_v3  ;;  %v13690_v57 = vsel %vm16269_vm13, %v4966_v31, %v4970_v44  ;;  %vm16270_vm4 = vmmov %vm16257_vm0 }
 0x353   : > { %9141 = vmatpush3.bf16.msra.mxu0 %v9531_v42  ;;  %v4976_v42 = vshll.u32 %v13555_v26, 16  ;;  %v5306_v16 = vrot.slane %v13690_v57, 1  ;;  %v5329_v32 = vsel %vm16270_vm4, %v5324_v46, %v5328_v9  ;;  %vm16272_vm11 = vmmov %vm16257_vm0 }
 0x354   : > { %9111 = vmatmul.mubr.bf16.gmra.mrb[192].mxu1 %v5321_v50  ;;  %9142 = vmatprep.subr.bf16.mxu0 %v9537_v10  ;;  %v13713_v50 = vrot.slane %v4920_v11, 1  ;;  %v5333_v31 = vsel %vm16272_vm11, %v5328_v9, %v5332_v7  ;;  %vm16273_vm7 = vmmov %vm16257_vm0  ;;  %v4980_v11 = vshrl.u32 %v13555_v26, 16 }
 0x355   : > { %9114 = vmatprep.mubr.bf16.mxu1 %v5325_v51  ;;  %6058 = vmatpush1.bf16.msra.mxu1 %v9517_v53  ;;  %v13711_v53 = vld [vmem:[#allocation2 + $0x88] sm:$0xff]   ;;  %v13717_v58 = vsel %vm16273_vm7, %v5106_v36, %v5108_v30  ;;  %v4924_v51 = vshrl.u32 %v13687_v23, 16  ;;  %vm16274_vm10 = vmmov %vm16257_vm0 }
 0x356   : > { %5596 = vmatmul.mubr.bf16.gmra.mrb[152].mxu0 %v13526_v63  ;;  %6059 = vmatprep.subr.bf16.mxu1 %v16125_v3  ;;  %16271 = vst [vmem:[#allocation35_spill] sm:$0xff] %v13711_v53  ;;  %v13721_v46 = vsel %vm16274_vm10, %v5108_v30, %v5110_v34  ;;  %vm16275_vm2 = vmmov %vm16257_vm0  ;;  %v9523_v36 = vld [vmem:[%s15556_s2 + $0x48] sm:$0xff]   ;;  %v5048_v20 = vshll.u32 %v13711_v53, 16 }
 0x357   : > { %5603 = vmatprep.mubr.bf16.mxu0 %v5303_v14  ;;  %9143 = vmatpush3.bf16.msra.mxu0 %v9537_v10  ;;  %v4974_v10 = vor.u32 %v4972_v18, %v4970_v44  ;;  %v4978_v14 = vrot.slane %v4976_v42, 1  ;;  %v9540_v44 = vld [vmem:[%s15556_s2 + $0xb8] sm:$0xff]   ;;  %v4926_v9 = vor.u32 %v4924_v51, %v13713_v50  ;;  %vm16276_vm15 = vmmov %vm16269_vm13  ;;  %v5336_v18 = vrot.slane %v13717_v58, 1 }
 0x358   : > { %9144 = vmatprep.subr.bf16.mxu0 %v9538_v62  ;;  %v13739_v42 = vrot.slane %v13711_v53, 1  ;;  %vm16277_vm9 = vmmov %vm16269_vm13 }
 0x359   : > { %6060 = vmatpush1.bf16.msra.mxu1 %v9518_v27  ;;  %v5307_v27 = vsel %vm16275_vm2, %v5302_v5, %v5306_v16  ;;  %v13734_v30 = vsel %vm16276_vm15, %v4974_v10, %v4978_v14  ;;  %v5340_v5 = vrot.slane %v13721_v46, 1  ;;  %v9528_v10 = vld [vmem:[#allocation2 + $0x90] sm:$0xff]   ;;  %v4982_v51 = vor.u32 %v4980_v11, %v4978_v14  ;;  %vm16278_vm1 = vmmov %vm16257_vm0 }
 0x35a   : > { %6061 = vmatprep.subr.bf16.mxu1 %v16125_v3  ;;  %v5337_v59 = vsel %vm16257_vm0, %v5332_v7, %v5336_v18  ;;  %vm16279_vm5 = vmmov %vm16257_vm0  ;;  %v4764_v7 = vld [vmem:[#allocation2 + $0x4] sm:$0xf]  ;;  %v5213_v33 = vshll.u32 %v9528_v10, 16 }
 0x35b   : > { %9145 = vmatpush3.bf16.msra.mxu0 %v9538_v62  ;;  %v5112_v62 = vrot.slane %v13707_v45, 1  ;;  %vm16281_vm13 = vmmov %vm16257_vm0 }
 0x35c   : > { %9115 = vmatmul.mubr.bf16.gmra.mrb[196].mxu1 %v5329_v32  ;;  %9146 = vmatprep.subr.bf16.mxu0 %v9539_v54  ;;  %v13746_v32 = vsel %vm16277_vm9, %v4926_v9, %v13528_v61  ;;  %v13765_v9 = vrot.slane %v5048_v20, 1  ;;  %vm16283_vm4 = vmmov %vm16257_vm0  ;;  %v5215_v24 = vrot.slane %v5213_v33, 1  ;;  %v9530_v33 = vld [vmem:[%s15556_s2 + $0x60] sm:$0xff]  }
 0x35d   : > { %9118 = vmatprep.mubr.bf16.mxu1 %v5333_v31  ;;  %6062 = vmatpush1.bf16.msra.mxu1 %v9522_v13  ;;  %v4984_v13 = vshll.u32 %v13558_v41, 16  ;;  %v13760_v61 = vsel %vm16279_vm5, %v5112_v62, %v13739_v42  ;;  %v5052_v31 = vshrl.u32 %v13711_v53, 16  ;;  %vm16284_vm11 = vmmov %vm16277_vm9  ;;  %v13788_v53 = vrot.slane %v9528_v10, 1 }
 0x35e   : > { %5604 = vmatmul.mubr.bf16.gmra.mrb[156].mxu0 %v13536_v49  ;;  %6063 = vmatprep.subr.bf16.mxu1 %v16125_v3  ;;  %16280 = vst [vmem:[#allocation37_spill] sm:$0xff] %v13760_v61  ;;  %v5348_v20 = vrot.slane %v13760_v61, 1  ;;  %vm16287_vm7 = vmmov %vm16257_vm0 }
 0x35f   : > { %5611 = vmatprep.mubr.bf16.mxu0 %v5307_v27  ;;  %9147 = vmatpush3.bf16.msra.mxu0 %v9539_v54  ;;  %v13750_v27 = vsel %vm16278_vm1, %v5110_v34, %v5112_v62  ;;  %v13762_v54 = vld [vmem:[#allocation2 + $0x98] ss:$0 sps:$4 sm:$0x33]   ;;  %v5341_v34 = vsel %vm16281_vm13, %v5336_v18, %v5340_v5  ;;  %v4986_v14 = vrot.slane %v4984_v13, 1  ;;  %v4992_v13 = vshll.u32 %v13594_v2, 16  ;;  %vm16288_vm10 = vmmov %vm16277_vm9 }
 0x360   : > { %9148 = vmatprep.subr.bf16.mxu0 %v9540_v44  ;;  %v5344_v11 = vrot.slane %v13750_v27, 1  ;;  %v5235_v63 = vrot.slane %v13762_v54, 1  ;;  %vm16289_vm2 = vmmov %vm16257_vm0 }
 0x361   : > { %6064 = vmatpush1.bf16.msra.mxu1 %v9523_v36  ;;  %v4763_v36 = vld [vmem:[#allocation2] sm:$0xf]  ;;  %v13775_v18 = vsel %vm16284_vm11, %v4982_v51, %v4986_v14  ;;  %vm16290_vm15 = vmmov %vm16257_vm0 }
 0x362   : > { %6065 = vmatprep.subr.bf16.mxu1 %v16125_v3  ;;  %16285 = vst [vmem:[#allocation34_spill] sm:$0xff] %v13775_v18  ;;  %v4800_v51 = vld [vmem:[#allocation2] sm:$0xe]  ;;  %v5345_v49 = vsel %vm16287_vm7, %v5340_v5, %v5344_v11  ;;  %v5349_v26 = vsel %vm16289_vm2, %v5344_v11, %v5348_v20  ;;  %v4994_v5 = vrot.slane %v4992_v13, 1  ;;  %vm16291_vm1 = vmmov %vm16257_vm0 }
 0x363   : > { %9149 = vmatpush3.bf16.msra.mxu0 %v9540_v44  ;;  %v9527_v44 = vld [vmem:[%s15556_s2 + $0x58] sm:$0xff]   ;;  %vm16293_vm5 = vmmov %vm16257_vm0 }
 0x364   : > { %9119 = vmatmul.mubr.bf16.gmra.mrb[200].mxu1 %v5337_v59  ;;  %7083 = vmatprep.subr.bf16.mxu0 %v16125_v3  ;;  %v16282_v59 = vrot.slane %v13734_v30, 1  ;;  %vm16294_vm13 = vmmov %vm16257_vm0 }
 0x365   : > { %9122 = vmatprep.mubr.bf16.mxu1 %v5341_v34  ;;  %6066 = vmatpush1.bf16.msra.mxu1 %v9526_v56  ;;  %v13784_v34 = vor.u32 %v5052_v31, %v13765_v9  ;;  %v13790_v56 = vcombine.low %v4763_v36, %v4764_v7  ;;  %v5225_v31 = vshrl.u32 %v13762_v54, 16  ;;  %vm16296_vm11 = vmmov %vm16257_vm0 }
 0x366   : > { %5612 = vmatmul.mubr.bf16.gmra.mrb[160].mxu0 %v13564_v29  ;;  %v5311_v62 = vsel %vm16283_vm4, %v5306_v16, %v16282_v59  ;;  %6067 = vmatprep.subr.bf16.mxu1 %v16125_v3  ;;  %v5221_v16 = vshll.u32 %v13762_v54, 16  ;;  %v4988_v59 = vshrl.u32 %v13558_v41, 16  ;;  %v5217_v29 = vshrl.u32 %v9528_v10, 16  ;;  %vm16295_vm4 = vmmov %vm16277_vm9 }
 0x367   : > { %5619 = vmatprep.mubr.bf16.mxu0 %v5311_v62  ;;  %16286 = vst [vmem:[#allocation36_spill] sm:$0xff] %v13784_v34  ;;  %v5314_v62 = vrot.slane %v13775_v18, 1  ;;  %v13801_v17 = vsel %vm16288_vm10, %v13784_v34, %v5215_v24  ;;  %v8448_v10 = vcombine.low %v4800_v51, %v4764_v7  ;;  %v5082_v54 = vrot.slane %v13687_v23, 1  ;;  %vm16297_vm7 = vmmov %vm16257_vm0 }
 0x368   : > { %v5219_v36 = vor.u32 %v5217_v29, %v5215_v24  ;;  %v5223_v41 = vrot.slane %v5221_v16, 1  ;;  %v4990_v61 = vor.u32 %v4988_v59, %v4986_v14  ;;  %v5236_v29 = vsel %vm16291_vm1, %v13788_v53, %v5235_v63  ;;  %vm16298_vm10 = vmmov %vm16257_vm0 }
 0x369   : > { %6068 = vmatpush1.bf16.msra.mxu1 %v9527_v44  ;;  %v13809_v44 = vsel %vm16290_vm15, %v13739_v42, %v13788_v53  ;;  %v5081_v24 = vrot.slane %v8448_v10, 1  ;;  %v15759_v14 = vrot.slane %v13801_v17, 1  ;;  %v13817_v7 = vsel %vm16257_vm0, %v5082_v54, %v13502_v12  ;;  %v9533_v10 = vld [vmem:[%s15556_s2 + $0x70] sm:$0xff]   ;;  %vm16299_vm2 = vmmov %vm16257_vm0 }
 0x36a   : > { %6069 = vmatprep.subr.bf16.mxu1 %v16125_v3  ;;  %v5224_v34 = vsel %vm16277_vm9, %v5219_v36, %v5223_v41  ;;  %v5227_v18 = vor.u32 %v5225_v31, %v5223_v41  ;;  %v5352_v12 = vrot.slane %v13809_v44, 1  ;;  %v5356_v59 = vrot.slane %v5236_v29, 1  ;;  %vm16300_vm15 = vmmov %vm16257_vm0 }
 0x36b   : > { %v5354_v11 = vrot.slane %v5224_v34, 1  ;;  %v13827_v16 = vsel %vm16294_vm13, %v5081_v24, %v5082_v54  ;;  %v13830_v34 = vsel %vm16295_vm4, %v4990_v61, %v4994_v5  ;;  %v4915_v31 = vshll.u32 %v13790_v56, 16  ;;  %vm16301_vm9 = vmmov %vm16295_vm4 }
 0x36c   : > { %9123 = vmatmul.mubr.bf16.gmra.mrb[204].mxu1 %v5345_v49  ;;  %v16292_v49 = vrot.slane %v13734_v30, 1  ;;  %v5360_v41 = vrot.slane %v5227_v18, 1  ;;  %v5000_v61 = vshll.u32 %v13601_v52, 16  ;;  %v5318_v36 = vrot.slane %v13830_v34, 1  ;;  %vm16302_vm1 = vmmov %vm16257_vm0 }
 0x36d   : > { %9126 = vmatprep.mubr.bf16.mxu1 %v5349_v26  ;;  %6070 = vmatpush1.bf16.msra.mxu1 %v9530_v33  ;;  %v9532_v26 = vld [vmem:[%s15556_s2 + $0x68] sm:$0xff]   ;;  %v13837_v51 = vsel %vm16296_vm11, %v15759_v14, %v5354_v11  ;;  %v4996_v33 = vshrl.u32 %v13594_v2, 16  ;;  %v5353_v54 = vsel %vm16298_vm10, %v5348_v20, %v5352_v12  ;;  %v5357_v29 = vsel %vm16299_vm2, %v5352_v12, %v5356_v59  ;;  %v9536_v20 = vld [vmem:[%s15556_s2 + $0x78] sm:$0xff]   ;;  %v9543_v12 = vld [vmem:[%s15556_s2 + $0x200] sm:$0xff]  }
 0x36e   : > { %5620 = vmatmul.mubr.bf16.gmra.mrb[164].mxu0 %v13572_v19  ;;  %v5315_v13 = vsel %vm16293_vm5, %v16292_v49, %v5314_v62  ;;  %6071 = vmatprep.subr.bf16.mxu1 %v16125_v3  ;;  %v13841_v18 = vsel %vm16297_vm7, %v5354_v11, %v5360_v41  ;;  %v4917_v11 = vrot.slane %v4915_v31, 1  ;;  %v5002_v49 = vrot.slane %v5000_v61, 1  ;;  %vm16303_vm0 = vmmov %vm16295_vm4 }
 0x36f   : > { %5627 = vmatprep.mubr.bf16.mxu0 %v5315_v13  ;;  %v4998_v24 = vor.u32 %v4996_v33, %v4994_v5  ;;  %v5319_v13 = vsel %vm16300_vm15, %v5314_v62, %v5318_v36  ;;  %v5362_v41 = vrot.slane %v5235_v63, 1  ;;  %v5004_v62 = vshrl.u32 %v13601_v52, 16  ;;  %vm16304_vm5 = vmmov %vm16302_vm1 }
 0x370   : > { %v5008_v33 = vshll.u32 %v13633_v21, 16  ;;  %vm16305_vm13 = vmmov %vm16303_vm0 }
 0x371   : > { %6072 = vmatpush1.bf16.msra.mxu1 %v9532_v26  ;;  %v4913_v26 = vshrl.u32 %v13790_v56, 16  ;;  %v13859_v5 = vsel %vm16301_vm9, %v4998_v24, %v5002_v49  ;;  %vm16306_vm4 = vmmov %vm16302_vm1 }
 0x372   : > { %6073 = vmatprep.subr.bf16.mxu1 %v16125_v3  ;;  %v5322_v61 = vrot.slane %v13859_v5, 1  ;;  %v5010_v24 = vrot.slane %v5008_v33, 1  ;;  %vm16307_vm11 = vmmov %vm16303_vm0 }
 0x373   : > { %v4918_v31 = vor.u32 %v4917_v11, %v4913_v26  ;;  %vm16308_vm7 = vmmov %vm16302_vm1 }
 0x374   : > { %9127 = vmatmul.mubr.bf16.gmra.mrb[208].mxu1 %v5353_v54  ;;  %v5006_v54 = vor.u32 %v5004_v62, %v5002_v49  ;;  %v5020_v62 = vshrl.u32 %v13638_v8, 16  ;;  %vm16309_vm10 = vmmov %vm16303_vm0 }
 0x375   : > { %9130 = vmatprep.mubr.bf16.mxu1 %v5357_v29  ;;  %6074 = vmatpush1.bf16.msra.mxu1 %v9533_v10  ;;  %v5363_v10 = vsel %vm16302_vm1, %v5356_v59, %v5362_v41  ;;  %v4923_v63 = vsel %vm16303_vm0, %v4918_v31, %v13713_v50  ;;  %v5323_v29 = vsel %vm16304_vm5, %v5318_v36, %v5322_v61  ;;  %v5016_v59 = vshll.u32 %v13638_v8, 16  ;;  %v9547_v50 = vld [vmem:[%s15556_s2 + $0x208] sm:$0xff]   ;;  %v9552_v41 = vld [vmem:[%s15556_s2 + $0x210] sm:$0xff]   ;;  %vm16310_vm2 = vmmov %vm16302_vm1 }
 0x376   : > { %5628 = vmatmul.mubr.bf16.gmra.mrb[168].mxu0 %v13589_v1  ;;  %6075 = vmatprep.subr.bf16.mxu1 %v16125_v3  ;;  %v13874_v11 = vsel %vm16305_vm13, %v5006_v54, %v5010_v24  ;;  %v9559_v54 = vld [vmem:[%s15556_s2 + $0x220] sm:$0xff]   ;;  %vm16311_vm15 = vmmov %vm16303_vm0 }
 0x377   : > { %5635 = vmatprep.mubr.bf16.mxu0 %v5319_v13  ;;  %v5012_v13 = vshrl.u32 %v13633_v21, 16  ;;  %v5326_v49 = vrot.slane %v13874_v11, 1  ;;  %v5018_v36 = vrot.slane %v5016_v59, 1  ;;  %vm16314_vm9 = vmmov %vm16303_vm0  ;;  %vm16318_vm0 = vcmask 1045504  }
 0x378   : > { %vm16320_vm5 = vmmov %vm16302_vm1 }
 0x379   : > { %6076 = vmatpush1.bf16.msra.mxu1 %v9536_v20  ;;  %v5014_v26 = vor.u32 %v5012_v13, %v5010_v24  ;;  %v5327_v20 = vsel %vm16306_vm4, %v5322_v61, %v5326_v49  ;;  %v5022_v33 = vor.u32 %v5020_v62, %v5018_v36  ;;  %v5032_v24 = vshll.u32 %v13676_v37, 16  ;;  %vm16321_vm13 = vmmov %vm16318_vm0 }
 0x37a   : > { %9186 = vmatprep.subr.bf16.mxu1 %v9543_v12  ;;  %vm16323_vm4 = vmmov %vm16314_vm9 }
 0x37b   : > { %v13890_v31 = vsel %vm16307_vm11, %v5014_v26, %v5018_v36  ;;  %v5034_v59 = vrot.slane %v5032_v24, 1  ;;  %v5040_v26 = vshll.u32 %v13707_v45, 16  ;;  %v9564_v36 = vld [vmem:[%s15556_s2 + $0x230] sm:$0xff]   ;;  %vm16324_vm11 = vmmov %vm16318_vm0 }
 0x37c   : > { %9131 = vmatmul.mubr.bf16.gmra.mrb[212].mxu1 %v5363_v10 }
 0x37d   : > { %6077 = vmatprep.mubr.bf16.mxu1 %v4923_v63 }
 0x37e   : > { %5636 = vmatmul.mubr.bf16.gmra.mrb[172].mxu0 %v13599_v4 }
 0x37f   : > { %5643 = vmatprep.mubr.bf16.mxu0 %v5323_v29  ;;  %v9562_v29 = vld [vmem:[%s15556_s2 + $0x228] sm:$0xff]  }
 0x384   : > { %6078 = vmatmul.mubr.bf16.vlgmr.msra.gmra.mrb[216].mxu1 %v13790_v56  ;;  %v5024_v56 = vshll.u32 %v13671_v47, 16 }
 0x385   : > { %6085 = vmatprep.mubr.bf16.mxu1 %v13746_v32  ;;  %9187 = vmatpush3.bf16.msra.mxu1 %v9543_v12  ;;  %v5330_v32 = vrot.slane %v13890_v31, 1  ;;  %v9557_v12 = vld [vmem:[%s15556_s2 + $0x218] sm:$0xff]  }
 0x386   : > { %5644 = vmatmul.mubr.bf16.gmra.mrb[176].mxu0 %v13631_v35  ;;  %9188 = vmatprep.subr.bf16.mxu1 %v9547_v50  ;;  %v5026_v61 = vrot.slane %v5024_v56, 1  ;;  %v5042_v56 = vrot.slane %v5040_v26, 1 }
 0x387   : > { %5651 = vmatprep.mubr.bf16.mxu0 %v5327_v20  ;;  %v5331_v10 = vsel %vm16308_vm7, %v5326_v49, %v5330_v32  ;;  %vm16326_vm7 = vmmov %vm16323_vm4 }
 0x388   : > { %v13906_v63 = vsel %vm16309_vm10, %v5022_v33, %v5026_v61  ;;  %vm16327_vm10 = vmmov %vm16323_vm4 }
 0x389   : > { %9189 = vmatpush3.bf16.msra.mxu1 %v9547_v50  ;;  %v5036_v50 = vshrl.u32 %v13676_v37, 16 }
 0x38a   : > { %9190 = vmatprep.subr.bf16.mxu1 %v9552_v41 }
 0x38b   : > { %v5038_v20 = vor.u32 %v5036_v50, %v5034_v59 }
 0x38c   : > { %6086 = vmatmul.mubr.bf16.gmra.mrb[220].mxu1 %v13687_v23  ;;  %v5028_v23 = vshrl.u32 %v13671_v47, 16 }
 0x38d   : > { %6093 = vmatprep.mubr.bf16.mxu1 %v13552_v6  ;;  %9191 = vmatpush3.bf16.msra.mxu1 %v9552_v41  ;;  %v5334_v6 = vrot.slane %v13906_v63, 1  ;;  %v13928_v41 = vld [vmem:[#allocation2 + $0x80] sm:$0xff]   ;;  %v13938_v33 = vsel %vm16314_vm9, %v5038_v20, %v5042_v56  ;;  %vm16331_vm9 = vmmov %vm16318_vm0 }
 0x38e   : > { %5652 = vmatmul.mubr.bf16.gmra.mrb[180].mxu0 %v13636_v0  ;;  %9192 = vmatprep.subr.bf16.mxu1 %v9557_v12  ;;  %v5030_v13 = vor.u32 %v5028_v23, %v5026_v61  ;;  %v13940_v61 = vld [vmem:[#allocation2 + $0x88] sm:$0xff]   ;;  %v13947_v23 = vld [vmem:[#allocation2 + $0x90] sm:$0xff]  }
 0x38f   : > { %5659 = vmatprep.mubr.bf16.mxu0 %v5331_v10  ;;  %v5335_v49 = vsel %vm16310_vm2, %v5330_v32, %v5334_v6  ;;  %v9571_v32 = vld [vmem:[%s15556_s2 + $0x238] sm:$0xff]   ;;  %16315 = vst [vmem:[#allocation39_spill] sm:$0xff] %v13947_v23  ;;  %v6654_v50 = vshll.u32 %v13940_v61, 16  ;;  %v6658_v14 = vshrl.u32 %v13940_v61, 16  ;;  %vm16328_vm2 = vmmov %vm16318_vm0 }
 0x391   : > { %9193 = vmatpush3.bf16.msra.mxu1 %v9557_v12  ;;  %v13934_v12 = vld [vmem:[#allocation2 + $0x78] sm:$0xff]  }
 0x392   : > { %9194 = vmatprep.subr.bf16.mxu1 %v9559_v54  ;;  %16313 = vst [vmem:[#allocation43_spill] sm:$0xff] %v13934_v12 }
 0x394   : > { %6094 = vmatmul.mubr.bf16.gmra.mrb[224].mxu1 %v13473_v22  ;;  %v13924_v22 = vsel %vm16311_vm15, %v5030_v13, %v5034_v59  ;;  %v13951_v13 = vld [vmem:[#allocation2 + $0x98] sm:$0xff]   ;;  %vm16329_vm15 = vmmov %vm16323_vm4 }
 0x395   : > { %6101 = vmatprep.mubr.bf16.mxu1 %v13568_v38  ;;  %9195 = vmatpush3.bf16.msra.mxu1 %v9559_v54  ;;  %v13926_v38 = vld [vmem:[#allocation2 + $0x70] sm:$0xff]   ;;  %v5338_v62 = vrot.slane %v13924_v22, 1  ;;  %v6646_v54 = vshll.u32 %v13928_v41, 16  ;;  %16316 = vst [vmem:[#allocation42_spill] sm:$0xff] %v13951_v13 }
 0x396   : > { %5660 = vmatmul.mubr.bf16.gmra.mrb[184].mxu0 %v13669_v40  ;;  %9196 = vmatprep.subr.bf16.mxu1 %v9562_v29  ;;  %16312 = vst [vmem:[#allocation41_spill] sm:$0xff] %v13926_v38  ;;  %v15764_v10 = vrot.slane %v13926_v38, 2 }
 0x397   : > { %5667 = vmatprep.mubr.bf16.mxu0 %v5335_v49  ;;  %v5339_v24 = vsel %vm16302_vm1, %v5334_v6, %v5338_v62  ;;  %v13953_v59 = vrot.slane %v6646_v54, 1  ;;  %v5044_v49 = vshrl.u32 %v13707_v45, 16  ;;  %v6656_v54 = vrot.slane %v6654_v50, 1  ;;  %vm16332_vm1 = vmmov %vm16318_vm0 }
 0x398   : > { %v6666_v50 = vshrl.u32 %v13947_v23, 16 }
 0x399   : > { %9197 = vmatpush3.bf16.msra.mxu1 %v9562_v29  ;;  %v5342_v29 = vrot.slane %v13938_v33, 1  ;;  %16317 = vst [vmem:[#allocation50_spill] sm:$0xff] %v13953_v59  ;;  %v5046_v20 = vor.u32 %v5044_v49, %v5042_v56 }
 0x39a   : > { %9198 = vmatprep.subr.bf16.mxu1 %v9564_v36 }
 0x39b   : > { %v5343_v38 = vsel %vm16320_vm5, %v5338_v62, %v5342_v29  ;;  %vm16335_vm5 = vmmov %vm16332_vm1 }
 0x39c   : > { %6102 = vmatmul.mubr.bf16.gmra.mrb[228].mxu1 %v13481_v28  ;;  %v6849_v28 = vrot.slane %v13934_v12, 2  ;;  %v6662_v12 = vshll.u32 %v13947_v23, 16 }
 0x39d   : > { %6109 = vmatprep.mubr.bf16.mxu1 %v13611_v55  ;;  %9199 = vmatpush3.bf16.msra.mxu1 %v9564_v36  ;;  %v6650_v55 = vshrl.u32 %v13928_v41, 16  ;;  %v6855_v36 = vrot.slane %v13928_v41, 2 }
 0x39e   : > { %5668 = vmatmul.mubr.bf16.gmra.mrb[188].mxu0 %v13674_v39  ;;  %9200 = vmatprep.subr.bf16.mxu1 %v9571_v32  ;;  %v13960_v6 = vsel %vm16318_vm0, %v15764_v10, %v6849_v28  ;;  %v6664_v49 = vrot.slane %v6662_v12, 1  ;;  %vm16334_vm0 = vmmov %vm16323_vm4 }
 0x39f   : > { %5675 = vmatprep.mubr.bf16.mxu0 %v5339_v24  ;;  %16319 = vst [vmem:[#allocation53_spill] sm:$0xff] %v13960_v6  ;;  %v6652_v26 = vor.u32 %v6650_v55, %v13953_v59  ;;  %v13965_v24 = vld [vmem:[#allocation2 + $0xa0] ss:$0 sps:$4 sm:$0x77]   ;;  %v13971_v10 = vsel %vm16321_vm13, %v6849_v28, %v6855_v36  ;;  %v6861_v6 = vrot.slane %v13940_v61, 2  ;;  %v6660_v55 = vor.u32 %v6658_v14, %v6656_v54  ;;  %vm16336_vm13 = vmmov %vm16332_vm1 }
 0x3a0   : > { %16322 = vst [vmem:[#allocation49_spill] sm:$0xff] %v13971_v10  ;;  %v6867_v59 = vrot.slane %v13947_v23, 2  ;;  %v6674_v14 = vshrl.u32 %v13951_v13, 16  ;;  %v6678_v12 = vshll.u32 %v13965_v24, 16 }
 0x3a1   : > { %9201 = vmatpush3.bf16.msra.mxu1 %v9571_v32  ;;  %v6670_v32 = vshll.u32 %v13951_v13, 16  ;;  %v13977_v56 = vsel %vm16323_vm4, %v6652_v26, %v6656_v54  ;;  %v13983_v28 = vsel %vm16324_vm11, %v6855_v36, %v6861_v6  ;;  %v6668_v26 = vor.u32 %v6666_v50, %v6664_v49  ;;  %vm16339_vm11 = vmmov %vm16332_vm1 }
 0x3a2   : > { %16325 = vst [vmem:[#allocation52_spill] sm:$0xff] %v13983_v28  ;;  %v13995_v36 = vsel %vm16328_vm2, %v6861_v6, %v6867_v59  ;;  %v16330_v50 = vrot.slane %v13977_v56, 2  ;;  %vm16338_vm4 = vcmask 1046528   ;;  %vm16353_vm2 = vmmov %vm16334_vm0 }
 0x3a3   : > { %v6672_v10 = vrot.slane %v6670_v32, 1  ;;  %v15767_v32 = vrot.slane %v13951_v13, 2 }
 0x3a4   : > { %6110 = vmatmul.mubr.bf16.gmra.mrb[232].mxu1 %v13489_v48  ;;  %v6665_v48 = vsel %vm16326_vm7, %v6660_v55, %v6664_v49  ;;  %v6680_v55 = vrot.slane %v6678_v12, 1  ;;  %v6682_v49 = vshrl.u32 %v13965_v24, 16  ;;  %vm16342_vm7 = vmmov %vm16338_vm4 }
 0x3a5   : > { %6117 = vmatprep.mubr.bf16.mxu1 %v13649_v43  ;;  %v13992_v43 = vsel %vm16327_vm10, %v5046_v20, %v13765_v9  ;;  %v6863_v54 = vrot.slane %v6665_v48, 2  ;;  %v6673_v62 = vsel %vm16329_vm15, %v6668_v26, %v6672_v10  ;;  %v6676_v28 = vor.u32 %v6674_v14, %v6672_v10  ;;  %vm16347_vm10 = vmmov %vm16338_vm4 }
 0x3a6   : > { %5676 = vmatmul.mubr.bf16.gmra.mrb[192].mxu0 %v13717_v58  ;;  %v6869_v23 = vrot.slane %v6673_v62, 2  ;;  %v14008_v9 = vsel %vm16332_vm1, %v6867_v59, %v15767_v32  ;;  %v5346_v6 = vrot.slane %v13992_v43, 1  ;;  %v6684_v48 = vor.u32 %v6682_v49, %v6680_v55  ;;  %vm16354_vm15 = vmmov %vm16338_vm4 }
 0x3a7   : > { %5683 = vmatprep.mubr.bf16.mxu0 %v5343_v38  ;;  %v14003_v38 = vsel %vm16331_vm9, %v16330_v50, %v6863_v54  ;;  %16333 = vst [vmem:[#allocation9_spill] sm:$0xff] %v14008_v9  ;;  %v6681_v20 = vsel %vm16334_vm0, %v6676_v28, %v6680_v55  ;;  %v16345_v28 = vld [vmem:[#allocation30_spill] sm:$0xff]  ;;  %vm16355_vm9 = vmmov %vm16338_vm4 }
 0x3a8   : > { %v14013_v10 = vsel %vm16335_vm5, %v6863_v54, %v6869_v23  ;;  %v6875_v26 = vrot.slane %v6681_v20, 2  ;;  %v6881_v14 = vrot.slane %v6684_v48, 2  ;;  %v5347_v59 = vsel %vm16338_vm4, %v5342_v29, %v5346_v6  ;;  %v16344_v29 = vld [vmem:[#allocation37_spill] sm:$0xff]  ;;  %v16352_v20 = vld [vmem:[#allocation36_spill] sm:$0xff]  ;;  %vm16357_vm1 = vmmov %vm16338_vm4 }
 0x3a9   : > { %vm16358_vm0 = vmmov %vm16335_vm5 }
 0x3aa   : > { %v14018_v62 = vsel %vm16336_vm13, %v6869_v23, %v6875_v26  ;;  %v14023_v12 = vsel %vm16339_vm11, %v6875_v26, %v6881_v14  ;;  %v16343_v23 = vld [vmem:[#allocation34_spill] sm:$0xff]  ;;  %vm16359_vm5 = vmmov %vm16357_vm1 }
 0x3ab   : > { %16337 = vst [vmem:[#allocation6_spill] sm:$0xff] %v14018_v62  ;;  %16340 = vst [vmem:[#allocation16_spill] sm:$0xff] %v14023_v12  ;;  %v14135_v26 = vld [vmem:[#allocation2 + $0x28] sm:$0xff]  }
 0x3ac   : > { %6118 = vmatmul.mubr.bf16.gmra.mrb[236].mxu1 %v13509_v15  ;;  %v16341_v15 = vrot.slane %v13801_v17, 1  ;;  %vm16360_vm13 = vmmov %vm16353_vm2 }
 0x3ad   : > { %6125 = vmatprep.mubr.bf16.mxu1 %v13690_v57  ;;  %vm16361_vm4 = vmmov %vm16353_vm2 }
 0x3ae   : > { %5684 = vmatmul.mubr.bf16.gmra.mrb[196].mxu0 %v13721_v46  ;;  %v5351_v57 = vsel %vm16342_vm7, %v5346_v6, %v16341_v15  ;;  %v14139_v15 = vld [vmem:[#allocation2 + $0x30] sm:$0xff]   ;;  %vm16362_vm11 = vmmov %vm16358_vm0 }
 0x3af   : > { %5691 = vmatprep.mubr.bf16.mxu0 %v5347_v59  ;;  %vm16363_vm7 = vmmov %vm16357_vm1 }
 0x3b4   : > { %6126 = vmatmul.mubr.bf16.gmra.mrb[240].mxu1 %v13538_v25  ;;  %v9541_v25 = vld [vmem:[#allocation2 + $0x98] ss:$0 sps:$4 sm:$0x11]  }
 0x3b5   : > { %6133 = vmatprep.mubr.bf16.mxu1 %v13734_v30  ;;  %v5358_v17 = vrot.slane %v9541_v25, 1  ;;  %v16346_v30 = vld [vmem:[#allocation27_spill] sm:$0xff] }
 0x3b6   : > { %5692 = vmatmul.mubr.bf16.gmra.mrb[200].mxu0 %v13750_v27 }
 0x3b7   : > { %5699 = vmatprep.mubr.bf16.mxu0 %v5351_v57 }
 0x3bc   : > { %6134 = vmatmul.mubr.bf16.gmra.mrb[244].mxu1 %v13540_v60  ;;  %v5359_v60 = vsel %vm16347_vm10, %v13788_v53, %v5358_v17  ;;  %v9545_v53 = vld [vmem:[%s15556_s2 + $0x188] sm:$0xff]   ;;  %vm16364_vm10 = vmmov %vm16358_vm0 }
 0x3bd   : > { %6141 = vmatprep.mubr.bf16.mxu1 %v16343_v23 }
 0x3be   : > { %5700 = vmatmul.mubr.bf16.gmra.mrb[204].mxu0 %v16344_v29 }
 0x3bf   : > { %5707 = vmatprep.mubr.bf16.mxu0 %v13837_v51  ;;  %v9548_v51 = vld [vmem:[%s15556_s2 + $0x198] sm:$0xff]  }
 0x3c4   : > { %6142 = vmatmul.mubr.bf16.gmra.mrb[248].mxu1 %v16345_v28  ;;  %v6693_v28 = vrot.slane %v14135_v26, 1 }
 0x3c5   : > { %6149 = vmatprep.mubr.bf16.mxu1 %v13830_v34  ;;  %v9544_v34 = vld [vmem:[%s15556_s2 + $0x180] sm:$0xff]  }
 0x3c6   : > { %5708 = vmatmul.mubr.bf16.gmra.mrb[208].mxu0 %v13809_v44  ;;  %v16348_v44 = vld [vmem:[#allocation22_spill] sm:$0xff] }
 0x3c7   : > { %5715 = vmatprep.mubr.bf16.mxu0 %v13841_v18  ;;  %v9549_v18 = vld [vmem:[%s15556_s2 + $0x1a0] sm:$0xff]  }
 0x3cc   : > { %6150 = vmatmul.mubr.bf16.gmra.mrb[252].mxu1 %v16346_v30 }
 0x3cd   : > { %6157 = vmatprep.mubr.bf16.mxu1 %v13859_v5  ;;  %v9550_v5 = vld [vmem:[%s15556_s2 + $0x1a8] sm:$0xff]  }
 0x3ce   : > { %5716 = vmatmul.mubr.bf16.gmra.mrb[212].mxu0 %v5359_v60 }
 0x3cf   : > { %9150 = vmatprep.mubr.bf16.mxu0 %v13827_v16  ;;  %v9546_v16 = vld [vmem:[%s15556_s2 + $0x190] sm:$0xff]  }
 0x3d4   : > { %6158 = vmatmul.mubr.bf16.gmra.mrb[0].mxu1 %v13594_v2  ;;  %v16349_v2 = vld [vmem:[#allocation25_spill] sm:$0xff] }
 0x3d5   : > { %6165 = vmatprep.mubr.bf16.mxu1 %v13874_v11  ;;  %v9551_v11 = vld [vmem:[%s15556_s2 + $0x1b0] sm:$0xff]  }
 0x3d6   : > { %9151 = vmatmul.mubr.bf16.vlgmr.msra.gmra.mrb[216].mxu0 %v13817_v7  ;;  %v16350_v7 = vld [vmem:[#allocation28_spill] sm:$0xff] }
 0x3d7   : > { %9154 = vmatprep.mubr.bf16.mxu0 %v16348_v44  ;;  %7084 = vmatpush1.bf16.msra.mxu0 %v9544_v34  ;;  %v9570_v34 = vld [vmem:[%s15556_s2 + $0x1f0] sm:$0xff]  }
 0x3d8   : > { %7085 = vmatprep.subr.bf16.mxu0 %v16125_v3 }
 0x3db   : > { %7086 = vmatpush1.bf16.msra.mxu0 %v9545_v53 }
 0x3dc   : > { %7087 = vmatprep.subr.bf16.mxu0 %v16125_v3  ;;  %6166 = vmatmul.mubr.bf16.gmra.mrb[4].mxu1 %v13601_v52  ;;  %v16351_v52 = vld [vmem:[#allocation29_spill] sm:$0xff] }
 0x3dd   : > { %6173 = vmatprep.mubr.bf16.mxu1 %v13890_v31  ;;  %v14111_v31 = vld [vmem:[#allocation2 + $0x18] sm:$0xff]  }
 0x3de   : > { %9155 = vmatmul.mubr.bf16.gmra.mrb[220].mxu0 %v16349_v2  ;;  %v6542_v6 = vshll.u32 %v14111_v31, 16  ;;  %v6546_v60 = vshrl.u32 %v14111_v31, 16 }
 0x3df   : > { %9158 = vmatprep.mubr.bf16.mxu0 %v16350_v7  ;;  %7088 = vmatpush1.bf16.msra.mxu0 %v9546_v16  ;;  %v16356_v16 = vld [vmem:[#allocation35_spill] sm:$0xff] }
 0x3e0   : > { %7089 = vmatprep.subr.bf16.mxu0 %v16125_v3  ;;  %v6544_v23 = vrot.slane %v6542_v6, 1 }
 0x3e2   : > { %v6548_v53 = vor.u32 %v6546_v60, %v6544_v23  ;;  %v6775_v60 = vrot.slane %v14111_v31, 2 }
 0x3e3   : > { %7090 = vmatpush1.bf16.msra.mxu0 %v9548_v51  ;;  %v14159_v51 = vld [vmem:[#allocation2 + $0x38] sm:$0xff]  }
 0x3e4   : > { %7091 = vmatprep.subr.bf16.mxu0 %v16125_v3  ;;  %6174 = vmatmul.mubr.bf16.gmra.mrb[8].mxu1 %v13633_v21  ;;  %v9554_v21 = vld [vmem:[%s15556_s2 + $0x1c0] sm:$0xff]  }
 0x3e5   : > { %6181 = vmatprep.mubr.bf16.mxu1 %v13906_v63  ;;  %v14113_v63 = vld [vmem:[#allocation2 + $0x20] sm:$0xff]  }
 0x3e6   : > { %9159 = vmatmul.mubr.bf16.gmra.mrb[224].mxu0 %v16351_v52  ;;  %v6691_v55 = vrot.slane %v14113_v63, 1 }
 0x3e7   : > { %9162 = vmatprep.mubr.bf16.mxu0 %v13572_v19  ;;  %7092 = vmatpush1.bf16.msra.mxu0 %v9549_v18  ;;  %v9553_v19 = vld [vmem:[%s15556_s2 + $0x1b8] sm:$0xff]  }
 0x3e8   : > { %7093 = vmatprep.subr.bf16.mxu0 %v16125_v3  ;;  %v6694_v2 = vsel %vm16357_vm1, %v6691_v55, %v6693_v28 }
 0x3eb   : > { %7094 = vmatpush1.bf16.msra.mxu0 %v9550_v5  ;;  %v14162_v5 = vld [vmem:[#allocation2 + $0x40] sm:$0xff]  }
 0x3ec   : > { %7095 = vmatprep.subr.bf16.mxu0 %v16125_v3  ;;  %6182 = vmatmul.mubr.bf16.gmra.mrb[12].mxu1 %v13638_v8  ;;  %v9556_v8 = vld [vmem:[%s15556_s2 + $0x1d0] sm:$0xff]  }
 0x3ed   : > { %6189 = vmatprep.mubr.bf16.mxu1 %v13924_v22 }
 0x3ee   : > { %9163 = vmatmul.mubr.bf16.gmra.mrb[228].mxu0 %v13589_v1  ;;  %v9555_v1 = vld [vmem:[%s15556_s2 + $0x1c8] sm:$0xff]  }
 0x3ef   : > { %9166 = vmatprep.mubr.bf16.mxu0 %v13599_v4  ;;  %7096 = vmatpush1.bf16.msra.mxu0 %v9551_v11  ;;  %v14103_v4 = vld [vmem:[#allocation2 + $0x90] ss:$0 sps:$4 sm:$0x11]   ;;  %v6787_v11 = vrot.slane %v6694_v2, 2 }
 0x3f0   : > { %7097 = vmatprep.subr.bf16.mxu0 %v16125_v3  ;;  %v5056_v22 = vshll.u32 %v14103_v4, 16 }
 0x3f2   : > { %v5058_v49 = vrot.slane %v5056_v22, 1  ;;  %v6554_v22 = vshrl.u32 %v14113_v63, 16 }
 0x3f3   : > { %7098 = vmatpush1.bf16.msra.mxu0 %v9553_v19 }
 0x3f4   : > { %6190 = vmatmul.mubr.bf16.gmra.mrb[16].mxu1 %v13671_v47  ;;  %7099 = vmatprep.subr.bf16.mxu0 %v16125_v3  ;;  %v6437_v47 = vld [vmem:[#allocation2 + $0x10] sm:$0x8]  ;;  %v5059_v48 = vsel %vm16353_vm2, %v16352_v20, %v5058_v49  ;;  %vm16365_vm2 = vmmov %vm16357_vm1 }
 0x3f5   : > { %6197 = vmatprep.mubr.bf16.mxu1 %v13938_v33 }
 0x3f6   : > { %9167 = vmatmul.mubr.bf16.gmra.mrb[232].mxu0 %v13631_v35  ;;  %v6399_v35 = vld [vmem:[#allocation2 + $0x10] sm:$0xc] }
 0x3f7   : > { %9170 = vmatprep.mubr.bf16.mxu0 %v13636_v0  ;;  %7100 = vmatpush1.bf16.msra.mxu0 %v9554_v21  ;;  %v6400_v0 = vld [vmem:[#allocation2 + $0x14] sm:$0xf] }
 0x3f8   : > { %7101 = vmatprep.subr.bf16.mxu0 %v16125_v3  ;;  %v14121_v33 = vcombine.low %v6399_v35, %v6400_v0  ;;  %v8570_v54 = vcombine.low %v6437_v47, %v6400_v0 }
 0x3fa   : > { %v6537_v50 = vshll.u32 %v14121_v33, 16  ;;  %v6535_v30 = vshrl.u32 %v14121_v33, 16 }
 0x3fb   : > { %7102 = vmatpush1.bf16.msra.mxu0 %v9555_v1 }
 0x3fc   : > { %6198 = vmatmul.mubr.bf16.gmra.mrb[20].mxu1 %v13676_v37  ;;  %7103 = vmatprep.subr.bf16.mxu0 %v16125_v3  ;;  %v9558_v37 = vld [vmem:[%s15556_s2 + $0x1d8] sm:$0xff]   ;;  %v6539_v57 = vrot.slane %v6537_v50, 1  ;;  %v14187_v50 = vld [vmem:[#allocation2 + $0x48] sm:$0xff]  }
 0x3fd   : > { %6205 = vmatprep.mubr.bf16.mxu1 %v13992_v43  ;;  %v6689_v43 = vrot.slane %v14111_v31, 1 }
 0x3fe   : > { %9171 = vmatmul.mubr.bf16.gmra.mrb[236].mxu0 %v13669_v40  ;;  %v9561_v40 = vld [vmem:[%s15556_s2 + $0x1e0] sm:$0xff]   ;;  %v6540_v44 = vor.u32 %v6539_v57, %v6535_v30 }
 0x3ff   : > { %9174 = vmatprep.mubr.bf16.mxu0 %v13674_v39  ;;  %7104 = vmatpush1.bf16.msra.mxu0 %v9556_v8  ;;  %v6688_v39 = vrot.slane %v8570_v54, 1  ;;  %v6692_v59 = vsel %vm16355_vm9, %v6689_v43, %v6691_v55  ;;  %v9572_v8 = vld [vmem:[%s15556_s2 + $0x1f8] sm:$0xff]   ;;  %v6699_v54 = vrot.slane %v14162_v5, 1  ;;  %vm16367_vm9 = vmmov %vm16358_vm0 }
 0x400   : > { %7105 = vmatprep.subr.bf16.mxu0 %v16125_v3  ;;  %v6781_v17 = vrot.slane %v6692_v59, 2  ;;  %v6545_v21 = vsel %vm16360_vm13, %v6540_v44, %v6544_v23  ;;  %vm16370_vm13 = vmmov %vm16358_vm0 }
 0x401   : > { %v6690_v14 = vsel %vm16354_vm15, %v6688_v39, %v6689_v43  ;;  %v6777_v43 = vrot.slane %v6545_v21, 2  ;;  %vm16366_vm15 = vmmov %vm16357_vm1 }
 0x402   : > { %v6780_v25 = vrot.slane %v6690_v14, 2  ;;  %v14192_v14 = vld [vmem:[#allocation2 + $0x50] sm:$0xff]   ;;  %vm16368_vm1 = vmmov %vm16361_vm4 }
 0x403   : > { %7106 = vmatpush1.bf16.msra.mxu0 %v9558_v37  ;;  %v6558_v37 = vshll.u32 %v14135_v26, 16  ;;  %v6703_v44 = vrot.slane %v14192_v14, 1 }
 0x404   : > { %6206 = vmatmul.mubr.bf16.gmra.mrb[24].mxu1 %v13707_v45  ;;  %7107 = vmatprep.subr.bf16.mxu0 %v16125_v3  ;;  %v9563_v45 = vld [vmem:[%s15556_s2 + $0x1e8] sm:$0xff]   ;;  %v6782_v7 = vsel %vm16358_vm0, %v6780_v25, %v6781_v17  ;;  %v6701_v25 = vrot.slane %v14187_v50, 1 }
 0x405   : > { %6213 = vmatprep.mubr.bf16.mxu1 %v5059_v48  ;;  %v6560_v20 = vrot.slane %v6558_v37, 1 }
 0x406   : > { %9175 = vmatmul.mubr.bf16.gmra.mrb[240].mxu0 %v13717_v58  ;;  %v6550_v58 = vshll.u32 %v14113_v63, 16 }
 0x407   : > { %9178 = vmatprep.mubr.bf16.mxu0 %v13721_v46  ;;  %7108 = vmatpush1.bf16.msra.mxu0 %v9561_v40  ;;  %v6695_v46 = vrot.slane %v14139_v15, 1  ;;  %v6788_v40 = vsel %vm16362_vm11, %v6781_v17, %v6787_v11  ;;  %vm16372_vm11 = vmmov %vm16365_vm2 }
 0x408   : > { %7109 = vmatprep.subr.bf16.mxu0 %v16125_v3  ;;  %v6552_v18 = vrot.slane %v6550_v58, 1 }
 0x409   : > { %v6696_v52 = vsel %vm16359_vm5, %v6693_v28, %v6695_v46  ;;  %vm16369_vm5 = vmmov %vm16365_vm2 }
 0x40a   : > { %v14170_v1 = vsel %vm16361_vm4, %v6548_v53, %v6552_v18  ;;  %v6793_v0 = vrot.slane %v6696_v52, 2  ;;  %v6702_v21 = vsel %vm16369_vm5, %v6699_v54, %v6701_v25  ;;  %vm16371_vm4 = vmmov %vm16358_vm0 }
 0x40b   : > { %7110 = vmatpush1.bf16.msra.mxu0 %v9563_v45  ;;  %v6778_v55 = vrot.slane %v14170_v1, 2  ;;  %v6811_v37 = vrot.slane %v6702_v21, 2 }
 0x40c   : > { %6214 = vmatmul.mubr.bf16.gmra.mrb[28].mxu1 %v16356_v16  ;;  %7111 = vmatprep.subr.bf16.mxu0 %v16125_v3 }
 0x40d   : > { %9202 = vmatprep.mubr.bf16.mxu1 %v6782_v7  ;;  %v6779_v59 = vsel %vm16367_vm9, %v6777_v43, %v6778_v55  ;;  %vm16377_vm9 = vmmov %vm16358_vm0 }
 0x40e   : > { %9179 = vmatmul.mubr.bf16.gmra.mrb[244].mxu0 %v13750_v27  ;;  %v6697_v27 = vrot.slane %v14159_v51, 1 }
 0x40f   : > { %9182 = vmatprep.mubr.bf16.mxu0 %v16344_v29  ;;  %v14166_v19 = vpop.f32.mrb[180].mxu1  ;;  %7112 = vmatpush1.bf16.msra.mxu0 %v9570_v34  ;;  %v5116_v29 = vrot.slane %v14103_v4, 1  ;;  %v6794_v4 = vsel %vm16364_vm10, %v6787_v11, %v6793_v0  ;;  %v6566_v34 = vshll.u32 %v14139_v15, 16  ;;  %vm16374_vm10 = vmmov %vm16368_vm1 }
 0x410   : > { %v5758_v35 = vpop.f32.mrb[181].mxu1  ;;  %7113 = vmatprep.subr.bf16.mxu0 %v16125_v3  ;;  %v6556_v3 = vor.u32 %v6554_v22, %v6552_v18  ;;  %v6698_v39 = vsel %vm16363_vm7, %v6695_v46, %v6697_v27  ;;  %v6700_v48 = vsel %vm16366_vm15, %v6697_v27, %v6699_v54  ;;  %v6562_v46 = vshrl.u32 %v14135_v26, 16  ;;  %v14224_v22 = vld [vmem:[#allocation2 + $0x60] sm:$0xff]   ;;  %vm16373_vm7 = vmmov %vm16358_vm0 }
 0x411   : > { %v14178_v47 = vpop.f32.mrb[182].mxu1  ;;  %v5117_v6 = vsel %vm16365_vm2, %v13739_v42, %v5116_v29  ;;  %v6799_v45 = vrot.slane %v6698_v39, 2  ;;  %v6774_v42 = vrot.slane %v14121_v33, 2  ;;  %v6805_v17 = vrot.slane %v6700_v48, 2  ;;  %vm16375_vm2 = vmmov %vm16358_vm0 }
 0x412   : > { %v5761_v49 = vpop.f32.mrb[183].mxu1  ;;  %v14198_v23 = vsel %vm16368_vm1, %v6556_v3, %v6560_v20  ;;  %v6564_v52 = vor.u32 %v6562_v46, %v6560_v20  ;;  %v6568_v27 = vrot.slane %v6566_v34, 1  ;;  %v6704_v29 = vsel %vm16372_vm11, %v6701_v25, %v6703_v44  ;;  %vm16376_vm15 = vmmov %vm16369_vm5 }
 0x413   : > { %7114 = vmatpush1.bf16.msra.mxu0 %v9572_v8  ;;  %v6785_v2 = vrot.slane %v14198_v23, 2  ;;  %v6800_v18 = vsel %vm16358_vm0, %v6793_v0, %v6799_v45  ;;  %v6806_v1 = vsel %vm16370_vm13, %v6799_v45, %v6805_v17  ;;  %v14220_v8 = vld [vmem:[#allocation2 + $0x58] sm:$0xff]   ;;  %v6817_v3 = vrot.slane %v6704_v29, 2  ;;  %vm16378_vm1 = vmmov %vm16358_vm0 }
 0x414   : > { %9203 = vmatmul.mubr.bf16.vlgmr.msra.gmra.mrb[32].mxu1 %v6788_v40  ;;  %v6569_v54 = vsel %vm16374_vm10, %v6564_v52, %v6568_v27  ;;  %v6705_v40 = vrot.slane %v14220_v8, 1  ;;  %v6570_v20 = vshrl.u32 %v14139_v15, 16  ;;  %v6707_v48 = vrot.slane %v14224_v22, 1  ;;  %vm16379_vm0 = vmmov %vm16369_vm5 }
 0x415   : > { %9206 = vmatprep.mubr.bf16.mxu1 %v6794_v4  ;;  %v6786_v0 = vsel %vm16373_vm7, %v6778_v55, %v6785_v2  ;;  %v6783_v4 = vrot.slane %v14113_v63, 2  ;;  %v6574_v55 = vshll.u32 %v14159_v51, 16  ;;  %v6791_v23 = vrot.slane %v6569_v54, 2  ;;  %vm16380_vm5 = vmmov %vm16378_vm1  ;;  %v16382_v54 = vld [vmem:[#allocation41_spill] sm:$0xff] }
 0x416   : > { %9183 = vmatmul.mubr.bf16.gmra.mrb[248].mxu0 %v5117_v6  ;;  %v6572_v46 = vor.u32 %v6570_v20, %v6568_v27  ;;  %vm16381_vm13 = vmmov %vm16374_vm10 }
 0x417   : > { %7115 = vmatprep.mubr.bf16.mxu0 %v6779_v59  ;;  %v14195_v57 = vpop.f32.mrb[184].mxu1  ;;  %v6576_v52 = vrot.slane %v6574_v55, 1  ;;  %vm16384_vm11 = vmmov %vm16379_vm0 }
 0x418   : > { %v14200_v28 = vpop.f32.mrb[185].mxu1  ;;  %vm16385_vm7 = vmmov %vm16378_vm1 }
 0x419   : > { %v5581_v30 = vpop.f32.mrb[144].mxu0  ;;  %v14205_v58 = vpop.f32.mrb[186].mxu1  ;;  %vm16386_vm10 = vmmov %vm16378_vm1 }
 0x41a   : > { %v14210_v53 = vadd.f32 %v5758_v35, %v5581_v30  ;;  %v5583_v16 = vpop.f32.mrb[145].mxu0  ;;  %v14213_v33 = vpop.f32.mrb[187].mxu1  ;;  %v6776_v35 = vsel %vm16371_vm4, %v6774_v42, %v6775_v60  ;;  %v6812_v30 = vsel %vm16375_vm2, %v6805_v17, %v6811_v37  ;;  %v6792_v17 = vsel %vm16380_vm5, %v6785_v2, %v6791_v23  ;;  %vm16383_vm4 = vmmov %vm16378_vm1 }
 0x41b   : > { %v5584_v7 = vpop.f32.mrb[146].mxu0  ;;  %v6706_v16 = vsel %vm16376_vm15, %v6703_v44, %v6705_v40  ;;  %v6582_v2 = vshll.u32 %v14162_v5, 16  ;;  %vm16387_vm2 = vmmov %vm16379_vm0 }
 0x41c   : > { %v14216_v31 = vadd.f32 %v5761_v49, %v5584_v7  ;;  %v5586_v11 = vpop.f32.mrb[147].mxu0  ;;  %9207 = vmatmul.mubr.bf16.gmra.mrb[36].mxu1 %v6800_v18  ;;  %v6818_v7 = vsel %vm16377_vm9, %v6811_v37, %v6817_v3  ;;  %v14250_v18 = vld [vmem:[#allocation2 + $0x68] sm:$0xff]   ;;  %v6578_v37 = vshrl.u32 %v14159_v51, 16  ;;  %vm16388_vm15 = vmmov %vm16378_vm1 }
 0x41d   : > { %9210 = vmatprep.mubr.bf16.mxu1 %v6806_v1  ;;  %v6708_v11 = vsel %vm16379_vm0, %v6705_v40, %v6707_v48  ;;  %v6577_v1 = vsel %vm16381_vm13, %v6572_v46, %v6576_v52  ;;  %v6711_v40 = vrot.slane %v16382_v54, 1  ;;  %vm16389_vm9 = vmmov %vm16381_vm13 }
 0x41e   : > { %7116 = vmatmul.mubr.bf16.vlgmr.msra.gmra.mrb[252].mxu0 %v6776_v35  ;;  %v6709_v35 = vrot.slane %v14250_v18, 1  ;;  %v6829_v27 = vrot.slane %v6708_v11, 2  ;;  %v6797_v55 = vrot.slane %v6577_v1, 2  ;;  %v6580_v46 = vor.u32 %v6578_v37, %v6576_v52  ;;  %vm16391_vm5 = vmmov %vm16378_vm1 }
 0x41f   : > { %7123 = vmatprep.mubr.bf16.mxu0 %v6786_v0  ;;  %v14227_v43 = vpop.f32.mrb[188].mxu1  ;;  %vm16392_vm13 = vmmov %vm16378_vm1 }
 0x420   : > { %v14230_v49 = vpop.f32.mrb[189].mxu1  ;;  %v6712_v11 = vsel %vm16387_vm2, %v6709_v35, %v6711_v40  ;;  %vm16398_vm2 = vmmov %vm16379_vm0 }
 0x421   : > { %v5589_v39 = vpop.f32.mrb[148].mxu0  ;;  %v14234_v6 = vpop.f32.mrb[190].mxu1 }
 0x422   : > { %v14240_v59 = vadd.f32 %v14166_v19, %v5589_v39  ;;  %v5591_v45 = vpop.f32.mrb[149].mxu0  ;;  %v14242_v42 = vpop.f32.mrb[191].mxu1  ;;  %v6784_v19 = vsel %vm16378_vm1, %v6775_v60, %v6783_v4  ;;  %v6789_v60 = vrot.slane %v14135_v26, 2 }
 0x423   : > { %v5592_v25 = vpop.f32.mrb[150].mxu0 }
 0x424   : > { %v14246_v63 = vadd.f32 %v14178_v47, %v5592_v25  ;;  %v5594_v34 = vpop.f32.mrb[151].mxu0  ;;  %9211 = vmatmul.mubr.bf16.gmra.mrb[40].mxu1 %v6812_v30  ;;  %v6823_v47 = vrot.slane %v6706_v16, 2  ;;  %v6710_v16 = vsel %vm16384_vm11, %v6707_v48, %v6709_v35  ;;  %v16390_v48 = vld [vmem:[#allocation43_spill] sm:$0xff]  ;;  %v6586_v35 = vshrl.u32 %v14162_v5, 16  ;;  %vm16394_vm11 = vmmov %vm16378_vm1 }
 0x425   : > { %9214 = vmatprep.mubr.bf16.mxu1 %v6818_v7 }
 0x426   : > { %7124 = vmatmul.mubr.bf16.gmra.mrb[0].mxu0 %v6784_v19  ;;  %v6824_v30 = vsel %vm16383_vm4, %v6817_v3, %v6823_v47  ;;  %v6830_v7 = vsel %vm16385_vm7, %v6823_v47, %v6829_v27  ;;  %v6584_v19 = vrot.slane %v6582_v2, 1  ;;  %v6835_v3 = vrot.slane %v6710_v16, 2  ;;  %vm16393_vm4 = vmmov %vm16379_vm0 }
 0x427   : > { %7131 = vmatprep.mubr.bf16.mxu0 %v6792_v17  ;;  %v14255_v21 = vpop.f32.mrb[192].mxu1  ;;  %v6798_v17 = vsel %vm16388_vm15, %v6791_v23, %v6797_v55  ;;  %v6841_v47 = vrot.slane %v6712_v11, 2  ;;  %v6590_v23 = vshll.u32 %v14187_v50, 16  ;;  %vm16395_vm7 = vmmov %vm16389_vm9 }
 0x428   : > { %v14258_v44 = vpop.f32.mrb[193].mxu1  ;;  %vm16399_vm15 = vmmov %vm16378_vm1 }
 0x429   : > { %v5597_v29 = vpop.f32.mrb[152].mxu0  ;;  %v14262_v0 = vpop.f32.mrb[194].mxu1 }
 0x42a   : > { %v14268_v39 = vadd.f32 %v14200_v28, %v5597_v29  ;;  %v5599_v20 = vpop.f32.mrb[153].mxu0  ;;  %v14270_v45 = vpop.f32.mrb[195].mxu1  ;;  %v6790_v28 = vsel %vm16386_vm10, %v6783_v4, %v6789_v60  ;;  %v6713_v29 = vrot.slane %v16390_v48, 1  ;;  %v6795_v4 = vrot.slane %v14139_v15, 2  ;;  %vm16397_vm10 = vmmov %vm16378_vm1 }
 0x42b   : > { %v5600_v25 = vpop.f32.mrb[154].mxu0  ;;  %v6715_v20 = vrot.slane %v13928_v41, 1  ;;  %v6842_v41 = vsel %vm16391_vm5, %v6835_v3, %v6841_v47 }
 0x42c   : > { %v14274_v26 = vadd.f32 %v14213_v33, %v5600_v25  ;;  %v5602_v34 = vpop.f32.mrb[155].mxu0  ;;  %9215 = vmatmul.mubr.bf16.gmra.mrb[44].mxu1 %v6824_v30  ;;  %v6585_v33 = vsel %vm16389_vm9, %v6580_v46, %v6584_v19  ;;  %vm16400_vm9 = vmmov %vm16378_vm1 }
 0x42d   : > { %9218 = vmatprep.mubr.bf16.mxu1 %v6830_v7  ;;  %v6803_v46 = vrot.slane %v6585_v33, 2  ;;  %v6836_v7 = vsel %vm16378_vm1, %v6829_v27, %v6835_v3  ;;  %v6716_v33 = vsel %vm16393_vm4, %v6713_v29, %v6715_v20  ;;  %vm16401_vm1 = vmmov %vm16379_vm0 }
 0x42e   : > { %7132 = vmatmul.mubr.bf16.gmra.mrb[4].mxu0 %v6790_v28  ;;  %v6588_v28 = vor.u32 %v6586_v35, %v6584_v19  ;;  %v6853_v3 = vrot.slane %v6716_v33, 2  ;;  %vm16405_vm4 = vmmov %vm16401_vm1 }
 0x42f   : > { %7139 = vmatprep.mubr.bf16.mxu0 %v6798_v17  ;;  %v14281_v52 = vpop.f32.mrb[196].mxu1  ;;  %v6714_v17 = vsel %vm16379_vm0, %v6711_v40, %v6713_v29  ;;  %v6717_v40 = vrot.slane %v13940_v61, 1  ;;  %v6594_v29 = vshrl.u32 %v14187_v50, 16  ;;  %vm16402_vm0 = vmmov %vm16391_vm5 }
 0x430   : > { %v14284_v1 = vpop.f32.mrb[197].mxu1  ;;  %v6847_v27 = vrot.slane %v6714_v17, 2  ;;  %vm16403_vm5 = vmmov %vm16395_vm7 }
 0x431   : > { %v5605_v37 = vpop.f32.mrb[156].mxu0  ;;  %v14288_v2 = vpop.f32.mrb[198].mxu1  ;;  %v6718_v12 = vsel %vm16398_vm2, %v6715_v20, %v6717_v40  ;;  %v6721_v20 = vrot.slane %v13951_v13, 1  ;;  %vm16409_vm2 = vmmov %vm16402_vm0 }
 0x432   : > { %v14294_v25 = vadd.f32 %v14195_v57, %v5605_v37  ;;  %v5607_v30 = vpop.f32.mrb[157].mxu0  ;;  %v14296_v34 = vpop.f32.mrb[199].mxu1  ;;  %v6796_v57 = vsel %vm16392_vm13, %v6789_v60, %v6795_v4  ;;  %v6592_v37 = vrot.slane %v6590_v23, 1  ;;  %v6801_v60 = vrot.slane %v14159_v51, 2  ;;  %vm16404_vm13 = vmmov %vm16402_vm0 }
 0x433   : > { %v5608_v16 = vpop.f32.mrb[158].mxu0  ;;  %v6804_v30 = vsel %vm16394_vm11, %v6797_v55, %v6803_v46  ;;  %v6598_v55 = vshll.u32 %v14192_v14, 16  ;;  %v6848_v33 = vsel %vm16397_vm10, %v6841_v47, %v6847_v27  ;;  %v6859_v47 = vrot.slane %v6718_v12, 2  ;;  %vm16406_vm11 = vmmov %vm16402_vm0 }
 0x434   : > { %v14300_v15 = vadd.f32 %v14205_v58, %v5608_v16  ;;  %v5610_v11 = vpop.f32.mrb[159].mxu0  ;;  %9219 = vmatmul.mubr.bf16.gmra.mrb[48].mxu1 %v6836_v7  ;;  %v6593_v58 = vsel %vm16395_vm7, %v6588_v28, %v6592_v37  ;;  %v16396_v7 = vld [vmem:[#allocation39_spill] sm:$0xff]  ;;  %v6723_v12 = vrot.slane %v13965_v24, 1  ;;  %vm16407_vm7 = vmmov %vm16402_vm0 }
 0x435   : > { %9222 = vmatprep.mubr.bf16.mxu1 %v6842_v41  ;;  %v6719_v11 = vrot.slane %v16396_v7, 1  ;;  %v6809_v41 = vrot.slane %v6593_v58, 2  ;;  %v6854_v7 = vsel %vm16399_vm15, %v6847_v27, %v6853_v3  ;;  %vm16408_vm10 = vmmov %vm16401_vm1 }
 0x436   : > { %7140 = vmatmul.mubr.bf16.gmra.mrb[8].mxu0 %v6796_v57  ;;  %vm16410_vm15 = vmmov %vm16403_vm5 }
 0x437   : > { %7147 = vmatprep.mubr.bf16.mxu0 %v6804_v30  ;;  %v14307_v19 = vpop.f32.mrb[200].mxu1  ;;  %v6596_v30 = vor.u32 %v6594_v29, %v6592_v37  ;;  %v6720_v58 = vsel %vm16401_vm1, %v6717_v40, %v6719_v11  ;;  %v6602_v40 = vshrl.u32 %v14192_v14, 16  ;;  %v6722_v9 = vsel %vm16405_vm4, %v6719_v11, %v6721_v20  ;;  %vm16412_vm1 = vmmov %vm16402_vm0 }
 0x438   : > { %v14310_v35 = vpop.f32.mrb[201].mxu1  ;;  %v6865_v27 = vrot.slane %v6720_v58, 2  ;;  %v6860_v58 = vsel %vm16404_vm13, %v6853_v3, %v6859_v47  ;;  %v6871_v3 = vrot.slane %v6722_v9, 2  ;;  %vm16414_vm13 = vmmov %vm16410_vm15 }
 0x439   : > { %v5613_v16 = vpop.f32.mrb[160].mxu0  ;;  %v14314_v23 = vpop.f32.mrb[202].mxu1  ;;  %vm16416_vm4 = vmmov %vm16402_vm0 }
 0x43a   : > { %v14320_v17 = vadd.f32 %v14230_v49, %v5613_v16  ;;  %v5615_v28 = vpop.f32.mrb[161].mxu0  ;;  %v14322_v57 = vpop.f32.mrb[203].mxu1  ;;  %v6802_v49 = vsel %vm16400_vm9, %v6795_v4, %v6801_v60  ;;  %v6600_v16 = vrot.slane %v6598_v55, 1  ;;  %v6807_v4 = vrot.slane %v14162_v5, 2  ;;  %vm16411_vm9 = vmmov %vm16402_vm0 }
 0x43b   : > { %v5616_v61 = vpop.f32.mrb[162].mxu0  ;;  %v6810_v28 = vsel %vm16402_vm0, %v6803_v46, %v6809_v41  ;;  %v6606_v46 = vshll.u32 %v14220_v8, 16  ;;  %v6866_v24 = vsel %vm16406_vm11, %v6859_v47, %v6865_v27  ;;  %v6813_v47 = vrot.slane %v14187_v50, 2  ;;  %vm16417_vm11 = vmmov %vm16402_vm0 }
 0x43c   : > { %v14326_v51 = vadd.f32 %v14242_v42, %v5616_v61  ;;  %v5618_v32 = vpop.f32.mrb[163].mxu0  ;;  %9223 = vmatmul.mubr.bf16.gmra.mrb[52].mxu1 %v6848_v33 }
 0x43d   : > { %9226 = vmatprep.mubr.bf16.mxu1 %v6854_v7  ;;  %v6601_v32 = vsel %vm16403_vm5, %v6596_v30, %v6600_v16  ;;  %v6814_v62 = vsel %vm16402_vm0, %v6807_v4, %v6813_v47  ;;  %vm16413_vm5 = vmmov %vm16402_vm0 }
 0x43e   : > { %7148 = vmatmul.mubr.bf16.gmra.mrb[12].mxu0 %v6802_v49  ;;  %v6815_v30 = vrot.slane %v6601_v32, 2  ;;  %v6724_v32 = vsel %vm16408_vm10, %v6721_v20, %v6723_v12  ;;  %v6614_v20 = vshll.u32 %v14224_v22, 16  ;;  %vm16419_vm10 = vmmov %vm16414_vm13 }
 0x43f   : > { %7155 = vmatprep.mubr.bf16.mxu0 %v6810_v28  ;;  %v14333_v37 = vpop.f32.mrb[204].mxu1  ;;  %v6604_v28 = vor.u32 %v6602_v40, %v6600_v16  ;;  %v6877_v11 = vrot.slane %v6724_v32, 2 }
 0x440   : > { %v14336_v42 = vpop.f32.mrb[205].mxu1 }
 0x441   : > { %v5621_v29 = vpop.f32.mrb[164].mxu0  ;;  %v14340_v55 = vpop.f32.mrb[206].mxu1 }
 0x442   : > { %v14346_v61 = vadd.f32 %v14227_v43, %v5621_v29  ;;  %v5623_v33 = vpop.f32.mrb[165].mxu0  ;;  %v14348_v7 = vpop.f32.mrb[207].mxu1  ;;  %v6808_v43 = vsel %vm16407_vm7, %v6801_v60, %v6807_v4  ;;  %v6608_v29 = vrot.slane %v6606_v46, 1  ;;  %v6610_v46 = vshrl.u32 %v14220_v8, 16  ;;  %vm16418_vm7 = vmmov %vm16402_vm0 }
 0x443   : > { %v5624_v49 = vpop.f32.mrb[166].mxu0  ;;  %v6816_v33 = vsel %vm16409_vm2, %v6809_v41, %v6815_v30  ;;  %v6618_v4 = vshrl.u32 %v14224_v22, 16  ;;  %vm16420_vm2 = vmmov %vm16402_vm0 }
 0x444   : > { %v14352_v5 = vadd.f32 %v14234_v6, %v5624_v49  ;;  %v5626_v13 = vpop.f32.mrb[167].mxu0  ;;  %9227 = vmatmul.mubr.bf16.gmra.mrb[56].mxu1 %v6860_v58 }
 0x445   : > { %9230 = vmatprep.mubr.bf16.mxu1 %v6866_v24  ;;  %v6609_v13 = vsel %vm16410_vm15, %v6604_v28, %v6608_v29  ;;  %v6872_v24 = vsel %vm16411_vm9, %v6865_v27, %v6871_v3  ;;  %vm16421_vm15 = vmmov %vm16402_vm0 }
 0x446   : > { %7156 = vmatmul.mubr.bf16.gmra.mrb[16].mxu0 %v6808_v43  ;;  %v6821_v49 = vrot.slane %v6609_v13, 2  ;;  %v6612_v43 = vor.u32 %v6610_v46, %v6608_v29  ;;  %v6819_v46 = vrot.slane %v14192_v14, 2  ;;  %vm16422_vm9 = vmmov %vm16419_vm10 }
 0x447   : > { %7163 = vmatprep.mubr.bf16.mxu0 %v6816_v33  ;;  %v14359_v16 = vpop.f32.mrb[208].mxu1  ;;  %v6878_v33 = vsel %vm16412_vm1, %v6871_v3, %v6877_v11  ;;  %v6622_v3 = vshll.u32 %v14250_v18, 16  ;;  %vm16423_vm1 = vmmov %vm16402_vm0 }
 0x448   : > { %v14362_v6 = vpop.f32.mrb[209].mxu1  ;;  %v6822_v13 = vsel %vm16413_vm5, %v6815_v30, %v6821_v49  ;;  %vm16424_vm5 = vmmov %vm16422_vm9 }
 0x449   : > { %v5629_v40 = vpop.f32.mrb[168].mxu0  ;;  %v14365_v60 = vpop.f32.mrb[210].mxu1 }
 0x44a   : > { %v14370_v41 = vadd.f32 %v14258_v44, %v5629_v40  ;;  %v5631_v9 = vpop.f32.mrb[169].mxu0  ;;  %v14372_v58 = vpop.f32.mrb[211].mxu1  ;;  %v6616_v44 = vrot.slane %v6614_v20, 1  ;;  %v6883_v40 = vrot.slane %v6723_v12, 2 }
 0x44b   : > { %v5632_v28 = vpop.f32.mrb[170].mxu0 }
 0x44c   : > { %v14376_v32 = vadd.f32 %v14270_v45, %v5632_v28  ;;  %v5634_v50 = vpop.f32.mrb[171].mxu0  ;;  %9231 = vmatmul.mubr.bf16.gmra.mrb[60].mxu1 %v6872_v24  ;;  %v6617_v27 = vsel %vm16414_vm13, %v6612_v43, %v6616_v44  ;;  %v6884_v43 = vsel %vm16416_vm4, %v6877_v11, %v6883_v40  ;;  %vm16425_vm13 = vmmov %vm16402_vm0 }
 0x44d   : > { %9234 = vmatprep.mubr.bf16.mxu1 %v6878_v33  ;;  %v6827_v12 = vrot.slane %v6617_v27, 2  ;;  %v6620_v50 = vor.u32 %v6618_v4, %v6616_v44  ;;  %v6626_v4 = vshrl.u32 %v14250_v18, 16  ;;  %vm16426_vm4 = vmmov %vm16402_vm0 }
 0x44e   : > { %7164 = vmatmul.mubr.bf16.gmra.mrb[20].mxu0 %v6814_v62 }
 0x44f   : > { %7171 = vmatprep.mubr.bf16.mxu0 %v6822_v13  ;;  %v14381_v9 = vpop.f32.mrb[212].mxu1  ;;  %v6820_v13 = vsel %vm16417_vm11, %v6813_v47, %v6819_v46  ;;  %v6630_v47 = vshll.u32 %v16382_v54, 16  ;;  %vm16428_vm11 = vmmov %vm16424_vm5 }
 0x450   : > { %v14384_v29 = vpop.f32.mrb[213].mxu1 }
 0x451   : > { %v5637_v45 = vpop.f32.mrb[172].mxu0  ;;  %v14387_v28 = vpop.f32.mrb[214].mxu1 }
 0x452   : > { %16415 = vst [vmem:[#allocation48_spill] sm:$0xff] %v14387_v28  ;;  %v14392_v62 = vadd.f32 %v14255_v21, %v5637_v45  ;;  %v5639_v30 = vpop.f32.mrb[173].mxu0  ;;  %v14394_v20 = vpop.f32.mrb[215].mxu1  ;;  %v6624_v28 = vrot.slane %v6622_v3, 1  ;;  %v6828_v21 = vsel %vm16418_vm7, %v6821_v49, %v6827_v12  ;;  %vm16430_vm7 = vmmov %vm16402_vm0 }
 0x453   : > { %v5640_v24 = vpop.f32.mrb[174].mxu0 }
 0x454   : > { %v14398_v33 = vadd.f32 %v14262_v0, %v5640_v24  ;;  %v5642_v14 = vpop.f32.mrb[175].mxu0  ;;  %9235 = vmatmul.mubr.bf16.gmra.mrb[64].mxu1 %v6884_v43  ;;  %v6625_v27 = vsel %vm16419_vm10, %v6620_v50, %v6624_v28  ;;  %v6825_v0 = vrot.slane %v14220_v8, 2  ;;  %vm16431_vm10 = vmmov %vm16402_vm0 }
 0x455   : > { %v6833_v43 = vrot.slane %v6625_v27, 2  ;;  %v6628_v14 = vor.u32 %v6626_v4, %v6624_v28  ;;  %v6831_v28 = vrot.slane %v14224_v22, 2  ;;  %v9610_v4 = vld [vmem:[#allocation2 + $0x70] sm:$0xff]  }
 0x456   : > { %7172 = vmatmul.mubr.bf16.gmra.mrb[24].mxu0 %v6820_v13 }
 0x457   : > { %7179 = vmatprep.mubr.bf16.mxu0 %v6828_v21  ;;  %v6079_v45 = vpop.f32.mrb[216].mxu1  ;;  %v6826_v21 = vsel %vm16420_vm2, %v6819_v46, %v6825_v0  ;;  %v6638_v46 = vshll.u32 %v16390_v48, 16  ;;  %vm16434_vm2 = vmmov %vm16402_vm0 }
 0x458   : > { %v14404_v30 = vadd.f32 %v6079_v45, %v14210_v53  ;;  %v6081_v11 = vpop.f32.mrb[217].mxu1  ;;  %v6632_v45 = vrot.slane %v6630_v47, 1 }
 0x459   : > { %v5645_v44 = vpop.f32.mrb[176].mxu0  ;;  %v6082_v40 = vpop.f32.mrb[218].mxu1  ;;  %v6834_v11 = vsel %vm16421_vm15, %v6827_v12, %v6833_v43  ;;  %vm16443_vm15 = vmmov %vm16402_vm0 }
 0x45a   : > { %v14410_v3 = vadd.f32 %v14284_v1, %v5645_v44  ;;  %v5647_v49 = vpop.f32.mrb[177].mxu0  ;;  %v14413_v24 = vadd.f32 %v6082_v40, %v14216_v31  ;;  %v6084_v50 = vpop.f32.mrb[219].mxu1  ;;  %v6633_v44 = vsel %vm16422_vm9, %v6628_v14, %v6632_v45 }
 0x45b   : > { %v5648_v53 = vpop.f32.mrb[178].mxu0  ;;  %v6634_v49 = vshrl.u32 %v9610_v4, 16 }
 0x45c   : > { %v14416_v13 = vadd.f32 %v14296_v34, %v5648_v53  ;;  %v5650_v8 = vpop.f32.mrb[179].mxu0  ;;  %v6839_v53 = vrot.slane %v6633_v44, 2 }
 0x45d   : > { %v6636_v8 = vor.u32 %v6634_v49, %v6632_v45  ;;  %v6837_v45 = vrot.slane %v14250_v18, 2 }
 0x45e   : > { %7180 = vmatmul.mubr.bf16.gmra.mrb[28].mxu0 %v6826_v21  ;;  %v6840_v48 = vsel %vm16402_vm0, %v6833_v43, %v6839_v53 }
 0x45f   : > { %7187 = vmatprep.mubr.bf16.mxu0 %v6834_v11  ;;  %v6087_v1 = vpop.f32.mrb[220].mxu1  ;;  %v6832_v11 = vsel %vm16423_vm1, %v6825_v0, %v6831_v28  ;;  %v6838_v18 = vsel %vm16425_vm13, %v6831_v28, %v6837_v45 }
 0x460   : > { %v14422_v31 = vadd.f32 %v6087_v1, %v14240_v59  ;;  %v6089_v27 = vpop.f32.mrb[221].mxu1  ;;  %v6640_v1 = vrot.slane %v6638_v46, 1 }
 0x461   : > { %v5653_v40 = vpop.f32.mrb[180].mxu0  ;;  %v6090_v34 = vpop.f32.mrb[222].mxu1 }
 0x462   : > { %v14427_v47 = vadd.f32 %v14281_v52, %v5653_v40  ;;  %v5655_v12 = vpop.f32.mrb[181].mxu0  ;;  %v14430_v50 = vadd.f32 %v6090_v34, %v14246_v63  ;;  %v6092_v14 = vpop.f32.mrb[223].mxu1  ;;  %v6641_v27 = vsel %vm16424_vm5, %v6636_v8, %v6640_v1  ;;  %v9611_v34 = vld [vmem:[#allocation2 + $0x78] sm:$0xff]  }
 0x463   : > { %v5656_v59 = vpop.f32.mrb[182].mxu0  ;;  %v6642_v4 = vshrl.u32 %v9611_v34, 16  ;;  %v6845_v46 = vrot.slane %v6641_v27, 2 }
 0x464   : > { %v14433_v21 = vadd.f32 %v14288_v2, %v5656_v59  ;;  %v5658_v22 = vpop.f32.mrb[183].mxu0 }
 0x465   : > { %v6644_v59 = vor.u32 %v6642_v4, %v6640_v1  ;;  %v6846_v22 = vsel %vm16426_vm4, %v6839_v53, %v6845_v46 }
 0x466   : > { %7188 = vmatmul.mubr.bf16.gmra.mrb[32].mxu0 %v6832_v11  ;;  %v16427_v11 = vld [vmem:[#allocation50_spill] sm:$0xff] }
 0x467   : > { %7195 = vmatprep.mubr.bf16.mxu0 %v6840_v48  ;;  %v6095_v52 = vpop.f32.mrb[224].mxu1  ;;  %v6649_v48 = vsel %vm16428_vm11, %v6644_v59, %v16427_v11  ;;  %v16432_v11 = vld [vmem:[#allocation53_spill] sm:$0xff] }
 0x468   : > { %v14439_v63 = vadd.f32 %v6095_v52, %v14268_v39  ;;  %v6097_v44 = vpop.f32.mrb[225].mxu1 }
 0x469   : > { %v5661_v40 = vpop.f32.mrb[184].mxu0  ;;  %v6098_v2 = vpop.f32.mrb[226].mxu1 }
 0x46a   : > { %v14443_v0 = vadd.f32 %v14310_v35, %v5661_v40  ;;  %v5663_v49 = vpop.f32.mrb[185].mxu0  ;;  %v14446_v43 = vadd.f32 %v6098_v2, %v14274_v26  ;;  %v6100_v12 = vpop.f32.mrb[227].mxu1  ;;  %v6851_v40 = vrot.slane %v6649_v48, 2 }
 0x46b   : > { %v5664_v14 = vpop.f32.mrb[186].mxu0 }
 0x46c   : > { %v14449_v39 = vadd.f32 %v14322_v57, %v5664_v14  ;;  %v5666_v8 = vpop.f32.mrb[187].mxu0  ;;  %v6852_v12 = vsel %vm16431_vm10, %v6845_v46, %v6851_v40 }
 0x46e   : > { %7196 = vmatmul.mubr.bf16.gmra.mrb[36].mxu0 %v6838_v18 }
 0x46f   : > { %7203 = vmatprep.mubr.bf16.mxu0 %v6846_v22  ;;  %v6103_v35 = vpop.f32.mrb[228].mxu1 }
 0x470   : > { %v14456_v26 = vadd.f32 %v6103_v35, %v14294_v25  ;;  %v6105_v52 = vpop.f32.mrb[229].mxu1  ;;  %v16429_v25 = vrot.slane %v16382_v54, 2 }
 0x471   : > { %v5669_v27 = vpop.f32.mrb[188].mxu0  ;;  %v6106_v1 = vpop.f32.mrb[230].mxu1 }
 0x472   : > { %v14459_v57 = vadd.f32 %v14307_v19, %v5669_v27  ;;  %v5671_v44 = vpop.f32.mrb[189].mxu0  ;;  %v14462_v28 = vadd.f32 %v6106_v1, %v14300_v15  ;;  %v6108_v53 = vpop.f32.mrb[231].mxu1  ;;  %v6844_v49 = vsel %vm16430_vm7, %v6837_v45, %v16429_v25  ;;  %v16435_v25 = vld [vmem:[#allocation49_spill] sm:$0xff] }
 0x473   : > { %v5672_v2 = vpop.f32.mrb[190].mxu0 }
 0x474   : > { %v14465_v34 = vadd.f32 %v14314_v23, %v5672_v2  ;;  %v5674_v4 = vpop.f32.mrb[191].mxu0 }
 0x476   : > { %7204 = vmatmul.mubr.bf16.gmra.mrb[40].mxu0 %v6844_v49 }
 0x477   : > { %7211 = vmatprep.mubr.bf16.mxu0 %v6852_v12  ;;  %v6111_v19 = vpop.f32.mrb[232].mxu1 }
 0x478   : > { %v14472_v14 = vadd.f32 %v6111_v19, %v14320_v17  ;;  %v6113_v15 = vpop.f32.mrb[233].mxu1  ;;  %v16433_v17 = vrot.slane %v13977_v56, 2 }
 0x479   : > { %v5677_v59 = vpop.f32.mrb[192].mxu0  ;;  %v6114_v8 = vpop.f32.mrb[234].mxu1 }
 0x47a   : > { %v14475_v18 = vadd.f32 %v14336_v42, %v5677_v59  ;;  %v5679_v23 = vpop.f32.mrb[193].mxu0  ;;  %v14478_v22 = vadd.f32 %v6114_v8, %v14326_v51  ;;  %v6116_v54 = vpop.f32.mrb[235].mxu1  ;;  %v6858_v48 = vsel %vm16434_vm2, %v6851_v40, %v16433_v17 }
 0x47b   : > { %v5680_v45 = vpop.f32.mrb[194].mxu0  ;;  %v16436_v54 = vld [vmem:[#allocation52_spill] sm:$0xff] }
 0x47c   : > { %v14481_v35 = vadd.f32 %v14348_v7, %v5680_v45  ;;  %v5682_v46 = vpop.f32.mrb[195].mxu0 }
 0x47e   : > { %7212 = vmatmul.mubr.bf16.gmra.mrb[44].mxu0 %v16432_v11 }
 0x47f   : > { %7219 = vmatprep.mubr.bf16.mxu0 %v6858_v48  ;;  %v6119_v52 = vpop.f32.mrb[236].mxu1 }
 0x480   : > { %v14488_v42 = vadd.f32 %v6119_v52, %v14346_v61  ;;  %v6121_v27 = vpop.f32.mrb[237].mxu1 }
 0x481   : > { %v5685_v51 = vpop.f32.mrb[196].mxu0  ;;  %v6122_v1 = vpop.f32.mrb[238].mxu1 }
 0x482   : > { %v14491_v44 = vadd.f32 %v14333_v37, %v5685_v51  ;;  %v5687_v7 = vpop.f32.mrb[197].mxu0  ;;  %v14494_v53 = vadd.f32 %v6122_v1, %v14352_v5  ;;  %v6124_v2 = vpop.f32.mrb[239].mxu1 }
 0x483   : > { %v5688_v4 = vpop.f32.mrb[198].mxu0 }
 0x484   : > { %v14497_v56 = vadd.f32 %v14340_v55, %v5688_v4  ;;  %v5690_v40 = vpop.f32.mrb[199].mxu0 }
 0x486   : > { %7220 = vmatmul.mubr.bf16.gmra.mrb[48].mxu0 %v16435_v25 }
 0x487   : > { %7227 = vmatprep.mubr.bf16.mxu0 %v14003_v38  ;;  %v6127_v61 = vpop.f32.mrb[240].mxu1 }
 0x488   : > { %v14502_v49 = vadd.f32 %v6127_v61, %v14370_v41  ;;  %v6129_v37 = vpop.f32.mrb[241].mxu1 }
 0x489   : > { %v5693_v12 = vpop.f32.mrb[200].mxu0  ;;  %v6130_v19 = vpop.f32.mrb[242].mxu1  ;;  %v9588_v37 = vld [vmem:[#allocation2 + $0xa0] ss:$0 sps:$4 sm:$0x33]  }
 0x48a   : > { %v14505_v5 = vadd.f32 %v14362_v6, %v5693_v12  ;;  %v5695_v15 = vpop.f32.mrb[201].mxu0  ;;  %v14508_v59 = vadd.f32 %v6130_v19, %v14376_v32  ;;  %v6132_v55 = vpop.f32.mrb[243].mxu1  ;;  %v16438_v12 = vld [vmem:[#allocation9_spill] sm:$0xff] }
 0x48b   : > { %v5696_v8 = vpop.f32.mrb[202].mxu0 }
 0x48c   : > { %v14511_v23 = vadd.f32 %v14372_v58, %v5696_v8  ;;  %v5698_v38 = vpop.f32.mrb[203].mxu0  ;;  %v6879_v8 = vrot.slane %v9588_v37, 2 }
 0x48e   : > { %7228 = vmatmul.mubr.bf16.gmra.mrb[52].mxu0 %v16436_v54 }
 0x48f   : > { %7235 = vmatprep.mubr.bf16.mxu0 %v14013_v10  ;;  %v6135_v41 = vpop.f32.mrb[244].mxu1 }
 0x490   : > { %v14516_v45 = vadd.f32 %v6135_v41, %v14392_v62  ;;  %v6137_v6 = vpop.f32.mrb[245].mxu1  ;;  %v16437_v62 = vld [vmem:[#allocation6_spill] sm:$0xff] }
 0x491   : > { %v5701_v46 = vpop.f32.mrb[204].mxu0  ;;  %v6138_v11 = vpop.f32.mrb[246].mxu1 }
 0x492   : > { %v14519_v32 = vadd.f32 %v14359_v16, %v5701_v46  ;;  %v5703_v17 = vpop.f32.mrb[205].mxu0  ;;  %v14522_v48 = vadd.f32 %v6138_v11, %v14398_v33  ;;  %v6140_v58 = vpop.f32.mrb[247].mxu1  ;;  %v16440_v46 = vld [vmem:[#allocation48_spill] sm:$0xff] }
 0x493   : > { %v5704_v52 = vpop.f32.mrb[206].mxu0  ;;  %v16441_v58 = vld [vmem:[#allocation42_spill] sm:$0xff] }
 0x494   : > { %v14525_v27 = vadd.f32 %v14365_v60, %v5704_v52  ;;  %v5706_v10 = vpop.f32.mrb[207].mxu0 }
 0x496   : > { %7236 = vmatmul.mubr.bf16.gmra.mrb[56].mxu0 %v13995_v36 }
 0x497   : > { %7243 = vmatprep.mubr.bf16.mxu0 %v16437_v62  ;;  %v6143_v51 = vpop.f32.mrb[248].mxu1 }
 0x498   : > { %v14530_v1 = vadd.f32 %v6143_v51, %v14410_v3  ;;  %v6145_v16 = vpop.f32.mrb[249].mxu1  ;;  %v16439_v3 = vld [vmem:[#allocation16_spill] sm:$0xff] }
 0x499   : > { %v5709_v7 = vpop.f32.mrb[208].mxu0  ;;  %v6146_v2 = vpop.f32.mrb[250].mxu1 }
 0x49a   : > { %v14533_v33 = vadd.f32 %v14384_v29, %v5709_v7  ;;  %v5711_v4 = vpop.f32.mrb[209].mxu0  ;;  %v14536_v40 = vadd.f32 %v6146_v2, %v14416_v13  ;;  %v6148_v60 = vpop.f32.mrb[251].mxu1 }
 0x49b   : > { %v5712_v25 = vpop.f32.mrb[210].mxu0 }
 0x49c   : > { %v14539_v36 = vadd.f32 %v14394_v20, %v5712_v25  ;;  %v5714_v61 = vpop.f32.mrb[211].mxu0 }
 0x49e   : > { %7244 = vmatmul.mubr.bf16.gmra.mrb[60].mxu0 %v16438_v12 }
 0x49f   : > { %7251 = vmatprep.mubr.bf16.mxu0 %v16439_v3  ;;  %v6151_v19 = vpop.f32.mrb[252].mxu1 }
 0x4a0   : > { %v14544_v15 = vadd.f32 %v6151_v19, %v14427_v47  ;;  %v6153_v29 = vpop.f32.mrb[253].mxu1  ;;  %v16442_v47 = vrot.slane %v16441_v58, 2 }
 0x4a1   : > { %v5717_v55 = vpop.f32.mrb[212].mxu0  ;;  %v6154_v13 = vpop.f32.mrb[254].mxu1 }
 0x4a2   : > { %v14547_v38 = vadd.f32 %v14381_v9, %v5717_v55  ;;  %v5719_v54 = vpop.f32.mrb[213].mxu0  ;;  %v14550_v20 = vadd.f32 %v6154_v13, %v14433_v21  ;;  %v6156_v41 = vpop.f32.mrb[255].mxu1  ;;  %v6880_v52 = vsel %vm16443_vm15, %v16442_v47, %v6879_v8 }
 0x4a3   : > { %v5720_v6 = vpop.f32.mrb[214].mxu0 }
 0x4a4   : > { %v14553_v11 = vadd.f32 %v16440_v46, %v5720_v6  ;;  %v5722_v17 = vpop.f32.mrb[215].mxu0 }
 0x4a6   : > { %7252 = vmatmul.mubr.bf16.gmra.mrb[64].mxu0 %v6880_v52 }
 0x4a7   : > { %v6159_v10 = vpop.f32.mrb[0].mxu1 }
 0x4a8   : > { %v14559_v62 = vadd.f32 %v6159_v10, %v14443_v0  ;;  %v6161_v9 = vpop.f32.mrb[1].mxu1 }
 0x4a9   : > { %v9152_v51 = vpop.f32.mrb[216].mxu0  ;;  %v6162_v16 = vpop.f32.mrb[2].mxu1 }
 0x4aa   : > { %v14562_v21 = vadd.f32 %v9152_v51, %v14422_v31  ;;  %v6256_v7 = vpop.f32.mrb[217].mxu0  ;;  %v14565_v2 = vadd.f32 %v6162_v16, %v14449_v39  ;;  %v6164_v4 = vpop.f32.mrb[3].mxu1 }
 0x4ab   : > { %v14568_v60 = vadd.f32 %v6256_v7, %v14404_v30  ;;  %v9153_v25 = vpop.f32.mrb[218].mxu0 }
 0x4ac   : > { %v14571_v61 = vadd.f32 %v9153_v25, %v14430_v50  ;;  %v6259_v0 = vpop.f32.mrb[219].mxu0 }
 0x4ad   : > { %v14574_v37 = vadd.f32 %v6259_v0, %v14413_v24 }
 0x4af   : > { %v6167_v12 = vpop.f32.mrb[4].mxu1 }
 0x4b0   : > { %v6168_v31 = vadd.f32 %v6167_v12, %v14459_v57  ;;  %v6169_v3 = vpop.f32.mrb[5].mxu1 }
 0x4b1   : > { %v9156_v19 = vpop.f32.mrb[220].mxu0  ;;  %v6170_v29 = vpop.f32.mrb[6].mxu1 }
 0x4b2   : > { %v14578_v39 = vadd.f32 %v9156_v19, %v14456_v26  ;;  %v6272_v55 = vpop.f32.mrb[221].mxu0  ;;  %v6171_v30 = vadd.f32 %v6170_v29, %v14465_v34  ;;  %v6172_v8 = vpop.f32.mrb[7].mxu1 }
 0x4b3   : > { %v14582_v50 = vadd.f32 %v6272_v55, %v14439_v63  ;;  %v9157_v13 = vpop.f32.mrb[222].mxu0 }
 0x4b4   : > { %v14585_v24 = vadd.f32 %v9157_v13, %v14462_v28  ;;  %v6275_v54 = vpop.f32.mrb[223].mxu0 }
 0x4b5   : > { %v14588_v57 = vadd.f32 %v6275_v54, %v14446_v43 }
 0x4b7   : > { %v6175_v41 = vpop.f32.mrb[8].mxu1 }
 0x4b8   : > { %v14591_v6 = vadd.f32 %v6175_v41, %v14475_v18  ;;  %v6177_v26 = vpop.f32.mrb[9].mxu1 }
 0x4b9   : > { %v9160_v46 = vpop.f32.mrb[224].mxu0  ;;  %v6178_v17 = vpop.f32.mrb[10].mxu1 }
 0x4ba   : > { %v14594_v34 = vadd.f32 %v9160_v46, %v14488_v42  ;;  %v6288_v63 = vpop.f32.mrb[225].mxu0  ;;  %v6179_v58 = vadd.f32 %v6178_v17, %v14481_v35  ;;  %v6180_v47 = vpop.f32.mrb[11].mxu1 }
 0x4bb   : > { %v14598_v28 = vadd.f32 %v6288_v63, %v14472_v14  ;;  %v9161_v52 = vpop.f32.mrb[226].mxu0 }
 0x4bc   : > { %v14601_v43 = vadd.f32 %v9161_v52, %v14494_v53  ;;  %v6291_v10 = vpop.f32.mrb[227].mxu0 }
 0x4bd   : > { %v14604_v18 = vadd.f32 %v6291_v10, %v14478_v22 }
 0x4bf   : > { %v6183_v9 = vpop.f32.mrb[12].mxu1 }
 0x4c0   : > { %v6184_v51 = vadd.f32 %v6183_v9, %v14491_v44  ;;  %v6185_v42 = vpop.f32.mrb[13].mxu1 }
 0x4c1   : > { %v9164_v16 = vpop.f32.mrb[228].mxu0  ;;  %v6186_v7 = vpop.f32.mrb[14].mxu1 }
 0x4c2   : > { %v14608_v35 = vadd.f32 %v9164_v16, %v14516_v45  ;;  %v6304_v4 = vpop.f32.mrb[229].mxu0  ;;  %v6187_v14 = vadd.f32 %v6186_v7, %v14497_v56  ;;  %v6188_v25 = vpop.f32.mrb[15].mxu1 }
 0x4c3   : > { %v14612_v53 = vadd.f32 %v6304_v4, %v14502_v49  ;;  %v9165_v0 = vpop.f32.mrb[230].mxu0 }
 0x4c4   : > { %v14615_v22 = vadd.f32 %v9165_v0, %v14522_v48  ;;  %v6307_v12 = vpop.f32.mrb[231].mxu0 }
 0x4c5   : > { %v14618_v44 = vadd.f32 %v6307_v12, %v14508_v59 }
 0x4c7   : > { %v6191_v3 = vpop.f32.mrb[16].mxu1 }
 0x4c8   : > { %v6192_v19 = vadd.f32 %v6191_v3, %v14505_v5  ;;  %v6193_v45 = vpop.f32.mrb[17].mxu1 }
 0x4c9   : > { %v9168_v29 = vpop.f32.mrb[232].mxu0  ;;  %v6194_v55 = vpop.f32.mrb[18].mxu1 }
 0x4ca   : > { %v14622_v56 = vadd.f32 %v9168_v29, %v14544_v15  ;;  %v6320_v8 = vpop.f32.mrb[233].mxu0  ;;  %v6195_v49 = vadd.f32 %v6194_v55, %v14511_v23  ;;  %v6196_v13 = vpop.f32.mrb[19].mxu1 }
 0x4cb   : > { %v14626_v48 = vadd.f32 %v6320_v8, %v14530_v1  ;;  %v9169_v54 = vpop.f32.mrb[234].mxu0 }
 0x4cc   : > { %v14629_v59 = vadd.f32 %v9169_v54, %v14550_v20  ;;  %v6323_v41 = vpop.f32.mrb[235].mxu0 }
 0x4cd   : > { %v14632_v5 = vadd.f32 %v6323_v41, %v14536_v40 }
 0x4cf   : > { %v6199_v26 = vpop.f32.mrb[20].mxu1 }
 0x4d0   : > { %v6200_v46 = vadd.f32 %v6199_v26, %v14519_v32  ;;  %v6201_v15 = vpop.f32.mrb[21].mxu1 }
 0x4d1   : > { %v9172_v17 = vpop.f32.mrb[236].mxu0  ;;  %v6202_v63 = vpop.f32.mrb[22].mxu1 }
 0x4d2   : > { %v14635_v47 = vadd.f32 %v9172_v17, %v6168_v31  ;;  %v6336_v23 = vpop.f32.mrb[237].mxu0  ;;  %v6203_v1 = vadd.f32 %v6202_v63, %v14525_v27  ;;  %v6204_v52 = vpop.f32.mrb[23].mxu1 }
 0x4d3   : > { %v14639_v10 = vadd.f32 %v6336_v23, %v14559_v62  ;;  %v9173_v20 = vpop.f32.mrb[238].mxu0 }
 0x4d4   : > { %v14641_v9 = vadd.f32 %v9173_v20, %v6171_v30  ;;  %v6339_v40 = vpop.f32.mrb[239].mxu0 }
 0x4d5   : > { %v14644_v42 = vadd.f32 %v6339_v40, %v14565_v2 }
 0x4d7   : > { %v6207_v32 = vpop.f32.mrb[24].mxu1 }
 0x4d8   : > { %v6208_v16 = vadd.f32 %v6207_v32, %v14533_v33  ;;  %v6209_v7 = vpop.f32.mrb[25].mxu1 }
 0x4d9   : > { %v9176_v31 = vpop.f32.mrb[240].mxu0  ;;  %v6210_v4 = vpop.f32.mrb[26].mxu1 }
 0x4da   : > { %v14647_v25 = vadd.f32 %v9176_v31, %v6184_v51  ;;  %v6352_v27 = vpop.f32.mrb[241].mxu0  ;;  %v6211_v0 = vadd.f32 %v6210_v4, %v14539_v36  ;;  %v6212_v62 = vpop.f32.mrb[27].mxu1 }
 0x4db   : > { %v14651_v12 = vadd.f32 %v6352_v27, %v14591_v6  ;;  %v9177_v30 = vpop.f32.mrb[242].mxu0 }
 0x4dc   : > { %v14653_v3 = vadd.f32 %v9177_v30, %v6187_v14  ;;  %v6355_v2 = vpop.f32.mrb[243].mxu0 }
 0x4dd   : > { %v14655_v45 = vadd.f32 %v6355_v2, %v6179_v58 }
 0x4df   : > { %v6215_v29 = vpop.f32.mrb[28].mxu1 }
 0x4e0   : > { %v6216_v33 = vadd.f32 %v6215_v29, %v14547_v38  ;;  %v6217_v55 = vpop.f32.mrb[29].mxu1 }
 0x4e1   : > { %v9180_v8 = vpop.f32.mrb[244].mxu0  ;;  %v6218_v51 = vpop.f32.mrb[30].mxu1 }
 0x4e2   : > { %v14658_v13 = vadd.f32 %v9180_v8, %v6200_v46  ;;  %v6368_v54 = vpop.f32.mrb[245].mxu0  ;;  %v6219_v36 = vadd.f32 %v6218_v51, %v14553_v11  ;;  %v6220_v41 = vpop.f32.mrb[31].mxu1 }
 0x4e3   : > { %v14661_v6 = vadd.f32 %v6368_v54, %v6192_v19  ;;  %v9181_v26 = vpop.f32.mrb[246].mxu0 }
 0x4e4   : > { %v14663_v14 = vadd.f32 %v9181_v26, %v6203_v1  ;;  %v6371_v15 = vpop.f32.mrb[247].mxu0 }
 0x4e5   : > { %v14665_v58 = vadd.f32 %v6371_v15, %v6195_v49 }
 0x4e6   : > { %16444 = vst [vmem:[#allocation20_spill] sm:$0xff] %v14663_v14 }
 0x4e7   : > { %v9204_v17 = vpop.f32.mrb[32].mxu1 }
 0x4e8   : > { %v7294_v63 = vpop.f32.mrb[33].mxu1 }
 0x4e9   : > { %v9184_v38 = vpop.f32.mrb[248].mxu0  ;;  %v9205_v23 = vpop.f32.mrb[34].mxu1 }
 0x4ea   : > { %v14667_v52 = vadd.f32 %v9184_v38, %v6216_v33  ;;  %v6384_v46 = vpop.f32.mrb[249].mxu0  ;;  %v7297_v20 = vpop.f32.mrb[35].mxu1 }
 0x4eb   : > { %v14669_v40 = vadd.f32 %v6384_v46, %v6208_v16  ;;  %v9185_v11 = vpop.f32.mrb[250].mxu0 }
 0x4ec   : > { %16445 = vst [vmem:[#allocation8_spill] sm:$0xff] %v14667_v52  ;;  %v14671_v32 = vadd.f32 %v9185_v11, %v6219_v36  ;;  %v6387_v19 = vpop.f32.mrb[251].mxu0 }
 0x4ed   : > { %16446 = vst [vmem:[#allocation45_spill] sm:$0xff] %v14669_v40  ;;  %v14673_v7 = vadd.f32 %v6387_v19, %v6211_v0 }
 0x4ee   : > { %16447 = vst [vmem:[#allocation34_spill] sm:$0xff] %v14671_v32  ;;  %v16458_v32 = vld [vmem:[#allocation60_spill] sm:$0xff] }
 0x4ef   : > { %16448 = vst [vmem:[#allocation37_spill] sm:$0xff] %v14673_v7  ;;  %v9208_v1 = vpop.f32.mrb[36].mxu1  ;;  %vm16459_vm1 = vnez %v16458_v32 }
 0x4f0   : > { %v7310_v31 = vpop.f32.mrb[37].mxu1 }
 0x4f1   : > { %v7117_v49 = vpop.f32.mrb[252].mxu0  ;;  %v9209_v4 = vpop.f32.mrb[38].mxu1 }
 0x4f2   : > { %v7295_v27 = vadd.f32 %v7294_v63, %v7117_v49  ;;  %v7119_v62 = vpop.f32.mrb[253].mxu0  ;;  %v7313_v30 = vpop.f32.mrb[39].mxu1 }
 0x4f3   : > { %v7120_v2 = vpop.f32.mrb[254].mxu0 }
 0x4f4   : > { %v14676_v29 = vadd.f32 %v7295_v27, %v14568_v60  ;;  %v7298_v33 = vadd.f32 %v7297_v20, %v7120_v2  ;;  %v7122_v16 = vpop.f32.mrb[255].mxu0 }
 0x4f6   : > { %16449 = vst [vmem:[#allocation30_spill] sm:$0xff] %v14676_v29  ;;  %v14679_v55 = vadd.f32 %v7298_v33, %v14574_v37 }
 0x4f7   : > { %v14681_v8 = vpop.f32.mrb[40].mxu1 }
 0x4f8   : > { %16450 = vst [vmem:[#allocation27_spill] sm:$0xff] %v14679_v55  ;;  %v7326_v0 = vpop.f32.mrb[41].mxu1 }
 0x4f9   : > { %v7125_v51 = vpop.f32.mrb[0].mxu0  ;;  %v14683_v54 = vpop.f32.mrb[42].mxu1 }
 0x4fa   : > { %v7303_v36 = vadd.f32 %v9204_v17, %v7125_v51  ;;  %v7127_v41 = vpop.f32.mrb[1].mxu0  ;;  %v7329_v26 = vpop.f32.mrb[43].mxu1 }
 0x4fb   : > { %v7128_v15 = vpop.f32.mrb[2].mxu0 }
 0x4fc   : > { %v14686_v63 = vadd.f32 %v7303_v36, %v14562_v21  ;;  %v7306_v60 = vadd.f32 %v9205_v23, %v7128_v15  ;;  %v7130_v38 = vpop.f32.mrb[3].mxu0 }
 0x4fe   : > { %16451 = vst [vmem:[#allocation22_spill] sm:$0xff] %v14686_v63  ;;  %v14689_v46 = vadd.f32 %v7306_v60, %v14571_v61  ;;  %v7475_v52 = vsel %vm16459_vm1, %v14686_v63, 0.0 }
 0x4ff   : > { %v14691_v37 = vpop.f32.mrb[44].mxu1 }
 0x500   : > { %v14693_v20 = vpop.f32.mrb[45].mxu1 }
 0x501   : > { %v7133_v11 = vpop.f32.mrb[4].mxu0  ;;  %v14695_v19 = vpop.f32.mrb[46].mxu1 }
 0x502   : > { %v7311_v49 = vadd.f32 %v7310_v31, %v7133_v11  ;;  %v7135_v17 = vpop.f32.mrb[5].mxu0  ;;  %v14697_v27 = vpop.f32.mrb[47].mxu1 }
 0x503   : > { %v7136_v62 = vpop.f32.mrb[6].mxu0 }
 0x504   : > { %v14700_v21 = vadd.f32 %v7311_v49, %v14582_v50  ;;  %v7314_v23 = vadd.f32 %v7313_v30, %v7136_v62  ;;  %v7138_v2 = vpop.f32.mrb[7].mxu0  ;;  %v7552_v49 = vmul.f32 %v14679_v55, %v14679_v55 }
 0x506   : > { %16452 = vst [vmem:[#allocation25_spill] sm:$0xff] %v14700_v21  ;;  %v14703_v61 = vadd.f32 %v7314_v23, %v14588_v57  ;;  %v7551_v23 = vmul.f32 %v14676_v29, %v14676_v29 }
 0x507   : > { %v14705_v33 = vpop.f32.mrb[48].mxu1 }
 0x508   : > { %v14707_v16 = vpop.f32.mrb[49].mxu1 }
 0x509   : > { %v7141_v51 = vpop.f32.mrb[8].mxu0  ;;  %v14709_v36 = vpop.f32.mrb[50].mxu1 }
 0x50a   : > { %v7319_v31 = vadd.f32 %v9208_v1, %v7141_v51  ;;  %v7143_v41 = vpop.f32.mrb[9].mxu0  ;;  %v14711_v15 = vpop.f32.mrb[51].mxu1 }
 0x50b   : > { %v7144_v60 = vpop.f32.mrb[10].mxu0  ;;  %v16456_v41 = vld [vmem:[#allocation56_spill] sm:$0xff] }
 0x50c   : > { %v14714_v50 = vadd.f32 %v7319_v31, %v14578_v39  ;;  %v7322_v30 = vadd.f32 %v9209_v4, %v7144_v60  ;;  %v7146_v38 = vpop.f32.mrb[11].mxu0  ;;  %v7474_v4 = vsel %vm11601_vm14, %v14679_v55, 0.0  ;;  %vm16457_vm9 = vnez %v16456_v41 }
 0x50d   : > { %v7473_v60 = vsel %vm16457_vm9, %v14676_v29, 0.0  ;;  %v7588_v38 = vsel %vm11601_vm14, %v7552_v49, 0.0  ;;  %v7554_v39 = vmul.f32 %v14689_v46, %v14689_v46 }
 0x50e   : > { %16453 = vst [vmem:[#allocation28_spill] sm:$0xff] %v14714_v50  ;;  %v14717_v57 = vadd.f32 %v7322_v30, %v14585_v24  ;;  %v7553_v24 = vmul.f32 %v14686_v63, %v14686_v63 }
 0x50f   : > { %v14719_v11 = vpop.f32.mrb[52].mxu1 }
 0x510   : > { %16454 = vst [vmem:[#allocation29_spill] sm:$0xff] %v14717_v57  ;;  %v14723_v17 = vpop.f32.mrb[53].mxu1  ;;  %v7589_v29 = vsel %vm16459_vm1, %v7553_v24, 0.0 }
 0x511   : > { %v7149_v1 = vpop.f32.mrb[12].mxu0  ;;  %v14725_v62 = vpop.f32.mrb[54].mxu1 }
 0x512   : > { %v7327_v2 = vadd.f32 %v7326_v0, %v7149_v1  ;;  %v7151_v51 = vpop.f32.mrb[13].mxu0  ;;  %v14734_v31 = vpop.f32.mrb[55].mxu1  ;;  %v7509_v1 = vadd.f32 %v7474_v4, %v7473_v60 }
 0x513   : > { %v7152_v30 = vpop.f32.mrb[14].mxu0  ;;  %v7587_v51 = vsel %vm16457_vm9, %v7551_v23, 0.0  ;;  %v7555_v23 = vmul.f32 %v14700_v21, %v14700_v21 }
 0x514   : > { %v14745_v55 = vadd.f32 %v7327_v2, %v14598_v28  ;;  %v7330_v7 = vadd.f32 %v7329_v26, %v7152_v30  ;;  %v7154_v0 = vpop.f32.mrb[15].mxu0  ;;  %v7623_v40 = vadd.f32 %v7588_v38, %v7587_v51  ;;  %v7510_v63 = vadd.f32 %v7509_v1, %v7475_v52  ;;  %v16463_v52 = vld [vmem:[#allocation66_spill] sm:$0xff] }
 0x515   : > { %v7476_v26 = vsel %vm11683_vm8, %v14689_v46, 0.0  ;;  %vm16464_vm14 = vnez %v16463_v52 }
 0x516   : > { %16460 = vst [vmem:[#allocation36_spill] sm:$0xff] %v14745_v55  ;;  %v14754_v49 = vadd.f32 %v7330_v7, %v14604_v18  ;;  %v7624_v32 = vadd.f32 %v7623_v40, %v7589_v29  ;;  %v7590_v18 = vsel %vm11683_vm8, %v7554_v39, 0.0  ;;  %v7477_v7 = vsel %vm16464_vm14, %v14700_v21, 0.0 }
 0x517   : > { %v14756_v14 = vpop.f32.mrb[56].mxu1  ;;  %v7511_v38 = vadd.f32 %v7510_v63, %v7476_v26  ;;  %v7591_v40 = vsel %vm16464_vm14, %v7555_v23, 0.0  ;;  %v7556_v29 = vmul.f32 %v14703_v61, %v14703_v61  ;;  %v7557_v63 = vmul.f32 %v14714_v50, %v14714_v50 }
 0x518   : > { %16461 = vst [vmem:[#allocation35_spill] sm:$0xff] %v14754_v49  ;;  %v14763_v4 = vpop.f32.mrb[57].mxu1  ;;  %v7625_v28 = vadd.f32 %v7624_v32, %v7590_v18 }
 0x519   : > { %v7157_v24 = vpop.f32.mrb[16].mxu0  ;;  %v14765_v2 = vpop.f32.mrb[58].mxu1  ;;  %v7512_v21 = vadd.f32 %v7511_v38, %v7477_v7  ;;  %v7558_v38 = vmul.f32 %v14717_v57, %v14717_v57 }
 0x51a   : > { %v7335_v41 = vadd.f32 %v14681_v8, %v7157_v24  ;;  %v7159_v60 = vpop.f32.mrb[17].mxu0  ;;  %v14773_v30 = vpop.f32.mrb[59].mxu1  ;;  %v16465_v8 = vld [vmem:[#allocation31_spill] sm:$0xff]  ;;  %v7626_v23 = vadd.f32 %v7625_v28, %v7591_v40 }
 0x51b   : > { %v7160_v0 = vpop.f32.mrb[18].mxu0  ;;  %vm16466_vm8 = vnez %v16465_v8  ;;  %v16469_v8 = vld [vmem:[#allocation33_spill] sm:$0xff] }
 0x51c   : > { %v14780_v1 = vadd.f32 %v7335_v41, %v14594_v34  ;;  %v7338_v51 = vadd.f32 %v14683_v54, %v7160_v0  ;;  %v7162_v39 = vpop.f32.mrb[19].mxu0  ;;  %v7478_v24 = vsel %vm16466_vm8, %v14703_v61, 0.0  ;;  %v7592_v34 = vsel %vm16466_vm8, %v7556_v29, 0.0  ;;  %v16467_v54 = vld [vmem:[#allocation21_spill] sm:$0xff] }
 0x51d   : > { %vm16468_vm0 = vnez %v16467_v54  ;;  %v7513_v7 = vadd.f32 %v7512_v21, %v7478_v24  ;;  %vm16470_vm5 = vnez %v16469_v8  ;;  %v7559_v24 = vmul.f32 %v14745_v55, %v14745_v55 }
 0x51e   : > { %v14789_v26 = vadd.f32 %v7338_v51, %v14601_v43  ;;  %v7479_v32 = vsel %vm16468_vm0, %v14714_v50, 0.0  ;;  %v7593_v43 = vsel %vm16468_vm0, %v7557_v63, 0.0  ;;  %v7627_v51 = vadd.f32 %v7626_v23, %v7592_v34  ;;  %v16471_v23 = vld [vmem:[#allocation32_spill] sm:$0xff] }
 0x51f   : > { %v14791_v52 = vpop.f32.mrb[60].mxu1  ;;  %v7514_v39 = vadd.f32 %v7513_v7, %v7479_v32  ;;  %v7480_v21 = vsel %vm16470_vm5, %v14717_v57, 0.0  ;;  %vm16472_vm13 = vnez %v16471_v23 }
 0x520   : > { %v14798_v18 = vpop.f32.mrb[61].mxu1  ;;  %v7481_v34 = vsel %vm16472_vm13, %v14745_v55, 0.0 }
 0x521   : > { %v7165_v41 = vpop.f32.mrb[20].mxu0  ;;  %v14800_v60 = vpop.f32.mrb[62].mxu1  ;;  %v7515_v7 = vadd.f32 %v7514_v39, %v7480_v21  ;;  %v7561_v39 = vmul.f32 %v14780_v1, %v14780_v1 }
 0x522   : > { %v7343_v0 = vadd.f32 %v14693_v20, %v7165_v41  ;;  %v7167_v40 = vpop.f32.mrb[21].mxu0  ;;  %v14807_v29 = vpop.f32.mrb[63].mxu1  ;;  %v7628_v20 = vadd.f32 %v7627_v51, %v7593_v43  ;;  %v7594_v41 = vsel %vm16470_vm5, %v7558_v38, 0.0 }
 0x523   : > { %v7168_v28 = vpop.f32.mrb[22].mxu0  ;;  %v7516_v38 = vadd.f32 %v7515_v7, %v7481_v34 }
 0x524   : > { %v14815_v63 = vadd.f32 %v7343_v0, %v14612_v53  ;;  %v7346_v54 = vadd.f32 %v14697_v27, %v7168_v28  ;;  %v7170_v50 = vpop.f32.mrb[23].mxu0  ;;  %v7595_v53 = vsel %vm16472_vm13, %v7559_v24, 0.0  ;;  %v7560_v27 = vmul.f32 %v14754_v49, %v14754_v49  ;;  %v16473_v28 = vld [vmem:[#allocation24_spill] sm:$0xff] }
 0x525   : > { %v7629_v43 = vadd.f32 %v7628_v20, %v7594_v41  ;;  %vm16474_vm4 = vnez %v16473_v28  ;;  %v16475_v41 = vld [vmem:[#allocation7_spill] sm:$0xff]  ;;  %v16477_v28 = vld [vmem:[#allocation10_spill] sm:$0xff] }
 0x526   : > { %v14824_v32 = vadd.f32 %v7346_v54, %v14618_v44  ;;  %v7482_v44 = vsel %vm16474_vm4, %v14754_v49, 0.0  ;;  %v7596_v20 = vsel %vm16474_vm4, %v7560_v27, 0.0  ;;  %vm16476_vm11 = vnez %v16475_v41 }
 0x527   : > { %v14826_v40 = vpop.f32.mrb[64].mxu1  ;;  %v7630_v54 = vadd.f32 %v7629_v43, %v7595_v53  ;;  %v7483_v34 = vsel %vm16476_vm11, %v14780_v1, 0.0  ;;  %v7517_v57 = vadd.f32 %v7516_v38, %v7482_v44  ;;  %v7562_v53 = vmul.f32 %v14789_v26, %v14789_v26 }
 0x528   : > { %v14832_v50 = vpop.f32.mrb[65].mxu1  ;;  %vm16478_vm7 = vnez %v16477_v28 }
 0x529   : > { %v7173_v0 = vpop.f32.mrb[24].mxu0  ;;  %v14834_v51 = vpop.f32.mrb[66].mxu1  ;;  %v7631_v27 = vadd.f32 %v7630_v54, %v7596_v20  ;;  %v7598_v44 = vsel %vm16478_vm7, %v7562_v53, 0.0 }
 0x52a   : > { %v7351_v8 = vadd.f32 %v14691_v37, %v7173_v0  ;;  %v7175_v21 = vpop.f32.mrb[25].mxu0  ;;  %v14842_v24 = vpop.f32.mrb[67].mxu1  ;;  %v7597_v37 = vsel %vm16476_vm11, %v7561_v39, 0.0  ;;  %v7518_v0 = vadd.f32 %v7517_v57, %v7483_v34  ;;  %v16479_v39 = vld [vmem:[#allocation44_spill] sm:$0xff] }
 0x52b   : > { %v7176_v23 = vpop.f32.mrb[26].mxu0  ;;  %vm16480_vm10 = vnez %v16479_v39 }
 0x52c   : > { %v14850_v7 = vadd.f32 %v7351_v8, %v14608_v35  ;;  %v7354_v49 = vadd.f32 %v14695_v19, %v7176_v23  ;;  %v7178_v55 = vpop.f32.mrb[27].mxu0  ;;  %v7484_v35 = vsel %vm16478_vm7, %v14789_v26, 0.0  ;;  %v7563_v19 = vmul.f32 %v14815_v63, %v14815_v63 }
 0x52d   : > { %v7632_v55 = vadd.f32 %v7631_v27, %v7597_v37  ;;  %v7485_v8 = vsel %vm16480_vm10, %v14815_v63, 0.0  ;;  %v7519_v57 = vadd.f32 %v7518_v0, %v7484_v35  ;;  %v7564_v23 = vmul.f32 %v14824_v32, %v14824_v32  ;;  %v16481_v27 = vld [vmem:[#allocation38_spill] sm:$0xff] }
 0x52e   : > { %v14858_v43 = vadd.f32 %v7354_v49, %v14615_v22  ;;  %v7599_v54 = vsel %vm16480_vm10, %v7563_v19, 0.0  ;;  %vm16482_vm2 = vnez %v16481_v27  ;;  %v7565_v0 = vmul.f32 %v14850_v7, %v14850_v7  ;;  %v16483_v19 = vld [vmem:[#allocation11_spill] sm:$0xff] }
 0x52f   : > { %v7633_v37 = vadd.f32 %v7632_v55, %v7598_v44  ;;  %v7520_v53 = vadd.f32 %v7519_v57, %v7485_v8  ;;  %vm16484_vm15 = vnez %v16483_v19 }
 0x530   : > { %v7601_v44 = vsel %vm16484_vm15, %v7565_v0, 0.0  ;;  %v7566_v39 = vmul.f32 %v14858_v43, %v14858_v43 }
 0x531   : > { %v7181_v38 = vpop.f32.mrb[28].mxu0  ;;  %v7634_v35 = vadd.f32 %v7633_v37, %v7599_v54  ;;  %v7488_v54 = vsel %vm12039_vm3, %v14858_v43, 0.0 }
 0x532   : > { %v7359_v22 = vadd.f32 %v14707_v16, %v7181_v38  ;;  %v7183_v49 = vpop.f32.mrb[29].mxu0  ;;  %v7486_v16 = vsel %vm16482_vm2, %v14824_v32, 0.0 }
 0x533   : > { %v7184_v21 = vpop.f32.mrb[30].mxu0  ;;  %v7521_v55 = vadd.f32 %v7520_v53, %v7486_v16 }
 0x534   : > { %v14876_v20 = vadd.f32 %v7359_v22, %v14626_v48  ;;  %v7362_v41 = vadd.f32 %v14711_v15, %v7184_v21  ;;  %v7186_v34 = vpop.f32.mrb[31].mxu0  ;;  %v7600_v48 = vsel %vm16482_vm2, %v7564_v23, 0.0  ;;  %v7487_v15 = vsel %vm16484_vm15, %v14850_v7, 0.0 }
 0x535   : > { %v7635_v22 = vadd.f32 %v7634_v35, %v7600_v48  ;;  %v7522_v49 = vadd.f32 %v7521_v55, %v7487_v15  ;;  %vm7853_vm2 = vcmask 1044480  }
 0x536   : > { %v14885_v28 = vadd.f32 %v7362_v41, %v14632_v5  ;;  %v7567_v23 = vmul.f32 %v14876_v20, %v14876_v20  ;;  %v7489_v16 = vsel %vm12082_vm6, %v14876_v20, 0.0 }
 0x537   : > { %v7636_v53 = vadd.f32 %v7635_v22, %v7601_v44  ;;  %v7523_v35 = vadd.f32 %v7522_v49, %v7488_v54  ;;  %v16488_v49 = vld [vmem:[#allocation14_spill] sm:$0xff] }
 0x538   : > { %v7603_v48 = vsel %vm12082_vm6, %v7567_v23, 0.0  ;;  %vm16489_vm6 = vnez %v16488_v49 }
 0x539   : > { %v7189_v38 = vpop.f32.mrb[32].mxu0  ;;  %v7524_v19 = vadd.f32 %v7523_v35, %v7489_v16  ;;  %v16490_v16 = vld [vmem:[#allocation15_spill] sm:$0xff] }
 0x53a   : > { %v7367_v8 = vadd.f32 %v14705_v33, %v7189_v38  ;;  %v7191_v5 = vpop.f32.mrb[33].mxu0  ;;  %v7602_v33 = vsel %vm12039_vm3, %v7566_v39, 0.0  ;;  %v7490_v38 = vsel %vm12132_vm12, %v14885_v28, 0.0  ;;  %vm16491_vm3 = vnez %v16490_v16 }
 0x53b   : > { %v7192_v57 = vpop.f32.mrb[34].mxu0 }
 0x53c   : > { %v14903_v41 = vadd.f32 %v7367_v8, %v14622_v56  ;;  %v7370_v34 = vadd.f32 %v14709_v36, %v7192_v57  ;;  %v7194_v37 = vpop.f32.mrb[35].mxu0  ;;  %v7568_v56 = vmul.f32 %v14885_v28, %v14885_v28  ;;  %v7637_v36 = vadd.f32 %v7636_v53, %v7602_v33 }
 0x53e   : > { %v14912_v0 = vadd.f32 %v7370_v34, %v14629_v59  ;;  %v7569_v44 = vmul.f32 %v14903_v41, %v14903_v41  ;;  %v7638_v8 = vadd.f32 %v7637_v36, %v7603_v48  ;;  %v7604_v22 = vsel %vm12132_vm12, %v7568_v56, 0.0  ;;  %v16492_v36 = vld [vmem:[#allocation18_spill] sm:$0xff] }
 0x53f   : > { %v7491_v57 = vsel %vm16489_vm6, %v14903_v41, 0.0  ;;  %v7525_v34 = vadd.f32 %v7524_v19, %v7490_v38  ;;  %vm16493_vm12 = vnez %v16492_v36 }
 0x540   : > { %v7570_v37 = vmul.f32 %v14912_v0, %v14912_v0  ;;  %v7639_v33 = vadd.f32 %v7638_v8, %v7604_v22 }
 0x541   : > { %v7197_v15 = vpop.f32.mrb[36].mxu0  ;;  %v7526_v27 = vadd.f32 %v7525_v34, %v7491_v57  ;;  %v16494_v57 = vld [vmem:[#allocation17_spill] sm:$0xff] }
 0x542   : > { %v7375_v59 = vadd.f32 %v14723_v17, %v7197_v15  ;;  %v7199_v39 = vpop.f32.mrb[37].mxu0  ;;  %v7605_v17 = vsel %vm16489_vm6, %v7569_v44, 0.0  ;;  %v7606_v56 = vsel %vm16491_vm3, %v7570_v37, 0.0  ;;  %vm16495_vm9 = vnez %v16494_v57 }
 0x543   : > { %v7200_v5 = vpop.f32.mrb[38].mxu0  ;;  %v7640_v35 = vadd.f32 %v7639_v33, %v7605_v17  ;;  %v16496_v17 = vld [vmem:[#allocation40_spill] sm:$0xff] }
 0x544   : > { %v14930_v21 = vadd.f32 %v7375_v59, %v14639_v10  ;;  %v7378_v54 = vadd.f32 %v14734_v31, %v7200_v5  ;;  %v7202_v23 = vpop.f32.mrb[39].mxu0  ;;  %v7492_v10 = vsel %vm16491_vm3, %v14912_v0, 0.0  ;;  %vm16497_vm1 = vnez %v16496_v17 }
 0x545   : > { %v7527_v55 = vadd.f32 %v7526_v27, %v7492_v10  ;;  %v7641_v22 = vadd.f32 %v7640_v35, %v7606_v56  ;;  %v16498_v56 = vld [vmem:[#allocation19_spill] sm:$0xff] }
 0x546   : > { %v14938_v53 = vadd.f32 %v7378_v54, %v14644_v42  ;;  %v7571_v31 = vmul.f32 %v14930_v21, %v14930_v21  ;;  %v7493_v19 = vsel %vm16493_vm12, %v14930_v21, 0.0  ;;  %vm16499_vm14 = vnez %v16498_v56  ;;  %v16506_v56 = vld [vmem:[#allocation59_spill] sm:$0xff] }
 0x547   : > { %v7528_v49 = vadd.f32 %v7527_v55, %v7493_v19  ;;  %vm16507_vm13 = vnez %v16506_v56 }
 0x548   : > { %v7607_v44 = vsel %vm16493_vm12, %v7571_v31, 0.0  ;;  %v7572_v59 = vmul.f32 %v14938_v53, %v14938_v53 }
 0x549   : > { %v7205_v48 = vpop.f32.mrb[40].mxu0  ;;  %v7642_v34 = vadd.f32 %v7641_v22, %v7607_v44 }
 0x54a   : > { %v7383_v42 = vadd.f32 %v14719_v11, %v7205_v48  ;;  %v7207_v15 = vpop.f32.mrb[41].mxu0  ;;  %v7494_v11 = vsel %vm16495_vm9, %v14938_v53, 0.0 }
 0x54b   : > { %v7208_v38 = vpop.f32.mrb[42].mxu0  ;;  %v7529_v37 = vadd.f32 %v7528_v49, %v7494_v11  ;;  %v16502_v11 = vld [vmem:[#allocation55_spill] sm:$0xff] }
 0x54c   : > { %v14956_v39 = vadd.f32 %v7383_v42, %v14635_v47  ;;  %v7386_v8 = vadd.f32 %v14725_v62, %v7208_v38  ;;  %v7210_v5 = vpop.f32.mrb[43].mxu0  ;;  %v7608_v47 = vsel %vm16495_vm9, %v7572_v59, 0.0  ;;  %vm16503_vm0 = vnez %v16502_v11 }
 0x54d   : > { %v7643_v31 = vadd.f32 %v7642_v34, %v7608_v47 }
 0x54e   : > { %v7573_v54 = vmul.f32 %v14956_v39, %v14956_v39  ;;  %v14965_v23 = vadd.f32 %v7386_v8, %v14641_v9  ;;  %v7495_v62 = vsel %vm16497_vm1, %v14956_v39, 0.0 }
 0x54f   : > { %v7530_v35 = vadd.f32 %v7529_v37, %v7495_v62 }
 0x550   : > { %v7609_v27 = vsel %vm16497_vm1, %v7573_v54, 0.0  ;;  %v7574_v16 = vmul.f32 %v14965_v23, %v14965_v23  ;;  %v7496_v36 = vsel %vm16499_vm14, %v14965_v23, 0.0 }
 0x551   : > { %v7213_v33 = vpop.f32.mrb[44].mxu0  ;;  %v7644_v55 = vadd.f32 %v7643_v31, %v7609_v27  ;;  %v7531_v5 = vadd.f32 %v7530_v35, %v7496_v36 }
 0x552   : > { %v7391_v10 = vadd.f32 %v14763_v4, %v7213_v33  ;;  %v7215_v9 = vpop.f32.mrb[45].mxu0  ;;  %v7610_v38 = vsel %vm16499_vm14, %v7574_v16, 0.0  ;;  %v16500_v4 = vld [vmem:[#allocation54_spill] sm:$0xff] }
 0x553   : > { %v7216_v48 = vpop.f32.mrb[46].mxu0  ;;  %vm16501_vm8 = vnez %v16500_v4  ;;  %v7645_v22 = vadd.f32 %v7644_v55, %v7610_v38 }
 0x554   : > { %v14981_v19 = vadd.f32 %v7391_v10, %v14651_v12  ;;  %v7394_v42 = vadd.f32 %v14773_v30, %v7216_v48  ;;  %v7218_v15 = vpop.f32.mrb[47].mxu0  ;;  %v16504_v10 = vld [vmem:[#allocation62_spill] sm:$0xff] }
 0x555   : > { %vm16505_vm5 = vnez %v16504_v10 }
 0x556   : > { %v7497_v44 = vsel %vm16501_vm8, %v14981_v19, 0.0  ;;  %v7575_v59 = vmul.f32 %v14981_v19, %v14981_v19  ;;  %v14992_v8 = vadd.f32 %v7394_v42, %v14655_v45 }
 0x557   : > { %v7532_v49 = vadd.f32 %v7531_v5, %v7497_v44 }
 0x558   : > { %v7611_v12 = vsel %vm16501_vm8, %v7575_v59, 0.0  ;;  %v7576_v30 = vmul.f32 %v14992_v8, %v14992_v8  ;;  %v7498_v54 = vsel %vm16503_vm0, %v14992_v8, 0.0 }
 0x559   : > { %v7221_v57 = vpop.f32.mrb[48].mxu0  ;;  %v7646_v17 = vadd.f32 %v7645_v22, %v7611_v12  ;;  %v7533_v16 = vadd.f32 %v7532_v49, %v7498_v54  ;;  %v16508_v22 = vld [vmem:[#allocation58_spill] sm:$0xff]  ;;  %v16510_v54 = vld [vmem:[#allocation47_spill] sm:$0xff] }
 0x55a   : > { %v7399_v34 = vadd.f32 %v14756_v14, %v7221_v57  ;;  %v7223_v47 = vpop.f32.mrb[49].mxu0  ;;  %v7612_v62 = vsel %vm16503_vm0, %v7576_v30, 0.0  ;;  %vm16509_vm4 = vnez %v16508_v22  ;;  %vm16511_vm11 = vnez %v16510_v54 }
 0x55b   : > { %v7224_v45 = vpop.f32.mrb[50].mxu0  ;;  %v7647_v35 = vadd.f32 %v7646_v17, %v7612_v62 }
 0x55c   : > { %v15005_v37 = vadd.f32 %v7399_v34, %v14647_v25  ;;  %v7402_v33 = vadd.f32 %v14765_v2, %v7224_v45  ;;  %v7226_v27 = vpop.f32.mrb[51].mxu0 }
 0x55e   : > { %v7499_v9 = vsel %vm16505_vm5, %v15005_v37, 0.0  ;;  %v7577_v14 = vmul.f32 %v15005_v37, %v15005_v37  ;;  %v15014_v31 = vadd.f32 %v7402_v33, %v14653_v3 }
 0x55f   : > { %v7534_v48 = vadd.f32 %v7533_v16, %v7499_v9 }
 0x560   : > { %v7613_v25 = vsel %vm16505_vm5, %v7577_v14, 0.0  ;;  %v7500_v2 = vsel %vm16507_vm13, %v15014_v31, 0.0  ;;  %v7578_v36 = vmul.f32 %v15014_v31, %v15014_v31 }
 0x561   : > { %v7648_v42 = vadd.f32 %v7647_v35, %v7613_v25  ;;  %v7535_v15 = vadd.f32 %v7534_v48, %v7500_v2  ;;  %v7229_v55 = vpop.f32.mrb[52].mxu0  ;;  %v7742_v35 = vld [vmem:[%s9784_s28 + $0x8] sm:$0xe]  ;;  %v7743_v48 = vld [vmem:[%s9784_s28 + $0xc] sm:$0xf]  ;;  %v16512_v25 = vld [vmem:[#allocation65_spill] sm:$0xff] }
 0x562   : > { %v7614_v38 = vsel %vm16507_vm13, %v7578_v36, 0.0  ;;  %v7407_v3 = vadd.f32 %v14798_v18, %v7229_v55  ;;  %v7231_v4 = vpop.f32.mrb[53].mxu0  ;;  %vm16513_vm7 = vnez %v16512_v25  ;;  %v16514_v36 = vld [vmem:[#allocation20_spill] sm:$0xff] }
 0x563   : > { %v7649_v44 = vadd.f32 %v7648_v42, %v7614_v38  ;;  %v7232_v59 = vpop.f32.mrb[54].mxu0  ;;  %v8753_v42 = vld [vmem:[%s9784_s28 + $0x10] sm:$0xff]   ;;  %v8754_v55 = vld [vmem:[%s9784_s28 + $0x18] sm:$0xff]   ;;  %v7779_v4 = vunpack.c.l.bf16 %v7742_v35 }
 0x564   : > { %v15027_v5 = vadd.f32 %v7407_v3, %v14661_v6  ;;  %v7410_v12 = vadd.f32 %v14807_v29, %v7232_v59  ;;  %v7234_v30 = vpop.f32.mrb[55].mxu0  ;;  %v8687_v22 = vunpack.c.l.bf16 %v8753_v42  ;;  %v8691_v54 = vunpack.c.l.bf16 %v8754_v55 }
 0x566   : > { %v7501_v49 = vsel %vm16509_vm4, %v15027_v5, 0.0  ;;  %v7579_v57 = vmul.f32 %v15027_v5, %v15027_v5  ;;  %v15036_v11 = vadd.f32 %v7410_v12, %v14665_v58 }
 0x567   : > { %v7536_v18 = vadd.f32 %v7535_v15, %v7501_v49 }
 0x568   : > { %v7615_v6 = vsel %vm16509_vm4, %v7579_v57, 0.0  ;;  %v7502_v29 = vsel %vm16511_vm11, %v15036_v11, 0.0  ;;  %v7580_v34 = vmul.f32 %v15036_v11, %v15036_v11 }
 0x569   : > { %v7650_v47 = vadd.f32 %v7649_v44, %v7615_v6  ;;  %v7537_v17 = vadd.f32 %v7536_v18, %v7502_v29  ;;  %v7237_v45 = vpop.f32.mrb[56].mxu0  ;;  %v7780_v44 = vunpack.c.l.bf16 %v7743_v48  ;;  %v8688_v6 = vunpack.c.h.bf16 %v8753_v42  ;;  %v16520_v48 = vld [vmem:[#allocation37_spill] sm:$0xff] }
 0x56a   : > { %v7616_v58 = vsel %vm16511_vm11, %v7580_v34, 0.0  ;;  %v7415_v62 = vadd.f32 %v14791_v52, %v7237_v45  ;;  %v7239_v33 = vpop.f32.mrb[57].mxu0 }
 0x56b   : > { %v7651_v27 = vadd.f32 %v7650_v47, %v7616_v58  ;;  %v7240_v16 = vpop.f32.mrb[58].mxu0  ;;  %v16517_v47 = vld [vmem:[#allocation45_spill] sm:$0xff]  ;;  %v7855_v33 = vrot.slane %v7780_v44, 3 }
 0x56c   : > { %v15049_v10 = vadd.f32 %v7415_v62, %v14658_v13  ;;  %v7418_v9 = vadd.f32 %v14800_v60, %v7240_v16  ;;  %v7242_v14 = vpop.f32.mrb[59].mxu0  ;;  %v16515_v60 = vld [vmem:[#allocation23_spill] sm:$0xff]  ;;  %v7854_v62 = vrot.slane %v7779_v4, 3  ;;  %v7857_v16 = vrot.slane %v8687_v22, 3 }
 0x56d   : > { %vm16516_vm10 = vnez %v16515_v60  ;;  %v16521_v60 = vld [vmem:[#allocation64_spill] sm:$0xff] }
 0x56e   : > { %v7503_v56 = vsel %vm16513_vm7, %v15049_v10, 0.0  ;;  %v7581_v2 = vmul.f32 %v15049_v10, %v15049_v10  ;;  %v15060_v52 = vadd.f32 %v7418_v9, %v16514_v36  ;;  %v8756_v9 = vld [vmem:[%s9784_s28 + $0x28] sm:$0xff]   ;;  %vm16522_vm6 = vnez %v16521_v60 }
 0x56f   : > { %v7538_v15 = vadd.f32 %v7537_v17, %v7503_v56  ;;  %v7859_v56 = vrot.slane %v8688_v6, 3  ;;  %v8699_v44 = vunpack.c.l.bf16 %v8756_v9  ;;  %v15103_v6 = vsel %vm7853_vm2, %v7855_v33, %v7857_v16  ;;  %v16526_v60 = vld [vmem:[#allocation34_spill] sm:$0xff] }
 0x570   : > { %v7617_v13 = vsel %vm16513_vm7, %v7581_v2, 0.0  ;;  %v7504_v38 = vsel %vm16516_vm10, %v15060_v52, 0.0  ;;  %v7582_v3 = vmul.f32 %v15060_v52, %v15060_v52  ;;  %v8692_v2 = vunpack.c.h.bf16 %v8754_v55 }
 0x571   : > { %v7652_v59 = vadd.f32 %v7651_v27, %v7617_v13  ;;  %v7539_v12 = vadd.f32 %v7538_v15, %v7504_v38  ;;  %v7245_v30 = vpop.f32.mrb[60].mxu0  ;;  %v8755_v27 = vld [vmem:[%s9784_s28 + $0x20] sm:$0xff]   ;;  %v8757_v15 = vld [vmem:[%s9784_s28 + $0x30] sm:$0xff]   ;;  %v8700_v55 = vunpack.c.h.bf16 %v8756_v9 }
 0x572   : > { %v7618_v49 = vsel %vm16516_vm10, %v7582_v3, 0.0  ;;  %v7423_v57 = vadd.f32 %v14832_v50, %v7245_v30  ;;  %v7247_v18 = vpop.f32.mrb[61].mxu0  ;;  %v16518_v50 = vld [vmem:[#allocation26_spill] sm:$0xff]  ;;  %v8695_v42 = vunpack.c.l.bf16 %v8755_v27  ;;  %v8696_v4 = vunpack.c.h.bf16 %v8755_v27  ;;  %v16523_v27 = vld [vmem:[#allocation8_spill] sm:$0xff] }
 0x573   : > { %v7653_v29 = vadd.f32 %v7652_v59, %v7618_v49  ;;  %v7248_v34 = vpop.f32.mrb[62].mxu0  ;;  %vm16519_vm15 = vnez %v16518_v50  ;;  %v15100_v18 = vsel %vm7853_vm2, %v7854_v62, %v7855_v33  ;;  %v7863_v50 = vrot.slane %v8692_v2, 3 }
 0x574   : > { %v15075_v17 = vadd.f32 %v7423_v57, %v16517_v47  ;;  %v7426_v45 = vadd.f32 %v14842_v24, %v7248_v34  ;;  %v7250_v58 = vpop.f32.mrb[63].mxu0  ;;  %v7861_v24 = vrot.slane %v8691_v54, 3  ;;  %v8703_v54 = vunpack.c.l.bf16 %v8757_v15 }
 0x575   : > { %v8758_v58 = vld [vmem:[%s9784_s28 + $0x38] sm:$0xff]   ;;  %v7867_v33 = vrot.slane %v8696_v4, 3 }
 0x576   : > { %v7505_v14 = vsel %vm16519_vm15, %v15075_v17, 0.0  ;;  %v7583_v35 = vmul.f32 %v15075_v17, %v15075_v17  ;;  %v15086_v25 = vadd.f32 %v7426_v45, %v16520_v48  ;;  %v15109_v45 = vsel %vm7853_vm2, %v7859_v56, %v7861_v24 }
 0x577   : > { %v7540_v36 = vadd.f32 %v7539_v12, %v7505_v14  ;;  %v7865_v14 = vrot.slane %v8695_v42, 3  ;;  %v7871_v48 = vrot.slane %v8700_v55, 3  ;;  %v8708_v42 = vunpack.c.h.bf16 %v8758_v58 }
 0x578   : > { %v7619_v13 = vsel %vm16519_vm15, %v7583_v35, 0.0  ;;  %v7506_v38 = vsel %vm16522_vm6, %v15086_v25, 0.0  ;;  %v7584_v3 = vmul.f32 %v15086_v25, %v15086_v25  ;;  %v7869_v35 = vrot.slane %v8699_v44, 3  ;;  %v16527_v44 = vld [vmem:[#allocation51_spill] sm:$0xff] }
 0x579   : > { %v7654_v59 = vadd.f32 %v7653_v29, %v7619_v13  ;;  %v7541_v30 = vadd.f32 %v7540_v36, %v7506_v38  ;;  %v7253_v22 = vpop.f32.mrb[64].mxu0  ;;  %v15106_v29 = vsel %vm7853_vm2, %v7857_v16, %v7859_v56  ;;  %v8759_v36 = vld [vmem:[%s9784_s28 + $0x40] sm:$0xff]   ;;  %vm16528_vm12 = vnez %v16527_v44 }
 0x57a   : > { %v7620_v12 = vsel %vm16522_vm6, %v7584_v3, 0.0  ;;  %v7431_v49 = vadd.f32 %v14826_v40, %v7253_v22  ;;  %v7255_v57 = vpop.f32.mrb[65].mxu0  ;;  %v16524_v13 = vld [vmem:[#allocation61_spill] sm:$0xff]  ;;  %v7873_v3 = vrot.slane %v8703_v54, 3  ;;  %v15139_v54 = vsel %vm7853_vm2, %v7865_v14, %v7867_v33 }
 0x57b   : > { %v7655_v34 = vadd.f32 %v7654_v59, %v7620_v12  ;;  %v7256_v47 = vpop.f32.mrb[66].mxu0  ;;  %vm16525_vm3 = vnez %v16524_v13  ;;  %v8707_v59 = vunpack.c.l.bf16 %v8758_v58  ;;  %v15133_v12 = vsel %vm7853_vm2, %v7861_v24, %v7863_v50  ;;  %16530 = vst [vmem:[#allocation43_spill] sm:$0xff] %v15139_v54  ;;  %v8760_v58 = vld [vmem:[%s9784_s28 + $0x48] sm:$0xff]  }
 0x57c   : > { %v15113_v40 = vadd.f32 %v7431_v49, %v16523_v27  ;;  %v7434_v62 = vadd.f32 %v14834_v51, %v7256_v47  ;;  %v7258_v9 = vpop.f32.mrb[67].mxu0  ;;  %v8704_v51 = vunpack.c.h.bf16 %v8757_v15  ;;  %v8711_v49 = vunpack.c.l.bf16 %v8759_v36 }
 0x57d   : > { %v8712_v47 = vunpack.c.h.bf16 %v8759_v36  ;;  %v15148_v24 = vsel %vm7853_vm2, %v7869_v35, %v7871_v48  ;;  %v8762_v36 = vld [vmem:[%s9784_s28 + $0x58] sm:$0xff]  }
 0x57e   : > { %v7507_v16 = vsel %vm16525_vm3, %v15113_v40, 0.0  ;;  %v7585_v56 = vmul.f32 %v15113_v40, %v15113_v40  ;;  %v15123_v38 = vadd.f32 %v7434_v62, %v16526_v60  ;;  %v15145_v62 = vsel %vm7853_vm2, %v7867_v33, %v7869_v35  ;;  %16532 = vst [vmem:[#allocation50_spill] sm:$0xff] %v15148_v24 }
 0x57f   : > { %v7542_v2 = vadd.f32 %v7541_v30, %v7507_v16  ;;  %v15136_v30 = vsel %vm7853_vm2, %v7863_v50, %v7865_v14  ;;  %16531 = vst [vmem:[#allocation39_spill] sm:$0xff] %v15145_v62  ;;  %v15152_v50 = vsel %vm7853_vm2, %v7871_v48, %v7873_v3  ;;  %v7875_v14 = vrot.slane %v8704_v51, 3 }
 0x580   : > { %v7621_v4 = vsel %vm16525_vm3, %v7585_v56, 0.0  ;;  %v7508_v22 = vsel %vm16528_vm12, %v15123_v38, 0.0  ;;  %v7586_v55 = vmul.f32 %v15123_v38, %v15123_v38  ;;  %16529 = vst [vmem:[#allocation41_spill] sm:$0xff] %v15136_v30  ;;  %16533 = vst [vmem:[#allocation53_spill] sm:$0xff] %v15152_v50  ;;  %v7877_v16 = vrot.slane %v8707_v59, 3 }
 0x581   : > { %v7656_v57 = vadd.f32 %v7655_v34, %v7621_v4  ;;  %v7543_v15 = vadd.f32 %v7542_v2, %v7508_v22  ;;  %v8761_v34 = vld [vmem:[%s9784_s28 + $0x50] sm:$0xff]   ;;  %v7879_v56 = vrot.slane %v8708_v42, 3  ;;  %v7881_v60 = vrot.slane %v8711_v49, 3  ;;  %v8763_v4 = vld [vmem:[%s9784_s28 + $0x60] sm:$0xff]  }
 0x582   : > { %v7622_v27 = vsel %vm16528_vm12, %v7586_v55, 0.0  ;;  %v8715_v2 = vunpack.c.l.bf16 %v8760_v58  ;;  %v7883_v22 = vrot.slane %v8712_v47, 3  ;;  %v8716_v55 = vunpack.c.h.bf16 %v8760_v58  ;;  %v8764_v58 = vld [vmem:[%s9784_s28 + $0x68] sm:$0xff]  }
 0x583   : > { %v7544_v9 = vrot.slane %v7543_v15, 4  ;;  %v7657_v13 = vadd.f32 %v7656_v57, %v7622_v27  ;;  %v8719_v35 = vunpack.c.l.bf16 %v8761_v34  ;;  %v8720_v24 = vunpack.c.h.bf16 %v8761_v34 }
 0x584   : > { %v8723_v62 = vunpack.c.l.bf16 %v8762_v36  ;;  %v8724_v54 = vunpack.c.h.bf16 %v8762_v36  ;;  %v15157_v51 = vsel %vm7853_vm2, %v7873_v3, %v7875_v14  ;;  %v15160_v59 = vsel %vm7853_vm2, %v7875_v14, %v7877_v16 }
 0x585   : > { %v7545_v44 = vadd.f32 %v7544_v9, %v7543_v15  ;;  %v7658_v33 = vrot.slane %v7657_v13, 4  ;;  %16534 = vst [vmem:[#allocation49_spill] sm:$0xff] %v15157_v51  ;;  %16535 = vst [vmem:[#allocation52_spill] sm:$0xff] %v15160_v59  ;;  %v15163_v42 = vsel %vm7853_vm2, %v7877_v16, %v7879_v56  ;;  %v8727_v49 = vunpack.c.l.bf16 %v8763_v4 }
 0x586   : > { %16536 = vst [vmem:[#allocation6_spill] sm:$0xff] %v15163_v42  ;;  %v15166_v15 = vsel %vm7853_vm2, %v7879_v56, %v7881_v60  ;;  %v7885_v47 = vrot.slane %v8715_v2, 3  ;;  %v15170_v9 = vsel %vm7853_vm2, %v7881_v60, %v7883_v22  ;;  %v7889_v3 = vrot.slane %v8719_v35, 3 }
 0x587   : > { %v7546_v57 = vrot.slane %v7545_v44, 2  ;;  %v7659_v48 = vadd.f32 %v7658_v33, %v7657_v13  ;;  %16537 = vst [vmem:[#allocation9_spill] sm:$0xff] %v15166_v15  ;;  %16538 = vst [vmem:[#allocation16_spill] sm:$0xff] %v15170_v9  ;;  %v7887_v13 = vrot.slane %v8716_v55, 3  ;;  %v7891_v36 = vrot.slane %v8720_v24, 3  ;;  %v8765_v33 = vld [vmem:[%s9784_s28 + $0x70] sm:$0xff]  }
 0x588   : > { %v7893_v14 = vrot.slane %v8723_v62, 3  ;;  %v7895_v59 = vrot.slane %v8724_v54, 3  ;;  %v7897_v42 = vrot.slane %v8727_v49, 3  ;;  %v8728_v56 = vunpack.c.h.bf16 %v8763_v4 }
 0x589   : > { %v7547_v27 = vadd.f32 %v7546_v57, %v7545_v44  ;;  %v7660_v34 = vrot.slane %v7659_v48, 2  ;;  %v8731_v15 = vunpack.c.l.bf16 %v8764_v58  ;;  %v8732_v2 = vunpack.c.h.bf16 %v8764_v58 }
 0x58a   : > { %v15174_v44 = vsel %vm7853_vm2, %v7883_v22, %v7885_v47  ;;  %v8735_v57 = vunpack.c.l.bf16 %v8765_v33  ;;  %v15177_v24 = vsel %vm7853_vm2, %v7885_v47, %v7887_v13  ;;  %v15180_v54 = vsel %vm7853_vm2, %v7887_v13, %v7889_v3 }
 0x58b   : > { %v7548_v51 = vrot.slane %v7547_v27, 1  ;;  %v7661_v16 = vadd.f32 %v7660_v34, %v7659_v48  ;;  %16539 = vst [vmem:[#allocation48_spill] sm:$0xff] %v15174_v44  ;;  %16540 = vst [vmem:[#allocation42_spill] sm:$0xff] %v15177_v24  ;;  %v15183_v62 = vsel %vm7853_vm2, %v7889_v3, %v7891_v36  ;;  %v8736_v4 = vunpack.c.h.bf16 %v8765_v33  ;;  %v8766_v48 = vld [vmem:[%s9784_s28 + $0x78] sm:$0xff]   ;;  %v8768_v3 = vld [vmem:[%s9784_s28 + $0x88] sm:$0xff]  }
 0x58c   : > { %16541 = vst [vmem:[#allocation57_spill] sm:$0xff] %v15180_v54  ;;  %16542 = vst [vmem:[#allocation56_spill] sm:$0xff] %v15183_v62  ;;  %v15186_v35 = vsel %vm7853_vm2, %v7891_v36, %v7893_v14  ;;  %v15189_v22 = vsel %vm7853_vm2, %v7893_v14, %v7895_v59  ;;  %v15196_v58 = vsel %vm7853_vm2, %v7895_v59, %v7897_v42  ;;  %v7901_v34 = vrot.slane %v8731_v15, 3  ;;  %v8769_v62 = vld [vmem:[%s9784_s28 + $0x90] sm:$0xff]  }
 0x58d   : > { %v7549_v60 = vadd.f32 %v7548_v51, %v7547_v27  ;;  %v7662_v55 = vrot.slane %v7661_v16, 1  ;;  %16543 = vst [vmem:[#allocation60_spill] sm:$0xff] %v15186_v35  ;;  %16544 = vst [vmem:[#allocation63_spill] sm:$0xff] %v15189_v22  ;;  %v8767_v51 = vld [vmem:[%s9784_s28 + $0x80] sm:$0xff]   ;;  %v7899_v27 = vrot.slane %v8728_v56, 3  ;;  %v7903_v13 = vrot.slane %v8732_v2, 3 }
 0x58e   : > { %16545 = vst [vmem:[#allocation66_spill] sm:$0xff] %v15196_v58  ;;  %v7905_v33 = vrot.slane %v8735_v57, 3  ;;  %v7778_v22 = vld [vmem:[%s9784_s28 + $0x98] sm:$0x3]  ;;  %v8739_v54 = vunpack.c.l.bf16 %v8766_v48  ;;  %v8744_v59 = vunpack.c.h.bf16 %v8767_v51  ;;  %v8747_v58 = vunpack.c.l.bf16 %v8768_v3  ;;  %s161_s28 = sand.u32 1, %s9666_s13  }
 0x58f   : > { %v15193_v49 = vmul.f32 0.00390625, %v7549_v60  ;;  %v7663_v47 = vadd.f32 %v7662_v55, %v7661_v16  ;;  %v7907_v60 = vrot.slane %v8736_v4, 3  ;;  %v8740_v16 = vunpack.c.h.bf16 %v8766_v48  ;;  %s8159_s29 = sshll.u32 %s161_s28, 8  ;;  %s15513_s16 = scalar_lea.sflag [#allocation4], %s161_s28 }
 0x590   : > { %v8743_v55 = vunpack.c.l.bf16 %v8767_v51  ;;  %v8748_v56 = vunpack.c.h.bf16 %v8768_v3  ;;  %v15206_v2 = vsel %vm7853_vm2, %v7897_v42, %v7899_v27  ;;  %v8751_v57 = vunpack.c.l.bf16 %v8769_v62  ;;  %s15321_s30 = scalar_lea.vmem [#allocation3], %s8159_s29 }
 0x591   : > { %v7664_v36 = vmul.f32 0.00390625, %v7663_v47  ;;  %v7665_v35 = vmul.f32 %v15193_v49, %v15193_v49  ;;  %16546 = vst [vmem:[#allocation31_spill] sm:$0xff] %v15206_v2  ;;  %v8752_v47 = vunpack.c.h.bf16 %v8769_v62  ;;  %v7815_v24 = vunpack.c.l.bf16 %v7778_v22  ;;  %s8093_s5 = sshll.u32 %s15321_s30, 4  ;;  %s15490_s5 = int_to_ptr.vmem [resolvable:$true] %s8093_s5 }
 0x592   : > { %v15209_v44 = vsel %vm7853_vm2, %v7899_v27, %v7901_v34  ;;  %v15212_v14 = vsel %vm7853_vm2, %v7901_v34, %v7903_v13  ;;  %v15215_v4 = vsel %vm7853_vm2, %v7903_v13, %v7905_v33  ;;  %v15218_v51 = vsel %vm7853_vm2, %v7905_v33, %v7907_v60  ;;  %s9612_s9 = scalar_lea.vmem %s15490_s5, 4096  ;;  %p9619_p0 = scmp.lt.s32.totalorder %s15490_s5, %s9617_s11 }
 0x593   : > { %v7666_v15 = vsub.f32 %v7664_v36, %v7665_v35  ;;  %16547 = vst [vmem:[#allocation21_spill] sm:$0xff] %v15209_v44  ;;  %16548 = vst [vmem:[#allocation33_spill] sm:$0xff] %v15212_v14  ;;  %v7909_v35 = vrot.slane %v8739_v54, 3  ;;  %v7911_v3 = vrot.slane %v8740_v16, 3  ;;  %v7913_v42 = vrot.slane %v8743_v55, 3  ;;  %p9613_p11 = scmp.ne.s32.totalorder %s15490_s5, %s9612_s9  ;;  %p9620_p1 = scmp.lt.s32.totalorder %s9618_s17, %s9612_s9 }
 0x594   : > { %16549 = vst [vmem:[#allocation32_spill] sm:$0xff] %v15215_v4  ;;  %16550 = vst [vmem:[#allocation24_spill] sm:$0xff] %v15218_v51  ;;  %v7915_v36 = vrot.slane %v8744_v59, 3  ;;  %v7917_v2 = vrot.slane %v8747_v58, 3  ;;  %v7919_v62 = vrot.slane %v8748_v56, 3  ;;  %v7921_v9 = vrot.slane %v8751_v57, 3 }
 0x595   : > { %v7667_v48 = vmax.f32 %v7666_v15, 0.0  ;;  %v7923_v27 = vrot.slane %v8752_v47, 3  ;;  %v7925_v44 = vrot.slane %v7815_v24, 3  ;;  %v15237_v59 = vsel %vm7853_vm2, %v7907_v60, %v7909_v35  ;;  %p9614_p12 = pnand %p9613_p11, %p9738_p5  ;;  %p9621_p2 = por %p9620_p1, %p9619_p0 }
 0x596   : > { %16551 = vst [vmem:[#allocation7_spill] sm:$0xff] %v15237_v59  ;;  %v15240_v56 = vsel %vm7853_vm2, %v7909_v35, %v7911_v3  ;;  %v15247_v47 = vsel %vm7853_vm2, %v7911_v3, %v7913_v42  ;;  %v15256_v60 = vsel %vm7853_vm2, %v7917_v2, %v7919_v62  ;;  %v15259_v35 = vsel %vm7853_vm2, %v7919_v62, %v7921_v9  ;;  %v16559_v3 = vld [vmem:[#allocation30_spill] sm:$0xff]  ;;  %v16562_v62 = vld [vmem:[#allocation25_spill] sm:$0xff] }
 0x597   : > { %v7704_v22 = vadd.f32 1e-05, %v7667_v48  ;;  %16552 = vst [vmem:[#allocation10_spill] sm:$0xff] %v15240_v56  ;;  %16553 = vst [vmem:[#allocation44_spill] sm:$0xff] %v15247_v47  ;;  %v15250_v48 = vsel %vm7853_vm2, %v7913_v42, %v7915_v36  ;;  %v15262_v15 = vsel %vm7853_vm2, %v7921_v9, %v7923_v27  ;;  %v7926_v57 = vsel %vm7853_vm2, %v7923_v27, %v7925_v44  ;;  %v16560_v42 = vld [vmem:[#allocation27_spill] sm:$0xff]  ;;  %v16563_v44 = vld [vmem:[#allocation28_spill] sm:$0xff]  ;;  %p9615_p13 = pneg %p9614_p12 }
 0x598   : > { %16554 = vst [vmem:[#allocation38_spill] sm:$0xff] %v15250_v48  ;;  %16556 = vst [vmem:[#allocation12_spill] sm:$0xff] %v15256_v60  ;;  %v7668_v55 = vsub.f32 %v16559_v3, %v15193_v49  ;;  %v7669_v24 = vsub.f32 %v16560_v42, %v15193_v49  ;;  %v7672_v58 = vsub.f32 %v16562_v62, %v15193_v49  ;;  %v16564_v3 = vld [vmem:[#allocation29_spill] sm:$0xff]  ;;  %v16565_v42 = vld [vmem:[#allocation36_spill] sm:$0xff] }
 0x599   : > { %9591 = vrsqrt.f32 %v7704_v22  ;;  %v15253_v22 = vsel %vm7853_vm2, %v7915_v36, %v7917_v2  ;;  %16557 = vst [vmem:[#allocation46_spill] sm:$0xff] %v15259_v35  ;;  %16558 = vst [vmem:[#allocation13_spill] sm:$0xff] %v15262_v15  ;;  %v16561_v36 = vld [vmem:[#allocation22_spill] sm:$0xff]  ;;  %v7671_v2 = vsub.f32 %v14689_v46, %v15193_v49  ;;  %v7673_v9 = vsub.f32 %v14703_v61, %v15193_v49  ;;  %p9622_p3 = pnand %p9621_p2, %p9615_p13 }
 0x59a   : > { %16555 = vst [vmem:[#allocation11_spill] sm:$0xff] %v15253_v22  ;;  %v7670_v16 = vsub.f32 %v16561_v36, %v15193_v49  ;;  %v7674_v27 = vsub.f32 %v16563_v44, %v15193_v49  ;;  %v7675_v54 = vsub.f32 %v16564_v3, %v15193_v49  ;;  %v7676_v33 = vsub.f32 %v16565_v42, %v15193_v49  ;;  %v16566_v36 = vld [vmem:[#allocation35_spill] sm:$0xff] }
 0x59b   : > { %v7677_v13 = vsub.f32 %v16566_v36, %v15193_v49  ;;  %v7678_v46 = vsub.f32 %v14780_v1, %v15193_v49  ;;  %v7679_v62 = vsub.f32 %v14789_v26, %v15193_v49  ;;  %v7680_v61 = vsub.f32 %v14815_v63, %v15193_v49 }
 0x59c   : > { %v7681_v44 = vsub.f32 %v14824_v32, %v15193_v49  ;;  %v7682_v3 = vsub.f32 %v14850_v7, %v15193_v49  ;;  %v7683_v42 = vsub.f32 %v14858_v43, %v15193_v49  ;;  %v7684_v1 = vsub.f32 %v14876_v20, %v15193_v49 }
 0x59d   : > { %v7685_v26 = vsub.f32 %v14885_v28, %v15193_v49  ;;  %v7686_v36 = vsub.f32 %v14903_v41, %v15193_v49  ;;  %v7687_v63 = vsub.f32 %v14912_v0, %v15193_v49  ;;  %v7688_v32 = vsub.f32 %v14930_v21, %v15193_v49 }
 0x59e   : > { %v7689_v7 = vsub.f32 %v14938_v53, %v15193_v49  ;;  %v7690_v43 = vsub.f32 %v14956_v39, %v15193_v49  ;;  %v7691_v20 = vsub.f32 %v14965_v23, %v15193_v49  ;;  %v7692_v28 = vsub.f32 %v14981_v19, %v15193_v49 }
 0x59f   : > { %v16567_v41 = vsub.f32 %v15123_v38, %v15193_v49 }
 0x5a3   : > { %v9592_v34 = vpop.eup %9591 }
 0x5a4   : > { %v7741_v0 = vmul.f32 %v9592_v34, %v16567_v41  ;;  %v7706_v21 = vmul.f32 %v9592_v34, %v7668_v55  ;;  %v7707_v15 = vmul.f32 %v9592_v34, %v7669_v24  ;;  %v7708_v35 = vmul.f32 %v9592_v34, %v7670_v16 }
 0x5a5   : > { %v7709_v60 = vmul.f32 %v9592_v34, %v7671_v2  ;;  %v7710_v53 = vmul.f32 %v9592_v34, %v7672_v58  ;;  %v7711_v22 = vmul.f32 %v9592_v34, %v7673_v9  ;;  %v7712_v48 = vmul.f32 %v9592_v34, %v7674_v27 }
 0x5a6   : > { %v7998_v39 = vadd.f32 %v7926_v57, %v7741_v0  ;;  %v7713_v47 = vmul.f32 %v9592_v34, %v7675_v54  ;;  %v7714_v56 = vmul.f32 %v9592_v34, %v7676_v33  ;;  %v7715_v23 = vmul.f32 %v9592_v34, %v7677_v13 }
 0x5a7   : > { %v7716_v59 = vmul.f32 %v9592_v34, %v7678_v46  ;;  %v7717_v51 = vmul.f32 %v9592_v34, %v7679_v62  ;;  %v7718_v19 = vmul.f32 %v9592_v34, %v7680_v61  ;;  %v7719_v4 = vmul.f32 %v9592_v34, %v7681_v44 }
 0x5a8   : > { %v8034_v14 = vmax.f32 %v7998_v39, 0.0  ;;  %v7720_v50 = vmul.f32 %v9592_v34, %v7682_v3  ;;  %v7721_v30 = vmul.f32 %v9592_v34, %v7683_v42  ;;  %v7722_v38 = vmul.f32 %v9592_v34, %v7684_v1 }
 0x5a9   : > { %v7723_v41 = vmul.f32 %v9592_v34, %v7685_v26  ;;  %v7724_v55 = vmul.f32 %v9592_v34, %v7686_v36  ;;  %v7725_v24 = vmul.f32 %v9592_v34, %v7687_v63  ;;  %v7726_v16 = vmul.f32 %v9592_v34, %v7688_v32 }
 0x5aa   : > { %8078 = vst [vmem:[%s15321_s30 + $0xfa] sm:$0x3f] %v8034_v14  ;;  %v7727_v58 = vmul.f32 %v9592_v34, %v7689_v7  ;;  %v7728_v54 = vmul.f32 %v9592_v34, %v7690_v43  ;;  %v7729_v33 = vmul.f32 %v9592_v34, %v7691_v20  ;;  %v7730_v13 = vmul.f32 %v9592_v34, %v7692_v28  ;;  %v16579_v28 = vld [vmem:[#allocation43_spill] sm:$0xff] }
 0x5ab   : > { %v16568_v57 = vsub.f32 %v14992_v8, %v15193_v49  ;;  %v16569_v9 = vsub.f32 %v15005_v37, %v15193_v49  ;;  %v16570_v46 = vsub.f32 %v15014_v31, %v15193_v49  ;;  %v16571_v61 = vsub.f32 %v15027_v5, %v15193_v49 }
 0x5ac   : > { %v16572_v44 = vsub.f32 %v15036_v11, %v15193_v49  ;;  %v16573_v8 = vsub.f32 %v15049_v10, %v15193_v49  ;;  %v16574_v37 = vsub.f32 %v15060_v52, %v15193_v49  ;;  %v16575_v31 = vsub.f32 %v15075_v17, %v15193_v49  ;;  %v16578_v17 = vld [vmem:[#allocation41_spill] sm:$0xff] }
 0x5ad   : > { %v7731_v2 = vmul.f32 %v9592_v34, %v16568_v57  ;;  %v7732_v27 = vmul.f32 %v9592_v34, %v16569_v9  ;;  %v7733_v62 = vmul.f32 %v9592_v34, %v16570_v46  ;;  %v7734_v14 = vmul.f32 %v9592_v34, %v16571_v61  ;;  %v16581_v57 = vld [vmem:[#allocation50_spill] sm:$0xff] }
 0x5ae   : > { %v7735_v3 = vmul.f32 %v9592_v34, %v16572_v44  ;;  %v7736_v42 = vmul.f32 %v9592_v34, %v16573_v8  ;;  %v7737_v1 = vmul.f32 %v9592_v34, %v16574_v37  ;;  %v7738_v26 = vmul.f32 %v9592_v34, %v16575_v31 }
 0x5af   : > { %v16576_v5 = vsub.f32 %v15086_v25, %v15193_v49  ;;  %v16577_v11 = vsub.f32 %v15113_v40, %v15193_v49  ;;  %v7963_v32 = vadd.f32 %v15100_v18, %v7706_v21  ;;  %v7964_v10 = vadd.f32 %v15103_v6, %v7707_v15  ;;  %v16580_v25 = vld [vmem:[#allocation39_spill] sm:$0xff]  ;;  %v16582_v40 = vld [vmem:[#allocation53_spill] sm:$0xff]  ;;  %v16584_v21 = vld [vmem:[#allocation52_spill] sm:$0xff] }
 0x5b0   : > { %v7965_v7 = vadd.f32 %v15106_v29, %v7708_v35  ;;  %v7966_v52 = vadd.f32 %v15109_v45, %v7709_v60  ;;  %v7967_v43 = vadd.f32 %v15133_v12, %v7710_v53  ;;  %v7968_v20 = vadd.f32 %v16578_v17, %v7711_v22  ;;  %v16585_v15 = vld [vmem:[#allocation6_spill] sm:$0xff]  ;;  %v16586_v35 = vld [vmem:[#allocation9_spill] sm:$0xff]  ;;  %v16587_v12 = vld [vmem:[#allocation16_spill] sm:$0xff] }
 0x5b1   : > { %v7739_v36 = vmul.f32 %v9592_v34, %v16576_v5  ;;  %v7740_v63 = vmul.f32 %v9592_v34, %v16577_v11  ;;  %v7969_v0 = vadd.f32 %v16579_v28, %v7712_v48  ;;  %v7970_v39 = vadd.f32 %v16580_v25, %v7713_v47  ;;  %v16583_v34 = vld [vmem:[#allocation49_spill] sm:$0xff]  ;;  %v16588_v22 = vld [vmem:[#allocation48_spill] sm:$0xff]  ;;  %v16589_v47 = vld [vmem:[#allocation42_spill] sm:$0xff] }
 0x5b2   : > { %v7971_v9 = vadd.f32 %v16581_v57, %v7714_v56  ;;  %v7972_v49 = vadd.f32 %v16582_v40, %v7715_v23  ;;  %v7973_v18 = vadd.f32 %v16583_v34, %v7716_v59  ;;  %v7974_v6 = vadd.f32 %v16584_v21, %v7717_v51  ;;  %v16590_v56 = vld [vmem:[#allocation57_spill] sm:$0xff]  ;;  %v16591_v59 = vld [vmem:[#allocation56_spill] sm:$0xff]  ;;  %v16606_v34 = vld [vmem:[#allocation46_spill] sm:$0xff] }
 0x5b3   : > { %v7975_v29 = vadd.f32 %v16585_v15, %v7718_v19  ;;  %v15368_v45 = vadd.f32 %v16586_v35, %v7719_v4  ;;  %v15371_v60 = vadd.f32 %v16587_v12, %v7720_v50  ;;  %v15374_v48 = vadd.f32 %v16588_v22, %v7721_v30  ;;  %v16592_v51 = vld [vmem:[#allocation60_spill] sm:$0xff]  ;;  %v16593_v4 = vld [vmem:[#allocation63_spill] sm:$0xff]  ;;  %v16594_v50 = vld [vmem:[#allocation66_spill] sm:$0xff] }
 0x5b4   : > { %v15377_v53 = vadd.f32 %v16589_v47, %v7722_v38  ;;  %v15380_v23 = vadd.f32 %v16590_v56, %v7723_v41  ;;  %v15383_v46 = vadd.f32 %v16591_v59, %v7724_v55  ;;  %v15386_v19 = vadd.f32 %v16592_v51, %v7725_v24  ;;  %v16595_v30 = vld [vmem:[#allocation31_spill] sm:$0xff]  ;;  %v16596_v38 = vld [vmem:[#allocation21_spill] sm:$0xff]  ;;  %v16598_v55 = vld [vmem:[#allocation32_spill] sm:$0xff] }
 0x5b5   : > { %v15389_v61 = vadd.f32 %v16593_v4, %v7726_v16  ;;  %v15392_v44 = vadd.f32 %v16594_v50, %v7727_v58  ;;  %v15395_v8 = vadd.f32 %v16595_v30, %v7728_v54  ;;  %v15398_v37 = vadd.f32 %v16596_v38, %v7729_v33  ;;  %v16597_v41 = vld [vmem:[#allocation33_spill] sm:$0xff]  ;;  %v16599_v24 = vld [vmem:[#allocation24_spill] sm:$0xff]  ;;  %v16600_v16 = vld [vmem:[#allocation7_spill] sm:$0xff] }
 0x5b6   : > { %v15401_v31 = vadd.f32 %v16597_v41, %v7730_v13  ;;  %v15404_v5 = vadd.f32 %v16598_v55, %v7731_v2  ;;  %v15407_v11 = vadd.f32 %v16599_v24, %v7732_v27  ;;  %v15410_v17 = vadd.f32 %v16600_v16, %v7733_v62  ;;  %v16601_v58 = vld [vmem:[#allocation10_spill] sm:$0xff]  ;;  %v16602_v54 = vld [vmem:[#allocation44_spill] sm:$0xff]  ;;  %v16604_v13 = vld [vmem:[#allocation11_spill] sm:$0xff] }
 0x5b7   : > { %v15413_v28 = vadd.f32 %v16601_v58, %v7734_v14  ;;  %v15416_v25 = vadd.f32 %v16602_v54, %v7735_v3  ;;  %v16603_v33 = vld [vmem:[#allocation38_spill] sm:$0xff]  ;;  %v15422_v40 = vadd.f32 %v16604_v13, %v7737_v1  ;;  %v16605_v2 = vld [vmem:[#allocation12_spill] sm:$0xff]  ;;  %v15428_v62 = vadd.f32 %v16606_v34, %v7739_v36  ;;  %v16607_v14 = vld [vmem:[#allocation13_spill] sm:$0xff] }
 0x5b8   : > { %v15419_v57 = vadd.f32 %v16603_v33, %v7736_v42  ;;  %v15425_v27 = vadd.f32 %v16605_v2, %v7738_v26  ;;  %v15431_v21 = vadd.f32 %v16607_v14, %v7740_v63  ;;  %v7999_v3 = vmax.f32 %v7963_v32, 0.0 }
 0x5b9   : > { %v8000_v15 = vmax.f32 %v7964_v10, 0.0  ;;  %v8001_v35 = vmax.f32 %v7965_v7, 0.0  ;;  %v8002_v42 = vmax.f32 %v7966_v52, 0.0  ;;  %v8003_v12 = vmax.f32 %v7967_v43, 0.0 }
 0x5ba   : > { %v8004_v1 = vmax.f32 %v7968_v20, 0.0  ;;  %v8005_v22 = vmax.f32 %v7969_v0, 0.0  ;;  %v8006_v26 = vmax.f32 %v7970_v39, 0.0  ;;  %v8007_v47 = vmax.f32 %v7971_v9, 0.0  ;;  %8035 = vst [vmem:[%s15321_s30] sm:$0xff] %v7999_v3 }
 0x5bb   : > { %v8008_v36 = vmax.f32 %v7972_v49, 0.0  ;;  %v8009_v56 = vmax.f32 %v7973_v18, 0.0  ;;  %8036 = vst [vmem:[%s15321_s30 + $0x8] sm:$0xff] %v8000_v15  ;;  %8037 = vst [vmem:[%s15321_s30 + $0xe] sm:$0xfc] %v8001_v35  ;;  %v8010_v63 = vmax.f32 %v7974_v6, 0.0 }
 0x5bc   : > { %v8011_v32 = vmax.f32 %v7975_v29, 0.0  ;;  %v8012_v10 = vmax.f32 %v15368_v45, 0.0  ;;  %v8013_v7 = vmax.f32 %v15371_v60, 0.0  ;;  %8038 = vst [vmem:[%s15321_s30 + $0x16] sm:$0xff] %v8002_v42  ;;  %8039 = vst [vmem:[%s15321_s30 + $0x1e] sm:$0x3] %v8003_v12 }
 0x5bd   : > { %8040 = vst [vmem:[%s15321_s30 + $0x1c] sm:$0xf0] %v8003_v12  ;;  %8041 = vst [vmem:[%s15321_s30 + $0x24] sm:$0xff] %v8004_v1  ;;  %v8014_v52 = vmax.f32 %v15374_v48, 0.0  ;;  %v8015_v43 = vmax.f32 %v15377_v53, 0.0  ;;  %v8016_v20 = vmax.f32 %v15380_v23, 0.0 }
 0x5be   : > { %8042 = vst [vmem:[%s15321_s30 + $0x2c] sm:$0xf] %v8005_v22  ;;  %8043 = vst [vmem:[%s15321_s30 + $0x2a] sm:$0xc0] %v8005_v22  ;;  %v8017_v0 = vmax.f32 %v15383_v46, 0.0  ;;  %v8018_v39 = vmax.f32 %v15386_v19, 0.0 }
 0x5bf   : > { %8044 = vst [vmem:[%s15321_s30 + $0x32] sm:$0xff] %v8006_v26  ;;  %8045 = vst [vmem:[%s15321_s30 + $0x3a] sm:$0x3f] %v8007_v47  ;;  %v8019_v9 = vmax.f32 %v15389_v61, 0.0  ;;  %v8020_v49 = vmax.f32 %v15392_v44, 0.0  ;;  %v8021_v18 = vmax.f32 %v15395_v8, 0.0 }
 0x5c0   : > { %8046 = vst [vmem:[%s15321_s30 + $0x40] sm:$0xff] %v8008_v36  ;;  %8047 = vst [vmem:[%s15321_s30 + $0x48] sm:$0xff] %v8009_v56  ;;  %v8022_v6 = vmax.f32 %v15398_v37, 0.0  ;;  %v8023_v29 = vmax.f32 %v15401_v31, 0.0  ;;  %v8024_v45 = vmax.f32 %v15404_v5, 0.0  ;;  %v8025_v60 = vmax.f32 %v15407_v11, 0.0 }
 0x5c1   : > { %8048 = vst [vmem:[%s15321_s30 + $0x4e] sm:$0xfc] %v8010_v63  ;;  %8049 = vst [vmem:[%s15321_s30 + $0x56] sm:$0xff] %v8011_v32  ;;  %v8026_v48 = vmax.f32 %v15410_v17, 0.0  ;;  %v8027_v53 = vmax.f32 %v15413_v28, 0.0  ;;  %v8028_v23 = vmax.f32 %v15416_v25, 0.0 }
 0x5c2   : > { %8050 = vst [vmem:[%s15321_s30 + $0x5e] sm:$0x3] %v8012_v10  ;;  %8051 = vst [vmem:[%s15321_s30 + $0x5c] sm:$0xf0] %v8012_v10  ;;  %v8029_v59 = vmax.f32 %v15419_v57, 0.0  ;;  %v8030_v46 = vmax.f32 %v15422_v40, 0.0 }
 0x5c3   : > { %8052 = vst [vmem:[%s15321_s30 + $0x64] sm:$0xff] %v8013_v7  ;;  %8053 = vst [vmem:[%s15321_s30 + $0x6c] sm:$0xf] %v8014_v52  ;;  %v8031_v51 = vmax.f32 %v15425_v27, 0.0  ;;  %v8032_v19 = vmax.f32 %v15428_v62, 0.0  ;;  %v8033_v4 = vmax.f32 %v15431_v21, 0.0 }
 0x5c4   : > { %8054 = vst [vmem:[%s15321_s30 + $0x6a] sm:$0xc0] %v8014_v52  ;;  %8055 = vst [vmem:[%s15321_s30 + $0x72] sm:$0xff] %v8015_v43 }
 0x5c5   : > { %8056 = vst [vmem:[%s15321_s30 + $0x7a] sm:$0x3f] %v8016_v20  ;;  %8057 = vst [vmem:[%s15321_s30 + $0x80] sm:$0xff] %v8017_v0 }
 0x5c6   : > { %8058 = vst [vmem:[%s15321_s30 + $0x88] sm:$0xff] %v8018_v39  ;;  %8059 = vst [vmem:[%s15321_s30 + $0x8e] sm:$0xfc] %v8019_v9 }
 0x5c7   : > { %8060 = vst [vmem:[%s15321_s30 + $0x96] sm:$0xff] %v8020_v49  ;;  %8061 = vst [vmem:[%s15321_s30 + $0x9e] sm:$0x3] %v8021_v18 }
 0x5c8   : > { %8062 = vst [vmem:[%s15321_s30 + $0x9c] sm:$0xf0] %v8021_v18  ;;  %8063 = vst [vmem:[%s15321_s30 + $0xa4] sm:$0xff] %v8022_v6 }
 0x5c9   : > { %8064 = vst [vmem:[%s15321_s30 + $0xac] sm:$0xf] %v8023_v29  ;;  %8065 = vst [vmem:[%s15321_s30 + $0xaa] sm:$0xc0] %v8023_v29 }
 0x5ca   : > { %8066 = vst [vmem:[%s15321_s30 + $0xb2] sm:$0xff] %v8024_v45  ;;  %8067 = vst [vmem:[%s15321_s30 + $0xba] sm:$0x3f] %v8025_v60 }
 0x5cb   : > { %8068 = vst [vmem:[%s15321_s30 + $0xc0] sm:$0xff] %v8026_v48  ;;  %8069 = vst [vmem:[%s15321_s30 + $0xc8] sm:$0xff] %v8027_v53 }
 0x5cc   : > { %8070 = vst [vmem:[%s15321_s30 + $0xce] sm:$0xfc] %v8028_v23  ;;  %8071 = vst [vmem:[%s15321_s30 + $0xd6] sm:$0xff] %v8029_v59 }
 0x5cd   : > { %8072 = vst [vmem:[%s15321_s30 + $0xde] sm:$0x3] %v8030_v46  ;;  %8073 = vst [vmem:[%s15321_s30 + $0xdc] sm:$0xf0] %v8030_v46 }
 0x5ce   : > { %8074 = vst [vmem:[%s15321_s30 + $0xe4] sm:$0xff] %v8031_v51  ;;  %8075 = vst [vmem:[%s15321_s30 + $0xec] sm:$0xf] %v8032_v19 }
 0x5cf   : > { %8076 = vst [vmem:[%s15321_s30 + $0xea] sm:$0xc0] %v8032_v19  ;;  %8077 = vst [vmem:[%s15321_s30 + $0xf2] sm:$0xff] %v8033_v4 }
 0x5d0   : > { %9625 = shalt.err (!%p9622_p3)
}
 0x5d1   : > { %s9626_s19 = scalar_lea.hbm %s15486_s8, 4096  ;;  %s9630_s25 = scalar_lea.hbm %s15557_s3, 8192 }
 0x5d2   : > { %p9627_p4 = scmp.ne.s32.totalorder %s15486_s8, %s9626_s19  ;;  %p9631_p9 = scmp.lt.u32.totalorder %s15486_s8, %s15557_s3 }
 0x5d3   : > { %p9632_p10 = scmp.lt.u32.totalorder %s9630_s25, %s9626_s19  ;;  %p9634_p12 = scmp.lt.u32.totalorder %s9626_s19, %s15486_s8 }
 0x5d4   : > { %p9628_p7 = pnand %p9627_p4, %p9738_p5 }
 0x5d5   : > { %p9633_p11 = por %p9632_p10, %p9631_p9 }
 0x5d6   : > { %p9629_p8 = pneg %p9628_p7 }
 0x5d7   : > { %p9635_p13 = por %p9634_p12, %p9633_p11 }
 0x5d9   : > { %p9636_p0 = pnand %p9635_p13, %p9629_p8 }
 0x5db   : > { %9639 = shalt.err (!%p9636_p0)
}
 0x5dc   : > { %s9678_s28 = smov 128   ;;  %s9679_s29 = smov 8  }
 0x5dd   : > { %9311 = dma.vmem_to_hbm [thread:$0]  (%p9738_p5), %s15490_s5, 4096, %s15486_s8, %s15513_s16, %s9678_s28, %s9678_s28, %s9679_s29  }
 0x5de PF: > { %p9317_p1 = scmp.ge.s32.totalorder %s9674_s15, 2  ;;  %s8108_s30 = sand.u32 1, %s9662_s12  }
 0x5df   : > { %s8109_s4 = scalar_lea.sflag [#allocation4], %s8108_s30 }
 0x5e0   : > { %p9314_p2 = pnand %p9317_p1, %p9742_p6 }
 0x5e2   : > { %9657 = dma.done.wait (!%p9314_p2), %s8109_s4, 4096  }
 0x5e3   : > { %9659 = vsyncadd (!%p9314_p2), %s8109_s4, 4294963200  ;;  %p13_p3 = scmp.ge.s32.totalorder %s9725_s18, 4   ;;  %s16608_s12 = smov %s9666_s13 }
 0x5e4   : > { %s16609_s13 = smov %s9670_s14  ;;  %s16610_s14 = smov %s9736_s21 }
 0x5e5   : > { %s16611_s15 = smov %s9725_s18  ;;  %15 = sbr.rel (!%p13_p3) target bundleno = 3 (0x3), region = 71 }
 0x5ec   :  { %8114 = vsyncpa [#allocation4], 1 }
 0x5ed   :  { %8116 = vsyncpa [#allocation4 + $0x1], 1 }

</bundles_post_ra>
